<compile_context>
chip_gen: v5e
topology: v5e:2x2
jax: 0.10.0
libtpu: 0.0.40
codegen_flags: <defaults>
</compile_context>

<pallas_src>
import jax
import jax.numpy as jnp
from jax import lax
from jax.experimental import pallas as pl
from jax.experimental.pallas import tpu as pltpu

_PATCH = 7
_PAD = _PATCH // 2          # 3 (conv padding)
_EPS_NORM = 0.81            # transform normalizer
_EPS_HAM = 0.1              # hamming normalizer


# ------------------------------ Pallas kernel -------------------------------

def _ternary_kernel(img0_ref, img1_ref, out_ref, p0_ref, p1_ref):
    # img*_ref: (3, H, W) block (batch dim squeezed)
    # out_ref : (H, W) block (batch & channel dims squeezed)
    # p*_ref  : (H+6, W+6) f32 VMEM scratch (zero-padded gray planes)
    H, W = out_ref.shape

    def gray(ref):
        r = ref[0].astype(jnp.float32)
        g = ref[1].astype(jnp.float32)
        b = ref[2].astype(jnp.float32)
        return 0.2989 * r + 0.587 * g + 0.114 * b   # (H, W) f32

    g0 = gray(img0_ref)
    g1 = gray(img1_ref)

    # Build the zero-padded planes in VMEM scratch (== conv2d padding=3).
    # Cheap full-ref zero store + interior store; the 49 shifted windows below
    # then become plain (unaligned) vector loads from these refs instead of
    # value-level concatenate/slice shuffles.
    p0_ref[...] = jnp.zeros_like(p0_ref)
    p1_ref[...] = jnp.zeros_like(p1_ref)
    p0_ref[pl.ds(_PAD, H), pl.ds(_PAD, W)] = g0
    p1_ref[pl.ds(_PAD, H), pl.ds(_PAD, W)] = g1

    # hamming(transform(g0), transform(g1)): accumulate over the 49 identity
    # filters (filter k picks neighbour offset (k//7, k%7)).
    acc = jnp.zeros((H, W), jnp.float32)
    for dy in range(_PATCH):
        for dx in range(_PATCH):
            t0 = p0_ref[pl.ds(dy, H), pl.ds(dx, W)] - g0
            t0 = t0 * lax.rsqrt(_EPS_NORM + t0 * t0)
            t1 = p1_ref[pl.ds(dy, H), pl.ds(dx, W)] - g1
            t1 = t1 * lax.rsqrt(_EPS_NORM + t1 * t1)
            d = (t0 - t1) * (t0 - t1)
            acc = acc + d * pl.reciprocal(_EPS_HAM + d, approx=True)
    acc = acc * jnp.float32(1.0 / (_PATCH * _PATCH))   # mean over the 49 terms

    # valid_mask(t, padding=1): ones inside, zeros on the 1-pixel border.
    row = lax.broadcasted_iota(jnp.int32, (H, W), 0)
    col = lax.broadcasted_iota(jnp.int32, (H, W), 1)
    valid = (row >= 1) & (row <= H - 2) & (col >= 1) & (col <= W - 2)

    out_ref[...] = jnp.where(valid, acc, 0.0).astype(out_ref.dtype)


# ------------------------------ Python wrapper -------------------------------

def ternary(img0, img1):
    """Forward pass of the PyTorch `Ternary` module (NCHW, 3-channel inputs)."""
    assert img0.shape == img1.shape, "img0/img1 must have identical shapes"
    B, C, H, W = img0.shape
    assert C == 3, "rgb2gray expects 3 input channels"

    # Explicit scoped-VMEM budget: double-buffered input blocks (x2 images),
    # double-buffered output block, two padded scratch planes, plus headroom
    # for g0/g1/acc/temps.  Floor at the v5e 16 MiB default, cap at v7x's
    # 64 MiB physical VMEM.
    itemsize = jnp.dtype(img0.dtype).itemsize
    pad_plane = (H + 2 * _PAD) * (W + 2 * _PAD) * 4
    vmem_est = (2 * 2 * C * H * W * itemsize     # inputs, double-buffered
                + 2 * H * W * 4                  # output, double-buffered
                + 2 * pad_plane                  # padded gray scratch planes
                + 6 * H * W * 4)                 # live values / temps headroom
    vmem_limit = int(min(max(2 * vmem_est, 16 << 20), 64 << 20))

    return pl.pallas_call(
        _ternary_kernel,
        out_shape=jax.ShapeDtypeStruct((B, 1, H, W), jnp.float32),
        grid=(B,),
        in_specs=[
            pl.BlockSpec((None, C, H, W), lambda b: (b, 0, 0, 0)),
            pl.BlockSpec((None, C, H, W), lambda b: (b, 0, 0, 0)),
        ],
        out_specs=pl.BlockSpec((None, None, H, W), lambda b: (b, 0, 0, 0)),
        scratch_shapes=[
            pltpu.VMEM((H + 2 * _PAD, W + 2 * _PAD), jnp.float32),
            pltpu.VMEM((H + 2 * _PAD, W + 2 * _PAD), jnp.float32),
        ],
        compiler_params=pltpu.CompilerParams(
            dimension_semantics=("parallel",),
            vmem_limit_bytes=vmem_limit),
    )(img0, img1)

# TODO(synk): for very large H*W (e.g. 960x540+ on v7x's 64 MiB VMEM), add a
# second "parallel" grid axis of row-tiles with a 3-row halo (manual halo DMA
# into the padded scratch planes); unnecessary at these sizes since the whole
# plane fits comfortably under the computed VMEM limit.


# ------------------------------ JAX reference --------------------------------

def _reference(img0, img1):
    def gray(x):
        return 0.2989 * x[:, 0:1] + 0.587 * x[:, 1:2] + 0.114 * x[:, 2:3]

    def transform(g):
        n, _, h, w = g.shape
        p = jnp.pad(g, ((0, 0), (0, 0), (_PAD, _PAD), (_PAD, _PAD)))
        patches = jnp.stack(
            [p[:, 0, dy:dy + h, dx:dx + w]
             for dy in range(_PATCH) for dx in range(_PATCH)],
            axis=1)                                   # (n, 49, h, w)
        t = patches - g
        return t / jnp.sqrt(_EPS_NORM + t * t)

    t0 = transform(gray(img0))
    t1 = transform(gray(img1))
    dist = (t0 - t1) ** 2
    ham = jnp.mean(dist / (_EPS_HAM + dist), axis=1, keepdims=True)
    n, _, h, w = img0.shape
    mask = jnp.zeros((n, 1, h, w), jnp.float32)
    mask = mask.at[:, :, 1:h - 1, 1:w - 1].set(1.0)
    return ham * mask


# --------------------------------- main ---------------------------------------

if __name__ == "__main__":
    key = jax.random.PRNGKey(0)
    k0, k1 = jax.random.split(key)

    # Small NCHW RGB image pair, consistent with the module's forward().
    img0 = jax.random.uniform(k0, (2, 3, 16, 16), dtype=jnp.float32)
    img1 = jax.random.uniform(k1, (2, 3, 16, 16), dtype=jnp.float32)

    out = ternary(img0, img1)
    out = jax.block_until_ready(out)

    ref = _reference(img0, img1)
    assert out.shape == (2, 1, 16, 16), out.shape
    # approx reciprocal / rsqrt drift is ~1e-3 at most; loss-map accuracy is
    # unaffected in practice.
    max_err = float(jnp.max(jnp.abs(out - ref)))
    assert jnp.allclose(out, ref, rtol=5e-3, atol=5e-3), max_err

    print("KERNEL_OK")
</pallas_src>

<mosaic_0001>
module attributes {stable_mosaic.version = 11 : i64} {
  func.func @_ternary_kernel(%arg0: i32, %arg1: memref<1x3x16x16xf32, #tpu.memory_space<vmem>>, %arg2: memref<1x3x16x16xf32, #tpu.memory_space<vmem>>, %arg3: memref<1x1x16x16xf32, #tpu.memory_space<vmem>>, %arg4: memref<22x22xf32, #tpu.memory_space<vmem>>, %arg5: memref<22x22xf32, #tpu.memory_space<vmem>>) attributes {dimension_semantics = [#tpu.dimension_semantics<parallel>], iteration_bounds = array<i64: 2>, scalar_prefetch = 0 : i64, scratch_operands = 2 : i64, tpu.core_type = #tpu.core_type<tc>, window_params = [{transform_indices = @transform_0, window_bounds = array<i64: 1, 3, 16, 16>}, {transform_indices = @transform_1, window_bounds = array<i64: 1, 3, 16, 16>}, {transform_indices = @transform_2, window_bounds = array<i64: 1, 1, 16, 16>}]} {
    %c0 = arith.constant 0 : index
    %c0_0 = arith.constant 0 : index
    %c0_1 = arith.constant 0 : index
    %c0_2 = arith.constant 0 : index
    %0 = vector.load %arg1[%c0, %c0_0, %c0_1, %c0_2] : memref<1x3x16x16xf32, #tpu.memory_space<vmem>>, vector<1x1x16x16xf32>
    %1 = vector.shape_cast %0 : vector<1x1x16x16xf32> to vector<16x16xf32>
    %c0_3 = arith.constant 0 : index
    %c1 = arith.constant 1 : index
    %c0_4 = arith.constant 0 : index
    %c0_5 = arith.constant 0 : index
    %2 = vector.load %arg1[%c0_3, %c1, %c0_4, %c0_5] : memref<1x3x16x16xf32, #tpu.memory_space<vmem>>, vector<1x1x16x16xf32>
    %3 = vector.shape_cast %2 : vector<1x1x16x16xf32> to vector<16x16xf32>
    %c0_6 = arith.constant 0 : index
    %c2 = arith.constant 2 : index
    %c0_7 = arith.constant 0 : index
    %c0_8 = arith.constant 0 : index
    %4 = vector.load %arg1[%c0_6, %c2, %c0_7, %c0_8] : memref<1x3x16x16xf32, #tpu.memory_space<vmem>>, vector<1x1x16x16xf32>
    %5 = vector.shape_cast %4 : vector<1x1x16x16xf32> to vector<16x16xf32>
    %cst = arith.constant 2.989000e-01 : f32
    %6 = vector.broadcast %cst : f32 to vector<16x16xf32>
    %7 = arith.mulf %6, %1 : vector<16x16xf32>
    %cst_9 = arith.constant 5.870000e-01 : f32
    %8 = vector.broadcast %cst_9 : f32 to vector<16x16xf32>
    %9 = arith.mulf %8, %3 : vector<16x16xf32>
    %10 = arith.addf %7, %9 : vector<16x16xf32>
    %cst_10 = arith.constant 1.140000e-01 : f32
    %11 = vector.broadcast %cst_10 : f32 to vector<16x16xf32>
    %12 = arith.mulf %11, %5 : vector<16x16xf32>
    %13 = arith.addf %10, %12 : vector<16x16xf32>
    %c0_11 = arith.constant 0 : index
    %c0_12 = arith.constant 0 : index
    %c0_13 = arith.constant 0 : index
    %c0_14 = arith.constant 0 : index
    %14 = vector.load %arg2[%c0_11, %c0_12, %c0_13, %c0_14] : memref<1x3x16x16xf32, #tpu.memory_space<vmem>>, vector<1x1x16x16xf32>
    %15 = vector.shape_cast %14 : vector<1x1x16x16xf32> to vector<16x16xf32>
    %c0_15 = arith.constant 0 : index
    %c1_16 = arith.constant 1 : index
    %c0_17 = arith.constant 0 : index
    %c0_18 = arith.constant 0 : index
    %16 = vector.load %arg2[%c0_15, %c1_16, %c0_17, %c0_18] : memref<1x3x16x16xf32, #tpu.memory_space<vmem>>, vector<1x1x16x16xf32>
    %17 = vector.shape_cast %16 : vector<1x1x16x16xf32> to vector<16x16xf32>
    %c0_19 = arith.constant 0 : index
    %c2_20 = arith.constant 2 : index
    %c0_21 = arith.constant 0 : index
    %c0_22 = arith.constant 0 : index
    %18 = vector.load %arg2[%c0_19, %c2_20, %c0_21, %c0_22] : memref<1x3x16x16xf32, #tpu.memory_space<vmem>>, vector<1x1x16x16xf32>
    %19 = vector.shape_cast %18 : vector<1x1x16x16xf32> to vector<16x16xf32>
    %cst_23 = arith.constant 2.989000e-01 : f32
    %20 = vector.broadcast %cst_23 : f32 to vector<16x16xf32>
    %21 = arith.mulf %20, %15 : vector<16x16xf32>
    %cst_24 = arith.constant 5.870000e-01 : f32
    %22 = vector.broadcast %cst_24 : f32 to vector<16x16xf32>
    %23 = arith.mulf %22, %17 : vector<16x16xf32>
    %24 = arith.addf %21, %23 : vector<16x16xf32>
    %cst_25 = arith.constant 1.140000e-01 : f32
    %25 = vector.broadcast %cst_25 : f32 to vector<16x16xf32>
    %26 = arith.mulf %25, %19 : vector<16x16xf32>
    %27 = arith.addf %24, %26 : vector<16x16xf32>
    %cst_26 = arith.constant 0.000000e+00 : f32
    %28 = vector.broadcast %cst_26 : f32 to vector<22x22xf32>
    %c0_27 = arith.constant 0 : index
    %c0_28 = arith.constant 0 : index
    %29 = vector.load %arg4[%c0_27, %c0_28] : memref<22x22xf32, #tpu.memory_space<vmem>>, vector<22x22xf32>
    tpu.vector_store %arg4[%c0_27, %c0_28], %28 {strides = array<i32>} : memref<22x22xf32, #tpu.memory_space<vmem>>, vector<22x22xf32>,
    %cst_29 = arith.constant 0.000000e+00 : f32
    %30 = vector.broadcast %cst_29 : f32 to vector<22x22xf32>
    %c0_30 = arith.constant 0 : index
    %c0_31 = arith.constant 0 : index
    %31 = vector.load %arg5[%c0_30, %c0_31] : memref<22x22xf32, #tpu.memory_space<vmem>>, vector<22x22xf32>
    tpu.vector_store %arg5[%c0_30, %c0_31], %30 {strides = array<i32>} : memref<22x22xf32, #tpu.memory_space<vmem>>, vector<22x22xf32>,
    %c3 = arith.constant 3 : index
    %c3_32 = arith.constant 3 : index
    %32 = vector.load %arg4[%c3, %c3_32] : memref<22x22xf32, #tpu.memory_space<vmem>>, vector<16x16xf32>
    tpu.vector_store %arg4[%c3, %c3_32], %13 {strides = array<i32>} : memref<22x22xf32, #tpu.memory_space<vmem>>, vector<16x16xf32>,
    %c3_33 = arith.constant 3 : index
    %c3_34 = arith.constant 3 : index
    %33 = vector.load %arg5[%c3_33, %c3_34] : memref<22x22xf32, #tpu.memory_space<vmem>>, vector<16x16xf32>
    tpu.vector_store %arg5[%c3_33, %c3_34], %27 {strides = array<i32>} : memref<22x22xf32, #tpu.memory_space<vmem>>, vector<16x16xf32>,
    %cst_35 = arith.constant 0.000000e+00 : f32
    %34 = vector.broadcast %cst_35 : f32 to vector<16x16xf32>
    %c0_36 = arith.constant 0 : index
    %c0_37 = arith.constant 0 : index
    %35 = vector.load %arg4[%c0_36, %c0_37] : memref<22x22xf32, #tpu.memory_space<vmem>>, vector<16x16xf32>
    %36 = arith.subf %35, %13 : vector<16x16xf32>
    %37 = arith.mulf %36, %36 : vector<16x16xf32>
    %cst_38 = arith.constant 8.100000e-01 : f32
    %38 = vector.broadcast %cst_38 : f32 to vector<16x16xf32>
    %39 = arith.addf %38, %37 : vector<16x16xf32>
    %40 = math.rsqrt %39 : vector<16x16xf32>
    %41 = arith.mulf %36, %40 : vector<16x16xf32>
    %c0_39 = arith.constant 0 : index
    %c0_40 = arith.constant 0 : index
    %42 = vector.load %arg5[%c0_39, %c0_40] : memref<22x22xf32, #tpu.memory_space<vmem>>, vector<16x16xf32>
    %43 = arith.subf %42, %27 : vector<16x16xf32>
    %44 = arith.mulf %43, %43 : vector<16x16xf32>
    %cst_41 = arith.constant 8.100000e-01 : f32
    %45 = vector.broadcast %cst_41 : f32 to vector<16x16xf32>
    %46 = arith.addf %45, %44 : vector<16x16xf32>
    %47 = math.rsqrt %46 : vector<16x16xf32>
    %48 = arith.mulf %43, %47 : vector<16x16xf32>
    %49 = arith.subf %41, %48 : vector<16x16xf32>
    %50 = arith.subf %41, %48 : vector<16x16xf32>
    %51 = arith.mulf %49, %50 : vector<16x16xf32>
    %cst_42 = arith.constant 1.000000e-01 : f32
    %52 = vector.broadcast %cst_42 : f32 to vector<16x16xf32>
    %53 = arith.addf %52, %51 : vector<16x16xf32>
    %54 = tpu.reciprocal %53 {approx = true} : vector<16x16xf32> -> vector<16x16xf32>
    %55 = arith.mulf %51, %54 : vector<16x16xf32>
    %56 = arith.addf %34, %55 : vector<16x16xf32>
    %c0_43 = arith.constant 0 : index
    %c1_44 = arith.constant 1 : index
    %57 = vector.load %arg4[%c0_43, %c1_44] : memref<22x22xf32, #tpu.memory_space<vmem>>, vector<16x16xf32>
    %58 = arith.subf %57, %13 : vector<16x16xf32>
    %59 = arith.mulf %58, %58 : vector<16x16xf32>
    %cst_45 = arith.constant 8.100000e-01 : f32
    %60 = vector.broadcast %cst_45 : f32 to vector<16x16xf32>
    %61 = arith.addf %60, %59 : vector<16x16xf32>
    %62 = math.rsqrt %61 : vector<16x16xf32>
    %63 = arith.mulf %58, %62 : vector<16x16xf32>
    %c0_46 = arith.constant 0 : index
    %c1_47 = arith.constant 1 : index
    %64 = vector.load %arg5[%c0_46, %c1_47] : memref<22x22xf32, #tpu.memory_space<vmem>>, vector<16x16xf32>
    %65 = arith.subf %64, %27 : vector<16x16xf32>
    %66 = arith.mulf %65, %65 : vector<16x16xf32>
    %cst_48 = arith.constant 8.100000e-01 : f32
    %67 = vector.broadcast %cst_48 : f32 to vector<16x16xf32>
    %68 = arith.addf %67, %66 : vector<16x16xf32>
    %69 = math.rsqrt %68 : vector<16x16xf32>
    %70 = arith.mulf %65, %69 : vector<16x16xf32>
    %71 = arith.subf %63, %70 : vector<16x16xf32>
    %72 = arith.subf %63, %70 : vector<16x16xf32>
    %73 = arith.mulf %71, %72 : vector<16x16xf32>
    %cst_49 = arith.constant 1.000000e-01 : f32
    %74 = vector.broadcast %cst_49 : f32 to vector<16x16xf32>
    %75 = arith.addf %74, %73 : vector<16x16xf32>
    %76 = tpu.reciprocal %75 {approx = true} : vector<16x16xf32> -> vector<16x16xf32>
    %77 = arith.mulf %73, %76 : vector<16x16xf32>
    %78 = arith.addf %56, %77 : vector<16x16xf32>
    %c0_50 = arith.constant 0 : index
    %c2_51 = arith.constant 2 : index
    %79 = vector.load %arg4[%c0_50, %c2_51] : memref<22x22xf32, #tpu.memory_space<vmem>>, vector<16x16xf32>
    %80 = arith.subf %79, %13 : vector<16x16xf32>
    %81 = arith.mulf %80, %80 : vector<16x16xf32>
    %cst_52 = arith.constant 8.100000e-01 : f32
    %82 = vector.broadcast %cst_52 : f32 to vector<16x16xf32>
    %83 = arith.addf %82, %81 : vector<16x16xf32>
    %84 = math.rsqrt %83 : vector<16x16xf32>
    %85 = arith.mulf %80, %84 : vector<16x16xf32>
    %c0_53 = arith.constant 0 : index
    %c2_54 = arith.constant 2 : index
    %86 = vector.load %arg5[%c0_53, %c2_54] : memref<22x22xf32, #tpu.memory_space<vmem>>, vector<16x16xf32>
    %87 = arith.subf %86, %27 : vector<16x16xf32>
    %88 = arith.mulf %87, %87 : vector<16x16xf32>
    %cst_55 = arith.constant 8.100000e-01 : f32
    %89 = vector.broadcast %cst_55 : f32 to vector<16x16xf32>
    %90 = arith.addf %89, %88 : vector<16x16xf32>
    %91 = math.rsqrt %90 : vector<16x16xf32>
    %92 = arith.mulf %87, %91 : vector<16x16xf32>
    %93 = arith.subf %85, %92 : vector<16x16xf32>
    %94 = arith.subf %85, %92 : vector<16x16xf32>
    %95 = arith.mulf %93, %94 : vector<16x16xf32>
    %cst_56 = arith.constant 1.000000e-01 : f32
    %96 = vector.broadcast %cst_56 : f32 to vector<16x16xf32>
    %97 = arith.addf %96, %95 : vector<16x16xf32>
    %98 = tpu.reciprocal %97 {approx = true} : vector<16x16xf32> -> vector<16x16xf32>
    %99 = arith.mulf %95, %98 : vector<16x16xf32>
    %100 = arith.addf %78, %99 : vector<16x16xf32>
    %c0_57 = arith.constant 0 : index
    %c3_58 = arith.constant 3 : index
    %101 = vector.load %arg4[%c0_57, %c3_58] : memref<22x22xf32, #tpu.memory_space<vmem>>, vector<16x16xf32>
    %102 = arith.subf %101, %13 : vector<16x16xf32>
    %103 = arith.mulf %102, %102 : vector<16x16xf32>
    %cst_59 = arith.constant 8.100000e-01 : f32
    %104 = vector.broadcast %cst_59 : f32 to vector<16x16xf32>
    %105 = arith.addf %104, %103 : vector<16x16xf32>
    %106 = math.rsqrt %105 : vector<16x16xf32>
    %107 = arith.mulf %102, %106 : vector<16x16xf32>
    %c0_60 = arith.constant 0 : index
    %c3_61 = arith.constant 3 : index
    %108 = vector.load %arg5[%c0_60, %c3_61] : memref<22x22xf32, #tpu.memory_space<vmem>>, vector<16x16xf32>
    %109 = arith.subf %108, %27 : vector<16x16xf32>
    %110 = arith.mulf %109, %109 : vector<16x16xf32>
    %cst_62 = arith.constant 8.100000e-01 : f32
    %111 = vector.broadcast %cst_62 : f32 to vector<16x16xf32>
    %112 = arith.addf %111, %110 : vector<16x16xf32>
    %113 = math.rsqrt %112 : vector<16x16xf32>
    %114 = arith.mulf %109, %113 : vector<16x16xf32>
    %115 = arith.subf %107, %114 : vector<16x16xf32>
    %116 = arith.subf %107, %114 : vector<16x16xf32>
    %117 = arith.mulf %115, %116 : vector<16x16xf32>
    %cst_63 = arith.constant 1.000000e-01 : f32
    %118 = vector.broadcast %cst_63 : f32 to vector<16x16xf32>
    %119 = arith.addf %118, %117 : vector<16x16xf32>
    %120 = tpu.reciprocal %119 {approx = true} : vector<16x16xf32> -> vector<16x16xf32>
    %121 = arith.mulf %117, %120 : vector<16x16xf32>
    %122 = arith.addf %100, %121 : vector<16x16xf32>
    %c0_64 = arith.constant 0 : index
    %c4 = arith.constant 4 : index
    %123 = vector.load %arg4[%c0_64, %c4] : memref<22x22xf32, #tpu.memory_space<vmem>>, vector<16x16xf32>
    %124 = arith.subf %123, %13 : vector<16x16xf32>
    %125 = arith.mulf %124, %124 : vector<16x16xf32>
    %cst_65 = arith.constant 8.100000e-01 : f32
    %126 = vector.broadcast %cst_65 : f32 to vector<16x16xf32>
    %127 = arith.addf %126, %125 : vector<16x16xf32>
    %128 = math.rsqrt %127 : vector<16x16xf32>
    %129 = arith.mulf %124, %128 : vector<16x16xf32>
    %c0_66 = arith.constant 0 : index
    %c4_67 = arith.constant 4 : index
    %130 = vector.load %arg5[%c0_66, %c4_67] : memref<22x22xf32, #tpu.memory_space<vmem>>, vector<16x16xf32>
    %131 = arith.subf %130, %27 : vector<16x16xf32>
    %132 = arith.mulf %131, %131 : vector<16x16xf32>
    %cst_68 = arith.constant 8.100000e-01 : f32
    %133 = vector.broadcast %cst_68 : f32 to vector<16x16xf32>
    %134 = arith.addf %133, %132 : vector<16x16xf32>
    %135 = math.rsqrt %134 : vector<16x16xf32>
    %136 = arith.mulf %131, %135 : vector<16x16xf32>
    %137 = arith.subf %129, %136 : vector<16x16xf32>
    %138 = arith.subf %129, %136 : vector<16x16xf32>
    %139 = arith.mulf %137, %138 : vector<16x16xf32>
    %cst_69 = arith.constant 1.000000e-01 : f32
    %140 = vector.broadcast %cst_69 : f32 to vector<16x16xf32>
    %141 = arith.addf %140, %139 : vector<16x16xf32>
    %142 = tpu.reciprocal %141 {approx = true} : vector<16x16xf32> -> vector<16x16xf32>
    %143 = arith.mulf %139, %142 : vector<16x16xf32>
    %144 = arith.addf %122, %143 : vector<16x16xf32>
    %c0_70 = arith.constant 0 : index
    %c5 = arith.constant 5 : index
    %145 = vector.load %arg4[%c0_70, %c5] : memref<22x22xf32, #tpu.memory_space<vmem>>, vector<16x16xf32>
    %146 = arith.subf %145, %13 : vector<16x16xf32>
    %147 = arith.mulf %146, %146 : vector<16x16xf32>
    %cst_71 = arith.constant 8.100000e-01 : f32
    %148 = vector.broadcast %cst_71 : f32 to vector<16x16xf32>
    %149 = arith.addf %148, %147 : vector<16x16xf32>
    %150 = math.rsqrt %149 : vector<16x16xf32>
    %151 = arith.mulf %146, %150 : vector<16x16xf32>
    %c0_72 = arith.constant 0 : index
    %c5_73 = arith.constant 5 : index
    %152 = vector.load %arg5[%c0_72, %c5_73] : memref<22x22xf32, #tpu.memory_space<vmem>>, vector<16x16xf32>
    %153 = arith.subf %152, %27 : vector<16x16xf32>
    %154 = arith.mulf %153, %153 : vector<16x16xf32>
    %cst_74 = arith.constant 8.100000e-01 : f32
    %155 = vector.broadcast %cst_74 : f32 to vector<16x16xf32>
    %156 = arith.addf %155, %154 : vector<16x16xf32>
    %157 = math.rsqrt %156 : vector<16x16xf32>
    %158 = arith.mulf %153, %157 : vector<16x16xf32>
    %159 = arith.subf %151, %158 : vector<16x16xf32>
    %160 = arith.subf %151, %158 : vector<16x16xf32>
    %161 = arith.mulf %159, %160 : vector<16x16xf32>
    %cst_75 = arith.constant 1.000000e-01 : f32
    %162 = vector.broadcast %cst_75 : f32 to vector<16x16xf32>
    %163 = arith.addf %162, %161 : vector<16x16xf32>
    %164 = tpu.reciprocal %163 {approx = true} : vector<16x16xf32> -> vector<16x16xf32>
    %165 = arith.mulf %161, %164 : vector<16x16xf32>
    %166 = arith.addf %144, %165 : vector<16x16xf32>
    %c0_76 = arith.constant 0 : index
    %c6 = arith.constant 6 : index
    %167 = vector.load %arg4[%c0_76, %c6] : memref<22x22xf32, #tpu.memory_space<vmem>>, vector<16x16xf32>
    %168 = arith.subf %167, %13 : vector<16x16xf32>
    %169 = arith.mulf %168, %168 : vector<16x16xf32>
    %cst_77 = arith.constant 8.100000e-01 : f32
    %170 = vector.broadcast %cst_77 : f32 to vector<16x16xf32>
    %171 = arith.addf %170, %169 : vector<16x16xf32>
    %172 = math.rsqrt %171 : vector<16x16xf32>
    %173 = arith.mulf %168, %172 : vector<16x16xf32>
    %c0_78 = arith.constant 0 : index
    %c6_79 = arith.constant 6 : index
    %174 = vector.load %arg5[%c0_78, %c6_79] : memref<22x22xf32, #tpu.memory_space<vmem>>, vector<16x16xf32>
    %175 = arith.subf %174, %27 : vector<16x16xf32>
    %176 = arith.mulf %175, %175 : vector<16x16xf32>
    %cst_80 = arith.constant 8.100000e-01 : f32
    %177 = vector.broadcast %cst_80 : f32 to vector<16x16xf32>
    %178 = arith.addf %177, %176 : vector<16x16xf32>
    %179 = math.rsqrt %178 : vector<16x16xf32>
    %180 = arith.mulf %175, %179 : vector<16x16xf32>
    %181 = arith.subf %173, %180 : vector<16x16xf32>
    %182 = arith.subf %173, %180 : vector<16x16xf32>
    %183 = arith.mulf %181, %182 : vector<16x16xf32>
    %cst_81 = arith.constant 1.000000e-01 : f32
    %184 = vector.broadcast %cst_81 : f32 to vector<16x16xf32>
    %185 = arith.addf %184, %183 : vector<16x16xf32>
    %186 = tpu.reciprocal %185 {approx = true} : vector<16x16xf32> -> vector<16x16xf32>
    %187 = arith.mulf %183, %186 : vector<16x16xf32>
    %188 = arith.addf %166, %187 : vector<16x16xf32>
    %c1_82 = arith.constant 1 : index
    %c0_83 = arith.constant 0 : index
    %189 = vector.load %arg4[%c1_82, %c0_83] : memref<22x22xf32, #tpu.memory_space<vmem>>, vector<16x16xf32>
    %190 = arith.subf %189, %13 : vector<16x16xf32>
    %191 = arith.mulf %190, %190 : vector<16x16xf32>
    %cst_84 = arith.constant 8.100000e-01 : f32
    %192 = vector.broadcast %cst_84 : f32 to vector<16x16xf32>
    %193 = arith.addf %192, %191 : vector<16x16xf32>
    %194 = math.rsqrt %193 : vector<16x16xf32>
    %195 = arith.mulf %190, %194 : vector<16x16xf32>
    %c1_85 = arith.constant 1 : index
    %c0_86 = arith.constant 0 : index
    %196 = vector.load %arg5[%c1_85, %c0_86] : memref<22x22xf32, #tpu.memory_space<vmem>>, vector<16x16xf32>
    %197 = arith.subf %196, %27 : vector<16x16xf32>
    %198 = arith.mulf %197, %197 : vector<16x16xf32>
    %cst_87 = arith.constant 8.100000e-01 : f32
    %199 = vector.broadcast %cst_87 : f32 to vector<16x16xf32>
    %200 = arith.addf %199, %198 : vector<16x16xf32>
    %201 = math.rsqrt %200 : vector<16x16xf32>
    %202 = arith.mulf %197, %201 : vector<16x16xf32>
    %203 = arith.subf %195, %202 : vector<16x16xf32>
    %204 = arith.subf %195, %202 : vector<16x16xf32>
    %205 = arith.mulf %203, %204 : vector<16x16xf32>
    %cst_88 = arith.constant 1.000000e-01 : f32
    %206 = vector.broadcast %cst_88 : f32 to vector<16x16xf32>
    %207 = arith.addf %206, %205 : vector<16x16xf32>
    %208 = tpu.reciprocal %207 {approx = true} : vector<16x16xf32> -> vector<16x16xf32>
    %209 = arith.mulf %205, %208 : vector<16x16xf32>
    %210 = arith.addf %188, %209 : vector<16x16xf32>
    %c1_89 = arith.constant 1 : index
    %c1_90 = arith.constant 1 : index
    %211 = vector.load %arg4[%c1_89, %c1_90] : memref<22x22xf32, #tpu.memory_space<vmem>>, vector<16x16xf32>
    %212 = arith.subf %211, %13 : vector<16x16xf32>
    %213 = arith.mulf %212, %212 : vector<16x16xf32>
    %cst_91 = arith.constant 8.100000e-01 : f32
    %214 = vector.broadcast %cst_91 : f32 to vector<16x16xf32>
    %215 = arith.addf %214, %213 : vector<16x16xf32>
    %216 = math.rsqrt %215 : vector<16x16xf32>
    %217 = arith.mulf %212, %216 : vector<16x16xf32>
    %c1_92 = arith.constant 1 : index
    %c1_93 = arith.constant 1 : index
    %218 = vector.load %arg5[%c1_92, %c1_93] : memref<22x22xf32, #tpu.memory_space<vmem>>, vector<16x16xf32>
    %219 = arith.subf %218, %27 : vector<16x16xf32>
    %220 = arith.mulf %219, %219 : vector<16x16xf32>
    %cst_94 = arith.constant 8.100000e-01 : f32
    %221 = vector.broadcast %cst_94 : f32 to vector<16x16xf32>
    %222 = arith.addf %221, %220 : vector<16x16xf32>
    %223 = math.rsqrt %222 : vector<16x16xf32>
    %224 = arith.mulf %219, %223 : vector<16x16xf32>
    %225 = arith.subf %217, %224 : vector<16x16xf32>
    %226 = arith.subf %217, %224 : vector<16x16xf32>
    %227 = arith.mulf %225, %226 : vector<16x16xf32>
    %cst_95 = arith.constant 1.000000e-01 : f32
    %228 = vector.broadcast %cst_95 : f32 to vector<16x16xf32>
    %229 = arith.addf %228, %227 : vector<16x16xf32>
    %230 = tpu.reciprocal %229 {approx = true} : vector<16x16xf32> -> vector<16x16xf32>
    %231 = arith.mulf %227, %230 : vector<16x16xf32>
    %232 = arith.addf %210, %231 : vector<16x16xf32>
    %c1_96 = arith.constant 1 : index
    %c2_97 = arith.constant 2 : index
    %233 = vector.load %arg4[%c1_96, %c2_97] : memref<22x22xf32, #tpu.memory_space<vmem>>, vector<16x16xf32>
    %234 = arith.subf %233, %13 : vector<16x16xf32>
    %235 = arith.mulf %234, %234 : vector<16x16xf32>
    %cst_98 = arith.constant 8.100000e-01 : f32
    %236 = vector.broadcast %cst_98 : f32 to vector<16x16xf32>
    %237 = arith.addf %236, %235 : vector<16x16xf32>
    %238 = math.rsqrt %237 : vector<16x16xf32>
    %239 = arith.mulf %234, %238 : vector<16x16xf32>
    %c1_99 = arith.constant 1 : index
    %c2_100 = arith.constant 2 : index
    %240 = vector.load %arg5[%c1_99, %c2_100] : memref<22x22xf32, #tpu.memory_space<vmem>>, vector<16x16xf32>
    %241 = arith.subf %240, %27 : vector<16x16xf32>
    %242 = arith.mulf %241, %241 : vector<16x16xf32>
    %cst_101 = arith.constant 8.100000e-01 : f32
    %243 = vector.broadcast %cst_101 : f32 to vector<16x16xf32>
    %244 = arith.addf %243, %242 : vector<16x16xf32>
    %245 = math.rsqrt %244 : vector<16x16xf32>
    %246 = arith.mulf %241, %245 : vector<16x16xf32>
    %247 = arith.subf %239, %246 : vector<16x16xf32>
    %248 = arith.subf %239, %246 : vector<16x16xf32>
    %249 = arith.mulf %247, %248 : vector<16x16xf32>
    %cst_102 = arith.constant 1.000000e-01 : f32
    %250 = vector.broadcast %cst_102 : f32 to vector<16x16xf32>
    %251 = arith.addf %250, %249 : vector<16x16xf32>
    %252 = tpu.reciprocal %251 {approx = true} : vector<16x16xf32> -> vector<16x16xf32>
    %253 = arith.mulf %249, %252 : vector<16x16xf32>
    %254 = arith.addf %232, %253 : vector<16x16xf32>
    %c1_103 = arith.constant 1 : index
    %c3_104 = arith.constant 3 : index
    %255 = vector.load %arg4[%c1_103, %c3_104] : memref<22x22xf32, #tpu.memory_space<vmem>>, vector<16x16xf32>
    %256 = arith.subf %255, %13 : vector<16x16xf32>
    %257 = arith.mulf %256, %256 : vector<16x16xf32>
    %cst_105 = arith.constant 8.100000e-01 : f32
    %258 = vector.broadcast %cst_105 : f32 to vector<16x16xf32>
    %259 = arith.addf %258, %257 : vector<16x16xf32>
    %260 = math.rsqrt %259 : vector<16x16xf32>
    %261 = arith.mulf %256, %260 : vector<16x16xf32>
    %c1_106 = arith.constant 1 : index
    %c3_107 = arith.constant 3 : index
    %262 = vector.load %arg5[%c1_106, %c3_107] : memref<22x22xf32, #tpu.memory_space<vmem>>, vector<16x16xf32>
    %263 = arith.subf %262, %27 : vector<16x16xf32>
    %264 = arith.mulf %263, %263 : vector<16x16xf32>
    %cst_108 = arith.constant 8.100000e-01 : f32
    %265 = vector.broadcast %cst_108 : f32 to vector<16x16xf32>
    %266 = arith.addf %265, %264 : vector<16x16xf32>
    %267 = math.rsqrt %266 : vector<16x16xf32>
    %268 = arith.mulf %263, %267 : vector<16x16xf32>
    %269 = arith.subf %261, %268 : vector<16x16xf32>
    %270 = arith.subf %261, %268 : vector<16x16xf32>
    %271 = arith.mulf %269, %270 : vector<16x16xf32>
    %cst_109 = arith.constant 1.000000e-01 : f32
    %272 = vector.broadcast %cst_109 : f32 to vector<16x16xf32>
    %273 = arith.addf %272, %271 : vector<16x16xf32>
    %274 = tpu.reciprocal %273 {approx = true} : vector<16x16xf32> -> vector<16x16xf32>
    %275 = arith.mulf %271, %274 : vector<16x16xf32>
    %276 = arith.addf %254, %275 : vector<16x16xf32>
    %c1_110 = arith.constant 1 : index
    %c4_111 = arith.constant 4 : index
    %277 = vector.load %arg4[%c1_110, %c4_111] : memref<22x22xf32, #tpu.memory_space<vmem>>, vector<16x16xf32>
    %278 = arith.subf %277, %13 : vector<16x16xf32>
    %279 = arith.mulf %278, %278 : vector<16x16xf32>
    %cst_112 = arith.constant 8.100000e-01 : f32
    %280 = vector.broadcast %cst_112 : f32 to vector<16x16xf32>
    %281 = arith.addf %280, %279 : vector<16x16xf32>
    %282 = math.rsqrt %281 : vector<16x16xf32>
    %283 = arith.mulf %278, %282 : vector<16x16xf32>
    %c1_113 = arith.constant 1 : index
    %c4_114 = arith.constant 4 : index
    %284 = vector.load %arg5[%c1_113, %c4_114] : memref<22x22xf32, #tpu.memory_space<vmem>>, vector<16x16xf32>
    %285 = arith.subf %284, %27 : vector<16x16xf32>
    %286 = arith.mulf %285, %285 : vector<16x16xf32>
    %cst_115 = arith.constant 8.100000e-01 : f32
    %287 = vector.broadcast %cst_115 : f32 to vector<16x16xf32>
    %288 = arith.addf %287, %286 : vector<16x16xf32>
    %289 = math.rsqrt %288 : vector<16x16xf32>
    %290 = arith.mulf %285, %289 : vector<16x16xf32>
    %291 = arith.subf %283, %290 : vector<16x16xf32>
    %292 = arith.subf %283, %290 : vector<16x16xf32>
    %293 = arith.mulf %291, %292 : vector<16x16xf32>
    %cst_116 = arith.constant 1.000000e-01 : f32
    %294 = vector.broadcast %cst_116 : f32 to vector<16x16xf32>
    %295 = arith.addf %294, %293 : vector<16x16xf32>
    %296 = tpu.reciprocal %295 {approx = true} : vector<16x16xf32> -> vector<16x16xf32>
    %297 = arith.mulf %293, %296 : vector<16x16xf32>
    %298 = arith.addf %276, %297 : vector<16x16xf32>
    %c1_117 = arith.constant 1 : index
    %c5_118 = arith.constant 5 : index
    %299 = vector.load %arg4[%c1_117, %c5_118] : memref<22x22xf32, #tpu.memory_space<vmem>>, vector<16x16xf32>
    %300 = arith.subf %299, %13 : vector<16x16xf32>
    %301 = arith.mulf %300, %300 : vector<16x16xf32>
    %cst_119 = arith.constant 8.100000e-01 : f32
    %302 = vector.broadcast %cst_119 : f32 to vector<16x16xf32>
    %303 = arith.addf %302, %301 : vector<16x16xf32>
    %304 = math.rsqrt %303 : vector<16x16xf32>
    %305 = arith.mulf %300, %304 : vector<16x16xf32>
    %c1_120 = arith.constant 1 : index
    %c5_121 = arith.constant 5 : index
    %306 = vector.load %arg5[%c1_120, %c5_121] : memref<22x22xf32, #tpu.memory_space<vmem>>, vector<16x16xf32>
    %307 = arith.subf %306, %27 : vector<16x16xf32>
    %308 = arith.mulf %307, %307 : vector<16x16xf32>
    %cst_122 = arith.constant 8.100000e-01 : f32
    %309 = vector.broadcast %cst_122 : f32 to vector<16x16xf32>
    %310 = arith.addf %309, %308 : vector<16x16xf32>
    %311 = math.rsqrt %310 : vector<16x16xf32>
    %312 = arith.mulf %307, %311 : vector<16x16xf32>
    %313 = arith.subf %305, %312 : vector<16x16xf32>
    %314 = arith.subf %305, %312 : vector<16x16xf32>
    %315 = arith.mulf %313, %314 : vector<16x16xf32>
    %cst_123 = arith.constant 1.000000e-01 : f32
    %316 = vector.broadcast %cst_123 : f32 to vector<16x16xf32>
    %317 = arith.addf %316, %315 : vector<16x16xf32>
    %318 = tpu.reciprocal %317 {approx = true} : vector<16x16xf32> -> vector<16x16xf32>
    %319 = arith.mulf %315, %318 : vector<16x16xf32>
    %320 = arith.addf %298, %319 : vector<16x16xf32>
    %c1_124 = arith.constant 1 : index
    %c6_125 = arith.constant 6 : index
    %321 = vector.load %arg4[%c1_124, %c6_125] : memref<22x22xf32, #tpu.memory_space<vmem>>, vector<16x16xf32>
    %322 = arith.subf %321, %13 : vector<16x16xf32>
    %323 = arith.mulf %322, %322 : vector<16x16xf32>
    %cst_126 = arith.constant 8.100000e-01 : f32
    %324 = vector.broadcast %cst_126 : f32 to vector<16x16xf32>
    %325 = arith.addf %324, %323 : vector<16x16xf32>
    %326 = math.rsqrt %325 : vector<16x16xf32>
    %327 = arith.mulf %322, %326 : vector<16x16xf32>
    %c1_127 = arith.constant 1 : index
    %c6_128 = arith.constant 6 : index
    %328 = vector.load %arg5[%c1_127, %c6_128] : memref<22x22xf32, #tpu.memory_space<vmem>>, vector<16x16xf32>
    %329 = arith.subf %328, %27 : vector<16x16xf32>
    %330 = arith.mulf %329, %329 : vector<16x16xf32>
    %cst_129 = arith.constant 8.100000e-01 : f32
    %331 = vector.broadcast %cst_129 : f32 to vector<16x16xf32>
    %332 = arith.addf %331, %330 : vector<16x16xf32>
    %333 = math.rsqrt %332 : vector<16x16xf32>
    %334 = arith.mulf %329, %333 : vector<16x16xf32>
    %335 = arith.subf %327, %334 : vector<16x16xf32>
    %336 = arith.subf %327, %334 : vector<16x16xf32>
    %337 = arith.mulf %335, %336 : vector<16x16xf32>
    %cst_130 = arith.constant 1.000000e-01 : f32
    %338 = vector.broadcast %cst_130 : f32 to vector<16x16xf32>
    %339 = arith.addf %338, %337 : vector<16x16xf32>
    %340 = tpu.reciprocal %339 {approx = true} : vector<16x16xf32> -> vector<16x16xf32>
    %341 = arith.mulf %337, %340 : vector<16x16xf32>
    %342 = arith.addf %320, %341 : vector<16x16xf32>
    %c2_131 = arith.constant 2 : index
    %c0_132 = arith.constant 0 : index
    %343 = vector.load %arg4[%c2_131, %c0_132] : memref<22x22xf32, #tpu.memory_space<vmem>>, vector<16x16xf32>
    %344 = arith.subf %343, %13 : vector<16x16xf32>
    %345 = arith.mulf %344, %344 : vector<16x16xf32>
    %cst_133 = arith.constant 8.100000e-01 : f32
    %346 = vector.broadcast %cst_133 : f32 to vector<16x16xf32>
    %347 = arith.addf %346, %345 : vector<16x16xf32>
    %348 = math.rsqrt %347 : vector<16x16xf32>
    %349 = arith.mulf %344, %348 : vector<16x16xf32>
    %c2_134 = arith.constant 2 : index
    %c0_135 = arith.constant 0 : index
    %350 = vector.load %arg5[%c2_134, %c0_135] : memref<22x22xf32, #tpu.memory_space<vmem>>, vector<16x16xf32>
    %351 = arith.subf %350, %27 : vector<16x16xf32>
    %352 = arith.mulf %351, %351 : vector<16x16xf32>
    %cst_136 = arith.constant 8.100000e-01 : f32
    %353 = vector.broadcast %cst_136 : f32 to vector<16x16xf32>
    %354 = arith.addf %353, %352 : vector<16x16xf32>
    %355 = math.rsqrt %354 : vector<16x16xf32>
    %356 = arith.mulf %351, %355 : vector<16x16xf32>
    %357 = arith.subf %349, %356 : vector<16x16xf32>
    %358 = arith.subf %349, %356 : vector<16x16xf32>
    %359 = arith.mulf %357, %358 : vector<16x16xf32>
    %cst_137 = arith.constant 1.000000e-01 : f32
    %360 = vector.broadcast %cst_137 : f32 to vector<16x16xf32>
    %361 = arith.addf %360, %359 : vector<16x16xf32>
    %362 = tpu.reciprocal %361 {approx = true} : vector<16x16xf32> -> vector<16x16xf32>
    %363 = arith.mulf %359, %362 : vector<16x16xf32>
    %364 = arith.addf %342, %363 : vector<16x16xf32>
    %c2_138 = arith.constant 2 : index
    %c1_139 = arith.constant 1 : index
    %365 = vector.load %arg4[%c2_138, %c1_139] : memref<22x22xf32, #tpu.memory_space<vmem>>, vector<16x16xf32>
    %366 = arith.subf %365, %13 : vector<16x16xf32>
    %367 = arith.mulf %366, %366 : vector<16x16xf32>
    %cst_140 = arith.constant 8.100000e-01 : f32
    %368 = vector.broadcast %cst_140 : f32 to vector<16x16xf32>
    %369 = arith.addf %368, %367 : vector<16x16xf32>
    %370 = math.rsqrt %369 : vector<16x16xf32>
    %371 = arith.mulf %366, %370 : vector<16x16xf32>
    %c2_141 = arith.constant 2 : index
    %c1_142 = arith.constant 1 : index
    %372 = vector.load %arg5[%c2_141, %c1_142] : memref<22x22xf32, #tpu.memory_space<vmem>>, vector<16x16xf32>
    %373 = arith.subf %372, %27 : vector<16x16xf32>
    %374 = arith.mulf %373, %373 : vector<16x16xf32>
    %cst_143 = arith.constant 8.100000e-01 : f32
    %375 = vector.broadcast %cst_143 : f32 to vector<16x16xf32>
    %376 = arith.addf %375, %374 : vector<16x16xf32>
    %377 = math.rsqrt %376 : vector<16x16xf32>
    %378 = arith.mulf %373, %377 : vector<16x16xf32>
    %379 = arith.subf %371, %378 : vector<16x16xf32>
    %380 = arith.subf %371, %378 : vector<16x16xf32>
    %381 = arith.mulf %379, %380 : vector<16x16xf32>
    %cst_144 = arith.constant 1.000000e-01 : f32
    %382 = vector.broadcast %cst_144 : f32 to vector<16x16xf32>
    %383 = arith.addf %382, %381 : vector<16x16xf32>
    %384 = tpu.reciprocal %383 {approx = true} : vector<16x16xf32> -> vector<16x16xf32>
    %385 = arith.mulf %381, %384 : vector<16x16xf32>
    %386 = arith.addf %364, %385 : vector<16x16xf32>
    %c2_145 = arith.constant 2 : index
    %c2_146 = arith.constant 2 : index
    %387 = vector.load %arg4[%c2_145, %c2_146] : memref<22x22xf32, #tpu.memory_space<vmem>>, vector<16x16xf32>
    %388 = arith.subf %387, %13 : vector<16x16xf32>
    %389 = arith.mulf %388, %388 : vector<16x16xf32>
    %cst_147 = arith.constant 8.100000e-01 : f32
    %390 = vector.broadcast %cst_147 : f32 to vector<16x16xf32>
    %391 = arith.addf %390, %389 : vector<16x16xf32>
    %392 = math.rsqrt %391 : vector<16x16xf32>
    %393 = arith.mulf %388, %392 : vector<16x16xf32>
    %c2_148 = arith.constant 2 : index
    %c2_149 = arith.constant 2 : index
    %394 = vector.load %arg5[%c2_148, %c2_149] : memref<22x22xf32, #tpu.memory_space<vmem>>, vector<16x16xf32>
    %395 = arith.subf %394, %27 : vector<16x16xf32>
    %396 = arith.mulf %395, %395 : vector<16x16xf32>
    %cst_150 = arith.constant 8.100000e-01 : f32
    %397 = vector.broadcast %cst_150 : f32 to vector<16x16xf32>
    %398 = arith.addf %397, %396 : vector<16x16xf32>
    %399 = math.rsqrt %398 : vector<16x16xf32>
    %400 = arith.mulf %395, %399 : vector<16x16xf32>
    %401 = arith.subf %393, %400 : vector<16x16xf32>
    %402 = arith.subf %393, %400 : vector<16x16xf32>
    %403 = arith.mulf %401, %402 : vector<16x16xf32>
    %cst_151 = arith.constant 1.000000e-01 : f32
    %404 = vector.broadcast %cst_151 : f32 to vector<16x16xf32>
    %405 = arith.addf %404, %403 : vector<16x16xf32>
    %406 = tpu.reciprocal %405 {approx = true} : vector<16x16xf32> -> vector<16x16xf32>
    %407 = arith.mulf %403, %406 : vector<16x16xf32>
    %408 = arith.addf %386, %407 : vector<16x16xf32>
    %c2_152 = arith.constant 2 : index
    %c3_153 = arith.constant 3 : index
    %409 = vector.load %arg4[%c2_152, %c3_153] : memref<22x22xf32, #tpu.memory_space<vmem>>, vector<16x16xf32>
    %410 = arith.subf %409, %13 : vector<16x16xf32>
    %411 = arith.mulf %410, %410 : vector<16x16xf32>
    %cst_154 = arith.constant 8.100000e-01 : f32
    %412 = vector.broadcast %cst_154 : f32 to vector<16x16xf32>
    %413 = arith.addf %412, %411 : vector<16x16xf32>
    %414 = math.rsqrt %413 : vector<16x16xf32>
    %415 = arith.mulf %410, %414 : vector<16x16xf32>
    %c2_155 = arith.constant 2 : index
    %c3_156 = arith.constant 3 : index
    %416 = vector.load %arg5[%c2_155, %c3_156] : memref<22x22xf32, #tpu.memory_space<vmem>>, vector<16x16xf32>
    %417 = arith.subf %416, %27 : vector<16x16xf32>
    %418 = arith.mulf %417, %417 : vector<16x16xf32>
    %cst_157 = arith.constant 8.100000e-01 : f32
    %419 = vector.broadcast %cst_157 : f32 to vector<16x16xf32>
    %420 = arith.addf %419, %418 : vector<16x16xf32>
    %421 = math.rsqrt %420 : vector<16x16xf32>
    %422 = arith.mulf %417, %421 : vector<16x16xf32>
    %423 = arith.subf %415, %422 : vector<16x16xf32>
    %424 = arith.subf %415, %422 : vector<16x16xf32>
    %425 = arith.mulf %423, %424 : vector<16x16xf32>
    %cst_158 = arith.constant 1.000000e-01 : f32
    %426 = vector.broadcast %cst_158 : f32 to vector<16x16xf32>
    %427 = arith.addf %426, %425 : vector<16x16xf32>
    %428 = tpu.reciprocal %427 {approx = true} : vector<16x16xf32> -> vector<16x16xf32>
    %429 = arith.mulf %425, %428 : vector<16x16xf32>
    %430 = arith.addf %408, %429 : vector<16x16xf32>
    %c2_159 = arith.constant 2 : index
    %c4_160 = arith.constant 4 : index
    %431 = vector.load %arg4[%c2_159, %c4_160] : memref<22x22xf32, #tpu.memory_space<vmem>>, vector<16x16xf32>
    %432 = arith.subf %431, %13 : vector<16x16xf32>
    %433 = arith.mulf %432, %432 : vector<16x16xf32>
    %cst_161 = arith.constant 8.100000e-01 : f32
    %434 = vector.broadcast %cst_161 : f32 to vector<16x16xf32>
    %435 = arith.addf %434, %433 : vector<16x16xf32>
    %436 = math.rsqrt %435 : vector<16x16xf32>
    %437 = arith.mulf %432, %436 : vector<16x16xf32>
    %c2_162 = arith.constant 2 : index
    %c4_163 = arith.constant 4 : index
    %438 = vector.load %arg5[%c2_162, %c4_163] : memref<22x22xf32, #tpu.memory_space<vmem>>, vector<16x16xf32>
    %439 = arith.subf %438, %27 : vector<16x16xf32>
    %440 = arith.mulf %439, %439 : vector<16x16xf32>
    %cst_164 = arith.constant 8.100000e-01 : f32
    %441 = vector.broadcast %cst_164 : f32 to vector<16x16xf32>
    %442 = arith.addf %441, %440 : vector<16x16xf32>
    %443 = math.rsqrt %442 : vector<16x16xf32>
    %444 = arith.mulf %439, %443 : vector<16x16xf32>
    %445 = arith.subf %437, %444 : vector<16x16xf32>
    %446 = arith.subf %437, %444 : vector<16x16xf32>
    %447 = arith.mulf %445, %446 : vector<16x16xf32>
    %cst_165 = arith.constant 1.000000e-01 : f32
    %448 = vector.broadcast %cst_165 : f32 to vector<16x16xf32>
    %449 = arith.addf %448, %447 : vector<16x16xf32>
    %450 = tpu.reciprocal %449 {approx = true} : vector<16x16xf32> -> vector<16x16xf32>
    %451 = arith.mulf %447, %450 : vector<16x16xf32>
    %452 = arith.addf %430, %451 : vector<16x16xf32>
    %c2_166 = arith.constant 2 : index
    %c5_167 = arith.constant 5 : index
    %453 = vector.load %arg4[%c2_166, %c5_167] : memref<22x22xf32, #tpu.memory_space<vmem>>, vector<16x16xf32>
    %454 = arith.subf %453, %13 : vector<16x16xf32>
    %455 = arith.mulf %454, %454 : vector<16x16xf32>
    %cst_168 = arith.constant 8.100000e-01 : f32
    %456 = vector.broadcast %cst_168 : f32 to vector<16x16xf32>
    %457 = arith.addf %456, %455 : vector<16x16xf32>
    %458 = math.rsqrt %457 : vector<16x16xf32>
    %459 = arith.mulf %454, %458 : vector<16x16xf32>
    %c2_169 = arith.constant 2 : index
    %c5_170 = arith.constant 5 : index
    %460 = vector.load %arg5[%c2_169, %c5_170] : memref<22x22xf32, #tpu.memory_space<vmem>>, vector<16x16xf32>
    %461 = arith.subf %460, %27 : vector<16x16xf32>
    %462 = arith.mulf %461, %461 : vector<16x16xf32>
    %cst_171 = arith.constant 8.100000e-01 : f32
    %463 = vector.broadcast %cst_171 : f32 to vector<16x16xf32>
    %464 = arith.addf %463, %462 : vector<16x16xf32>
    %465 = math.rsqrt %464 : vector<16x16xf32>
    %466 = arith.mulf %461, %465 : vector<16x16xf32>
    %467 = arith.subf %459, %466 : vector<16x16xf32>
    %468 = arith.subf %459, %466 : vector<16x16xf32>
    %469 = arith.mulf %467, %468 : vector<16x16xf32>
    %cst_172 = arith.constant 1.000000e-01 : f32
    %470 = vector.broadcast %cst_172 : f32 to vector<16x16xf32>
    %471 = arith.addf %470, %469 : vector<16x16xf32>
    %472 = tpu.reciprocal %471 {approx = true} : vector<16x16xf32> -> vector<16x16xf32>
    %473 = arith.mulf %469, %472 : vector<16x16xf32>
    %474 = arith.addf %452, %473 : vector<16x16xf32>
    %c2_173 = arith.constant 2 : index
    %c6_174 = arith.constant 6 : index
    %475 = vector.load %arg4[%c2_173, %c6_174] : memref<22x22xf32, #tpu.memory_space<vmem>>, vector<16x16xf32>
    %476 = arith.subf %475, %13 : vector<16x16xf32>
    %477 = arith.mulf %476, %476 : vector<16x16xf32>
    %cst_175 = arith.constant 8.100000e-01 : f32
    %478 = vector.broadcast %cst_175 : f32 to vector<16x16xf32>
    %479 = arith.addf %478, %477 : vector<16x16xf32>
    %480 = math.rsqrt %479 : vector<16x16xf32>
    %481 = arith.mulf %476, %480 : vector<16x16xf32>
    %c2_176 = arith.constant 2 : index
    %c6_177 = arith.constant 6 : index
    %482 = vector.load %arg5[%c2_176, %c6_177] : memref<22x22xf32, #tpu.memory_space<vmem>>, vector<16x16xf32>
    %483 = arith.subf %482, %27 : vector<16x16xf32>
    %484 = arith.mulf %483, %483 : vector<16x16xf32>
    %cst_178 = arith.constant 8.100000e-01 : f32
    %485 = vector.broadcast %cst_178 : f32 to vector<16x16xf32>
    %486 = arith.addf %485, %484 : vector<16x16xf32>
    %487 = math.rsqrt %486 : vector<16x16xf32>
    %488 = arith.mulf %483, %487 : vector<16x16xf32>
    %489 = arith.subf %481, %488 : vector<16x16xf32>
    %490 = arith.subf %481, %488 : vector<16x16xf32>
    %491 = arith.mulf %489, %490 : vector<16x16xf32>
    %cst_179 = arith.constant 1.000000e-01 : f32
    %492 = vector.broadcast %cst_179 : f32 to vector<16x16xf32>
    %493 = arith.addf %492, %491 : vector<16x16xf32>
    %494 = tpu.reciprocal %493 {approx = true} : vector<16x16xf32> -> vector<16x16xf32>
    %495 = arith.mulf %491, %494 : vector<16x16xf32>
    %496 = arith.addf %474, %495 : vector<16x16xf32>
    %c3_180 = arith.constant 3 : index
    %c0_181 = arith.constant 0 : index
    %497 = vector.load %arg4[%c3_180, %c0_181] : memref<22x22xf32, #tpu.memory_space<vmem>>, vector<16x16xf32>
    %498 = arith.subf %497, %13 : vector<16x16xf32>
    %499 = arith.mulf %498, %498 : vector<16x16xf32>
    %cst_182 = arith.constant 8.100000e-01 : f32
    %500 = vector.broadcast %cst_182 : f32 to vector<16x16xf32>
    %501 = arith.addf %500, %499 : vector<16x16xf32>
    %502 = math.rsqrt %501 : vector<16x16xf32>
    %503 = arith.mulf %498, %502 : vector<16x16xf32>
    %c3_183 = arith.constant 3 : index
    %c0_184 = arith.constant 0 : index
    %504 = vector.load %arg5[%c3_183, %c0_184] : memref<22x22xf32, #tpu.memory_space<vmem>>, vector<16x16xf32>
    %505 = arith.subf %504, %27 : vector<16x16xf32>
    %506 = arith.mulf %505, %505 : vector<16x16xf32>
    %cst_185 = arith.constant 8.100000e-01 : f32
    %507 = vector.broadcast %cst_185 : f32 to vector<16x16xf32>
    %508 = arith.addf %507, %506 : vector<16x16xf32>
    %509 = math.rsqrt %508 : vector<16x16xf32>
    %510 = arith.mulf %505, %509 : vector<16x16xf32>
    %511 = arith.subf %503, %510 : vector<16x16xf32>
    %512 = arith.subf %503, %510 : vector<16x16xf32>
    %513 = arith.mulf %511, %512 : vector<16x16xf32>
    %cst_186 = arith.constant 1.000000e-01 : f32
    %514 = vector.broadcast %cst_186 : f32 to vector<16x16xf32>
    %515 = arith.addf %514, %513 : vector<16x16xf32>
    %516 = tpu.reciprocal %515 {approx = true} : vector<16x16xf32> -> vector<16x16xf32>
    %517 = arith.mulf %513, %516 : vector<16x16xf32>
    %518 = arith.addf %496, %517 : vector<16x16xf32>
    %c3_187 = arith.constant 3 : index
    %c1_188 = arith.constant 1 : index
    %519 = vector.load %arg4[%c3_187, %c1_188] : memref<22x22xf32, #tpu.memory_space<vmem>>, vector<16x16xf32>
    %520 = arith.subf %519, %13 : vector<16x16xf32>
    %521 = arith.mulf %520, %520 : vector<16x16xf32>
    %cst_189 = arith.constant 8.100000e-01 : f32
    %522 = vector.broadcast %cst_189 : f32 to vector<16x16xf32>
    %523 = arith.addf %522, %521 : vector<16x16xf32>
    %524 = math.rsqrt %523 : vector<16x16xf32>
    %525 = arith.mulf %520, %524 : vector<16x16xf32>
    %c3_190 = arith.constant 3 : index
    %c1_191 = arith.constant 1 : index
    %526 = vector.load %arg5[%c3_190, %c1_191] : memref<22x22xf32, #tpu.memory_space<vmem>>, vector<16x16xf32>
    %527 = arith.subf %526, %27 : vector<16x16xf32>
    %528 = arith.mulf %527, %527 : vector<16x16xf32>
    %cst_192 = arith.constant 8.100000e-01 : f32
    %529 = vector.broadcast %cst_192 : f32 to vector<16x16xf32>
    %530 = arith.addf %529, %528 : vector<16x16xf32>
    %531 = math.rsqrt %530 : vector<16x16xf32>
    %532 = arith.mulf %527, %531 : vector<16x16xf32>
    %533 = arith.subf %525, %532 : vector<16x16xf32>
    %534 = arith.subf %525, %532 : vector<16x16xf32>
    %535 = arith.mulf %533, %534 : vector<16x16xf32>
    %cst_193 = arith.constant 1.000000e-01 : f32
    %536 = vector.broadcast %cst_193 : f32 to vector<16x16xf32>
    %537 = arith.addf %536, %535 : vector<16x16xf32>
    %538 = tpu.reciprocal %537 {approx = true} : vector<16x16xf32> -> vector<16x16xf32>
    %539 = arith.mulf %535, %538 : vector<16x16xf32>
    %540 = arith.addf %518, %539 : vector<16x16xf32>
    %c3_194 = arith.constant 3 : index
    %c2_195 = arith.constant 2 : index
    %541 = vector.load %arg4[%c3_194, %c2_195] : memref<22x22xf32, #tpu.memory_space<vmem>>, vector<16x16xf32>
    %542 = arith.subf %541, %13 : vector<16x16xf32>
    %543 = arith.mulf %542, %542 : vector<16x16xf32>
    %cst_196 = arith.constant 8.100000e-01 : f32
    %544 = vector.broadcast %cst_196 : f32 to vector<16x16xf32>
    %545 = arith.addf %544, %543 : vector<16x16xf32>
    %546 = math.rsqrt %545 : vector<16x16xf32>
    %547 = arith.mulf %542, %546 : vector<16x16xf32>
    %c3_197 = arith.constant 3 : index
    %c2_198 = arith.constant 2 : index
    %548 = vector.load %arg5[%c3_197, %c2_198] : memref<22x22xf32, #tpu.memory_space<vmem>>, vector<16x16xf32>
    %549 = arith.subf %548, %27 : vector<16x16xf32>
    %550 = arith.mulf %549, %549 : vector<16x16xf32>
    %cst_199 = arith.constant 8.100000e-01 : f32
    %551 = vector.broadcast %cst_199 : f32 to vector<16x16xf32>
    %552 = arith.addf %551, %550 : vector<16x16xf32>
    %553 = math.rsqrt %552 : vector<16x16xf32>
    %554 = arith.mulf %549, %553 : vector<16x16xf32>
    %555 = arith.subf %547, %554 : vector<16x16xf32>
    %556 = arith.subf %547, %554 : vector<16x16xf32>
    %557 = arith.mulf %555, %556 : vector<16x16xf32>
    %cst_200 = arith.constant 1.000000e-01 : f32
    %558 = vector.broadcast %cst_200 : f32 to vector<16x16xf32>
    %559 = arith.addf %558, %557 : vector<16x16xf32>
    %560 = tpu.reciprocal %559 {approx = true} : vector<16x16xf32> -> vector<16x16xf32>
    %561 = arith.mulf %557, %560 : vector<16x16xf32>
    %562 = arith.addf %540, %561 : vector<16x16xf32>
    %c3_201 = arith.constant 3 : index
    %c3_202 = arith.constant 3 : index
    %563 = vector.load %arg4[%c3_201, %c3_202] : memref<22x22xf32, #tpu.memory_space<vmem>>, vector<16x16xf32>
    %564 = arith.subf %563, %13 : vector<16x16xf32>
    %565 = arith.mulf %564, %564 : vector<16x16xf32>
    %cst_203 = arith.constant 8.100000e-01 : f32
    %566 = vector.broadcast %cst_203 : f32 to vector<16x16xf32>
    %567 = arith.addf %566, %565 : vector<16x16xf32>
    %568 = math.rsqrt %567 : vector<16x16xf32>
    %569 = arith.mulf %564, %568 : vector<16x16xf32>
    %c3_204 = arith.constant 3 : index
    %c3_205 = arith.constant 3 : index
    %570 = vector.load %arg5[%c3_204, %c3_205] : memref<22x22xf32, #tpu.memory_space<vmem>>, vector<16x16xf32>
    %571 = arith.subf %570, %27 : vector<16x16xf32>
    %572 = arith.mulf %571, %571 : vector<16x16xf32>
    %cst_206 = arith.constant 8.100000e-01 : f32
    %573 = vector.broadcast %cst_206 : f32 to vector<16x16xf32>
    %574 = arith.addf %573, %572 : vector<16x16xf32>
    %575 = math.rsqrt %574 : vector<16x16xf32>
    %576 = arith.mulf %571, %575 : vector<16x16xf32>
    %577 = arith.subf %569, %576 : vector<16x16xf32>
    %578 = arith.subf %569, %576 : vector<16x16xf32>
    %579 = arith.mulf %577, %578 : vector<16x16xf32>
    %cst_207 = arith.constant 1.000000e-01 : f32
    %580 = vector.broadcast %cst_207 : f32 to vector<16x16xf32>
    %581 = arith.addf %580, %579 : vector<16x16xf32>
    %582 = tpu.reciprocal %581 {approx = true} : vector<16x16xf32> -> vector<16x16xf32>
    %583 = arith.mulf %579, %582 : vector<16x16xf32>
    %584 = arith.addf %562, %583 : vector<16x16xf32>
    %c3_208 = arith.constant 3 : index
    %c4_209 = arith.constant 4 : index
    %585 = vector.load %arg4[%c3_208, %c4_209] : memref<22x22xf32, #tpu.memory_space<vmem>>, vector<16x16xf32>
    %586 = arith.subf %585, %13 : vector<16x16xf32>
    %587 = arith.mulf %586, %586 : vector<16x16xf32>
    %cst_210 = arith.constant 8.100000e-01 : f32
    %588 = vector.broadcast %cst_210 : f32 to vector<16x16xf32>
    %589 = arith.addf %588, %587 : vector<16x16xf32>
    %590 = math.rsqrt %589 : vector<16x16xf32>
    %591 = arith.mulf %586, %590 : vector<16x16xf32>
    %c3_211 = arith.constant 3 : index
    %c4_212 = arith.constant 4 : index
    %592 = vector.load %arg5[%c3_211, %c4_212] : memref<22x22xf32, #tpu.memory_space<vmem>>, vector<16x16xf32>
    %593 = arith.subf %592, %27 : vector<16x16xf32>
    %594 = arith.mulf %593, %593 : vector<16x16xf32>
    %cst_213 = arith.constant 8.100000e-01 : f32
    %595 = vector.broadcast %cst_213 : f32 to vector<16x16xf32>
    %596 = arith.addf %595, %594 : vector<16x16xf32>
    %597 = math.rsqrt %596 : vector<16x16xf32>
    %598 = arith.mulf %593, %597 : vector<16x16xf32>
    %599 = arith.subf %591, %598 : vector<16x16xf32>
    %600 = arith.subf %591, %598 : vector<16x16xf32>
    %601 = arith.mulf %599, %600 : vector<16x16xf32>
    %cst_214 = arith.constant 1.000000e-01 : f32
    %602 = vector.broadcast %cst_214 : f32 to vector<16x16xf32>
    %603 = arith.addf %602, %601 : vector<16x16xf32>
    %604 = tpu.reciprocal %603 {approx = true} : vector<16x16xf32> -> vector<16x16xf32>
    %605 = arith.mulf %601, %604 : vector<16x16xf32>
    %606 = arith.addf %584, %605 : vector<16x16xf32>
    %c3_215 = arith.constant 3 : index
    %c5_216 = arith.constant 5 : index
    %607 = vector.load %arg4[%c3_215, %c5_216] : memref<22x22xf32, #tpu.memory_space<vmem>>, vector<16x16xf32>
    %608 = arith.subf %607, %13 : vector<16x16xf32>
    %609 = arith.mulf %608, %608 : vector<16x16xf32>
    %cst_217 = arith.constant 8.100000e-01 : f32
    %610 = vector.broadcast %cst_217 : f32 to vector<16x16xf32>
    %611 = arith.addf %610, %609 : vector<16x16xf32>
    %612 = math.rsqrt %611 : vector<16x16xf32>
    %613 = arith.mulf %608, %612 : vector<16x16xf32>
    %c3_218 = arith.constant 3 : index
    %c5_219 = arith.constant 5 : index
    %614 = vector.load %arg5[%c3_218, %c5_219] : memref<22x22xf32, #tpu.memory_space<vmem>>, vector<16x16xf32>
    %615 = arith.subf %614, %27 : vector<16x16xf32>
    %616 = arith.mulf %615, %615 : vector<16x16xf32>
    %cst_220 = arith.constant 8.100000e-01 : f32
    %617 = vector.broadcast %cst_220 : f32 to vector<16x16xf32>
    %618 = arith.addf %617, %616 : vector<16x16xf32>
    %619 = math.rsqrt %618 : vector<16x16xf32>
    %620 = arith.mulf %615, %619 : vector<16x16xf32>
    %621 = arith.subf %613, %620 : vector<16x16xf32>
    %622 = arith.subf %613, %620 : vector<16x16xf32>
    %623 = arith.mulf %621, %622 : vector<16x16xf32>
    %cst_221 = arith.constant 1.000000e-01 : f32
    %624 = vector.broadcast %cst_221 : f32 to vector<16x16xf32>
    %625 = arith.addf %624, %623 : vector<16x16xf32>
    %626 = tpu.reciprocal %625 {approx = true} : vector<16x16xf32> -> vector<16x16xf32>
    %627 = arith.mulf %623, %626 : vector<16x16xf32>
    %628 = arith.addf %606, %627 : vector<16x16xf32>
    %c3_222 = arith.constant 3 : index
    %c6_223 = arith.constant 6 : index
    %629 = vector.load %arg4[%c3_222, %c6_223] : memref<22x22xf32, #tpu.memory_space<vmem>>, vector<16x16xf32>
    %630 = arith.subf %629, %13 : vector<16x16xf32>
    %631 = arith.mulf %630, %630 : vector<16x16xf32>
    %cst_224 = arith.constant 8.100000e-01 : f32
    %632 = vector.broadcast %cst_224 : f32 to vector<16x16xf32>
    %633 = arith.addf %632, %631 : vector<16x16xf32>
    %634 = math.rsqrt %633 : vector<16x16xf32>
    %635 = arith.mulf %630, %634 : vector<16x16xf32>
    %c3_225 = arith.constant 3 : index
    %c6_226 = arith.constant 6 : index
    %636 = vector.load %arg5[%c3_225, %c6_226] : memref<22x22xf32, #tpu.memory_space<vmem>>, vector<16x16xf32>
    %637 = arith.subf %636, %27 : vector<16x16xf32>
    %638 = arith.mulf %637, %637 : vector<16x16xf32>
    %cst_227 = arith.constant 8.100000e-01 : f32
    %639 = vector.broadcast %cst_227 : f32 to vector<16x16xf32>
    %640 = arith.addf %639, %638 : vector<16x16xf32>
    %641 = math.rsqrt %640 : vector<16x16xf32>
    %642 = arith.mulf %637, %641 : vector<16x16xf32>
    %643 = arith.subf %635, %642 : vector<16x16xf32>
    %644 = arith.subf %635, %642 : vector<16x16xf32>
    %645 = arith.mulf %643, %644 : vector<16x16xf32>
    %cst_228 = arith.constant 1.000000e-01 : f32
    %646 = vector.broadcast %cst_228 : f32 to vector<16x16xf32>
    %647 = arith.addf %646, %645 : vector<16x16xf32>
    %648 = tpu.reciprocal %647 {approx = true} : vector<16x16xf32> -> vector<16x16xf32>
    %649 = arith.mulf %645, %648 : vector<16x16xf32>
    %650 = arith.addf %628, %649 : vector<16x16xf32>
    %c4_229 = arith.constant 4 : index
    %c0_230 = arith.constant 0 : index
    %651 = vector.load %arg4[%c4_229, %c0_230] : memref<22x22xf32, #tpu.memory_space<vmem>>, vector<16x16xf32>
    %652 = arith.subf %651, %13 : vector<16x16xf32>
    %653 = arith.mulf %652, %652 : vector<16x16xf32>
    %cst_231 = arith.constant 8.100000e-01 : f32
    %654 = vector.broadcast %cst_231 : f32 to vector<16x16xf32>
    %655 = arith.addf %654, %653 : vector<16x16xf32>
    %656 = math.rsqrt %655 : vector<16x16xf32>
    %657 = arith.mulf %652, %656 : vector<16x16xf32>
    %c4_232 = arith.constant 4 : index
    %c0_233 = arith.constant 0 : index
    %658 = vector.load %arg5[%c4_232, %c0_233] : memref<22x22xf32, #tpu.memory_space<vmem>>, vector<16x16xf32>
    %659 = arith.subf %658, %27 : vector<16x16xf32>
    %660 = arith.mulf %659, %659 : vector<16x16xf32>
    %cst_234 = arith.constant 8.100000e-01 : f32
    %661 = vector.broadcast %cst_234 : f32 to vector<16x16xf32>
    %662 = arith.addf %661, %660 : vector<16x16xf32>
    %663 = math.rsqrt %662 : vector<16x16xf32>
    %664 = arith.mulf %659, %663 : vector<16x16xf32>
    %665 = arith.subf %657, %664 : vector<16x16xf32>
    %666 = arith.subf %657, %664 : vector<16x16xf32>
    %667 = arith.mulf %665, %666 : vector<16x16xf32>
    %cst_235 = arith.constant 1.000000e-01 : f32
    %668 = vector.broadcast %cst_235 : f32 to vector<16x16xf32>
    %669 = arith.addf %668, %667 : vector<16x16xf32>
    %670 = tpu.reciprocal %669 {approx = true} : vector<16x16xf32> -> vector<16x16xf32>
    %671 = arith.mulf %667, %670 : vector<16x16xf32>
    %672 = arith.addf %650, %671 : vector<16x16xf32>
    %c4_236 = arith.constant 4 : index
    %c1_237 = arith.constant 1 : index
    %673 = vector.load %arg4[%c4_236, %c1_237] : memref<22x22xf32, #tpu.memory_space<vmem>>, vector<16x16xf32>
    %674 = arith.subf %673, %13 : vector<16x16xf32>
    %675 = arith.mulf %674, %674 : vector<16x16xf32>
    %cst_238 = arith.constant 8.100000e-01 : f32
    %676 = vector.broadcast %cst_238 : f32 to vector<16x16xf32>
    %677 = arith.addf %676, %675 : vector<16x16xf32>
    %678 = math.rsqrt %677 : vector<16x16xf32>
    %679 = arith.mulf %674, %678 : vector<16x16xf32>
    %c4_239 = arith.constant 4 : index
    %c1_240 = arith.constant 1 : index
    %680 = vector.load %arg5[%c4_239, %c1_240] : memref<22x22xf32, #tpu.memory_space<vmem>>, vector<16x16xf32>
    %681 = arith.subf %680, %27 : vector<16x16xf32>
    %682 = arith.mulf %681, %681 : vector<16x16xf32>
    %cst_241 = arith.constant 8.100000e-01 : f32
    %683 = vector.broadcast %cst_241 : f32 to vector<16x16xf32>
    %684 = arith.addf %683, %682 : vector<16x16xf32>
    %685 = math.rsqrt %684 : vector<16x16xf32>
    %686 = arith.mulf %681, %685 : vector<16x16xf32>
    %687 = arith.subf %679, %686 : vector<16x16xf32>
    %688 = arith.subf %679, %686 : vector<16x16xf32>
    %689 = arith.mulf %687, %688 : vector<16x16xf32>
    %cst_242 = arith.constant 1.000000e-01 : f32
    %690 = vector.broadcast %cst_242 : f32 to vector<16x16xf32>
    %691 = arith.addf %690, %689 : vector<16x16xf32>
    %692 = tpu.reciprocal %691 {approx = true} : vector<16x16xf32> -> vector<16x16xf32>
    %693 = arith.mulf %689, %692 : vector<16x16xf32>
    %694 = arith.addf %672, %693 : vector<16x16xf32>
    %c4_243 = arith.constant 4 : index
    %c2_244 = arith.constant 2 : index
    %695 = vector.load %arg4[%c4_243, %c2_244] : memref<22x22xf32, #tpu.memory_space<vmem>>, vector<16x16xf32>
    %696 = arith.subf %695, %13 : vector<16x16xf32>
    %697 = arith.mulf %696, %696 : vector<16x16xf32>
    %cst_245 = arith.constant 8.100000e-01 : f32
    %698 = vector.broadcast %cst_245 : f32 to vector<16x16xf32>
    %699 = arith.addf %698, %697 : vector<16x16xf32>
    %700 = math.rsqrt %699 : vector<16x16xf32>
    %701 = arith.mulf %696, %700 : vector<16x16xf32>
    %c4_246 = arith.constant 4 : index
    %c2_247 = arith.constant 2 : index
    %702 = vector.load %arg5[%c4_246, %c2_247] : memref<22x22xf32, #tpu.memory_space<vmem>>, vector<16x16xf32>
    %703 = arith.subf %702, %27 : vector<16x16xf32>
    %704 = arith.mulf %703, %703 : vector<16x16xf32>
    %cst_248 = arith.constant 8.100000e-01 : f32
    %705 = vector.broadcast %cst_248 : f32 to vector<16x16xf32>
    %706 = arith.addf %705, %704 : vector<16x16xf32>
    %707 = math.rsqrt %706 : vector<16x16xf32>
    %708 = arith.mulf %703, %707 : vector<16x16xf32>
    %709 = arith.subf %701, %708 : vector<16x16xf32>
    %710 = arith.subf %701, %708 : vector<16x16xf32>
    %711 = arith.mulf %709, %710 : vector<16x16xf32>
    %cst_249 = arith.constant 1.000000e-01 : f32
    %712 = vector.broadcast %cst_249 : f32 to vector<16x16xf32>
    %713 = arith.addf %712, %711 : vector<16x16xf32>
    %714 = tpu.reciprocal %713 {approx = true} : vector<16x16xf32> -> vector<16x16xf32>
    %715 = arith.mulf %711, %714 : vector<16x16xf32>
    %716 = arith.addf %694, %715 : vector<16x16xf32>
    %c4_250 = arith.constant 4 : index
    %c3_251 = arith.constant 3 : index
    %717 = vector.load %arg4[%c4_250, %c3_251] : memref<22x22xf32, #tpu.memory_space<vmem>>, vector<16x16xf32>
    %718 = arith.subf %717, %13 : vector<16x16xf32>
    %719 = arith.mulf %718, %718 : vector<16x16xf32>
    %cst_252 = arith.constant 8.100000e-01 : f32
    %720 = vector.broadcast %cst_252 : f32 to vector<16x16xf32>
    %721 = arith.addf %720, %719 : vector<16x16xf32>
    %722 = math.rsqrt %721 : vector<16x16xf32>
    %723 = arith.mulf %718, %722 : vector<16x16xf32>
    %c4_253 = arith.constant 4 : index
    %c3_254 = arith.constant 3 : index
    %724 = vector.load %arg5[%c4_253, %c3_254] : memref<22x22xf32, #tpu.memory_space<vmem>>, vector<16x16xf32>
    %725 = arith.subf %724, %27 : vector<16x16xf32>
    %726 = arith.mulf %725, %725 : vector<16x16xf32>
    %cst_255 = arith.constant 8.100000e-01 : f32
    %727 = vector.broadcast %cst_255 : f32 to vector<16x16xf32>
    %728 = arith.addf %727, %726 : vector<16x16xf32>
    %729 = math.rsqrt %728 : vector<16x16xf32>
    %730 = arith.mulf %725, %729 : vector<16x16xf32>
    %731 = arith.subf %723, %730 : vector<16x16xf32>
    %732 = arith.subf %723, %730 : vector<16x16xf32>
    %733 = arith.mulf %731, %732 : vector<16x16xf32>
    %cst_256 = arith.constant 1.000000e-01 : f32
    %734 = vector.broadcast %cst_256 : f32 to vector<16x16xf32>
    %735 = arith.addf %734, %733 : vector<16x16xf32>
    %736 = tpu.reciprocal %735 {approx = true} : vector<16x16xf32> -> vector<16x16xf32>
    %737 = arith.mulf %733, %736 : vector<16x16xf32>
    %738 = arith.addf %716, %737 : vector<16x16xf32>
    %c4_257 = arith.constant 4 : index
    %c4_258 = arith.constant 4 : index
    %739 = vector.load %arg4[%c4_257, %c4_258] : memref<22x22xf32, #tpu.memory_space<vmem>>, vector<16x16xf32>
    %740 = arith.subf %739, %13 : vector<16x16xf32>
    %741 = arith.mulf %740, %740 : vector<16x16xf32>
    %cst_259 = arith.constant 8.100000e-01 : f32
    %742 = vector.broadcast %cst_259 : f32 to vector<16x16xf32>
    %743 = arith.addf %742, %741 : vector<16x16xf32>
    %744 = math.rsqrt %743 : vector<16x16xf32>
    %745 = arith.mulf %740, %744 : vector<16x16xf32>
    %c4_260 = arith.constant 4 : index
    %c4_261 = arith.constant 4 : index
    %746 = vector.load %arg5[%c4_260, %c4_261] : memref<22x22xf32, #tpu.memory_space<vmem>>, vector<16x16xf32>
    %747 = arith.subf %746, %27 : vector<16x16xf32>
    %748 = arith.mulf %747, %747 : vector<16x16xf32>
    %cst_262 = arith.constant 8.100000e-01 : f32
    %749 = vector.broadcast %cst_262 : f32 to vector<16x16xf32>
    %750 = arith.addf %749, %748 : vector<16x16xf32>
    %751 = math.rsqrt %750 : vector<16x16xf32>
    %752 = arith.mulf %747, %751 : vector<16x16xf32>
    %753 = arith.subf %745, %752 : vector<16x16xf32>
    %754 = arith.subf %745, %752 : vector<16x16xf32>
    %755 = arith.mulf %753, %754 : vector<16x16xf32>
    %cst_263 = arith.constant 1.000000e-01 : f32
    %756 = vector.broadcast %cst_263 : f32 to vector<16x16xf32>
    %757 = arith.addf %756, %755 : vector<16x16xf32>
    %758 = tpu.reciprocal %757 {approx = true} : vector<16x16xf32> -> vector<16x16xf32>
    %759 = arith.mulf %755, %758 : vector<16x16xf32>
    %760 = arith.addf %738, %759 : vector<16x16xf32>
    %c4_264 = arith.constant 4 : index
    %c5_265 = arith.constant 5 : index
    %761 = vector.load %arg4[%c4_264, %c5_265] : memref<22x22xf32, #tpu.memory_space<vmem>>, vector<16x16xf32>
    %762 = arith.subf %761, %13 : vector<16x16xf32>
    %763 = arith.mulf %762, %762 : vector<16x16xf32>
    %cst_266 = arith.constant 8.100000e-01 : f32
    %764 = vector.broadcast %cst_266 : f32 to vector<16x16xf32>
    %765 = arith.addf %764, %763 : vector<16x16xf32>
    %766 = math.rsqrt %765 : vector<16x16xf32>
    %767 = arith.mulf %762, %766 : vector<16x16xf32>
    %c4_267 = arith.constant 4 : index
    %c5_268 = arith.constant 5 : index
    %768 = vector.load %arg5[%c4_267, %c5_268] : memref<22x22xf32, #tpu.memory_space<vmem>>, vector<16x16xf32>
    %769 = arith.subf %768, %27 : vector<16x16xf32>
    %770 = arith.mulf %769, %769 : vector<16x16xf32>
    %cst_269 = arith.constant 8.100000e-01 : f32
    %771 = vector.broadcast %cst_269 : f32 to vector<16x16xf32>
    %772 = arith.addf %771, %770 : vector<16x16xf32>
    %773 = math.rsqrt %772 : vector<16x16xf32>
    %774 = arith.mulf %769, %773 : vector<16x16xf32>
    %775 = arith.subf %767, %774 : vector<16x16xf32>
    %776 = arith.subf %767, %774 : vector<16x16xf32>
    %777 = arith.mulf %775, %776 : vector<16x16xf32>
    %cst_270 = arith.constant 1.000000e-01 : f32
    %778 = vector.broadcast %cst_270 : f32 to vector<16x16xf32>
    %779 = arith.addf %778, %777 : vector<16x16xf32>
    %780 = tpu.reciprocal %779 {approx = true} : vector<16x16xf32> -> vector<16x16xf32>
    %781 = arith.mulf %777, %780 : vector<16x16xf32>
    %782 = arith.addf %760, %781 : vector<16x16xf32>
    %c4_271 = arith.constant 4 : index
    %c6_272 = arith.constant 6 : index
    %783 = vector.load %arg4[%c4_271, %c6_272] : memref<22x22xf32, #tpu.memory_space<vmem>>, vector<16x16xf32>
    %784 = arith.subf %783, %13 : vector<16x16xf32>
    %785 = arith.mulf %784, %784 : vector<16x16xf32>
    %cst_273 = arith.constant 8.100000e-01 : f32
    %786 = vector.broadcast %cst_273 : f32 to vector<16x16xf32>
    %787 = arith.addf %786, %785 : vector<16x16xf32>
    %788 = math.rsqrt %787 : vector<16x16xf32>
    %789 = arith.mulf %784, %788 : vector<16x16xf32>
    %c4_274 = arith.constant 4 : index
    %c6_275 = arith.constant 6 : index
    %790 = vector.load %arg5[%c4_274, %c6_275] : memref<22x22xf32, #tpu.memory_space<vmem>>, vector<16x16xf32>
    %791 = arith.subf %790, %27 : vector<16x16xf32>
    %792 = arith.mulf %791, %791 : vector<16x16xf32>
    %cst_276 = arith.constant 8.100000e-01 : f32
    %793 = vector.broadcast %cst_276 : f32 to vector<16x16xf32>
    %794 = arith.addf %793, %792 : vector<16x16xf32>
    %795 = math.rsqrt %794 : vector<16x16xf32>
    %796 = arith.mulf %791, %795 : vector<16x16xf32>
    %797 = arith.subf %789, %796 : vector<16x16xf32>
    %798 = arith.subf %789, %796 : vector<16x16xf32>
    %799 = arith.mulf %797, %798 : vector<16x16xf32>
    %cst_277 = arith.constant 1.000000e-01 : f32
    %800 = vector.broadcast %cst_277 : f32 to vector<16x16xf32>
    %801 = arith.addf %800, %799 : vector<16x16xf32>
    %802 = tpu.reciprocal %801 {approx = true} : vector<16x16xf32> -> vector<16x16xf32>
    %803 = arith.mulf %799, %802 : vector<16x16xf32>
    %804 = arith.addf %782, %803 : vector<16x16xf32>
    %c5_278 = arith.constant 5 : index
    %c0_279 = arith.constant 0 : index
    %805 = vector.load %arg4[%c5_278, %c0_279] : memref<22x22xf32, #tpu.memory_space<vmem>>, vector<16x16xf32>
    %806 = arith.subf %805, %13 : vector<16x16xf32>
    %807 = arith.mulf %806, %806 : vector<16x16xf32>
    %cst_280 = arith.constant 8.100000e-01 : f32
    %808 = vector.broadcast %cst_280 : f32 to vector<16x16xf32>
    %809 = arith.addf %808, %807 : vector<16x16xf32>
    %810 = math.rsqrt %809 : vector<16x16xf32>
    %811 = arith.mulf %806, %810 : vector<16x16xf32>
    %c5_281 = arith.constant 5 : index
    %c0_282 = arith.constant 0 : index
    %812 = vector.load %arg5[%c5_281, %c0_282] : memref<22x22xf32, #tpu.memory_space<vmem>>, vector<16x16xf32>
    %813 = arith.subf %812, %27 : vector<16x16xf32>
    %814 = arith.mulf %813, %813 : vector<16x16xf32>
    %cst_283 = arith.constant 8.100000e-01 : f32
    %815 = vector.broadcast %cst_283 : f32 to vector<16x16xf32>
    %816 = arith.addf %815, %814 : vector<16x16xf32>
    %817 = math.rsqrt %816 : vector<16x16xf32>
    %818 = arith.mulf %813, %817 : vector<16x16xf32>
    %819 = arith.subf %811, %818 : vector<16x16xf32>
    %820 = arith.subf %811, %818 : vector<16x16xf32>
    %821 = arith.mulf %819, %820 : vector<16x16xf32>
    %cst_284 = arith.constant 1.000000e-01 : f32
    %822 = vector.broadcast %cst_284 : f32 to vector<16x16xf32>
    %823 = arith.addf %822, %821 : vector<16x16xf32>
    %824 = tpu.reciprocal %823 {approx = true} : vector<16x16xf32> -> vector<16x16xf32>
    %825 = arith.mulf %821, %824 : vector<16x16xf32>
    %826 = arith.addf %804, %825 : vector<16x16xf32>
    %c5_285 = arith.constant 5 : index
    %c1_286 = arith.constant 1 : index
    %827 = vector.load %arg4[%c5_285, %c1_286] : memref<22x22xf32, #tpu.memory_space<vmem>>, vector<16x16xf32>
    %828 = arith.subf %827, %13 : vector<16x16xf32>
    %829 = arith.mulf %828, %828 : vector<16x16xf32>
    %cst_287 = arith.constant 8.100000e-01 : f32
    %830 = vector.broadcast %cst_287 : f32 to vector<16x16xf32>
    %831 = arith.addf %830, %829 : vector<16x16xf32>
    %832 = math.rsqrt %831 : vector<16x16xf32>
    %833 = arith.mulf %828, %832 : vector<16x16xf32>
    %c5_288 = arith.constant 5 : index
    %c1_289 = arith.constant 1 : index
    %834 = vector.load %arg5[%c5_288, %c1_289] : memref<22x22xf32, #tpu.memory_space<vmem>>, vector<16x16xf32>
    %835 = arith.subf %834, %27 : vector<16x16xf32>
    %836 = arith.mulf %835, %835 : vector<16x16xf32>
    %cst_290 = arith.constant 8.100000e-01 : f32
    %837 = vector.broadcast %cst_290 : f32 to vector<16x16xf32>
    %838 = arith.addf %837, %836 : vector<16x16xf32>
    %839 = math.rsqrt %838 : vector<16x16xf32>
    %840 = arith.mulf %835, %839 : vector<16x16xf32>
    %841 = arith.subf %833, %840 : vector<16x16xf32>
    %842 = arith.subf %833, %840 : vector<16x16xf32>
    %843 = arith.mulf %841, %842 : vector<16x16xf32>
    %cst_291 = arith.constant 1.000000e-01 : f32
    %844 = vector.broadcast %cst_291 : f32 to vector<16x16xf32>
    %845 = arith.addf %844, %843 : vector<16x16xf32>
    %846 = tpu.reciprocal %845 {approx = true} : vector<16x16xf32> -> vector<16x16xf32>
    %847 = arith.mulf %843, %846 : vector<16x16xf32>
    %848 = arith.addf %826, %847 : vector<16x16xf32>
    %c5_292 = arith.constant 5 : index
    %c2_293 = arith.constant 2 : index
    %849 = vector.load %arg4[%c5_292, %c2_293] : memref<22x22xf32, #tpu.memory_space<vmem>>, vector<16x16xf32>
    %850 = arith.subf %849, %13 : vector<16x16xf32>
    %851 = arith.mulf %850, %850 : vector<16x16xf32>
    %cst_294 = arith.constant 8.100000e-01 : f32
    %852 = vector.broadcast %cst_294 : f32 to vector<16x16xf32>
    %853 = arith.addf %852, %851 : vector<16x16xf32>
    %854 = math.rsqrt %853 : vector<16x16xf32>
    %855 = arith.mulf %850, %854 : vector<16x16xf32>
    %c5_295 = arith.constant 5 : index
    %c2_296 = arith.constant 2 : index
    %856 = vector.load %arg5[%c5_295, %c2_296] : memref<22x22xf32, #tpu.memory_space<vmem>>, vector<16x16xf32>
    %857 = arith.subf %856, %27 : vector<16x16xf32>
    %858 = arith.mulf %857, %857 : vector<16x16xf32>
    %cst_297 = arith.constant 8.100000e-01 : f32
    %859 = vector.broadcast %cst_297 : f32 to vector<16x16xf32>
    %860 = arith.addf %859, %858 : vector<16x16xf32>
    %861 = math.rsqrt %860 : vector<16x16xf32>
    %862 = arith.mulf %857, %861 : vector<16x16xf32>
    %863 = arith.subf %855, %862 : vector<16x16xf32>
    %864 = arith.subf %855, %862 : vector<16x16xf32>
    %865 = arith.mulf %863, %864 : vector<16x16xf32>
    %cst_298 = arith.constant 1.000000e-01 : f32
    %866 = vector.broadcast %cst_298 : f32 to vector<16x16xf32>
    %867 = arith.addf %866, %865 : vector<16x16xf32>
    %868 = tpu.reciprocal %867 {approx = true} : vector<16x16xf32> -> vector<16x16xf32>
    %869 = arith.mulf %865, %868 : vector<16x16xf32>
    %870 = arith.addf %848, %869 : vector<16x16xf32>
    %c5_299 = arith.constant 5 : index
    %c3_300 = arith.constant 3 : index
    %871 = vector.load %arg4[%c5_299, %c3_300] : memref<22x22xf32, #tpu.memory_space<vmem>>, vector<16x16xf32>
    %872 = arith.subf %871, %13 : vector<16x16xf32>
    %873 = arith.mulf %872, %872 : vector<16x16xf32>
    %cst_301 = arith.constant 8.100000e-01 : f32
    %874 = vector.broadcast %cst_301 : f32 to vector<16x16xf32>
    %875 = arith.addf %874, %873 : vector<16x16xf32>
    %876 = math.rsqrt %875 : vector<16x16xf32>
    %877 = arith.mulf %872, %876 : vector<16x16xf32>
    %c5_302 = arith.constant 5 : index
    %c3_303 = arith.constant 3 : index
    %878 = vector.load %arg5[%c5_302, %c3_303] : memref<22x22xf32, #tpu.memory_space<vmem>>, vector<16x16xf32>
    %879 = arith.subf %878, %27 : vector<16x16xf32>
    %880 = arith.mulf %879, %879 : vector<16x16xf32>
    %cst_304 = arith.constant 8.100000e-01 : f32
    %881 = vector.broadcast %cst_304 : f32 to vector<16x16xf32>
    %882 = arith.addf %881, %880 : vector<16x16xf32>
    %883 = math.rsqrt %882 : vector<16x16xf32>
    %884 = arith.mulf %879, %883 : vector<16x16xf32>
    %885 = arith.subf %877, %884 : vector<16x16xf32>
    %886 = arith.subf %877, %884 : vector<16x16xf32>
    %887 = arith.mulf %885, %886 : vector<16x16xf32>
    %cst_305 = arith.constant 1.000000e-01 : f32
    %888 = vector.broadcast %cst_305 : f32 to vector<16x16xf32>
    %889 = arith.addf %888, %887 : vector<16x16xf32>
    %890 = tpu.reciprocal %889 {approx = true} : vector<16x16xf32> -> vector<16x16xf32>
    %891 = arith.mulf %887, %890 : vector<16x16xf32>
    %892 = arith.addf %870, %891 : vector<16x16xf32>
    %c5_306 = arith.constant 5 : index
    %c4_307 = arith.constant 4 : index
    %893 = vector.load %arg4[%c5_306, %c4_307] : memref<22x22xf32, #tpu.memory_space<vmem>>, vector<16x16xf32>
    %894 = arith.subf %893, %13 : vector<16x16xf32>
    %895 = arith.mulf %894, %894 : vector<16x16xf32>
    %cst_308 = arith.constant 8.100000e-01 : f32
    %896 = vector.broadcast %cst_308 : f32 to vector<16x16xf32>
    %897 = arith.addf %896, %895 : vector<16x16xf32>
    %898 = math.rsqrt %897 : vector<16x16xf32>
    %899 = arith.mulf %894, %898 : vector<16x16xf32>
    %c5_309 = arith.constant 5 : index
    %c4_310 = arith.constant 4 : index
    %900 = vector.load %arg5[%c5_309, %c4_310] : memref<22x22xf32, #tpu.memory_space<vmem>>, vector<16x16xf32>
    %901 = arith.subf %900, %27 : vector<16x16xf32>
    %902 = arith.mulf %901, %901 : vector<16x16xf32>
    %cst_311 = arith.constant 8.100000e-01 : f32
    %903 = vector.broadcast %cst_311 : f32 to vector<16x16xf32>
    %904 = arith.addf %903, %902 : vector<16x16xf32>
    %905 = math.rsqrt %904 : vector<16x16xf32>
    %906 = arith.mulf %901, %905 : vector<16x16xf32>
    %907 = arith.subf %899, %906 : vector<16x16xf32>
    %908 = arith.subf %899, %906 : vector<16x16xf32>
    %909 = arith.mulf %907, %908 : vector<16x16xf32>
    %cst_312 = arith.constant 1.000000e-01 : f32
    %910 = vector.broadcast %cst_312 : f32 to vector<16x16xf32>
    %911 = arith.addf %910, %909 : vector<16x16xf32>
    %912 = tpu.reciprocal %911 {approx = true} : vector<16x16xf32> -> vector<16x16xf32>
    %913 = arith.mulf %909, %912 : vector<16x16xf32>
    %914 = arith.addf %892, %913 : vector<16x16xf32>
    %c5_313 = arith.constant 5 : index
    %c5_314 = arith.constant 5 : index
    %915 = vector.load %arg4[%c5_313, %c5_314] : memref<22x22xf32, #tpu.memory_space<vmem>>, vector<16x16xf32>
    %916 = arith.subf %915, %13 : vector<16x16xf32>
    %917 = arith.mulf %916, %916 : vector<16x16xf32>
    %cst_315 = arith.constant 8.100000e-01 : f32
    %918 = vector.broadcast %cst_315 : f32 to vector<16x16xf32>
    %919 = arith.addf %918, %917 : vector<16x16xf32>
    %920 = math.rsqrt %919 : vector<16x16xf32>
    %921 = arith.mulf %916, %920 : vector<16x16xf32>
    %c5_316 = arith.constant 5 : index
    %c5_317 = arith.constant 5 : index
    %922 = vector.load %arg5[%c5_316, %c5_317] : memref<22x22xf32, #tpu.memory_space<vmem>>, vector<16x16xf32>
    %923 = arith.subf %922, %27 : vector<16x16xf32>
    %924 = arith.mulf %923, %923 : vector<16x16xf32>
    %cst_318 = arith.constant 8.100000e-01 : f32
    %925 = vector.broadcast %cst_318 : f32 to vector<16x16xf32>
    %926 = arith.addf %925, %924 : vector<16x16xf32>
    %927 = math.rsqrt %926 : vector<16x16xf32>
    %928 = arith.mulf %923, %927 : vector<16x16xf32>
    %929 = arith.subf %921, %928 : vector<16x16xf32>
    %930 = arith.subf %921, %928 : vector<16x16xf32>
    %931 = arith.mulf %929, %930 : vector<16x16xf32>
    %cst_319 = arith.constant 1.000000e-01 : f32
    %932 = vector.broadcast %cst_319 : f32 to vector<16x16xf32>
    %933 = arith.addf %932, %931 : vector<16x16xf32>
    %934 = tpu.reciprocal %933 {approx = true} : vector<16x16xf32> -> vector<16x16xf32>
    %935 = arith.mulf %931, %934 : vector<16x16xf32>
    %936 = arith.addf %914, %935 : vector<16x16xf32>
    %c5_320 = arith.constant 5 : index
    %c6_321 = arith.constant 6 : index
    %937 = vector.load %arg4[%c5_320, %c6_321] : memref<22x22xf32, #tpu.memory_space<vmem>>, vector<16x16xf32>
    %938 = arith.subf %937, %13 : vector<16x16xf32>
    %939 = arith.mulf %938, %938 : vector<16x16xf32>
    %cst_322 = arith.constant 8.100000e-01 : f32
    %940 = vector.broadcast %cst_322 : f32 to vector<16x16xf32>
    %941 = arith.addf %940, %939 : vector<16x16xf32>
    %942 = math.rsqrt %941 : vector<16x16xf32>
    %943 = arith.mulf %938, %942 : vector<16x16xf32>
    %c5_323 = arith.constant 5 : index
    %c6_324 = arith.constant 6 : index
    %944 = vector.load %arg5[%c5_323, %c6_324] : memref<22x22xf32, #tpu.memory_space<vmem>>, vector<16x16xf32>
    %945 = arith.subf %944, %27 : vector<16x16xf32>
    %946 = arith.mulf %945, %945 : vector<16x16xf32>
    %cst_325 = arith.constant 8.100000e-01 : f32
    %947 = vector.broadcast %cst_325 : f32 to vector<16x16xf32>
    %948 = arith.addf %947, %946 : vector<16x16xf32>
    %949 = math.rsqrt %948 : vector<16x16xf32>
    %950 = arith.mulf %945, %949 : vector<16x16xf32>
    %951 = arith.subf %943, %950 : vector<16x16xf32>
    %952 = arith.subf %943, %950 : vector<16x16xf32>
    %953 = arith.mulf %951, %952 : vector<16x16xf32>
    %cst_326 = arith.constant 1.000000e-01 : f32
    %954 = vector.broadcast %cst_326 : f32 to vector<16x16xf32>
    %955 = arith.addf %954, %953 : vector<16x16xf32>
    %956 = tpu.reciprocal %955 {approx = true} : vector<16x16xf32> -> vector<16x16xf32>
    %957 = arith.mulf %953, %956 : vector<16x16xf32>
    %958 = arith.addf %936, %957 : vector<16x16xf32>
    %c6_327 = arith.constant 6 : index
    %c0_328 = arith.constant 0 : index
    %959 = vector.load %arg4[%c6_327, %c0_328] : memref<22x22xf32, #tpu.memory_space<vmem>>, vector<16x16xf32>
    %960 = arith.subf %959, %13 : vector<16x16xf32>
    %961 = arith.mulf %960, %960 : vector<16x16xf32>
    %cst_329 = arith.constant 8.100000e-01 : f32
    %962 = vector.broadcast %cst_329 : f32 to vector<16x16xf32>
    %963 = arith.addf %962, %961 : vector<16x16xf32>
    %964 = math.rsqrt %963 : vector<16x16xf32>
    %965 = arith.mulf %960, %964 : vector<16x16xf32>
    %c6_330 = arith.constant 6 : index
    %c0_331 = arith.constant 0 : index
    %966 = vector.load %arg5[%c6_330, %c0_331] : memref<22x22xf32, #tpu.memory_space<vmem>>, vector<16x16xf32>
    %967 = arith.subf %966, %27 : vector<16x16xf32>
    %968 = arith.mulf %967, %967 : vector<16x16xf32>
    %cst_332 = arith.constant 8.100000e-01 : f32
    %969 = vector.broadcast %cst_332 : f32 to vector<16x16xf32>
    %970 = arith.addf %969, %968 : vector<16x16xf32>
    %971 = math.rsqrt %970 : vector<16x16xf32>
    %972 = arith.mulf %967, %971 : vector<16x16xf32>
    %973 = arith.subf %965, %972 : vector<16x16xf32>
    %974 = arith.subf %965, %972 : vector<16x16xf32>
    %975 = arith.mulf %973, %974 : vector<16x16xf32>
    %cst_333 = arith.constant 1.000000e-01 : f32
    %976 = vector.broadcast %cst_333 : f32 to vector<16x16xf32>
    %977 = arith.addf %976, %975 : vector<16x16xf32>
    %978 = tpu.reciprocal %977 {approx = true} : vector<16x16xf32> -> vector<16x16xf32>
    %979 = arith.mulf %975, %978 : vector<16x16xf32>
    %980 = arith.addf %958, %979 : vector<16x16xf32>
    %c6_334 = arith.constant 6 : index
    %c1_335 = arith.constant 1 : index
    %981 = vector.load %arg4[%c6_334, %c1_335] : memref<22x22xf32, #tpu.memory_space<vmem>>, vector<16x16xf32>
    %982 = arith.subf %981, %13 : vector<16x16xf32>
    %983 = arith.mulf %982, %982 : vector<16x16xf32>
    %cst_336 = arith.constant 8.100000e-01 : f32
    %984 = vector.broadcast %cst_336 : f32 to vector<16x16xf32>
    %985 = arith.addf %984, %983 : vector<16x16xf32>
    %986 = math.rsqrt %985 : vector<16x16xf32>
    %987 = arith.mulf %982, %986 : vector<16x16xf32>
    %c6_337 = arith.constant 6 : index
    %c1_338 = arith.constant 1 : index
    %988 = vector.load %arg5[%c6_337, %c1_338] : memref<22x22xf32, #tpu.memory_space<vmem>>, vector<16x16xf32>
    %989 = arith.subf %988, %27 : vector<16x16xf32>
    %990 = arith.mulf %989, %989 : vector<16x16xf32>
    %cst_339 = arith.constant 8.100000e-01 : f32
    %991 = vector.broadcast %cst_339 : f32 to vector<16x16xf32>
    %992 = arith.addf %991, %990 : vector<16x16xf32>
    %993 = math.rsqrt %992 : vector<16x16xf32>
    %994 = arith.mulf %989, %993 : vector<16x16xf32>
    %995 = arith.subf %987, %994 : vector<16x16xf32>
    %996 = arith.subf %987, %994 : vector<16x16xf32>
    %997 = arith.mulf %995, %996 : vector<16x16xf32>
    %cst_340 = arith.constant 1.000000e-01 : f32
    %998 = vector.broadcast %cst_340 : f32 to vector<16x16xf32>
    %999 = arith.addf %998, %997 : vector<16x16xf32>
    %1000 = tpu.reciprocal %999 {approx = true} : vector<16x16xf32> -> vector<16x16xf32>
    %1001 = arith.mulf %997, %1000 : vector<16x16xf32>
    %1002 = arith.addf %980, %1001 : vector<16x16xf32>
    %c6_341 = arith.constant 6 : index
    %c2_342 = arith.constant 2 : index
    %1003 = vector.load %arg4[%c6_341, %c2_342] : memref<22x22xf32, #tpu.memory_space<vmem>>, vector<16x16xf32>
    %1004 = arith.subf %1003, %13 : vector<16x16xf32>
    %1005 = arith.mulf %1004, %1004 : vector<16x16xf32>
    %cst_343 = arith.constant 8.100000e-01 : f32
    %1006 = vector.broadcast %cst_343 : f32 to vector<16x16xf32>
    %1007 = arith.addf %1006, %1005 : vector<16x16xf32>
    %1008 = math.rsqrt %1007 : vector<16x16xf32>
    %1009 = arith.mulf %1004, %1008 : vector<16x16xf32>
    %c6_344 = arith.constant 6 : index
    %c2_345 = arith.constant 2 : index
    %1010 = vector.load %arg5[%c6_344, %c2_345] : memref<22x22xf32, #tpu.memory_space<vmem>>, vector<16x16xf32>
    %1011 = arith.subf %1010, %27 : vector<16x16xf32>
    %1012 = arith.mulf %1011, %1011 : vector<16x16xf32>
    %cst_346 = arith.constant 8.100000e-01 : f32
    %1013 = vector.broadcast %cst_346 : f32 to vector<16x16xf32>
    %1014 = arith.addf %1013, %1012 : vector<16x16xf32>
    %1015 = math.rsqrt %1014 : vector<16x16xf32>
    %1016 = arith.mulf %1011, %1015 : vector<16x16xf32>
    %1017 = arith.subf %1009, %1016 : vector<16x16xf32>
    %1018 = arith.subf %1009, %1016 : vector<16x16xf32>
    %1019 = arith.mulf %1017, %1018 : vector<16x16xf32>
    %cst_347 = arith.constant 1.000000e-01 : f32
    %1020 = vector.broadcast %cst_347 : f32 to vector<16x16xf32>
    %1021 = arith.addf %1020, %1019 : vector<16x16xf32>
    %1022 = tpu.reciprocal %1021 {approx = true} : vector<16x16xf32> -> vector<16x16xf32>
    %1023 = arith.mulf %1019, %1022 : vector<16x16xf32>
    %1024 = arith.addf %1002, %1023 : vector<16x16xf32>
    %c6_348 = arith.constant 6 : index
    %c3_349 = arith.constant 3 : index
    %1025 = vector.load %arg4[%c6_348, %c3_349] : memref<22x22xf32, #tpu.memory_space<vmem>>, vector<16x16xf32>
    %1026 = arith.subf %1025, %13 : vector<16x16xf32>
    %1027 = arith.mulf %1026, %1026 : vector<16x16xf32>
    %cst_350 = arith.constant 8.100000e-01 : f32
    %1028 = vector.broadcast %cst_350 : f32 to vector<16x16xf32>
    %1029 = arith.addf %1028, %1027 : vector<16x16xf32>
    %1030 = math.rsqrt %1029 : vector<16x16xf32>
    %1031 = arith.mulf %1026, %1030 : vector<16x16xf32>
    %c6_351 = arith.constant 6 : index
    %c3_352 = arith.constant 3 : index
    %1032 = vector.load %arg5[%c6_351, %c3_352] : memref<22x22xf32, #tpu.memory_space<vmem>>, vector<16x16xf32>
    %1033 = arith.subf %1032, %27 : vector<16x16xf32>
    %1034 = arith.mulf %1033, %1033 : vector<16x16xf32>
    %cst_353 = arith.constant 8.100000e-01 : f32
    %1035 = vector.broadcast %cst_353 : f32 to vector<16x16xf32>
    %1036 = arith.addf %1035, %1034 : vector<16x16xf32>
    %1037 = math.rsqrt %1036 : vector<16x16xf32>
    %1038 = arith.mulf %1033, %1037 : vector<16x16xf32>
    %1039 = arith.subf %1031, %1038 : vector<16x16xf32>
    %1040 = arith.subf %1031, %1038 : vector<16x16xf32>
    %1041 = arith.mulf %1039, %1040 : vector<16x16xf32>
    %cst_354 = arith.constant 1.000000e-01 : f32
    %1042 = vector.broadcast %cst_354 : f32 to vector<16x16xf32>
    %1043 = arith.addf %1042, %1041 : vector<16x16xf32>
    %1044 = tpu.reciprocal %1043 {approx = true} : vector<16x16xf32> -> vector<16x16xf32>
    %1045 = arith.mulf %1041, %1044 : vector<16x16xf32>
    %1046 = arith.addf %1024, %1045 : vector<16x16xf32>
    %c6_355 = arith.constant 6 : index
    %c4_356 = arith.constant 4 : index
    %1047 = vector.load %arg4[%c6_355, %c4_356] : memref<22x22xf32, #tpu.memory_space<vmem>>, vector<16x16xf32>
    %1048 = arith.subf %1047, %13 : vector<16x16xf32>
    %1049 = arith.mulf %1048, %1048 : vector<16x16xf32>
    %cst_357 = arith.constant 8.100000e-01 : f32
    %1050 = vector.broadcast %cst_357 : f32 to vector<16x16xf32>
    %1051 = arith.addf %1050, %1049 : vector<16x16xf32>
    %1052 = math.rsqrt %1051 : vector<16x16xf32>
    %1053 = arith.mulf %1048, %1052 : vector<16x16xf32>
    %c6_358 = arith.constant 6 : index
    %c4_359 = arith.constant 4 : index
    %1054 = vector.load %arg5[%c6_358, %c4_359] : memref<22x22xf32, #tpu.memory_space<vmem>>, vector<16x16xf32>
    %1055 = arith.subf %1054, %27 : vector<16x16xf32>
    %1056 = arith.mulf %1055, %1055 : vector<16x16xf32>
    %cst_360 = arith.constant 8.100000e-01 : f32
    %1057 = vector.broadcast %cst_360 : f32 to vector<16x16xf32>
    %1058 = arith.addf %1057, %1056 : vector<16x16xf32>
    %1059 = math.rsqrt %1058 : vector<16x16xf32>
    %1060 = arith.mulf %1055, %1059 : vector<16x16xf32>
    %1061 = arith.subf %1053, %1060 : vector<16x16xf32>
    %1062 = arith.subf %1053, %1060 : vector<16x16xf32>
    %1063 = arith.mulf %1061, %1062 : vector<16x16xf32>
    %cst_361 = arith.constant 1.000000e-01 : f32
    %1064 = vector.broadcast %cst_361 : f32 to vector<16x16xf32>
    %1065 = arith.addf %1064, %1063 : vector<16x16xf32>
    %1066 = tpu.reciprocal %1065 {approx = true} : vector<16x16xf32> -> vector<16x16xf32>
    %1067 = arith.mulf %1063, %1066 : vector<16x16xf32>
    %1068 = arith.addf %1046, %1067 : vector<16x16xf32>
    %c6_362 = arith.constant 6 : index
    %c5_363 = arith.constant 5 : index
    %1069 = vector.load %arg4[%c6_362, %c5_363] : memref<22x22xf32, #tpu.memory_space<vmem>>, vector<16x16xf32>
    %1070 = arith.subf %1069, %13 : vector<16x16xf32>
    %1071 = arith.mulf %1070, %1070 : vector<16x16xf32>
    %cst_364 = arith.constant 8.100000e-01 : f32
    %1072 = vector.broadcast %cst_364 : f32 to vector<16x16xf32>
    %1073 = arith.addf %1072, %1071 : vector<16x16xf32>
    %1074 = math.rsqrt %1073 : vector<16x16xf32>
    %1075 = arith.mulf %1070, %1074 : vector<16x16xf32>
    %c6_365 = arith.constant 6 : index
    %c5_366 = arith.constant 5 : index
    %1076 = vector.load %arg5[%c6_365, %c5_366] : memref<22x22xf32, #tpu.memory_space<vmem>>, vector<16x16xf32>
    %1077 = arith.subf %1076, %27 : vector<16x16xf32>
    %1078 = arith.mulf %1077, %1077 : vector<16x16xf32>
    %cst_367 = arith.constant 8.100000e-01 : f32
    %1079 = vector.broadcast %cst_367 : f32 to vector<16x16xf32>
    %1080 = arith.addf %1079, %1078 : vector<16x16xf32>
    %1081 = math.rsqrt %1080 : vector<16x16xf32>
    %1082 = arith.mulf %1077, %1081 : vector<16x16xf32>
    %1083 = arith.subf %1075, %1082 : vector<16x16xf32>
    %1084 = arith.subf %1075, %1082 : vector<16x16xf32>
    %1085 = arith.mulf %1083, %1084 : vector<16x16xf32>
    %cst_368 = arith.constant 1.000000e-01 : f32
    %1086 = vector.broadcast %cst_368 : f32 to vector<16x16xf32>
    %1087 = arith.addf %1086, %1085 : vector<16x16xf32>
    %1088 = tpu.reciprocal %1087 {approx = true} : vector<16x16xf32> -> vector<16x16xf32>
    %1089 = arith.mulf %1085, %1088 : vector<16x16xf32>
    %1090 = arith.addf %1068, %1089 : vector<16x16xf32>
    %c6_369 = arith.constant 6 : index
    %c6_370 = arith.constant 6 : index
    %1091 = vector.load %arg4[%c6_369, %c6_370] : memref<22x22xf32, #tpu.memory_space<vmem>>, vector<16x16xf32>
    %1092 = arith.subf %1091, %13 : vector<16x16xf32>
    %1093 = arith.mulf %1092, %1092 : vector<16x16xf32>
    %cst_371 = arith.constant 8.100000e-01 : f32
    %1094 = vector.broadcast %cst_371 : f32 to vector<16x16xf32>
    %1095 = arith.addf %1094, %1093 : vector<16x16xf32>
    %1096 = math.rsqrt %1095 : vector<16x16xf32>
    %1097 = arith.mulf %1092, %1096 : vector<16x16xf32>
    %c6_372 = arith.constant 6 : index
    %c6_373 = arith.constant 6 : index
    %1098 = vector.load %arg5[%c6_372, %c6_373] : memref<22x22xf32, #tpu.memory_space<vmem>>, vector<16x16xf32>
    %1099 = arith.subf %1098, %27 : vector<16x16xf32>
    %1100 = arith.mulf %1099, %1099 : vector<16x16xf32>
    %cst_374 = arith.constant 8.100000e-01 : f32
    %1101 = vector.broadcast %cst_374 : f32 to vector<16x16xf32>
    %1102 = arith.addf %1101, %1100 : vector<16x16xf32>
    %1103 = math.rsqrt %1102 : vector<16x16xf32>
    %1104 = arith.mulf %1099, %1103 : vector<16x16xf32>
    %1105 = arith.subf %1097, %1104 : vector<16x16xf32>
    %1106 = arith.subf %1097, %1104 : vector<16x16xf32>
    %1107 = arith.mulf %1105, %1106 : vector<16x16xf32>
    %cst_375 = arith.constant 1.000000e-01 : f32
    %1108 = vector.broadcast %cst_375 : f32 to vector<16x16xf32>
    %1109 = arith.addf %1108, %1107 : vector<16x16xf32>
    %1110 = tpu.reciprocal %1109 {approx = true} : vector<16x16xf32> -> vector<16x16xf32>
    %1111 = arith.mulf %1107, %1110 : vector<16x16xf32>
    %1112 = arith.addf %1090, %1111 : vector<16x16xf32>
    %cst_376 = arith.constant 0.0204081628 : f32
    %1113 = vector.broadcast %cst_376 : f32 to vector<16x16xf32>
    %1114 = arith.mulf %1112, %1113 : vector<16x16xf32>
    %1115 = tpu.iota {dimensions = array<i32: 0>} : vector<16x16xi32>
    %1116 = tpu.iota {dimensions = array<i32: 1>} : vector<16x16xi32>
    %c1_i32 = arith.constant 1 : i32
    %1117 = vector.broadcast %c1_i32 : i32 to vector<16x16xi32>
    %1118 = arith.cmpi sge, %1115, %1117 : vector<16x16xi32>
    %c14_i32 = arith.constant 14 : i32
    %1119 = vector.broadcast %c14_i32 : i32 to vector<16x16xi32>
    %1120 = arith.cmpi sle, %1115, %1119 : vector<16x16xi32>
    %1121 = arith.andi %1118, %1120 : vector<16x16xi1>
    %c1_i32_377 = arith.constant 1 : i32
    %1122 = vector.broadcast %c1_i32_377 : i32 to vector<16x16xi32>
    %1123 = arith.cmpi sge, %1116, %1122 : vector<16x16xi32>
    %1124 = arith.andi %1121, %1123 : vector<16x16xi1>
    %c14_i32_378 = arith.constant 14 : i32
    %1125 = vector.broadcast %c14_i32_378 : i32 to vector<16x16xi32>
    %1126 = arith.cmpi sle, %1116, %1125 : vector<16x16xi32>
    %1127 = arith.andi %1124, %1126 : vector<16x16xi1>
    %cst_379 = arith.constant 0.000000e+00 : f32
    %1128 = vector.broadcast %cst_379 : f32 to vector<16x16xf32>
    %1129 = arith.select %1127, %1114, %1128 : vector<16x16xi1>, vector<16x16xf32>
    %c0_380 = arith.constant 0 : index
    %c0_381 = arith.constant 0 : index
    %c0_382 = arith.constant 0 : index
    %c0_383 = arith.constant 0 : index
    %1130 = vector.load %arg3[%c0_380, %c0_381, %c0_382, %c0_383] : memref<1x1x16x16xf32, #tpu.memory_space<vmem>>, vector<1x1x16x16xf32>
    %1131 = vector.shape_cast %1130 : vector<1x1x16x16xf32> to vector<16x16xf32>
    %1132 = vector.shape_cast %1129 : vector<16x16xf32> to vector<1x1x16x16xf32>
    tpu.vector_store %arg3[%c0_380, %c0_381, %c0_382, %c0_383], %1132 {strides = array<i32>} : memref<1x1x16x16xf32, #tpu.memory_space<vmem>>, vector<1x1x16x16xf32>,
    return
  }
  func.func @transform_0(%arg0: i32) -> (i32, i32, i32, i32) {
    %c0_i32 = arith.constant 0 : i32
    %c0_i32_0 = arith.constant 0 : i32
    %c0_i32_1 = arith.constant 0 : i32
    %c0_i32_2 = arith.constant 0 : i32
    return %arg0, %c0_i32, %c0_i32_0, %c0_i32_1 : i32, i32, i32, i32
  }
  func.func @transform_1(%arg0: i32) -> (i32, i32, i32, i32) {
    %c0_i32 = arith.constant 0 : i32
    %c0_i32_0 = arith.constant 0 : i32
    %c0_i32_1 = arith.constant 0 : i32
    %c0_i32_2 = arith.constant 0 : i32
    return %arg0, %c0_i32, %c0_i32_0, %c0_i32_1 : i32, i32, i32, i32
  }
  func.func @transform_2(%arg0: i32) -> (i32, i32, i32, i32) {
    %c0_i32 = arith.constant 0 : i32
    %c0_i32_0 = arith.constant 0 : i32
    %c0_i32_1 = arith.constant 0 : i32
    %c0_i32_2 = arith.constant 0 : i32
    return %arg0, %c0_i32, %c0_i32_0, %c0_i32_1 : i32, i32, i32, i32
  }
}

</mosaic_0001>

<bundles_post_ra>
// kernel: tpu_custom_call.1
= control target key start
LH: loop header
LB: loop body
LE: loop exit
PB: predicated region body
PF: predicated region fallthrough
CT: control target
= control target key end

     0   :  { %7 = vsyncpa [#allocation5], 0  ;;  %s10244_s0 = inlined_call_operand.hbm [shape: f32[2,3,16,16], index: 0, kind: input, shape index: {}]   ;;  %s10245_s1 = inlined_call_operand.hbm [shape: f32[2,3,16,16], index: 1, kind: input, shape index: {}]   ;;  %s10246_s2 = inlined_call_operand.hbm [shape: f32[2,1,16,16], index: 2, kind: output, shape index: {}]  }
   0x1   :  { %9 = vsyncpa [#allocation5 + $0x1], 0 }
   0x2   :  { %10 = vsyncpa [#allocation8], 0 }
   0x3   :  { %12 = vsyncpa [#allocation8 + $0x1], 0 }
   0x4   :  { %13 = vsyncpa [#allocation6], 0 }
   0x5   :  { %15 = vsyncpa [#allocation6 + $0x1], 0  ;;  %s5061_s9 = smov 0   ;;  %s5063_s10 = smov 0  }
   0x6   :  { %s5065_s11 = smov 0   ;;  %s5067_s12 = smov 0  }
   0x7 LB: > { %s5082_s13 = sadd.s32 4294967295, %s5027_s12   ;;  %s4163_s14 = sadd.s32 4294967294, %s5027_s12   ;;  %s5027_s12 = sphi %s5067_s12, %s10569_s12   ;;  %s5023_s11 = sphi %s5065_s11, %s10568_s11   ;;  %s5019_s10 = sphi %s5063_s10, %s10567_s10   ;;  %s5015_s9 = sphi %s5061_s9, %s10566_s9  }
   0x8   : > { %s5086_s15 = sadd.s32 1, %s5027_s12   ;;  %s28_s16 = sadd.s32 1, %s5023_s11 }
   0x9   : > { %s25_s17 = ssub.s32 %s5027_s12, %s5086_s15  ;;  %p35_p0 = scmp.ne.s32.totalorder %s5023_s11, %s5019_s10 }
   0xa   : > { %p26_p1 = scmp.eq.s32.totalorder %s25_s17, 0  ;;  %p36_p2 = scmp.eq.s32.totalorder %s5027_s12, 0 }
   0xb   : > { %p41_p3 = scmp.ne.s32.totalorder %s5019_s10, %s5015_s9  ;;  %p42_p4 = scmp.eq.s32.totalorder %s5082_s13, 0 }
   0xc   : > { %s5098_s18 = scalar_select %p26_p1, %s5023_s11, %s28_s16  }
   0xd   : > { %p37_p5 = por %p36_p2, %p35_p0  ;;  %p5100_p6 = por %p42_p4, %p41_p3 }
   0xe   : > { %p91_p7 = scmp.eq.s32.totalorder %s5082_s13, 1  ;;  %p97_p8 = scmp.eq.s32.totalorder %s4163_s14, 1 }
   0xf   : > { %p4165_p9 = scmp.ge.s32.totalorder %s5027_s12, 2  ;;  %p4206_p10 = scmp.lt.s32.totalorder %s5027_s12, 2 }
  0x10   : > { %p5107_p11 = por %p91_p7, %p35_p0  ;;  %p5111_p12 = por %p97_p8, %p41_p3 }
  0x11   : > { %s5116_s22 = sand.u32 1, %s5023_s11   ;;  %s4185_s23 = smul.u32 48, %s5027_s12 }
  0x12   : > { %s4184_s24 = smul.u32 48, %s5116_s22  ;;  %p5125_p13 = pnand %p4206_p10, %p37_p5 }
  0x13   : > { %s126_s27 = scalar_lea.hbm %s10244_s0, %s4185_s23  ;;  %s118_s4 = scalar_lea.sflag [#allocation5], %s5116_s22 }
  0x14   : > { %s127_s29 = sshll.u32 %s126_s27, 4  ;;  %s121_s30 = scalar_lea.vmem [#allocation4], %s4184_s24  ;;  %s128_s29 = int_to_ptr.hbm [resolvable:$true] %s127_s29 }
  0x15   : > { %s129_s3 = sshll.u32 %s121_s30, 4  ;;  %s4897_s5 = sshra.s32 %s128_s29, 4  ;;  %s130_s3 = int_to_ptr.vmem [resolvable:$true] %s129_s3  ;;  %s4898_s5 = int_to_ptr.hbm [resolvable:$true] %s4897_s5 }
  0x16   : > { %s4899_s6 = scalar_lea.hbm %s4898_s5, 48  ;;  %p4901_p1 = pneg %p5125_p13 }
  0x17   : > { %p4900_p0 = scmp.ne.s32.totalorder %s4898_s5, %s4899_s6  ;;  %s4904_s14 = scalar_lea.hbm %s10244_s0, 96 }
  0x18   : > { %p4905_p4 = scmp.lt.s32.totalorder %s4898_s5, %s10244_s0  ;;  %p4906_p5 = scmp.lt.s32.totalorder %s4904_s14, %s4899_s6 }
  0x19   : > { %p4902_p2 = pnand %p4901_p1, %p4900_p0 }
  0x1a   : > { %p4907_p7 = por %p4906_p5, %p4905_p4 }
  0x1b   : > { %p4903_p3 = pneg %p4902_p2 }
  0x1d   : > { %p4908_p8 = pnand %p4907_p7, %p4903_p3 }
  0x1f   : > { %4911 = shalt.err (!%p4908_p8)
}
  0x20   : > { %s5029_s25 = smov 128   ;;  %s5030_s26 = smov 8  }
  0x21   : > { %4198 = dma.hbm_to_vmem [thread:$0]  (!%p5125_p13), %s128_s29, 768, %s130_s3, %s118_s4, %s5029_s25, %s5029_s25, %s5030_s26  }
  0x22   : > { %p4168_p10 = scmp.ge.s32.totalorder %s5027_s12, 1  ;;  %p159_p0 = scmp.lt.s32.totalorder %s5027_s12, 3 }
  0x23   : > { %s148_s6 = scalar_lea.hbm %s10245_s1, %s4185_s23  ;;  %s143_s8 = scalar_lea.vmem [#allocation7], %s4184_s24 }
  0x24   : > { %p5147_p2 = pnand %p4168_p10, %p159_p0  ;;  %s149_s7 = sshll.u32 %s148_s6, 4  ;;  %s150_s7 = int_to_ptr.hbm [resolvable:$true] %s149_s7 }
  0x25   : > { %s151_s14 = sshll.u32 %s143_s8, 4  ;;  %s140_s16 = scalar_lea.sflag [#allocation8], %s5116_s22  ;;  %s152_s14 = int_to_ptr.vmem [resolvable:$true] %s151_s14 }
  0x26   : > { %s4927_s17 = sshra.s32 %s150_s7, 4  ;;  %s4934_s30 = scalar_lea.hbm %s10245_s1, 96  ;;  %s4928_s17 = int_to_ptr.hbm [resolvable:$true] %s4927_s17 }
  0x27   : > { %s4929_s29 = scalar_lea.hbm %s4928_s17, 48  ;;  %p4935_p7 = scmp.lt.s32.totalorder %s4928_s17, %s10245_s1 }
  0x28   : > { %p4930_p3 = scmp.ne.s32.totalorder %s4928_s17, %s4929_s29  ;;  %p4936_p8 = scmp.lt.s32.totalorder %s4934_s30, %s4929_s29 }
  0x2a   : > { %p4932_p4 = pnand %p4930_p3, %p4901_p1  ;;  %p4937_p10 = por %p4936_p8, %p4935_p7 }
  0x2c   : > { %p4933_p5 = pneg %p4932_p4 }
  0x2e   : > { %p4938_p0 = pnand %p4937_p10, %p4933_p5 }
  0x30   : > { %4941 = shalt.err (!%p4938_p0)
}
  0x31   : > { %4201 = dma.hbm_to_vmem [thread:$0]  (!%p5125_p13), %s150_s7, 768, %s152_s14, %s140_s16, %s5029_s25, %s5029_s25, %s5030_s26  }
  0x32   : > { %163 = sbr.rel (%p5147_p2) target bundleno = 1057 (0x421), region = 28 }
  0x37   : > { %s5173_s22 = sand.u32 1, %s5019_s10  }
  0x38   : > { %s4188_s24 = smul.u32 48, %s5173_s22  ;;  %s166_s6 = scalar_lea.sflag [#allocation5], %s5173_s22 }
  0x3a   : > { %s169_s8 = scalar_lea.vmem [#allocation4], %s4188_s24 }
  0x3b   : > { %5002 = dma.done.wait (%p5100_p6), %s166_s6, 768  }
  0x3c   : > { %5004 = vsyncadd (%p5100_p6), %s166_s6, 4294966528  ;;  %s176_s28 = scalar_lea.sflag [#allocation8], %s5173_s22  ;;  %s179_s25 = scalar_lea.vmem [#allocation7], %s4188_s24 }
  0x3d   : > { %5006 = dma.done.wait (%p5100_p6), %s176_s28, 768  }
  0x3e   : > { %5008 = vsyncadd (%p5100_p6), %s176_s28, 4294966528  ;;  %v224_v0 = vld [vmem:[%s179_s25] sm:$0xff]  ;;  %v4174_v1 = vld [vmem:[%s179_s25 + $0x10] sm:$0xff]  ;;  %s5031_s19 = smov 3   ;;  %s5032_s26 = smov 1   ;;  %vm242_vm0 = vcmask 179200  }
  0x3f   : > { %v4176_v2 = vld [vmem:[%s179_s25 + $0x20] sm:$0xff]  ;;  %v232_v3 = vmul.f32 0.2989, %v224_v0  ;;  %v234_v4 = vmul.f32 0.587, %v4174_v1  ;;  %v4170_v7 = vld [vmem:[%s169_s8 + $0x10] sm:$0xff] }
  0x40   : > { %v238_v5 = vmul.f32 0.114, %v4176_v2  ;;  %v206_v6 = vld [vmem:[%s169_s8] sm:$0xff]  ;;  %v216_v11 = vmul.f32 0.587, %v4170_v7  ;;  %v225_v13 = vld [vmem:[%s179_s25 + $0x8] sm:$0xff] }
  0x41   : > { %v4172_v8 = vld [vmem:[%s169_s8 + $0x20] sm:$0xff]  ;;  %v236_v9 = vadd.f32 %v234_v4, %v232_v3  ;;  %v214_v10 = vmul.f32 0.2989, %v206_v6  ;;  %v4175_v14 = vld [vmem:[%s179_s25 + $0x18] sm:$0xff]  ;;  %v4177_v15 = vld [vmem:[%s179_s25 + $0x28] sm:$0xff]  ;;  %s5033_s27 = smov 2  }
  0x42   : > { %v220_v12 = vmul.f32 0.114, %v4172_v8  ;;  %v233_v18 = vmul.f32 0.2989, %v225_v13  ;;  %v235_v19 = vmul.f32 0.587, %v4175_v14 }
  0x43   : > { %v5186_v16 = vadd.f32 %v238_v5, %v236_v9  ;;  %v218_v17 = vadd.f32 %v216_v11, %v214_v10  ;;  %v207_v20 = vld [vmem:[%s169_s8 + $0x8] sm:$0xff]  ;;  %v4171_v21 = vld [vmem:[%s169_s8 + $0x18] sm:$0xff]  ;;  %v239_v26 = vmul.f32 0.114, %v4177_v15  ;;  %s5034_s7 = smov 4   ;;  %s5035_s14 = smov 5  }
  0x44   : > { %v4173_v22 = vld [vmem:[%s169_s8 + $0x28] sm:$0xff]  ;;  %v215_v23 = vmul.f32 0.2989, %v207_v20  ;;  %v237_v25 = vadd.f32 %v235_v19, %v233_v18  ;;  %v217_v27 = vmul.f32 0.587, %v4171_v21  ;;  %s5036_s16 = smov 6  }
  0x45   : > { %10293 = vst [vmem:[#allocation13_spill] sm:$0xff] %v5186_v16  ;;  %263 = vrot.lane.b32.xlu1 %v5186_v16, %s5031_s19  ;;  %v5189_v24 = vadd.f32 %v220_v12, %v218_v17  ;;  %v221_v29 = vmul.f32 0.114, %v4173_v22  ;;  %v5037_v32 = vmov 0.0   ;;  %vm245_vm1 = vcmask 177152   ;;  %s5038_s17 = smov 125  }
  0x46   : > { %v219_v28 = vadd.f32 %v217_v27, %v215_v23  ;;  %v5193_v30 = vadd.f32 %v239_v26, %v237_v25  ;;  %247 = vst.msk [vmem:[#allocation3] sm:$0xff] %vm242_vm0, %v5037_v32  ;;  %vm258_vm2 = vcmask 154648   ;;  %s5039_s29 = smov 127   ;;  %s5040_s3 = smov 126  }
  0x47   : > { %10294 = vst [vmem:[#allocation14_spill] sm:$0xff] %v5189_v24  ;;  %343 = vrot.lane.b32.xlu2 %v5189_v24, %s5032_s26  ;;  %252 = vrot.lane.b32.xlu0 %v5189_v24, %s5031_s19  ;;  %s5041_s4 = smov 124   ;;  %s5042_s30 = smov 123  }
  0x48   : > { %10295 = vst [vmem:[#allocation15_spill] sm:$0xff] %v5193_v30  ;;  %v5195_v31 = vadd.f32 %v221_v29, %v219_v28  ;;  %s5043_s23 = smov 122   ;;  %s4169_s5 = sshll.u32 %s5173_s22, 4 }
  0x49   : > { %248 = vst.msk [vmem:[#allocation3 + $0x8] sm:$0xff] %vm242_vm0, %v5037_v32  ;;  %s4183_s24 = sshll.u32 %s5082_s13, 4  ;;  %s205_s6 = scalar_lea.vmem [#allocation9], %s4169_s5 }
  0x4a   : > { %10296 = vst [vmem:[#allocation16_spill] sm:$0xff] %v5195_v31  ;;  %s4063_s25 = scalar_lea.hbm %s10246_s2, %s4183_s24  ;;  %s4052_s13 = scalar_lea.sflag [#allocation6], %s5173_s22 }
  0x4b   : > { %243 = vst.msk [vmem:[#allocation2] sm:$0xff] %vm242_vm0, %v5037_v32 }
  0x4c   : > { %244 = vst.msk [vmem:[#allocation2 + $0x8] sm:$0xff] %vm242_vm0, %v5037_v32 }
  0x4d   : > { %265 = vrot.lane.b32.xlu1 %v5193_v30, %s5031_s19  ;;  %249 = vst.msk [vmem:[#allocation3 + $0x10] sm:$0x3f] %vm245_vm1, %v5037_v32 }
  0x4e   : > { %246 = vst.msk [vmem:[#allocation2 + $0x10] sm:$0x3f] %vm245_vm1, %v5037_v32 }
  0x4f   : > { %345 = vrot.lane.b32.xlu2 %v5195_v31, %s5032_s26  ;;  %254 = vrot.lane.b32.xlu0 %v5195_v31, %s5031_s19  ;;  %s4064_s19 = sshll.u32 %s205_s6, 4  ;;  %s4065_s19 = int_to_ptr.vmem [resolvable:$true] %s4064_s19 }
  0x55   : > { %379 = vrot.lane.b32.xlu1 %v5193_v30, %s5032_s26 }
  0x57   : > { %433 = vrot.lane.b32.xlu2 %v5195_v31, %s5033_s27  ;;  %377 = vrot.lane.b32.xlu0 %v5186_v16, %s5032_s26  ;;  %s4066_s26 = sshll.u32 %s4063_s25, 4  ;;  %s4067_s26 = int_to_ptr.hbm [resolvable:$true] %s4066_s26 }
  0x5d   : > { %431 = vrot.lane.b32.xlu1 %v5189_v24, %s5033_s27 }
  0x5f   : > { %629 = vrot.lane.b32.xlu2 %v5186_v16, %s5034_s7  ;;  %465 = vrot.lane.b32.xlu0 %v5186_v16, %s5033_s27 }
  0x65   : > { %467 = vrot.lane.b32.xlu1 %v5193_v30, %s5033_s27  ;;  %s4971_s27 = sshra.s32 %s4067_s26, 4  ;;  %s4972_s27 = int_to_ptr.hbm [resolvable:$true] %s4971_s27 }
  0x66   : > { %p4978_p2 = scmp.lt.s32.totalorder %s4972_s27, %s10246_s2 }
  0x67   : > { %717 = vrot.lane.b32.xlu2 %v5186_v16, %s5035_s14  ;;  %595 = vrot.lane.b32.xlu0 %v5189_v24, %s5034_s7 }
  0x6d   : > { %597 = vrot.lane.b32.xlu1 %v5195_v31, %s5034_s7 }
  0x6f   : > { %805 = vrot.lane.b32.xlu2 %v5186_v16, %s5036_s16  ;;  %631 = vrot.lane.b32.xlu0 %v5193_v30, %s5034_s7  ;;  %s4973_s7 = scalar_lea.hbm %s4972_s27, 16 }
  0x70   : > { %p4974_p6 = scmp.ne.s32.totalorder %s4972_s27, %s4973_s7 }
  0x72   : > { %p4975_p13 = pnand %p4974_p6, %p5107_p11 }
  0x74   : > { %p4976_p1 = pneg %p4975_p13 }
  0x75   : > { %685 = vrot.lane.b32.xlu1 %v5195_v31, %s5035_s14 }
  0x77   : > { %683 = vrot.lane.b32.xlu0 %v5189_v24, %s5035_s14 }
  0x7d   : > { %773 = vrot.lane.b32.xlu1 %v5195_v31, %s5036_s16 }
  0x7f   : > { %719 = vrot.lane.b32.xlu0 %v5193_v30, %s5035_s14 }
  0x87   : > { %771 = vrot.lane.b32.xlu0 %v5189_v24, %s5036_s16 }
  0x8f   : > { %807 = vrot.lane.b32.xlu0 %v5193_v30, %s5036_s16 }
  0xa1   : > { %v5218_v33 = vpop.permute.xlu2 %343 }
  0xa2   : > { %10297 = vst [vmem:[#allocation17_spill] sm:$0xff] %v5218_v33 }
  0xa9   : > { %v5220_v34 = vpop.permute.xlu2 %345 }
  0xb1   : > { %v5222_v35 = vpop.permute.xlu2 %433 }
  0xb7   : > { %v5224_v36 = vpop.permute.xlu1 %263 }
  0xb8   : > { %10298 = vst [vmem:[#allocation18_spill] sm:$0xff] %v5224_v36 }
  0xb9   : > { %269 = vst.msk [vmem:[#allocation3 + $0x3] sm:$0xff] %vm258_vm2, %v5224_v36  ;;  %v5227_v37 = vpop.permute.xlu0 %252  ;;  %v5234_v40 = vpop.permute.xlu2 %629 }
  0xba   : > { %10299 = vst [vmem:[#allocation19_spill] sm:$0xff] %v5227_v37 }
  0xbb   : > { %259 = vst.msk [vmem:[#allocation2 + $0x3] sm:$0xff] %vm258_vm2, %v5227_v37 }
  0xbc   : > { %10301 = vst [vmem:[#allocation21_spill] sm:$0xff] %v5234_v40 }
  0xbf   : > { %v5230_v38 = vpop.permute.xlu1 %265 }
  0xc0   : > { %10300 = vst [vmem:[#allocation20_spill] sm:$0xff] %v5230_v38  ;;  %v5232_v39 = vld [vmem:[#allocation3] sm:$0xff] }
  0xc1   : > { %270 = vst.msk [vmem:[#allocation3 + $0xb] sm:$0xff] %vm258_vm2, %v5230_v38  ;;  %v5239_v41 = vsub.f32 %v5232_v39, %v5224_v36  ;;  %v5241_v42 = vpop.permute.xlu0 %254  ;;  %v5247_v44 = vsub.f32 %v5232_v39, %v5234_v40 }
  0xc2   : > { %10302 = vst [vmem:[#allocation22_spill] sm:$0xff] %v5241_v42  ;;  %v5243_v43 = vld [vmem:[#allocation2] sm:$0xff] }
  0xc3   : > { %v5249_v45 = vld [vmem:[#allocation2 + $0x1] sm:$0xff]  ;;  %260 = vst.msk [vmem:[#allocation2 + $0xb] sm:$0xff] %vm258_vm2, %v5241_v42  ;;  %v5254_v46 = vsub.f32 %v5243_v43, %v5227_v37  ;;  %v549_v47 = vmul.f32 %v5239_v41, %v5239_v41  ;;  %v5260_v48 = vsub.f32 %v5243_v43, %v5218_v33  ;;  %v637_v53 = vmul.f32 %v5247_v44, %v5247_v44 }
  0xc4   : > { %v5264_v49 = vsub.f32 %v5249_v45, %v5218_v33 }
  0xc5   : > { %v521_v50 = vmul.f32 %v5254_v46, %v5254_v46  ;;  %v551_v51 = vadd.f32 0.81, %v549_v47  ;;  %v351_v52 = vmul.f32 %v5260_v48, %v5260_v48  ;;  %v5296_v63 = vadd.f32 0.81, %v637_v53 }
  0xc6   : > { %v933_v58 = vmul.f32 %v5264_v49, %v5264_v49 }
  0xc7   : > { %v5272_v54 = vadd.f32 0.81, %v521_v50  ;;  %4257 = vrsqrt.f32 %v551_v51  ;;  %v5274_v55 = vadd.f32 0.81, %v351_v52  ;;  %v5276_v56 = vpop.permute.xlu1 %379  ;;  %vm559_vm3 = vweird.f32 %v551_v51 }
  0xc8   : > { %10303 = vst [vmem:[#allocation23_spill] sm:$0xff] %v5276_v56  ;;  %v5278_v57 = vld [vmem:[#allocation3 + $0x8] sm:$0xff]  ;;  %v5316_v5 = vadd.f32 0.81, %v933_v58 }
  0xc9   : > { %4259 = vrsqrt.f32 %v5272_v54  ;;  %v5285_v59 = vsub.f32 %v5278_v57, %v5276_v56  ;;  %v5287_v60 = vpop.permute.xlu0 %377  ;;  %v5294_v62 = vsub.f32 %v5278_v57, %v5230_v38  ;;  %vm531_vm4 = vweird.f32 %v5272_v54 }
  0xca   : > { %10304 = vst [vmem:[#allocation24_spill] sm:$0xff] %v5287_v60  ;;  %v5289_v61 = vld [vmem:[#allocation2 + $0x8] sm:$0xff]  ;;  %4261 = vrsqrt.f32 %v5274_v55  ;;  %v5306_v2 = vsub.f32 %v5232_v39, %v5287_v60  ;;  %vm361_vm6 = vweird.f32 %v5274_v55 }
  0xcb   : > { %v5300_v0 = vsub.f32 %v5289_v61, %v5220_v34  ;;  %v386_v1 = vmul.f32 %v5285_v59, %v5285_v59  ;;  %v5310_v3 = vsub.f32 %v5289_v61, %v5222_v35  ;;  %v5314_v4 = vsub.f32 %v5289_v61, %v5241_v42 }
  0xcc   : > { %v385_v9 = vmul.f32 %v5306_v2, %v5306_v2  ;;  %v550_v12 = vmul.f32 %v5294_v62, %v5294_v62  ;;  %4263 = vrsqrt.f32 %v5296_v63 }
  0xcd   : > { %v4258_v6 = vpop.eup %4257  ;;  %v352_v7 = vmul.f32 %v5300_v0, %v5300_v0  ;;  %v5320_v8 = vadd.f32 0.81, %v386_v1  ;;  %v440_v10 = vmul.f32 %v5310_v3, %v5310_v3  ;;  %v522_v21 = vmul.f32 %v5314_v4, %v5314_v4 }
  0xce   : > { %v554_v11 = vmul.f32 %v4258_v6, %v551_v51  ;;  %v5334_v15 = vadd.f32 0.81, %v385_v9  ;;  %vm560_vm5 = vweird.f32 %v4258_v6  ;;  %v5356_v28 = vadd.f32 0.81, %v550_v12 }
  0xcf   : > { %v5329_v13 = vpop.eup %4259  ;;  %v5331_v14 = vadd.f32 0.81, %v352_v7  ;;  %4265 = vrsqrt.f32 %v5320_v8  ;;  %v5338_v18 = vpop.permute.xlu1 %431  ;;  %v5349_v23 = vadd.f32 0.81, %v440_v10  ;;  %vm405_vm7 = vweird.f32 %v5320_v8  ;;  %vm5377_vm9 = vmor %vm559_vm3, %vm560_vm5 }
  0xd0   : > { %v5336_v17 = vpop.eup %4261  ;;  %10305 = vst [vmem:[#allocation25_spill] sm:$0xff] %v5338_v18  ;;  %v526_v19 = vmul.f32 %v5329_v13, %v5272_v54  ;;  %v555_v20 = vmul.f32 %v4258_v6, %v554_v11  ;;  %4267 = vrsqrt.f32 %v5316_v5  ;;  %v5362_v32 = vsub.f32 %v5243_v43, %v5338_v18 }
  0xd1   : > { %4269 = vrsqrt.f32 %v5331_v14  ;;  %v356_v22 = vmul.f32 %v5336_v17, %v5274_v55  ;;  %v5351_v25 = vpop.permute.xlu0 %465  ;;  %vm532_vm8 = vweird.f32 %v5329_v13  ;;  %v5371_v58 = vadd.f32 0.81, %v522_v21 }
  0xd2   : > { %v527_v26 = vmul.f32 %v5329_v13, %v526_v19  ;;  %v556_v27 = vmul.f32 0.5, %v555_v20  ;;  %4271 = vrsqrt.f32 %v5334_v15  ;;  %v5366_v47 = vsub.f32 %v5232_v39, %v5351_v25  ;;  %v5368_v50 = vpop.eup %4263  ;;  %vm533_vm11 = vmor %vm531_vm4, %vm532_vm8 }
  0xd3   : > { %v357_v29 = vmul.f32 %v5336_v17, %v356_v22  ;;  %v439_v10 = vmul.f32 %v5362_v32, %v5362_v32  ;;  %4273 = vrsqrt.f32 %v5349_v23  ;;  %vm362_vm10 = vweird.f32 %v5336_v17 }
  0xd4   : > { %v528_v52 = vmul.f32 0.5, %v527_v26  ;;  %v557_v53 = vsub.f32 1.5, %v556_v27  ;;  %v473_v11 = vmul.f32 %v5366_v47, %v5366_v47  ;;  %4275 = vrsqrt.f32 %v5356_v28  ;;  %vm5426_vm14 = vmor %vm361_vm6, %vm362_vm10 }
  0xd5   : > { %v5373_v1 = vpop.eup %4265  ;;  %v358_v9 = vmul.f32 0.5, %v357_v29  ;;  %v5394_v26 = vadd.f32 0.81, %v439_v10  ;;  %4277 = vrsqrt.f32 %v5371_v58  ;;  %vm371_vm12 = vweird.f32 %v5331_v14 }
  0xd6   : > { %v5386_v12 = vpop.eup %4267  ;;  %v529_v19 = vsub.f32 1.5, %v528_v52  ;;  %v558_v20 = vmul.f32 %v4258_v6, %v557_v53  ;;  %v400_v51 = vmul.f32 %v5373_v1, %v5320_v8  ;;  %v5402_v30 = vadd.f32 0.81, %v473_v11 }
  0xd7   : > { %v5391_v21 = vpop.eup %4269  ;;  %v359_v22 = vsub.f32 1.5, %v358_v9  ;;  %4279 = vrsqrt.f32 %v5394_v26  ;;  %v5418_v54 = vpop.permute.xlu1 %467  ;;  %vm406_vm13 = vweird.f32 %v5373_v1  ;;  %vm395_vm15 = vweird.f32 %v5334_v15 }
  0xd8   : > { %v4272_v27 = vpop.eup %4271  ;;  %v530_v29 = vmul.f32 %v5329_v13, %v529_v19  ;;  %v562_v52 = vsel %vm5377_vm9, %v4258_v6, %v558_v20  ;;  %v366_v53 = vmul.f32 %v5391_v21, %v5331_v14  ;;  %v401_v10 = vmul.f32 %v5373_v1, %v400_v51  ;;  %10308 = vst [vmem:[#allocation26_spill] sm:$0xff] %v5418_v54  ;;  %vm5442_vm1 = vmor %vm405_vm7, %vm406_vm13 }
  0xd9   : > { %v573_v9 = vmul.f32 %v562_v52, %v5239_v41  ;;  %v360_v31 = vmul.f32 %v5336_v17, %v359_v22  ;;  %v390_v19 = vmul.f32 %v4272_v27, %v5334_v15  ;;  %v5416_v11 = vpop.eup %4273  ;;  %4281 = vrsqrt.f32 %v5402_v30 }
  0xda   : > { %v534_v6 = vsel %vm533_vm11, %v5329_v13, %v530_v29  ;;  %v367_v7 = vmul.f32 %v5391_v21, %v366_v53  ;;  %v402_v20 = vmul.f32 0.5, %v401_v10  ;;  %v5430_v22 = vpop.eup %4275  ;;  %vm372_vm0 = vweird.f32 %v5391_v21 }
  0xdb   : > { %v545_v41 = vmul.f32 %v534_v6, %v5254_v46  ;;  %v391_v51 = vmul.f32 %v4272_v27, %v390_v19  ;;  %v364_v52 = vsel %vm5426_vm14, %v5336_v17, %v360_v31  ;;  %v5437_v46 = vpop.eup %4277  ;;  %vm396_vm2 = vweird.f32 %v4272_v27  ;;  %vm373_vm3 = vmor %vm371_vm12, %vm372_vm0 }
  0xdc   : > { %v368_v29 = vmul.f32 0.5, %v367_v7  ;;  %v403_v55 = vsub.f32 1.5, %v402_v20  ;;  %v454_v31 = vmul.f32 %v5416_v11, %v5349_v23  ;;  %v5450_v17 = vsub.f32 %v5278_v57, %v5418_v54  ;;  %vm397_vm4 = vmor %vm395_vm15, %vm396_vm2 }
  0xdd   : > { %v575_v53 = vsub.f32 %v545_v41, %v573_v9  ;;  %v392_v10 = vmul.f32 0.5, %v391_v51  ;;  %v375_v41 = vmul.f32 %v364_v52, %v5260_v48  ;;  %v4280_v13 = vpop.eup %4279  ;;  %v536_v16 = vmul.f32 %v5437_v46, %v5371_v58 }
  0xde   : > { %v369_v6 = vsub.f32 1.5, %v368_v29  ;;  %v404_v7 = vmul.f32 %v5373_v1, %v403_v55  ;;  %v455_v51 = vmul.f32 %v5416_v11, %v454_v31  ;;  %v474_v29 = vmul.f32 %v5450_v17, %v5450_v17 }
  0xdf   : > { %v577_v9 = vmul.f32 %v575_v53, %v575_v53  ;;  %v393_v20 = vsub.f32 1.5, %v392_v10  ;;  %v444_v53 = vmul.f32 %v4280_v13, %v5394_v26  ;;  %v5468_v55 = vpop.eup %4281  ;;  %vm449_vm5 = vweird.f32 %v5394_v26 }
  0xe0   : > { %v370_v8 = vmul.f32 %v5391_v21, %v369_v6  ;;  %v408_v48 = vsel %vm5442_vm1, %v5373_v1, %v404_v7  ;;  %v456_v14 = vmul.f32 0.5, %v455_v51  ;;  %vm483_vm6 = vweird.f32 %v5402_v30 }
  0xe1   : > { %v579_v24 = vadd.f32 0.1, %v577_v9  ;;  %v394_v52 = vmul.f32 %v4272_v27, %v393_v20  ;;  %v410_v6 = vmul.f32 %v408_v48, %v5285_v59  ;;  %v445_v31 = vmul.f32 %v4280_v13, %v444_v53 }
  0xe2   : > { %v374_v10 = vsel %vm373_vm3, %v5391_v21, %v370_v8  ;;  %v478_v20 = vmul.f32 %v5468_v55, %v5402_v30  ;;  %v457_v59 = vsub.f32 1.5, %v456_v14  ;;  %vm460_vm7 = vweird.f32 %v5416_v11 }
  0xe3   : > { %4283 = vrcp.f32 %v579_v24  ;;  %v376_v19 = vmul.f32 %v374_v10, %v5300_v0  ;;  %v398_v1 = vsel %vm397_vm4, %v4272_v27, %v394_v52  ;;  %v446_v21 = vmul.f32 0.5, %v445_v31 }
  0xe4   : > { %v409_v7 = vmul.f32 %v398_v1, %v5306_v2  ;;  %v5482_v8 = vadd.f32 0.81, %v474_v29  ;;  %v537_v24 = vmul.f32 %v5437_v46, %v536_v16  ;;  %vm450_vm8 = vweird.f32 %v4280_v13  ;;  %v5492_v16 = vpop.permute.xlu0 %595 }
  0xe5   : > { %v412_v15 = vsub.f32 %v376_v19, %v410_v6  ;;  %v479_v0 = vmul.f32 %v5468_v55, %v478_v20  ;;  %vm541_vm9 = vweird.f32 %v5371_v58  ;;  %v447_v27 = vsub.f32 1.5, %v446_v21  ;;  %10313 = vst [vmem:[#allocation27_spill] sm:$0xff] %v5492_v16  ;;  %vm451_vm12 = vmor %vm449_vm5, %vm450_vm8 }
  0xe6   : > { %v411_v51 = vsub.f32 %v375_v41, %v409_v7  ;;  %vm484_vm10 = vweird.f32 %v5468_v55  ;;  %4285 = vrsqrt.f32 %v5482_v8  ;;  %v5490_v53 = vmul.f32 %v5416_v11, %v457_v59 }
  0xe7   : > { %v414_v2 = vmul.f32 %v412_v15, %v412_v15  ;;  %v480_v52 = vmul.f32 0.5, %v479_v0  ;;  %v538_v29 = vmul.f32 0.5, %v537_v24  ;;  %v448_v6 = vmul.f32 %v4280_v13, %v447_v27  ;;  %vm485_vm14 = vmor %vm483_vm6, %vm484_vm10 }
  0xe8   : > { %v413_v48 = vmul.f32 %v411_v51, %v411_v51  ;;  %vm542_vm11 = vweird.f32 %v5437_v46  ;;  %v564_v14 = vmul.f32 %v5430_v22, %v5356_v28  ;;  %vm569_vm13 = vweird.f32 %v5356_v28 }
  0xe9   : > { %v4284_v10 = vpop.eup %4283  ;;  %v416_v41 = vadd.f32 0.1, %v414_v2  ;;  %v481_v31 = vsub.f32 1.5, %v480_v52  ;;  %v539_v7 = vsub.f32 1.5, %v538_v29  ;;  %v452_v20 = vsel %vm451_vm12, %v4280_v13, %v448_v6  ;;  %vm5527_vm1 = vmor %vm541_vm9, %vm542_vm11 }
  0xea   : > { %v583_v19 = vmul.f32 %v4284_v10, %v577_v9  ;;  %v415_v1 = vadd.f32 0.1, %v413_v48  ;;  %v565_v59 = vmul.f32 %v5430_v22, %v564_v14  ;;  %v463_v15 = vmul.f32 %v452_v20, %v5362_v32 }
  0xeb   : > { %4287 = vrcp.f32 %v416_v41  ;;  %v482_v9 = vmul.f32 %v5468_v55, %v481_v31  ;;  %v540_v21 = vmul.f32 %v5437_v46, %v539_v7  ;;  %vm570_vm15 = vweird.f32 %v5430_v22 }
  0xec   : > { %587 = vrot.lane.b32.xlu1 %v583_v19, %s5038_s17  ;;  %4289 = vrcp.f32 %v415_v1  ;;  %v5506_v26 = vpop.eup %4285  ;;  %v566_v13 = vmul.f32 0.5, %v565_v59  ;;  %v5515_v24 = vsub.f32 %v5243_v43, %v5492_v16  ;;  %v642_v32 = vmul.f32 %v5368_v50, %v5296_v63  ;;  %vm5553_vm4 = vmor %vm569_vm13, %vm570_vm15  ;;  %v5563_v1 = vpop.permute.xlu1 %597 }
  0xed   : > { %v486_v51 = vsel %vm485_vm14, %v5468_v55, %v482_v9  ;;  %vm459_vm0 = vweird.f32 %v5349_v23  ;;  %v488_v0 = vmul.f32 %v5506_v26, %v5482_v8  ;;  %v544_v23 = vsel %vm5527_vm1, %v5437_v46, %v540_v21  ;;  %10320 = vst [vmem:[#allocation28_spill] sm:$0xff] %v5563_v1  ;;  %v5566_v59 = vpop.permute.xlu0 %631 }
  0xee   : > { %v497_v27 = vmul.f32 %v486_v51, %v5366_v47  ;;  %vm5534_vm2 = vmor %vm459_vm0, %vm460_vm7  ;;  %v567_v55 = vsub.f32 1.5, %v566_v13  ;;  %v603_v58 = vmul.f32 %v5515_v24, %v5515_v24  ;;  %vm493_vm3 = vweird.f32 %v5482_v8  ;;  %10321 = vst [vmem:[#allocation29_spill] sm:$0xff] %v5566_v59 }
  0xef   : > { %v462_v29 = vsel %vm5534_vm2, %v5416_v11, %v5490_v53  ;;  %v489_v47 = vmul.f32 %v5506_v26, %v488_v0  ;;  %v643_v46 = vmul.f32 %v5368_v50, %v642_v32  ;;  %v938_v11 = vmul.f32 %v5386_v12, %v5316_v5 }
  0xf0   : > { %v499_v6 = vsub.f32 %v463_v15, %v497_v27  ;;  %v568_v14 = vmul.f32 %v5430_v22, %v567_v55  ;;  %v5559_v19 = vadd.f32 0.81, %v603_v58  ;;  %v546_v7 = vmul.f32 %v544_v23, %v5314_v4  ;;  %v5576_v4 = vld [vmem:[#allocation3 + $0x1] sm:$0xff] }
  0xf1   : > { %v4288_v41 = vpop.eup %4287  ;;  %v490_v28 = vmul.f32 0.5, %v489_v47  ;;  %v644_v20 = vmul.f32 0.5, %v643_v46  ;;  %vm494_vm5 = vweird.f32 %v5506_v26  ;;  %vm647_vm6 = vweird.f32 %v5296_v63 }
  0xf2   : > { %v4290_v53 = vpop.eup %4289  ;;  %v420_v31 = vmul.f32 %v4288_v41, %v414_v2  ;;  %v501_v21 = vmul.f32 %v499_v6, %v499_v6  ;;  %v572_v15 = vsel %vm5553_vm4, %v5430_v22, %v568_v14  ;;  %4291 = vrsqrt.f32 %v5559_v19  ;;  %vm495_vm7 = vmor %vm493_vm3, %vm494_vm5 }
  0xf3   : > { %v419_v9 = vmul.f32 %v4290_v53, %v413_v48  ;;  %v491_v13 = vsub.f32 1.5, %v490_v28  ;;  %v574_v2 = vmul.f32 %v572_v15, %v5294_v62  ;;  %v939_v32 = vmul.f32 %v5386_v12, %v938_v11  ;;  %v5617_v28 = vld [vmem:[#allocation2 + $0x9] sm:$0xff] }
  0xf4   : > { %425 = vrot.lane.b32.xlu0 %v420_v31, %s5039_s29  ;;  %v503_v48 = vadd.f32 0.1, %v501_v21  ;;  %v5582_v22 = vsub.f32 %v5576_v4, %v5287_v60  ;;  %v5586_v51 = vsub.f32 %v5289_v61, %v5563_v1  ;;  %v645_v30 = vsub.f32 1.5, %v644_v20 }
  0xf5   : > { %423 = vrot.lane.b32.xlu2 %v419_v9, %s5039_s29  ;;  %v492_v0 = vmul.f32 %v5506_v26, %v491_v13  ;;  %v576_v62 = vsub.f32 %v546_v7, %v574_v2  ;;  %v5591_v27 = vsub.f32 %v5278_v57, %v5566_v59  ;;  %v940_v52 = vmul.f32 0.5, %v939_v32  ;;  %v5631_v15 = vpop.permute.xlu0 %683 }
  0xf6   : > { %4293 = vrcp.f32 %v503_v48  ;;  %v961_v23 = vmul.f32 %v5582_v22, %v5582_v22  ;;  %v604_v55 = vmul.f32 %v5586_v51, %v5586_v51  ;;  %vm648_vm8 = vweird.f32 %v5368_v50 }
  0xf7   : > { %v496_v58 = vsel %vm495_vm7, %v5506_v26, %v492_v0  ;;  %v5600_v47 = vmul.f32 %v576_v62, %v576_v62  ;;  %v638_v10 = vmul.f32 %v5591_v27, %v5591_v27  ;;  %v464_v8 = vmul.f32 %v462_v29, %v5310_v3  ;;  %vm5621_vm9 = vmor %vm647_vm6, %vm648_vm8  ;;  %v5647_v62 = vld [vmem:[#allocation3 + $0x9] sm:$0xff] }
  0xf8   : > { %v5605_v46 = vpop.eup %4291  ;;  %v498_v41 = vmul.f32 %v496_v58, %v5450_v17  ;;  %v941_v6 = vsub.f32 1.5, %v940_v52  ;;  %v5609_v14 = vadd.f32 0.81, %v961_v23  ;;  %v646_v53 = vmul.f32 %v5368_v50, %v645_v30 }
  0xf9   : > { %v580_v11 = vadd.f32 0.1, %v5600_v47  ;;  %v608_v26 = vmul.f32 %v5605_v46, %v5559_v19  ;;  %v5615_v31 = vadd.f32 0.81, %v604_v55  ;;  %vm944_vm10 = vweird.f32 %v5386_v12 }
  0xfa   : > { %v500_v7 = vsub.f32 %v464_v8, %v498_v41  ;;  %v942_v17 = vmul.f32 %v5386_v12, %v941_v6  ;;  %4295 = vrsqrt.f32 %v5609_v14  ;;  %v5629_v20 = vadd.f32 0.81, %v638_v10  ;;  %v5672_v41 = vpop.permute.xlu2 %717 }
  0xfb   : > { %4297 = vrcp.f32 %v580_v11  ;;  %v609_v29 = vmul.f32 %v5605_v46, %v608_v26  ;;  %vm943_vm11 = vweird.f32 %v5316_v5  ;;  %v5637_v63 = vsub.f32 %v5617_v28, %v5222_v35  ;;  %10326 = vst [vmem:[#allocation30_spill] sm:$0xff] %v5672_v41 }
  0xfc   : > { %v4294_v9 = vpop.eup %4293  ;;  %v502_v13 = vmul.f32 %v500_v7, %v500_v7  ;;  %4299 = vrsqrt.f32 %v5615_v31  ;;  %v650_v32 = vsel %vm5621_vm9, %v5368_v50, %v646_v53  ;;  %vm5642_vm12 = vmor %vm943_vm11, %vm944_vm10  ;;  %v5656_v52 = vsub.f32 %v5647_v62, %v5418_v54 }
  0xfd   : > { %v507_v2 = vmul.f32 %v4294_v9, %v501_v21  ;;  %v610_v48 = vmul.f32 0.5, %v609_v29  ;;  %4301 = vrsqrt.f32 %v5629_v20  ;;  %v946_v30 = vsel %vm5642_vm12, %v5386_v12, %v942_v17 }
  0xfe   : > { %v504_v5 = vadd.f32 0.1, %v502_v13  ;;  %v1010_v21 = vmul.f32 %v5637_v63, %v5637_v63  ;;  %vm613_vm13 = vweird.f32 %v5559_v19  ;;  %vm614_vm14 = vweird.f32 %v5605_v46 }
  0xff   : > { %511 = vrot.lane.b32.xlu2 %v507_v2, %s5040_s3  ;;  %v611_v50 = vsub.f32 1.5, %v610_v48  ;;  %v5663_v23 = vsub.f32 %v5243_v43, %v5631_v15  ;;  %v661_v55 = vmul.f32 %v650_v32, %v5247_v44  ;;  %v1038_v10 = vmul.f32 %v5656_v52, %v5656_v52  ;;  %vm615_vm0 = vmor %vm613_vm13, %vm614_vm14 }
 0x100   : > { %v5665_v12 = vpop.eup %4295  ;;  %4303 = vrcp.f32 %v504_v5  ;;  %v5668_v58 = vadd.f32 0.81, %v1010_v21  ;;  %v5676_v11 = vmul.f32 %v946_v30, %v5264_v49  ;;  %vm971_vm15 = vweird.f32 %v5609_v14 }
 0x101   : > { %v4298_v8 = vpop.eup %4297  ;;  %v612_v6 = vmul.f32 %v5605_v46, %v611_v50  ;;  %v966_v26 = vmul.f32 %v5665_v12, %v5609_v14  ;;  %v691_v44 = vmul.f32 %v5663_v23, %v5663_v23  ;;  %v5690_v7 = vadd.f32 0.81, %v1038_v10 }
 0x102   : > { %v5683_v53 = vpop.eup %4299  ;;  %4305 = vrsqrt.f32 %v5668_v58  ;;  %v5694_v49 = vsub.f32 %v5232_v39, %v5672_v41  ;;  %v5698_v3 = vsub.f32 %v5249_v45, %v5492_v16  ;;  %vm623_vm1 = vweird.f32 %v5615_v31 }
 0x103   : > { %v5700_v17 = vpop.eup %4301  ;;  %v616_v29 = vsel %vm615_vm0, %v5605_v46, %v612_v6  ;;  %v967_v9 = vmul.f32 %v5665_v12, %v966_v26  ;;  %v618_v19 = vmul.f32 %v5683_v53, %v5615_v31  ;;  %v5709_v2 = vsub.f32 %v5576_v4, %v5234_v40 }
 0x104   : > { %v627_v48 = vmul.f32 %v616_v29, %v5515_v24  ;;  %vm972_vm2 = vweird.f32 %v5665_v12  ;;  %v652_v45 = vmul.f32 %v5700_v17, %v5629_v20  ;;  %vm657_vm3 = vweird.f32 %v5629_v20 }
 0x105   : > { %4307 = vrsqrt.f32 %v5690_v7  ;;  %v584_v46 = vmul.f32 %v4298_v8, %v5600_v47  ;;  %v968_v32 = vmul.f32 0.5, %v967_v9  ;;  %v619_v0 = vmul.f32 %v5683_v53, %v618_v19  ;;  %vm973_vm7 = vmor %vm971_vm15, %vm972_vm2 }
 0x106   : > { %v5719_v5 = vadd.f32 0.81, %v691_v44  ;;  %v4304_v30 = vpop.eup %4303  ;;  %v663_v21 = vsub.f32 %v627_v48, %v661_v55  ;;  %vm624_vm4 = vweird.f32 %v5683_v53  ;;  %v653_v24 = vmul.f32 %v5700_v17, %v652_v45 }
 0x107   : > { %v725_v50 = vmul.f32 %v5694_v49, %v5694_v49  ;;  %v508_v10 = vmul.f32 %v4304_v30, %v502_v13  ;;  %589 = vrot.lane.b32.xlu2 %v584_v46, %s5038_s17  ;;  %v969_v6 = vsub.f32 1.5, %v968_v32  ;;  %v620_v26 = vmul.f32 0.5, %v619_v0  ;;  %vm625_vm9 = vmor %vm623_vm1, %vm624_vm4 }
 0x108   : > { %4309 = vrsqrt.f32 %v5719_v5  ;;  %v5727_v47 = vpop.eup %4305  ;;  %v665_v8 = vmul.f32 %v663_v21, %v663_v21  ;;  %v654_v44 = vmul.f32 0.5, %v653_v24  ;;  %vm658_vm5 = vweird.f32 %v5700_v17 }
 0x109   : > { %v5730_v55 = vadd.f32 0.81, %v725_v50  ;;  %513 = vrot.lane.b32.xlu0 %v508_v10, %s5040_s3  ;;  %v970_v29 = vmul.f32 %v5665_v12, %v969_v6  ;;  %v621_v9 = vsub.f32 1.5, %v620_v26  ;;  %v1024_v13 = vmul.f32 %v5727_v47, %v5668_v58  ;;  %vm659_vm11 = vmor %vm657_vm3, %vm658_vm5 }
 0x10a   : > { %vm1029_vm6 = vweird.f32 %v5668_v58  ;;  %v1161_v19 = vmul.f32 %v5698_v3, %v5698_v3  ;;  %v667_v45 = vadd.f32 0.1, %v665_v8  ;;  %v655_v46 = vsub.f32 1.5, %v654_v44 }
 0x10b   : > { %v5739_v48 = vpop.eup %4307  ;;  %vm1057_vm8 = vweird.f32 %v5690_v7  ;;  %4311 = vrsqrt.f32 %v5730_v55  ;;  %v974_v32 = vsel %vm973_vm7, %v5665_v12, %v970_v29  ;;  %v622_v0 = vmul.f32 %v5683_v53, %v621_v9 }
 0x10c   : > { %v1025_v30 = vmul.f32 %v5727_v47, %v1024_v13  ;;  %v1052_v21 = vmul.f32 %v5739_v48, %v5690_v7  ;;  %4313 = vrcp.f32 %v667_v45  ;;  %v985_v24 = vmul.f32 %v974_v32, %v5582_v22  ;;  %v5786_v32 = vpop.permute.xlu1 %685 }
 0x10d   : > { %v656_v14 = vmul.f32 %v5700_v17, %v655_v46  ;;  %vm1030_vm10 = vweird.f32 %v5727_v47  ;;  %v626_v50 = vsel %vm625_vm9, %v5683_v53, %v622_v0  ;;  %v5767_v6 = vadd.f32 0.81, %v1161_v19 }
 0x10e   : > { %v5759_v12 = vpop.eup %4309  ;;  %v1026_v10 = vmul.f32 0.5, %v1025_v30  ;;  %v1053_v22 = vmul.f32 %v5739_v48, %v1052_v21  ;;  %v987_v31 = vsub.f32 %v5676_v11, %v985_v24  ;;  %v628_v26 = vmul.f32 %v626_v50, %v5586_v51  ;;  %vm1031_vm0 = vmor %vm1029_vm6, %vm1030_vm10 }
 0x10f   : > { %v660_v44 = vsel %vm659_vm11, %v5700_v17, %v656_v14  ;;  %v696_v29 = vmul.f32 %v5759_v12, %v5719_v5  ;;  %vm701_vm12 = vweird.f32 %v5719_v5  ;;  %vm735_vm13 = vweird.f32 %v5730_v55 }
 0x110   : > { %v662_v20 = vmul.f32 %v660_v44, %v5591_v27  ;;  %v1027_v53 = vsub.f32 1.5, %v1026_v10  ;;  %v1054_v9 = vmul.f32 0.5, %v1053_v22  ;;  %vm1058_vm14 = vweird.f32 %v5739_v48 }
 0x111   : > { %v5778_v13 = vpop.eup %4311  ;;  %v989_v11 = vmul.f32 %v987_v31, %v987_v31  ;;  %v697_v51 = vmul.f32 %v5759_v12, %v696_v29  ;;  %vm702_vm15 = vweird.f32 %v5759_v12  ;;  %4315 = vrsqrt.f32 %v5767_v6  ;;  %vm1059_vm2 = vmor %vm1057_vm8, %vm1058_vm14 }
 0x112   : > { %v664_v17 = vsub.f32 %v628_v26, %v662_v20  ;;  %v1028_v19 = vmul.f32 %v5727_v47, %v1027_v53  ;;  %v1055_v45 = vsub.f32 1.5, %v1054_v9  ;;  %v730_v27 = vmul.f32 %v5778_v13, %v5730_v55  ;;  %v4314_v46 = vpop.eup %4313  ;;  %v5803_v26 = vpop.permute.xlu0 %719  ;;  %vm5825_vm3 = vmor %vm701_vm12, %vm702_vm15 }
 0x113   : > { %v991_v0 = vadd.f32 0.1, %v989_v11  ;;  %v698_v30 = vmul.f32 0.5, %v697_v51  ;;  %vm736_vm1 = vweird.f32 %v5778_v13  ;;  %v1189_v21 = vmul.f32 %v5709_v2, %v5709_v2 }
 0x114   : > { %v671_v24 = vmul.f32 %v4314_v46, %v665_v8  ;;  %v666_v14 = vmul.f32 %v664_v17, %v664_v17  ;;  %v1032_v50 = vsel %vm1031_vm0, %v5727_v47, %v1028_v19  ;;  %v1056_v10 = vmul.f32 %v5739_v48, %v1055_v45  ;;  %vm5839_vm4 = vmor %vm735_vm13, %vm736_vm1 }
 0x115   : > { %4317 = vrcp.f32 %v991_v0  ;;  %v1034_v22 = vmul.f32 %v1032_v50, %v5637_v63  ;;  %v699_v58 = vsub.f32 1.5, %v698_v30  ;;  %v731_v31 = vmul.f32 %v5778_v13, %v730_v27 }
 0x116   : > { %675 = vrot.lane.b32.xlu1 %v671_v24, %s5041_s4  ;;  %v668_v8 = vadd.f32 0.1, %v666_v14  ;;  %v1060_v47 = vsel %vm1059_vm2, %v5739_v48, %v1056_v10  ;;  %v5807_v44 = vadd.f32 0.81, %v1189_v21  ;;  %v5811_v63 = vsub.f32 %v5289_v61, %v5786_v32 }
 0x117   : > { %v5813_v29 = vpop.eup %4315  ;;  %v1062_v7 = vmul.f32 %v1060_v47, %v5656_v52  ;;  %v700_v20 = vmul.f32 %v5759_v12, %v699_v58  ;;  %v732_v53 = vmul.f32 0.5, %v731_v31  ;;  %v5819_v9 = vsub.f32 %v5617_v28, %v5786_v32  ;;  %v5867_v47 = vpop.permute.xlu2 %805 }
 0x118   : > { %4319 = vrcp.f32 %v668_v8  ;;  %v1166_v61 = vmul.f32 %v5813_v29, %v5767_v6  ;;  %v692_v45 = vmul.f32 %v5811_v63, %v5811_v63  ;;  %v5851_v30 = vsub.f32 %v5278_v57, %v5803_v26 }
 0x119   : > { %v1064_v52 = vsub.f32 %v1034_v22, %v1062_v7  ;;  %v704_v51 = vsel %vm5825_vm3, %v5759_v12, %v700_v20  ;;  %v733_v17 = vsub.f32 1.5, %v732_v53  ;;  %4321 = vrsqrt.f32 %v5807_v44 }
 0x11a   : > { %v1167_v19 = vmul.f32 %v5813_v29, %v1166_v61  ;;  %v1238_v27 = vmul.f32 %v5819_v9, %v5819_v9  ;;  %v5855_v55 = vsub.f32 %v5647_v62, %v5803_v26  ;;  %v715_v24 = vmul.f32 %v704_v51, %v5663_v23  ;;  %v5879_v48 = vpop.permute.xlu0 %771 }
 0x11b   : > { %v4318_v12 = vpop.eup %4317  ;;  %v1066_v46 = vmul.f32 %v1064_v52, %v1064_v52  ;;  %v734_v0 = vmul.f32 %v5778_v13, %v733_v17  ;;  %v5858_v10 = vadd.f32 0.81, %v692_v45  ;;  %v726_v31 = vmul.f32 %v5851_v30, %v5851_v30  ;;  %10331 = vst [vmem:[#allocation31_spill] sm:$0xff] %v5879_v48  ;;  %v5893_v17 = vld [vmem:[#allocation2 + $0x2] sm:$0xff] }
 0x11c   : > { %v995_v21 = vmul.f32 %v4318_v12, %v989_v11  ;;  %v1168_v50 = vmul.f32 0.5, %v1167_v19  ;;  %v1266_v57 = vmul.f32 %v5855_v55, %v5855_v55  ;;  %v5872_v7 = vadd.f32 0.81, %v1238_v27 }
 0x11d   : > { %v1068_v22 = vadd.f32 0.1, %v1066_v46  ;;  %v738_v58 = vsel %vm5839_vm4, %v5778_v13, %v734_v0  ;;  %4323 = vrsqrt.f32 %v5858_v10  ;;  %vm1172_vm5 = vweird.f32 %v5813_v29 }
 0x11e   : > { %v4320_v8 = vpop.eup %4319  ;;  %999 = vrot.lane.b32.xlu0 %v995_v21, %s5039_s29  ;;  %v749_v23 = vmul.f32 %v738_v58, %v5694_v49  ;;  %v1169_v11 = vsub.f32 1.5, %v1168_v50  ;;  %v5877_v53 = vadd.f32 0.81, %v726_v31  ;;  %vm1171_vm6 = vweird.f32 %v5767_v6 }
 0x11f   : > { %v5874_v20 = vpop.eup %4321  ;;  %v672_v13 = vmul.f32 %v4320_v8, %v666_v14  ;;  %4325 = vrcp.f32 %v1068_v22  ;;  %v5887_v14 = vadd.f32 0.81, %v1266_v57  ;;  %v5891_v51 = vsub.f32 %v5232_v39, %v5867_v47  ;;  %vm5895_vm7 = vmor %vm1171_vm6, %vm1172_vm5 }
 0x120   : > { %v751_v61 = vsub.f32 %v715_v24, %v749_v23  ;;  %v1170_v52 = vmul.f32 %v5813_v29, %v1169_v11  ;;  %v1194_v49 = vmul.f32 %v5874_v20, %v5807_v44  ;;  %4327 = vrsqrt.f32 %v5877_v53  ;;  %v5915_v24 = vld [vmem:[#allocation3 + $0x2] sm:$0xff] }
 0x121   : > { %677 = vrot.lane.b32.xlu2 %v672_v13, %s5041_s4  ;;  %vm1199_vm8 = vweird.f32 %v5807_v44  ;;  %4329 = vrsqrt.f32 %v5872_v7  ;;  %vm1200_vm9 = vweird.f32 %v5874_v20  ;;  %v5909_v39 = vsub.f32 %v5243_v43, %v5879_v48 }
 0x122   : > { %v753_v5 = vmul.f32 %v751_v61, %v751_v61  ;;  %v1195_v45 = vmul.f32 %v5874_v20, %v1194_v49  ;;  %v1174_v6 = vsel %vm5895_vm7, %v5813_v29, %v1170_v52  ;;  %4331 = vrsqrt.f32 %v5887_v14  ;;  %vm5938_vm10 = vmor %vm1199_vm8, %vm1200_vm9 }
 0x123   : > { %v5911_v27 = vpop.eup %4323  ;;  %v813_v21 = vmul.f32 %v5891_v51, %v5891_v51  ;;  %v5919_v29 = vsub.f32 %v5893_v17, %v5218_v33  ;;  %v779_v43 = vmul.f32 %v5909_v39, %v5909_v39  ;;  %v5927_v58 = vsub.f32 %v5915_v24, %v5287_v60 }
 0x124   : > { %v755_v12 = vadd.f32 0.1, %v753_v5  ;;  %v1196_v0 = vmul.f32 0.5, %v1195_v45  ;;  %v706_v22 = vmul.f32 %v5911_v27, %v5858_v10  ;;  %v1185_v11 = vmul.f32 %v1174_v6, %v5698_v3 }
 0x125   : > { %v4326_v50 = vpop.eup %4325  ;;  %v5929_v8 = vadd.f32 0.81, %v813_v21  ;;  %vm711_vm11 = vweird.f32 %v5858_v10  ;;  %vm745_vm12 = vweird.f32 %v5877_v53  ;;  %v1461_v44 = vmul.f32 %v5919_v29, %v5919_v29 }
 0x126   : > { %v1072_v31 = vmul.f32 %v4326_v50, %v1066_v46  ;;  %4333 = vrcp.f32 %v755_v12  ;;  %v1197_v57 = vsub.f32 1.5, %v1196_v0  ;;  %v5931_v23 = vpop.eup %4327  ;;  %v707_v61 = vmul.f32 %v5911_v27, %v706_v22 }
 0x127   : > { %v5944_v46 = vadd.f32 0.81, %v779_v43  ;;  %v5946_v52 = vpop.eup %4329  ;;  %v740_v49 = vmul.f32 %v5931_v23, %v5877_v53  ;;  %4335 = vrsqrt.f32 %v5929_v8  ;;  %vm712_vm13 = vweird.f32 %v5911_v27 }
 0x128   : > { %1077 = vrot.lane.b32.xlu0 %v1072_v31, %s5040_s3  ;;  %v1198_v3 = vmul.f32 %v5874_v20, %v1197_v57  ;;  %v5956_v19 = vpop.eup %4331  ;;  %v708_v45 = vmul.f32 0.5, %v707_v61  ;;  %v1252_v6 = vmul.f32 %v5946_v52, %v5872_v7  ;;  %vm1257_vm14 = vweird.f32 %v5872_v7  ;;  %vm5986_vm2 = vmor %vm711_vm11, %vm712_vm13 }
 0x129   : > { %4337 = vrsqrt.f32 %v5944_v46  ;;  %v741_v0 = vmul.f32 %v5931_v23, %v740_v49  ;;  %v1280_v21 = vmul.f32 %v5956_v19, %v5887_v14  ;;  %vm1285_vm15 = vweird.f32 %v5887_v14 }
 0x12a   : > { %v1202_v12 = vsel %vm5938_vm10, %v5874_v20, %v1198_v3  ;;  %v1489_v50 = vmul.f32 %v5927_v58, %v5927_v58  ;;  %v709_v43 = vsub.f32 1.5, %v708_v45  ;;  %vm746_vm0 = vweird.f32 %v5931_v23 }
 0x12b   : > { %v1213_v22 = vmul.f32 %v1202_v12, %v5709_v2  ;;  %v1253_v31 = vmul.f32 %v5946_v52, %v1252_v6  ;;  %v742_v13 = vmul.f32 0.5, %v741_v0  ;;  %vm1258_vm1 = vweird.f32 %v5946_v52  ;;  %vm747_vm5 = vmor %vm745_vm12, %vm746_vm0 }
 0x12c   : > { %v4334_v57 = vpop.eup %4333  ;;  %v1281_v20 = vmul.f32 %v5956_v19, %v1280_v21  ;;  %v5977_v61 = vadd.f32 0.81, %v1461_v44  ;;  %v710_v60 = vmul.f32 %v5911_v27, %v709_v43  ;;  %vm1286_vm3 = vweird.f32 %v5956_v19  ;;  %vm1259_vm6 = vmor %vm1257_vm14, %vm1258_vm1 }
 0x12d   : > { %v759_v3 = vmul.f32 %v4334_v57, %v753_v5  ;;  %v1215_v49 = vsub.f32 %v1185_v11, %v1213_v22  ;;  %v1254_v33 = vmul.f32 0.5, %v1253_v31  ;;  %v5980_v48 = vpop.eup %4335  ;;  %v743_v45 = vsub.f32 1.5, %v742_v13  ;;  %vm1287_vm8 = vmor %vm1285_vm15, %vm1286_vm3 }
 0x12e   : > { %v1282_v6 = vmul.f32 0.5, %v1281_v20  ;;  %4339 = vrsqrt.f32 %v5977_v61  ;;  %v714_v44 = vsel %vm5986_vm2, %v5911_v27, %v710_v60  ;;  %v818_v12 = vmul.f32 %v5980_v48, %v5929_v8 }
 0x12f   : > { %v4338_v5 = vpop.eup %4337  ;;  %763 = vrot.lane.b32.xlu1 %v759_v3, %s5042_s30  ;;  %v1217_v11 = vmul.f32 %v1215_v49, %v1215_v49  ;;  %v1255_v10 = vsub.f32 1.5, %v1254_v33  ;;  %v744_v0 = vmul.f32 %v5931_v23, %v743_v45  ;;  %vm823_vm4 = vweird.f32 %v5929_v8 }
 0x130   : > { %v1283_v21 = vsub.f32 1.5, %v1282_v6  ;;  %v784_v22 = vmul.f32 %v4338_v5, %v5944_v46  ;;  %v716_v31 = vmul.f32 %v714_v44, %v5811_v63  ;;  %v819_v60 = vmul.f32 %v5980_v48, %v818_v12  ;;  %v6030_v44 = vld [vmem:[#allocation2 + $0xa] sm:$0xff] }
 0x131   : > { %v1219_v43 = vadd.f32 0.1, %v1217_v11  ;;  %v1256_v33 = vmul.f32 %v5946_v52, %v1255_v10  ;;  %v748_v27 = vsel %vm747_vm5, %v5931_v23, %v744_v0  ;;  %vm824_vm7 = vweird.f32 %v5980_v48 }
 0x132   : > { %v1284_v57 = vmul.f32 %v5956_v19, %v1283_v21  ;;  %v785_v13 = vmul.f32 %v4338_v5, %v784_v22  ;;  %v750_v63 = vmul.f32 %v748_v27, %v5851_v30  ;;  %v820_v23 = vmul.f32 0.5, %v819_v60  ;;  %vm6037_vm11 = vmor %vm823_vm4, %vm824_vm7 }
 0x133   : > { %4341 = vrcp.f32 %v1219_v43  ;;  %v1260_v53 = vsel %vm1259_vm6, %v5946_v52, %v1256_v33  ;;  %v6025_v2 = vadd.f32 0.81, %v1489_v50  ;;  %vm789_vm9 = vweird.f32 %v5944_v46 }
 0x134   : > { %v6021_v20 = vpop.eup %4339  ;;  %v1262_v7 = vmul.f32 %v1260_v53, %v5819_v9  ;;  %v1288_v3 = vsel %vm1287_vm8, %v5956_v19, %v1284_v57  ;;  %v786_v49 = vmul.f32 0.5, %v785_v13  ;;  %v752_v45 = vsub.f32 %v716_v31, %v750_v63 }
 0x135   : > { %v1290_v30 = vmul.f32 %v1288_v3, %v5855_v55  ;;  %v821_v6 = vsub.f32 1.5, %v820_v23  ;;  %v1466_v52 = vmul.f32 %v6021_v20, %v5977_v61  ;;  %vm790_vm10 = vweird.f32 %v4338_v5  ;;  %v6065_v3 = vld [vmem:[#allocation3 + $0xa] sm:$0xff] }
 0x136   : > { %v787_v14 = vsub.f32 1.5, %v786_v49  ;;  %4343 = vrsqrt.f32 %v6025_v2  ;;  %v754_v55 = vmul.f32 %v752_v45, %v752_v45  ;;  %v6046_v0 = vsub.f32 %v5617_v28, %v5220_v34  ;;  %vm791_vm12 = vmor %vm789_vm9, %vm790_vm10 }
 0x137   : > { %v1292_v19 = vsub.f32 %v1262_v7, %v1290_v30  ;;  %v822_v50 = vmul.f32 %v5980_v48, %v821_v6  ;;  %v1467_v10 = vmul.f32 %v6021_v20, %v1466_v52  ;;  %v6050_v8 = vsub.f32 %v5647_v62, %v5276_v56  ;;  %v6083_v30 = vpop.permute.xlu1 %773 }
 0x138   : > { %v788_v12 = vmul.f32 %v4338_v5, %v787_v14  ;;  %v6054_v21 = vsub.f32 %v6030_v44, %v5222_v35  ;;  %v756_v43 = vadd.f32 0.1, %v754_v55  ;;  %v934_v63 = vmul.f32 %v6046_v0, %v6046_v0 }
 0x139   : > { %v4342_v22 = vpop.eup %4341  ;;  %v1294_v31 = vmul.f32 %v1292_v19, %v1292_v19  ;;  %v826_v33 = vsel %vm6037_vm11, %v5980_v48, %v822_v50  ;;  %v1468_v60 = vmul.f32 0.5, %v1467_v10  ;;  %v962_v48 = vmul.f32 %v6050_v8, %v6050_v8  ;;  %v6088_v19 = vpop.permute.xlu0 %807 }
 0x13a   : > { %v1223_v27 = vmul.f32 %v4342_v22, %v1217_v11  ;;  %v792_v57 = vsel %vm791_vm12, %v4338_v5, %v788_v12  ;;  %v837_v13 = vmul.f32 %v826_v33, %v5891_v51  ;;  %4345 = vrcp.f32 %v756_v43  ;;  %10340 = vst [vmem:[#allocation32_spill] sm:$0xff] %v6088_v19 }
 0x13b   : > { %v1296_v53 = vadd.f32 0.1, %v1294_v31  ;;  %v803_v23 = vmul.f32 %v792_v57, %v5909_v39  ;;  %v1469_v7 = vsub.f32 1.5, %v1468_v60  ;;  %v6068_v49 = vadd.f32 0.81, %v934_v63  ;;  %v4846_v63 = vld [vmem:[#allocation3 + $0x8] sm:$0xff] }
 0x13c   : > { %v4344_v46 = vpop.eup %4343  ;;  %1227 = vrot.lane.b32.xlu0 %v1223_v27, %s5041_s4  ;;  %v1538_v51 = vmul.f32 %v6054_v21, %v6054_v21  ;;  %v6076_v5 = vsub.f32 %v6065_v3, %v5418_v54  ;;  %vm1472_vm13 = vweird.f32 %v6021_v20  ;;  %v6081_v45 = vadd.f32 0.81, %v962_v48 }
 0x13d   : > { %4347 = vrcp.f32 %v1296_v53  ;;  %v839_v39 = vsub.f32 %v803_v23, %v837_v13  ;;  %v1494_v11 = vmul.f32 %v4344_v46, %v6025_v2  ;;  %v1470_v52 = vmul.f32 %v6021_v20, %v1469_v7 }
 0x13e   : > { %4349 = vrsqrt.f32 %v6068_v49  ;;  %v6086_v9 = vadd.f32 0.81, %v1538_v51  ;;  %vm1471_vm14 = vweird.f32 %v5977_v61  ;;  %v1566_v50 = vmul.f32 %v6076_v5, %v6076_v5  ;;  %v4845_v61 = vld [vmem:[#allocation2 + $0x8] sm:$0xff] }
 0x13f   : > { %v841_v6 = vmul.f32 %v839_v39, %v839_v39  ;;  %v1495_v14 = vmul.f32 %v4344_v46, %v1494_v11  ;;  %4351 = vrsqrt.f32 %v6081_v45  ;;  %vm1499_vm15 = vweird.f32 %v6025_v2  ;;  %vm6098_vm0 = vmor %vm1471_vm14, %vm1472_vm13  ;;  %v6119_v51 = vld [vmem:[#allocation2 + $0x1] sm:$0xff] }
 0x140   : > { %v4346_v10 = vpop.eup %4345  ;;  %4353 = vrsqrt.f32 %v6086_v9  ;;  %vm1500_vm1 = vweird.f32 %v4344_v46  ;;  %v6103_v60 = vsub.f32 %v4845_v61, %v6083_v30  ;;  %v6105_v27 = vadd.f32 0.81, %v1566_v50 }
 0x141   : > { %v843_v12 = vadd.f32 0.1, %v841_v6  ;;  %v1496_v22 = vmul.f32 0.5, %v1495_v14  ;;  %v760_v43 = vmul.f32 %v4346_v10, %v754_v55  ;;  %v1474_v13 = vsel %vm6098_vm0, %v6021_v20, %v1470_v52  ;;  %vm1501_vm2 = vmor %vm1499_vm15, %vm1500_vm1 }
 0x142   : > { %v6111_v53 = vsub.f32 %v4846_v63, %v6088_v19  ;;  %v780_v48 = vmul.f32 %v6103_v60, %v6103_v60  ;;  %v6123_v20 = vsub.f32 %v6119_v51, %v5227_v37  ;;  %v1485_v50 = vmul.f32 %v1474_v13, %v5919_v29 }
 0x143   : > { %v4348_v57 = vpop.eup %4347  ;;  %4355 = vrcp.f32 %v843_v12  ;;  %v1497_v55 = vsub.f32 1.5, %v1496_v22  ;;  %765 = vrot.lane.b32.xlu2 %v760_v43, %s5042_s30  ;;  %vm953_vm3 = vweird.f32 %v6068_v49  ;;  %vm981_vm4 = vweird.f32 %v6081_v45 }
 0x144   : > { %v6113_v23 = vpop.eup %4349  ;;  %v1300_v7 = vmul.f32 %v4348_v57, %v1294_v31  ;;  %4357 = vrsqrt.f32 %v6105_v27  ;;  %v814_v52 = vmul.f32 %v6111_v53, %v6111_v53  ;;  %v6131_v31 = vsub.f32 %v5576_v4, %v5224_v36 }
 0x145   : > { %v1498_v39 = vmul.f32 %v4344_v46, %v1497_v55  ;;  %v948_v11 = vmul.f32 %v6113_v23, %v6068_v49  ;;  %v6133_v14 = vpop.eup %4351  ;;  %v6142_v10 = vadd.f32 0.81, %v780_v48  ;;  %vm954_vm5 = vweird.f32 %v6113_v23 }
 0x146   : > { %1305 = vrot.lane.b32.xlu0 %v1300_v7, %s5042_s30  ;;  %v6144_v12 = vpop.eup %4353  ;;  %v976_v29 = vmul.f32 %v6133_v14, %v6081_v45  ;;  %v6152_v2 = vadd.f32 0.81, %v814_v52  ;;  %v1085_v61 = vmul.f32 %v6123_v20, %v6123_v20  ;;  %v1113_v63 = vmul.f32 %v6131_v31, %v6131_v31  ;;  %vm6178_vm9 = vmor %vm953_vm3, %vm954_vm5 }
 0x147   : > { %v1502_v22 = vsel %vm1501_vm2, %v4344_v46, %v1498_v39  ;;  %v949_v43 = vmul.f32 %v6113_v23, %v948_v11  ;;  %4359 = vrsqrt.f32 %v6142_v10  ;;  %v1552_v55 = vmul.f32 %v6144_v12, %v6086_v9 }
 0x148   : > { %v1513_v33 = vmul.f32 %v1502_v22, %v5927_v58  ;;  %v977_v46 = vmul.f32 %v6133_v14, %v976_v29  ;;  %vm982_vm6 = vweird.f32 %v6133_v14  ;;  %4361 = vrsqrt.f32 %v6152_v2 }
 0x149   : > { %v4356_v57 = vpop.eup %4355  ;;  %v950_v13 = vmul.f32 0.5, %v949_v43  ;;  %v1553_v52 = vmul.f32 %v6144_v12, %v1552_v55  ;;  %vm1557_vm7 = vweird.f32 %v6086_v9  ;;  %vm1585_vm8 = vweird.f32 %v6105_v27  ;;  %vm6189_vm10 = vmor %vm981_vm4, %vm982_vm6 }
 0x14a   : > { %v6161_v7 = vpop.eup %4357  ;;  %v847_v58 = vmul.f32 %v4356_v57, %v841_v6  ;;  %v1515_v48 = vsub.f32 %v1485_v50, %v1513_v33  ;;  %v978_v11 = vmul.f32 0.5, %v977_v46  ;;  %v6171_v6 = vadd.f32 0.81, %v1085_v61 }
 0x14b   : > { %v951_v39 = vsub.f32 1.5, %v950_v13  ;;  %v1580_v22 = vmul.f32 %v6161_v7, %v6105_v27  ;;  %v1554_v57 = vmul.f32 0.5, %v1553_v52  ;;  %v6194_v49 = vadd.f32 0.81, %v1113_v63 }
 0x14c   : > { %851 = vrot.lane.b32.xlu1 %v847_v58, %s5043_s23  ;;  %v1517_v43 = vmul.f32 %v1515_v48, %v1515_v48  ;;  %v979_v33 = vsub.f32 1.5, %v978_v11  ;;  %4363 = vrsqrt.f32 %v6171_v6  ;;  %v6198_v58 = vsub.f32 %v6119_v51, %v5338_v18 }
 0x14d   : > { %v952_v50 = vmul.f32 %v6113_v23, %v951_v39  ;;  %v1581_v13 = vmul.f32 %v6161_v7, %v1580_v22  ;;  %v6183_v46 = vpop.eup %4359  ;;  %vm799_vm11 = vweird.f32 %v6142_v10  ;;  %vm1558_vm12 = vweird.f32 %v6144_v12 }
 0x14e   : > { %v1519_v55 = vadd.f32 0.1, %v1517_v43  ;;  %v980_v39 = vmul.f32 %v6133_v14, %v979_v33  ;;  %v794_v45 = vmul.f32 %v6183_v46, %v6142_v10  ;;  %v4362_v11 = vpop.eup %4361  ;;  %v1555_v52 = vsub.f32 1.5, %v1554_v57  ;;  %vm1559_vm0 = vmor %vm1557_vm7, %vm1558_vm12 }
 0x14f   : > { %v956_v48 = vsel %vm6178_vm9, %v6113_v23, %v952_v50  ;;  %v1582_v22 = vmul.f32 0.5, %v1581_v13  ;;  %v828_v50 = vmul.f32 %v4362_v11, %v6152_v2  ;;  %vm833_vm13 = vweird.f32 %v6152_v2 }
 0x150   : > { %4365 = vrcp.f32 %v1519_v55  ;;  %v958_v63 = vmul.f32 %v956_v48, %v6046_v0  ;;  %v984_v29 = vsel %vm6189_vm10, %v6133_v14, %v980_v39  ;;  %v795_v23 = vmul.f32 %v6183_v46, %v794_v45 }
 0x151   : > { %vm1586_vm14 = vweird.f32 %v6161_v7  ;;  %v986_v33 = vmul.f32 %v984_v29, %v6050_v8  ;;  %v1556_v55 = vmul.f32 %v6144_v12, %v1555_v52  ;;  %v1583_v18 = vsub.f32 1.5, %v1582_v22 }
 0x152   : > { %4367 = vrsqrt.f32 %v6194_v49  ;;  %v796_v0 = vmul.f32 0.5, %v795_v23  ;;  %vm800_vm15 = vweird.f32 %v6183_v46  ;;  %v829_v57 = vmul.f32 %v4362_v11, %v828_v50  ;;  %v6226_v13 = vpop.eup %4363  ;;  %vm1587_vm2 = vmor %vm1585_vm8, %vm1586_vm14 }
 0x153   : > { %v1009_v14 = vmul.f32 %v6198_v58, %v6198_v58  ;;  %v988_v8 = vsub.f32 %v958_v63, %v986_v33  ;;  %vm834_vm1 = vweird.f32 %v4362_v11  ;;  %v1560_v61 = vsel %vm1559_vm0, %v6144_v12, %v1556_v55  ;;  %vm801_vm5 = vmor %vm799_vm11, %vm800_vm15 }
 0x154   : > { %v1584_v48 = vmul.f32 %v6161_v7, %v1583_v18  ;;  %v797_v39 = vsub.f32 1.5, %v796_v0  ;;  %v830_v45 = vmul.f32 0.5, %v829_v57  ;;  %v1090_v9 = vmul.f32 %v6226_v13, %v6171_v6  ;;  %vm835_vm6 = vmor %vm833_vm13, %vm834_vm1 }
 0x155   : > { %vm1123_vm3 = vweird.f32 %v6194_v49  ;;  %v6239_v63 = vsub.f32 %v5576_v4, %v5351_v25  ;;  %v990_v12 = vmul.f32 %v988_v8, %v988_v8  ;;  %v1562_v18 = vmul.f32 %v1560_v61, %v6054_v21 }
 0x156   : > { %v4366_v52 = vpop.eup %4365  ;;  %v1588_v22 = vsel %vm1587_vm2, %v6161_v7, %v1584_v48  ;;  %vm1095_vm4 = vweird.f32 %v6171_v6  ;;  %v6244_v29 = vadd.f32 0.81, %v1009_v14  ;;  %v798_v23 = vmul.f32 %v6183_v46, %v797_v39 }
 0x157   : > { %v1523_v27 = vmul.f32 %v4366_v52, %v1517_v43  ;;  %v831_v50 = vsub.f32 1.5, %v830_v45  ;;  %v1590_v33 = vmul.f32 %v1588_v22, %v6076_v5  ;;  %v992_v0 = vadd.f32 0.1, %v990_v12 }
 0x158   : > { %v4368_v55 = vpop.eup %4367  ;;  %v1091_v4 = vmul.f32 %v6226_v13, %v1090_v9  ;;  %4369 = vrsqrt.f32 %v6244_v29  ;;  %v6256_v21 = vsub.f32 %v5893_v17, %v5492_v16  ;;  %v802_v7 = vsel %vm801_vm5, %v6183_v46, %v798_v23 }
 0x159   : > { %1527 = vrot.lane.b32.xlu0 %v1523_v27, %s5039_s29  ;;  %v832_v5 = vmul.f32 %v4362_v11, %v831_v50  ;;  %v1592_v43 = vsub.f32 %v1562_v18, %v1590_v33  ;;  %v1118_v57 = vmul.f32 %v4368_v55, %v6194_v49  ;;  %4371 = vrcp.f32 %v992_v0 }
 0x15a   : > { %v804_v10 = vmul.f32 %v802_v7, %v6103_v60  ;;  %v1092_v14 = vmul.f32 0.5, %v1091_v4  ;;  %vm1096_vm7 = vweird.f32 %v6226_v13  ;;  %v1037_v46 = vmul.f32 %v6239_v63, %v6239_v63 }
 0x15b   : > { %v836_v17 = vsel %vm835_vm6, %v4362_v11, %v832_v5  ;;  %v1594_v8 = vmul.f32 %v1592_v43, %v1592_v43  ;;  %v1119_v61 = vmul.f32 %v4368_v55, %v1118_v57  ;;  %v1689_v45 = vmul.f32 %v6256_v21, %v6256_v21  ;;  %vm1097_vm9 = vmor %vm1095_vm4, %vm1096_vm7 }
 0x15c   : > { %v838_v48 = vmul.f32 %v836_v17, %v6111_v53  ;;  %v1093_v39 = vsub.f32 1.5, %v1092_v14  ;;  %v6273_v60 = vsub.f32 %v5915_v24, %v5234_v40  ;;  %vm1124_vm8 = vweird.f32 %v4368_v55  ;;  %v6312_v17 = vld [vmem:[#allocation2 + $0x9] sm:$0xff] }
 0x15d   : > { %v1596_v2 = vadd.f32 0.1, %v1594_v8  ;;  %v1120_v9 = vmul.f32 0.5, %v1119_v61  ;;  %v6275_v52 = vadd.f32 0.81, %v1037_v46  ;;  %v6292_v50 = vsub.f32 %v5617_v28, %v5563_v1  ;;  %vm1125_vm10 = vmor %vm1123_vm3, %vm1124_vm8 }
 0x15e   : > { %v6277_v11 = vpop.eup %4369  ;;  %v840_v18 = vsub.f32 %v804_v10, %v838_v48  ;;  %v1094_v22 = vmul.f32 %v6226_v13, %v1093_v39  ;;  %v6280_v27 = vadd.f32 0.81, %v1689_v45  ;;  %v1717_v53 = vmul.f32 %v6273_v60, %v6273_v60 }
 0x15f   : > { %4373 = vrcp.f32 %v1596_v2  ;;  %v1121_v24 = vsub.f32 1.5, %v1120_v9  ;;  %v1014_v23 = vmul.f32 %v6277_v11, %v6244_v29  ;;  %v4372_v33 = vpop.eup %4371  ;;  %v1162_v49 = vmul.f32 %v6292_v50, %v6292_v50 }
 0x160   : > { %v842_v0 = vmul.f32 %v840_v18, %v840_v18  ;;  %v1098_v4 = vsel %vm1097_vm9, %v6226_v13, %v1094_v22  ;;  %4375 = vrsqrt.f32 %v6275_v52  ;;  %v996_v6 = vmul.f32 %v4372_v33, %v990_v12 }
 0x161   : > { %v1122_v7 = vmul.f32 %v4368_v55, %v1121_v24  ;;  %v1015_v5 = vmul.f32 %v6277_v11, %v1014_v23  ;;  %v1109_v57 = vmul.f32 %v1098_v4, %v6123_v20  ;;  %4377 = vrsqrt.f32 %v6280_v27  ;;  %v6343_v4 = vld [vmem:[#allocation3 + $0x9] sm:$0xff] }
 0x162   : > { %v844_v43 = vadd.f32 0.1, %v842_v0  ;;  %v6302_v28 = vadd.f32 0.81, %v1717_v53  ;;  %1001 = vrot.lane.b32.xlu1 %v996_v6, %s5039_s29  ;;  %v6309_v12 = vsub.f32 %v5647_v62, %v5566_v59  ;;  %v6316_v20 = vsub.f32 %v6312_v17, %v5241_v42 }
 0x163   : > { %v1126_v13 = vsel %vm1125_vm10, %v4368_v55, %v1122_v7  ;;  %v1016_v10 = vmul.f32 0.5, %v1015_v5  ;;  %v6319_v55 = vadd.f32 0.81, %v1162_v49  ;;  %vm1020_vm11 = vweird.f32 %v6277_v11 }
 0x164   : > { %4379 = vrcp.f32 %v844_v43  ;;  %v1137_v14 = vmul.f32 %v1126_v13, %v6131_v31  ;;  %v1190_v48 = vmul.f32 %v6309_v12, %v6309_v12  ;;  %v1086_v31 = vmul.f32 %v6316_v20, %v6316_v20 }
 0x165   : > { %v4374_v61 = vpop.eup %4373  ;;  %v1017_v46 = vsub.f32 1.5, %v1016_v10  ;;  %4381 = vrsqrt.f32 %v6302_v28  ;;  %vm1019_vm12 = vweird.f32 %v6244_v29  ;;  %v6347_v6 = vsub.f32 %v6343_v4, %v5230_v38 }
 0x166   : > { %v4376_v62 = vpop.eup %4375  ;;  %v1600_v39 = vmul.f32 %v4374_v61, %v1594_v8  ;;  %v1139_v45 = vsub.f32 %v1109_v57, %v1137_v14  ;;  %4383 = vrsqrt.f32 %v6319_v55  ;;  %v6333_v8 = vadd.f32 0.81, %v1190_v48  ;;  %vm6337_vm13 = vmor %vm1019_vm12, %vm1020_vm11 }
 0x167   : > { %v1018_v2 = vmul.f32 %v6277_v11, %v1017_v46  ;;  %v1042_v9 = vmul.f32 %v4376_v62, %v6275_v52  ;;  %v6329_v18 = vpop.eup %4377  ;;  %v6335_v53 = vadd.f32 0.81, %v1086_v31  ;;  %vm1047_vm14 = vweird.f32 %v6275_v52 }
 0x168   : > { %1605 = vrot.lane.b32.xlu0 %v1600_v39, %s5040_s3  ;;  %v1141_v22 = vmul.f32 %v1139_v45, %v1139_v45  ;;  %v1694_v33 = vmul.f32 %v6329_v18, %v6280_v27  ;;  %4385 = vrsqrt.f32 %v6333_v8  ;;  %vm1699_vm15 = vweird.f32 %v6280_v27 }
 0x169   : > { %v1043_v23 = vmul.f32 %v4376_v62, %v1042_v9  ;;  %v1022_v5 = vsel %vm6337_vm13, %v6277_v11, %v1018_v2  ;;  %4387 = vrsqrt.f32 %v6335_v53  ;;  %vm1727_vm0 = vweird.f32 %v6302_v28  ;;  %v4850_v2 = vld [vmem:[#allocation3 + $0x1] sm:$0xff] }
 0x16a   : > { %v4380_v7 = vpop.eup %4379  ;;  %v1143_v29 = vadd.f32 0.1, %v1141_v22  ;;  %v1695_v10 = vmul.f32 %v6329_v18, %v1694_v33  ;;  %vm1048_vm1 = vweird.f32 %v4376_v62  ;;  %v1033_v46 = vmul.f32 %v1022_v5, %v6198_v58 }
 0x16b   : > { %v4382_v43 = vpop.eup %4381  ;;  %v848_v57 = vmul.f32 %v4380_v7, %v842_v0  ;;  %v1044_v13 = vmul.f32 0.5, %v1043_v23  ;;  %v1114_v0 = vmul.f32 %v6347_v6, %v6347_v6  ;;  %vm1700_vm2 = vweird.f32 %v6329_v18  ;;  %vm1049_vm5 = vmor %vm1047_vm14, %vm1048_vm1 }
 0x16c   : > { %4389 = vrcp.f32 %v1143_v29  ;;  %v1722_v49 = vmul.f32 %v4382_v43, %v6302_v28  ;;  %v6359_v14 = vpop.eup %4383  ;;  %v1696_v61 = vmul.f32 0.5, %v1695_v10  ;;  %vm1181_vm3 = vweird.f32 %v6319_v55  ;;  %vm1701_vm7 = vmor %vm1699_vm15, %vm1700_vm2 }
 0x16d   : > { %853 = vrot.lane.b32.xlu2 %v848_v57, %s5043_s23  ;;  %v1045_v11 = vsub.f32 1.5, %v1044_v13  ;;  %v1176_v39 = vmul.f32 %v6359_v14, %v6319_v55  ;;  %vm1728_vm4 = vweird.f32 %v4382_v43  ;;  %v6370_v9 = vsub.f32 %v4850_v2, %v5867_v47 }
 0x16e   : > { %v1723_v48 = vmul.f32 %v4382_v43, %v1722_v49  ;;  %v1697_v31 = vsub.f32 1.5, %v1696_v61  ;;  %v4386_v24 = vpop.eup %4385  ;;  %vm1182_vm6 = vweird.f32 %v6359_v14  ;;  %v6376_v33 = vadd.f32 0.81, %v1114_v0  ;;  %vm6397_vm8 = vmor %vm1727_vm0, %vm1728_vm4 }
 0x16f   : > { %v1046_v45 = vmul.f32 %v4376_v62, %v1045_v11  ;;  %v1177_v23 = vmul.f32 %v6359_v14, %v1176_v39  ;;  %v6378_v7 = vpop.eup %4387  ;;  %v1204_v57 = vmul.f32 %v4386_v24, %v6333_v8  ;;  %v6384_v13 = vsub.f32 %v6030_v44, %v5786_v32  ;;  %vm1183_vm10 = vmor %vm1181_vm3, %vm1182_vm6 }
 0x170   : > { %v1724_v58 = vmul.f32 0.5, %v1723_v48  ;;  %v1698_v5 = vmul.f32 %v6329_v18, %v1697_v31  ;;  %v1341_v27 = vmul.f32 %v6370_v9, %v6370_v9  ;;  %vm1210_vm9 = vweird.f32 %v4386_v24 }
 0x171   : > { %v1050_v29 = vsel %vm1049_vm5, %v4376_v62, %v1046_v45  ;;  %v1178_v11 = vmul.f32 0.5, %v1177_v23  ;;  %v1100_v62 = vmul.f32 %v6378_v7, %v6335_v53  ;;  %4391 = vrsqrt.f32 %v6376_v33 }
 0x172   : > { %v4390_v52 = vpop.eup %4389  ;;  %v1061_v10 = vmul.f32 %v1050_v29, %v6239_v63  ;;  %v1725_v49 = vsub.f32 1.5, %v1724_v58  ;;  %v1702_v0 = vsel %vm1701_vm7, %v6329_v18, %v1698_v5  ;;  %v1205_v63 = vmul.f32 %v4386_v24, %v1204_v57 }
 0x173   : > { %v1147_v61 = vmul.f32 %v4390_v52, %v1141_v22  ;;  %v1179_v31 = vsub.f32 1.5, %v1178_v11  ;;  %v1713_v22 = vmul.f32 %v1702_v0, %v6256_v21  ;;  %v1101_v58 = vmul.f32 %v6378_v7, %v1100_v62 }
 0x174   : > { %v1063_v39 = vsub.f32 %v1033_v46, %v1061_v10  ;;  %v1726_v45 = vmul.f32 %v4382_v43, %v1725_v49  ;;  %v1206_v18 = vmul.f32 0.5, %v1205_v63  ;;  %v1766_v46 = vmul.f32 %v6384_v13, %v6384_v13 }
 0x175   : > { %1151 = vrot.lane.b32.xlu1 %v1147_v61, %s5038_s17  ;;  %v1180_v29 = vmul.f32 %v6359_v14, %v1179_v31  ;;  %v1102_v57 = vmul.f32 0.5, %v1101_v58  ;;  %v6419_v52 = vsub.f32 %v6065_v3, %v5803_v26  ;;  %vm1209_vm11 = vweird.f32 %v6333_v8 }
 0x176   : > { %v1065_v28 = vmul.f32 %v1063_v39, %v1063_v39  ;;  %v1730_v23 = vsel %vm6397_vm8, %v4382_v43, %v1726_v45  ;;  %v1207_v21 = vsub.f32 1.5, %v1206_v18  ;;  %v6422_v49 = vadd.f32 0.81, %v1766_v46  ;;  %vm1211_vm12 = vmor %vm1209_vm11, %vm1210_vm9 }
 0x177   : > { %v1741_v5 = vmul.f32 %v1730_v23, %v6273_v60  ;;  %v1184_v43 = vsel %vm1183_vm10, %v6359_v14, %v1180_v29  ;;  %v6425_v60 = vadd.f32 0.81, %v1341_v27  ;;  %v1103_v61 = vsub.f32 1.5, %v1102_v57  ;;  %v4392_v48 = vpop.eup %4391 }
 0x178   : > { %v1067_v10 = vadd.f32 0.1, %v1065_v28  ;;  %v1208_v62 = vmul.f32 %v4386_v24, %v1207_v21  ;;  %v1186_v55 = vmul.f32 %v1184_v43, %v6292_v50  ;;  %v1794_v0 = vmul.f32 %v6419_v52, %v6419_v52  ;;  %v6457_v21 = vld [vmem:[#allocation2 + $0x3] sm:$0xff] }
 0x179   : > { %v1743_v11 = vsub.f32 %v1713_v22, %v1741_v5  ;;  %v6433_v39 = vsub.f32 %v4850_v2, %v5672_v41  ;;  %vm1105_vm13 = vweird.f32 %v6335_v53  ;;  %v1128_v50 = vmul.f32 %v4392_v48, %v6376_v33 }
 0x17a   : > { %4393 = vrcp.f32 %v1067_v10  ;;  %v1212_v14 = vsel %vm1211_vm12, %v4386_v24, %v1208_v62  ;;  %v6438_v27 = vadd.f32 0.81, %v1794_v0  ;;  %vm1106_vm14 = vweird.f32 %v6378_v7 }
 0x17b   : > { %v1745_v63 = vmul.f32 %v1743_v11, %v1743_v11  ;;  %4395 = vrsqrt.f32 %v6422_v49  ;;  %v1214_v8 = vmul.f32 %v1212_v14, %v6309_v12  ;;  %v6444_v24 = vsub.f32 %v6119_v51, %v5631_v15  ;;  %v10351_v12 = vld [vmem:[#allocation31_spill] sm:$0xff]  ;;  %vm6465_vm1 = vmor %vm1105_vm13, %vm1106_vm14 }
 0x17c   : > { %4397 = vrsqrt.f32 %v6425_v60  ;;  %v1104_v2 = vmul.f32 %v6378_v7, %v1103_v61  ;;  %v1129_v22 = vmul.f32 %v4392_v48, %v1128_v50  ;;  %v6450_v18 = vsub.f32 %v6119_v51, %v10351_v12 }
 0x17d   : > { %v1747_v45 = vadd.f32 0.1, %v1745_v63  ;;  %v1216_v31 = vsub.f32 %v1186_v55, %v1214_v8  ;;  %4399 = vrsqrt.f32 %v6438_v27  ;;  %v1237_v58 = vmul.f32 %v6444_v24, %v6444_v24  ;;  %v10356_v8 = vld [vmem:[#allocation17_spill] sm:$0xff] }
 0x17e   : > { %v1265_v23 = vmul.f32 %v6433_v39, %v6433_v39  ;;  %v1130_v5 = vmul.f32 0.5, %v1129_v22  ;;  %vm1133_vm15 = vweird.f32 %v6376_v33  ;;  %vm1134_vm0 = vweird.f32 %v4392_v48 }
 0x17f   : > { %4401 = vrcp.f32 %v1747_v45  ;;  %v1218_v46 = vmul.f32 %v1216_v31, %v1216_v31  ;;  %v1313_v43 = vmul.f32 %v6450_v18, %v6450_v18  ;;  %v6471_v11 = vadd.f32 0.81, %v1237_v58  ;;  %vm6481_vm2 = vmor %vm1133_vm15, %vm1134_vm0 }
 0x180   : > { %v4394_v29 = vpop.eup %4393  ;;  %v1108_v62 = vsel %vm6465_vm1, %v6378_v7, %v1104_v2  ;;  %v1131_v55 = vsub.f32 1.5, %v1130_v5  ;;  %v6488_v14 = vadd.f32 0.81, %v1265_v23  ;;  %v6492_v7 = vsub.f32 %v6457_v21, %v10356_v8 }
 0x181   : > { %v6459_v57 = vpop.eup %4395  ;;  %v1071_v10 = vmul.f32 %v4394_v29, %v1065_v28  ;;  %v1220_v33 = vadd.f32 0.1, %v1218_v46  ;;  %v6485_v0 = vadd.f32 0.81, %v1313_v43  ;;  %4403 = vrsqrt.f32 %v6471_v11  ;;  %v6508_v43 = vld [vmem:[#allocation3 + $0x3] sm:$0xff] }
 0x182   : > { %v1780_v28 = vmul.f32 %v6459_v57, %v6422_v49  ;;  %v6478_v61 = vpop.eup %4397  ;;  %v1132_v45 = vmul.f32 %v4392_v48, %v1131_v55  ;;  %v1110_v58 = vmul.f32 %v1108_v62, %v6316_v20  ;;  %vm1785_vm3 = vweird.f32 %v6422_v49  ;;  %v10357_v62 = vld [vmem:[#allocation24_spill] sm:$0xff] }
 0x183   : > { %1075 = vrot.lane.b32.xlu2 %v1071_v10, %s5040_s3  ;;  %v6494_v50 = vpop.eup %4399  ;;  %4405 = vrcp.f32 %v1220_v33  ;;  %v1346_v2 = vmul.f32 %v6478_v61, %v6425_v60  ;;  %vm1351_vm4 = vweird.f32 %v6425_v60  ;;  %v6515_v55 = vsub.f32 %v6508_v43, %v10357_v62 }
 0x184   : > { %v1781_v31 = vmul.f32 %v6459_v57, %v1780_v28  ;;  %v1808_v23 = vmul.f32 %v6494_v50, %v6438_v27  ;;  %4407 = vrsqrt.f32 %v6485_v0  ;;  %v1136_v5 = vsel %vm6481_vm2, %v4392_v48, %v1132_v45 }
 0x185   : > { %v4402_v22 = vpop.eup %4401  ;;  %v1347_v51 = vmul.f32 %v6478_v61, %v1346_v2  ;;  %v1138_v20 = vmul.f32 %v1136_v5, %v6347_v6  ;;  %4409 = vrsqrt.f32 %v6488_v14  ;;  %vm1786_vm5 = vweird.f32 %v6459_v57 }
 0x186   : > { %v1751_v29 = vmul.f32 %v4402_v22, %v1745_v63  ;;  %v1782_v10 = vmul.f32 0.5, %v1781_v31  ;;  %v1809_v33 = vmul.f32 %v6494_v50, %v1808_v23  ;;  %v1989_v28 = vmul.f32 %v6492_v7, %v6492_v7  ;;  %vm6535_vm9 = vmor %vm1785_vm3, %vm1786_vm5 }
 0x187   : > { %v1348_v63 = vmul.f32 0.5, %v1347_v51  ;;  %v6521_v53 = vpop.eup %4403  ;;  %v1140_v6 = vsub.f32 %v1110_v58, %v1138_v20  ;;  %vm1813_vm6 = vweird.f32 %v6438_v27  ;;  %vm1814_vm7 = vweird.f32 %v6494_v50 }
 0x188   : > { %1755 = vrot.lane.b32.xlu0 %v1751_v29, %s5041_s4  ;;  %v1783_v48 = vsub.f32 1.5, %v1782_v10  ;;  %v1810_v45 = vmul.f32 0.5, %v1809_v33  ;;  %vm1352_vm8 = vweird.f32 %v6478_v61  ;;  %v1242_v23 = vmul.f32 %v6521_v53, %v6471_v11  ;;  %vm1815_vm13 = vmor %vm1813_vm6, %vm1814_vm7 }
 0x189   : > { %v4406_v31 = vpop.eup %4405  ;;  %v1349_v22 = vsub.f32 1.5, %v1348_v63  ;;  %v1142_v10 = vmul.f32 %v1140_v6, %v1140_v6  ;;  %vm1247_vm10 = vweird.f32 %v6471_v11  ;;  %vm1275_vm11 = vweird.f32 %v6488_v14  ;;  %vm6583_vm0 = vmor %vm1351_vm4, %vm1352_vm8  ;;  %v4851_v11 = vld [vmem:[#allocation2] sm:$0xff] }
 0x18a   : > { %v1784_v2 = vmul.f32 %v6459_v57, %v1783_v48  ;;  %v6529_v29 = vpop.eup %4407  ;;  %v1224_v5 = vmul.f32 %v4406_v31, %v1218_v46  ;;  %v1811_v51 = vsub.f32 1.5, %v1810_v45  ;;  %v2017_v20 = vmul.f32 %v6515_v55, %v6515_v55 }
 0x18b   : > { %v1318_v33 = vmul.f32 %v6529_v29, %v6485_v0  ;;  %vm1323_vm12 = vweird.f32 %v6485_v0  ;;  %v6549_v49 = vadd.f32 0.81, %v1989_v28  ;;  %v6553_v48 = vsub.f32 %v6030_v44, %v5220_v34  ;;  %v6555_v63 = vpop.eup %4409 }
 0x18c   : > { %v1788_v46 = vsel %vm6535_vm9, %v6459_v57, %v1784_v2  ;;  %1229 = vrot.lane.b32.xlu1 %v1224_v5, %s5041_s4  ;;  %v1144_v6 = vadd.f32 0.1, %v1142_v10  ;;  %v1812_v45 = vmul.f32 %v6494_v50, %v1811_v51  ;;  %v1243_v57 = vmul.f32 %v6521_v53, %v1242_v23 }
 0x18d   : > { %v6562_v31 = vsub.f32 %v6065_v3, %v5276_v56  ;;  %v1319_v44 = vmul.f32 %v6529_v29, %v1318_v33  ;;  %v1350_v28 = vmul.f32 %v6478_v61, %v1349_v22  ;;  %vm1248_vm14 = vweird.f32 %v6521_v53 }
 0x18e   : > { %v1270_v2 = vmul.f32 %v6555_v63, %v6488_v14  ;;  %4411 = vrcp.f32 %v1144_v6  ;;  %v1790_v23 = vmul.f32 %v1788_v46, %v6384_v13  ;;  %v1816_v3 = vsel %vm1815_vm13, %v6494_v50, %v1812_v45  ;;  %vm6606_vm2 = vmor %vm1247_vm10, %vm1248_vm14 }
 0x18f   : > { %v1244_v5 = vmul.f32 0.5, %v1243_v57  ;;  %v1818_v58 = vmul.f32 %v1816_v3, %v6419_v52  ;;  %v1320_v51 = vmul.f32 0.5, %v1319_v44  ;;  %4413 = vrsqrt.f32 %v6549_v49 }
 0x190   : > { %v1271_v27 = vmul.f32 %v6555_v63, %v1270_v2  ;;  %vm1324_vm15 = vweird.f32 %v6529_v29  ;;  %v6587_v50 = vadd.f32 0.81, %v2017_v20  ;;  %v1462_v52 = vmul.f32 %v6553_v48, %v6553_v48 }
 0x191   : > { %v1245_v13 = vsub.f32 1.5, %v1244_v5  ;;  %v1820_v46 = vsub.f32 %v1790_v23, %v1818_v58  ;;  %v1321_v33 = vsub.f32 1.5, %v1320_v51  ;;  %v1490_v45 = vmul.f32 %v6562_v31, %v6562_v31  ;;  %vm1325_vm3 = vmor %vm1323_vm12, %vm1324_vm15 }
 0x192   : > { %v1272_v6 = vmul.f32 0.5, %v1271_v27  ;;  %vm1276_vm1 = vweird.f32 %v6555_v63  ;;  %4415 = vrsqrt.f32 %v6587_v50  ;;  %v6596_v60 = vadd.f32 0.81, %v1462_v52 }
 0x193   : > { %v1246_v57 = vmul.f32 %v6521_v53, %v1245_v13  ;;  %v1822_v44 = vmul.f32 %v1820_v46, %v1820_v46  ;;  %v1322_v20 = vmul.f32 %v6529_v29, %v1321_v33  ;;  %v1354_v2 = vsel %vm6583_vm0, %v6478_v61, %v1350_v28  ;;  %v10364_v28 = vld [vmem:[#allocation14_spill] sm:$0xff]  ;;  %vm6630_vm4 = vmor %vm1275_vm11, %vm1276_vm1 }
 0x194   : > { %v1273_v3 = vsub.f32 1.5, %v1272_v6  ;;  %v4412_v5 = vpop.eup %4411  ;;  %4417 = vrsqrt.f32 %v6596_v60  ;;  %v6618_v61 = vadd.f32 0.81, %v1490_v45  ;;  %v6621_v51 = vsub.f32 %v4851_v11, %v10364_v28  ;;  %v4852_v6 = vld [vmem:[#allocation3] sm:$0xff]  ;;  %v10367_v45 = vld [vmem:[#allocation13_spill] sm:$0xff] }
 0x195   : > { %v1250_v58 = vsel %vm6606_vm2, %v6521_v53, %v1246_v57  ;;  %v6623_v27 = vpop.eup %4413  ;;  %v1148_v22 = vmul.f32 %v4412_v5, %v1142_v10  ;;  %v1824_v13 = vadd.f32 0.1, %v1822_v44  ;;  %v1326_v52 = vsel %vm1325_vm3, %v6529_v29, %v1322_v20 }
 0x196   : > { %v1337_v53 = vmul.f32 %v1326_v52, %v6450_v18  ;;  %v1365_v46 = vmul.f32 %v1354_v2, %v6370_v9  ;;  %v1274_v33 = vmul.f32 %v6555_v63, %v1273_v3  ;;  %v1994_v10 = vmul.f32 %v6623_v27, %v6549_v49 }
 0x197   : > { %1153 = vrot.lane.b32.xlu2 %v1148_v22, %s5038_s17  ;;  %4419 = vrcp.f32 %v1824_v13  ;;  %v1261_v29 = vmul.f32 %v1250_v58, %v6444_v24  ;;  %vm1999_vm5 = vweird.f32 %v6549_v49  ;;  %v275_v14 = vmul.f32 %v6621_v51, %v6621_v51 }
 0x198   : > { %v6645_v18 = vsub.f32 %v4852_v6, %v10367_v45  ;;  %v4416_v9 = vpop.eup %4415  ;;  %v1367_v57 = vsub.f32 %v1337_v53, %v1365_v46  ;;  %v1278_v20 = vsel %vm6630_vm4, %v6555_v63, %v1274_v33  ;;  %v1995_v2 = vmul.f32 %v6623_v27, %v1994_v10  ;;  %v6675_v6 = vld [vmem:[#allocation2 + $0xb] sm:$0xff] }
 0x199   : > { %4421 = vrsqrt.f32 %v6618_v61  ;;  %v1289_v24 = vmul.f32 %v1278_v20, %v6433_v39  ;;  %v2022_v23 = vmul.f32 %v4416_v9, %v6587_v50  ;;  %vm2027_vm6 = vweird.f32 %v6587_v50 }
 0x19a   : > { %v6655_v3 = vadd.f32 0.81, %v275_v14  ;;  %v6657_v5 = vpop.eup %4417  ;;  %v1369_v58 = vmul.f32 %v1367_v57, %v1367_v57  ;;  %v1996_v11 = vmul.f32 0.5, %v1995_v2  ;;  %vm2000_vm7 = vweird.f32 %v6623_v27 }
 0x19b   : > { %vm2028_vm8 = vweird.f32 %v4416_v9  ;;  %v1291_v63 = vsub.f32 %v1261_v29, %v1289_v24  ;;  %v2023_v22 = vmul.f32 %v4416_v9, %v2022_v23  ;;  %v1476_v13 = vmul.f32 %v6657_v5, %v6596_v60  ;;  %vm6689_vm10 = vmor %vm1999_vm5, %vm2000_vm7 }
 0x19c   : > { %v305_v39 = vmul.f32 %v6645_v18, %v6645_v18  ;;  %v1371_v52 = vadd.f32 0.1, %v1369_v58  ;;  %v1997_v0 = vsub.f32 1.5, %v1996_v11  ;;  %vm1481_vm9 = vweird.f32 %v6596_v60  ;;  %vm2029_vm12 = vmor %vm2027_vm6, %vm2028_vm8 }
 0x19d   : > { %v6667_v53 = vsub.f32 %v6312_v17, %v6083_v30  ;;  %v6671_v46 = vsub.f32 %v6343_v4, %v6088_v19  ;;  %v4420_v33 = vpop.eup %4419  ;;  %v1293_v10 = vmul.f32 %v1291_v63, %v1291_v63  ;;  %v2024_v29 = vmul.f32 0.5, %v2023_v22 }
 0x19e   : > { %v1477_v14 = vmul.f32 %v6657_v5, %v1476_v13  ;;  %4423 = vrsqrt.f32 %v6655_v3  ;;  %v1828_v20 = vmul.f32 %v4420_v33, %v1822_v44  ;;  %v1998_v17 = vmul.f32 %v6623_v27, %v1997_v0 }
 0x19f   : > { %v6677_v57 = vpop.eup %4421  ;;  %4425 = vrcp.f32 %v1371_v52  ;;  %v1314_v2 = vmul.f32 %v6667_v53, %v6667_v53  ;;  %v1295_v4 = vadd.f32 0.1, %v1293_v10  ;;  %v2025_v24 = vsub.f32 1.5, %v2024_v29 }
 0x1a0   : > { %v1478_v23 = vmul.f32 0.5, %v1477_v14  ;;  %v1504_v11 = vmul.f32 %v6677_v57, %v6618_v61  ;;  %1833 = vrot.lane.b32.xlu0 %v1828_v20, %s5042_s30  ;;  %vm1509_vm11 = vweird.f32 %v6618_v61  ;;  %v1342_v22 = vmul.f32 %v6671_v46, %v6671_v46  ;;  %v6757_v61 = vld [vmem:[#allocation2 + $0x2] sm:$0xff] }
 0x1a1   : > { %v6694_v63 = vadd.f32 0.81, %v1314_v2  ;;  %v6700_v13 = vsub.f32 %v6675_v6, %v5222_v35  ;;  %4427 = vrcp.f32 %v1295_v4  ;;  %v2002_v49 = vsel %vm6689_vm10, %v6623_v27, %v1998_v17 }
 0x1a2   : > { %v2026_v52 = vmul.f32 %v4416_v9, %v2025_v24  ;;  %v1479_v0 = vsub.f32 1.5, %v1478_v23  ;;  %vm1482_vm13 = vweird.f32 %v6657_v5  ;;  %v1505_v33 = vmul.f32 %v6677_v57, %v1504_v11 }
 0x1a3   : > { %4429 = vrsqrt.f32 %v6694_v63  ;;  %v6711_v29 = vadd.f32 0.81, %v1342_v22  ;;  %vm1510_vm14 = vweird.f32 %v6677_v57  ;;  %v6717_v27 = vadd.f32 0.81, %v305_v39  ;;  %vm6726_vm15 = vmor %vm1481_vm9, %vm1482_vm13 }
 0x1a4   : > { %v6713_v14 = vpop.eup %4423  ;;  %v2030_v20 = vsel %vm2029_vm12, %v4416_v9, %v2026_v52  ;;  %v1480_v2 = vmul.f32 %v6657_v5, %v1479_v0  ;;  %v2013_v50 = vmul.f32 %v2002_v49, %v6492_v7  ;;  %v1506_v24 = vmul.f32 0.5, %v1505_v33  ;;  %vm6743_vm0 = vmor %vm1509_vm11, %vm1510_vm14 }
 0x1a5   : > { %v4426_v17 = vpop.eup %4425  ;;  %v2041_v4 = vmul.f32 %v2030_v20, %v6515_v55  ;;  %4431 = vrsqrt.f32 %v6711_v29  ;;  %v280_v39 = vmul.f32 %v6713_v14, %v6655_v3  ;;  %vm1333_vm1 = vweird.f32 %v6694_v63 }
 0x1a6   : > { %v1375_v23 = vmul.f32 %v4426_v17, %v1369_v58  ;;  %v1484_v7 = vsel %vm6726_vm15, %v6657_v5, %v1480_v2  ;;  %v1507_v55 = vsub.f32 1.5, %v1506_v24  ;;  %4433 = vrsqrt.f32 %v6717_v27  ;;  %v6736_v58 = vld [vmem:[#allocation3 + $0xb] sm:$0xff] }
 0x1a7   : > { %v2043_v11 = vsub.f32 %v2013_v50, %v2041_v4  ;;  %v4428_v44 = vpop.eup %4427  ;;  %v281_v22 = vmul.f32 %v6713_v14, %v280_v39  ;;  %v2066_v5 = vmul.f32 %v6700_v13, %v6700_v13  ;;  %v6752_v49 = vsub.f32 %v6736_v58, %v5418_v54 }
 0x1a8   : > { %1379 = vrot.lane.b32.xlu1 %v1375_v23, %s5043_s23  ;;  %v1299_v0 = vmul.f32 %v4428_v44, %v1293_v10  ;;  %v1508_v20 = vmul.f32 %v6677_v57, %v1507_v55  ;;  %v6761_v2 = vsub.f32 %v6757_v61, %v5227_v37  ;;  %v1486_v17 = vmul.f32 %v1484_v7, %v6553_v48 }
 0x1a9   : > { %v6754_v52 = vpop.eup %4429  ;;  %v2045_v33 = vmul.f32 %v2043_v11, %v2043_v11  ;;  %v282_v4 = vmul.f32 0.5, %v281_v22  ;;  %vm285_vm2 = vweird.f32 %v6655_v3  ;;  %v6774_v9 = vadd.f32 0.81, %v2066_v5 }
 0x1aa   : > { %v1328_v50 = vmul.f32 %v6754_v52, %v6694_v63  ;;  %1303 = vrot.lane.b32.xlu2 %v1299_v0, %s5042_s30  ;;  %v1512_v23 = vsel %vm6743_vm0, %v6677_v57, %v1508_v20  ;;  %v2094_v48 = vmul.f32 %v6752_v49, %v6752_v49  ;;  %vm1361_vm3 = vweird.f32 %v6711_v29 }
 0x1ab   : > { %v6767_v24 = vpop.eup %4431  ;;  %v2047_v10 = vadd.f32 0.1, %v2045_v33  ;;  %v1514_v39 = vmul.f32 %v1512_v23, %v6562_v31  ;;  %v283_v57 = vsub.f32 1.5, %v282_v4  ;;  %v1613_v60 = vmul.f32 %v6761_v2, %v6761_v2 }
 0x1ac   : > { %v1329_v11 = vmul.f32 %v6754_v52, %v1328_v50  ;;  %v1356_v7 = vmul.f32 %v6767_v24, %v6711_v29  ;;  %v6783_v55 = vpop.eup %4433  ;;  %v6785_v44 = vadd.f32 0.81, %v2094_v48  ;;  %vm1334_vm4 = vweird.f32 %v6754_v52  ;;  %v6801_v48 = vld [vmem:[#allocation3 + $0x2] sm:$0xff] }
 0x1ad   : > { %4435 = vrcp.f32 %v2047_v10  ;;  %v1516_v22 = vsub.f32 %v1486_v17, %v1514_v39  ;;  %v310_v0 = vmul.f32 %v6783_v55, %v6717_v27  ;;  %vm286_vm5 = vweird.f32 %v6713_v14  ;;  %vm6813_vm8 = vmor %vm1333_vm1, %vm1334_vm4 }
 0x1ae   : > { %v1330_v5 = vmul.f32 0.5, %v1329_v11  ;;  %v1357_v31 = vmul.f32 %v6767_v24, %v1356_v7  ;;  %vm315_vm6 = vweird.f32 %v6717_v27  ;;  %4437 = vrsqrt.f32 %v6774_v9  ;;  %vm6829_vm10 = vmor %vm285_vm2, %vm286_vm5 }
 0x1af   : > { %v1518_v20 = vmul.f32 %v1516_v22, %v1516_v22  ;;  %v311_v10 = vmul.f32 %v6783_v55, %v310_v0  ;;  %v284_v17 = vmul.f32 %v6713_v14, %v283_v57  ;;  %4439 = vrsqrt.f32 %v6785_v44 }
 0x1b0   : > { %v1331_v50 = vsub.f32 1.5, %v1330_v5  ;;  %v1358_v4 = vmul.f32 0.5, %v1357_v31  ;;  %v6799_v23 = vadd.f32 0.81, %v1613_v60  ;;  %v6805_v39 = vsub.f32 %v6801_v48, %v5224_v36 }
 0x1b1   : > { %v1520_v11 = vadd.f32 0.1, %v1518_v20  ;;  %vm1362_vm7 = vweird.f32 %v6767_v24  ;;  %v312_v60 = vmul.f32 0.5, %v311_v10  ;;  %vm316_vm9 = vweird.f32 %v6783_v55 }
 0x1b2   : > { %v1332_v7 = vmul.f32 %v6754_v52, %v1331_v50  ;;  %v1359_v22 = vsub.f32 1.5, %v1358_v4  ;;  %4441 = vrsqrt.f32 %v6799_v23  ;;  %v1641_v31 = vmul.f32 %v6805_v39, %v6805_v39  ;;  %vm1363_vm11 = vmor %vm1361_vm3, %vm1362_vm7 }
 0x1b3   : > { %v4436_v5 = vpop.eup %4435  ;;  %4443 = vrcp.f32 %v1520_v11  ;;  %vm2085_vm12 = vweird.f32 %v6774_v9  ;;  %vm6853_vm13 = vmor %vm315_vm6, %vm316_vm9  ;;  %vm2113_vm14 = vweird.f32 %v6785_v44  ;;  %vm1623_vm1 = vweird.f32 %v6799_v23 }
 0x1b4   : > { %v2051_v0 = vmul.f32 %v4436_v5, %v2045_v33  ;;  %v1336_v50 = vsel %vm6813_vm8, %v6754_v52, %v1332_v7  ;;  %v1360_v63 = vmul.f32 %v6767_v24, %v1359_v22  ;;  %v6833_v10 = vpop.eup %4437  ;;  %v288_v33 = vsel %vm6829_vm10, %v6713_v14, %v284_v17  ;;  %v10378_v7 = vld [vmem:[#allocation25_spill] sm:$0xff] }
 0x1b5   : > { %v313_v52 = vsub.f32 1.5, %v312_v60  ;;  %v6841_v11 = vadd.f32 0.81, %v1641_v31  ;;  %v6845_v3 = vsub.f32 %v6757_v61, %v10378_v7  ;;  %v2080_v14 = vmul.f32 %v6833_v10, %v6774_v9  ;;  %v4440_v5 = vpop.eup %4439  ;;  %v424_v9 = vpop.permute.xlu2 %423 }
 0x1b6   : > { %2055 = vrot.lane.b32.xlu0 %v2051_v0, %s5039_s29  ;;  %v1364_v22 = vsel %vm1363_vm11, %v6767_v24, %v1360_v63  ;;  %v6862_v17 = vsub.f32 %v6801_v48, %v5351_v25  ;;  %v1338_v24 = vmul.f32 %v1336_v50, %v6667_v53  ;;  %v299_v60 = vmul.f32 %v288_v33, %v6621_v51 }
 0x1b7   : > { %v1366_v57 = vmul.f32 %v1364_v22, %v6671_v46  ;;  %v314_v27 = vmul.f32 %v6783_v55, %v313_v52  ;;  %4445 = vrsqrt.f32 %v6841_v11  ;;  %v2081_v31 = vmul.f32 %v6833_v10, %v2080_v14 }
 0x1b8   : > { %v2108_v0 = vmul.f32 %v4440_v5, %v6785_v44  ;;  %v1537_v63 = vmul.f32 %v6845_v3, %v6845_v3  ;;  %v6873_v4 = vpop.eup %4441  ;;  %vm2086_vm15 = vweird.f32 %v6833_v10  ;;  %v1565_v46 = vmul.f32 %v6862_v17, %v6862_v17 }
 0x1b9   : > { %v1368_v45 = vsub.f32 %v1338_v24, %v1366_v57  ;;  %v318_v53 = vsel %vm6853_vm13, %v6783_v55, %v314_v27  ;;  %v4444_v51 = vpop.eup %4443  ;;  %v2082_v33 = vmul.f32 0.5, %v2081_v31  ;;  %v1618_v22 = vmul.f32 %v6873_v4, %v6799_v23  ;;  %vm2087_vm3 = vmor %vm2085_vm12, %vm2086_vm15 }
 0x1ba   : > { %v329_v50 = vmul.f32 %v318_v53, %v6645_v18  ;;  %v2109_v52 = vmul.f32 %v4440_v5, %v2108_v0  ;;  %v1524_v14 = vmul.f32 %v4444_v51, %v1518_v20  ;;  %vm2114_vm0 = vweird.f32 %v4440_v5 }
 0x1bb   : > { %v1370_v28 = vmul.f32 %v1368_v45, %v1368_v45  ;;  %vm1651_vm2 = vweird.f32 %v6841_v11  ;;  %v6886_v55 = vadd.f32 0.81, %v1537_v63  ;;  %v2083_v24 = vsub.f32 1.5, %v2082_v33  ;;  %vm6907_vm4 = vmor %vm2113_vm14, %vm2114_vm0 }
 0x1bc   : > { %v331_v29 = vsub.f32 %v299_v60, %v329_v50  ;;  %v2110_v57 = vmul.f32 0.5, %v2109_v52  ;;  %v1619_v27 = vmul.f32 %v6873_v4, %v1618_v22  ;;  %1529 = vrot.lane.b32.xlu1 %v1524_v14, %s5039_s29  ;;  %v6893_v45 = vadd.f32 0.81, %v1565_v46 }
 0x1bd   : > { %v6889_v18 = vpop.eup %4445  ;;  %v1372_v31 = vadd.f32 0.1, %v1370_v28  ;;  %4447 = vrsqrt.f32 %v6886_v55  ;;  %v6897_v20 = vsub.f32 %v6457_v21, %v5492_v16  ;;  %v2084_v60 = vmul.f32 %v6833_v10, %v2083_v24 }
 0x1be   : > { %v333_v0 = vmul.f32 %v331_v29, %v331_v29  ;;  %v2111_v63 = vsub.f32 1.5, %v2110_v57  ;;  %v1620_v53 = vmul.f32 0.5, %v1619_v27  ;;  %vm1624_vm5 = vweird.f32 %v6873_v4 }
 0x1bf   : > { %4449 = vrcp.f32 %v1372_v31  ;;  %v1646_v21 = vmul.f32 %v6889_v18, %v6841_v11  ;;  %vm1652_vm6 = vweird.f32 %v6889_v18  ;;  %v2088_v50 = vsel %vm2087_vm3, %v6833_v10, %v2084_v60  ;;  %v6931_v60 = vld [vmem:[#allocation2 + $0xa] sm:$0xff]  ;;  %vm6941_vm7 = vmor %vm1623_vm1, %vm1624_vm5 }
 0x1c0   : > { %v335_v51 = vadd.f32 0.1, %v333_v0  ;;  %v2112_v33 = vmul.f32 %v4440_v5, %v2111_v63  ;;  %v1621_v52 = vsub.f32 1.5, %v1620_v53  ;;  %v2090_v22 = vmul.f32 %v2088_v50, %v6700_v13  ;;  %vm6956_vm8 = vmor %vm1651_vm2, %vm1652_vm6 }
 0x1c1   : > { %v1647_v44 = vmul.f32 %v6889_v18, %v1646_v21  ;;  %4451 = vrsqrt.f32 %v6893_v45  ;;  %v2217_v14 = vmul.f32 %v6897_v20, %v6897_v20  ;;  %v6926_v10 = vsub.f32 %v6508_v43, %v5234_v40 }
 0x1c2   : > { %4453 = vrcp.f32 %v335_v51  ;;  %v2116_v29 = vsel %vm6907_vm4, %v4440_v5, %v2112_v33  ;;  %v1622_v24 = vmul.f32 %v6873_v4, %v1621_v52  ;;  %v6935_v63 = vsub.f32 %v6931_v60, %v5563_v1 }
 0x1c3   : > { %v4448_v57 = vpop.eup %4447  ;;  %v2118_v13 = vmul.f32 %v2116_v29, %v6752_v49  ;;  %v1648_v27 = vmul.f32 0.5, %v1647_v44  ;;  %v6929_v31 = vadd.f32 0.81, %v2217_v14  ;;  %v2245_v49 = vmul.f32 %v6926_v10, %v6926_v10  ;;  %v6966_v14 = vld [vmem:[#allocation3 + $0xa] sm:$0xff] }
 0x1c4   : > { %v1542_v43 = vmul.f32 %v4448_v57, %v6886_v55  ;;  %v1626_v21 = vsel %vm6941_vm7, %v6873_v4, %v1622_v24  ;;  %vm1547_vm9 = vweird.f32 %v6886_v55  ;;  %v6970_v11 = vsub.f32 %v6966_v14, %v5566_v59 }
 0x1c5   : > { %v4450_v53 = vpop.eup %4449  ;;  %v2120_v46 = vsub.f32 %v2090_v22, %v2118_v13  ;;  %v1649_v51 = vsub.f32 1.5, %v1648_v27  ;;  %4455 = vrsqrt.f32 %v6929_v31  ;;  %v6961_v52 = vadd.f32 0.81, %v2245_v49 }
 0x1c6   : > { %v1376_v50 = vmul.f32 %v4450_v53, %v1370_v28  ;;  %v1543_v33 = vmul.f32 %v4448_v57, %v1542_v43  ;;  %v1690_v28 = vmul.f32 %v6935_v63, %v6935_v63  ;;  %v1637_v24 = vmul.f32 %v1626_v21, %v6761_v2 }
 0x1c7   : > { %v4452_v22 = vpop.eup %4451  ;;  %v2122_v44 = vmul.f32 %v2120_v46, %v2120_v46  ;;  %v1650_v4 = vmul.f32 %v6889_v18, %v1649_v51  ;;  %vm1575_vm10 = vweird.f32 %v6893_v45  ;;  %4457 = vrsqrt.f32 %v6961_v52 }
 0x1c8   : > { %v4454_v29 = vpop.eup %4453  ;;  %1381 = vrot.lane.b32.xlu2 %v1376_v50, %s5043_s23  ;;  %v1544_v13 = vmul.f32 0.5, %v1543_v33  ;;  %v1570_v27 = vmul.f32 %v4452_v22, %v6893_v45  ;;  %vm1548_vm11 = vweird.f32 %v4448_v57  ;;  %v512_v50 = vpop.permute.xlu2 %511  ;;  %v6981_v2 = vadd.f32 0.81, %v1690_v28 }
 0x1c9   : > { %v339_v5 = vmul.f32 %v4454_v29, %v333_v0  ;;  %v2124_v43 = vadd.f32 0.1, %v2122_v44  ;;  %v1654_v49 = vsel %vm6956_vm8, %v6889_v18, %v1650_v4  ;;  %v1718_v0 = vmul.f32 %v6970_v11, %v6970_v11  ;;  %vm1549_vm12 = vmor %vm1547_vm9, %vm1548_vm11 }
 0x1ca   : > { %v1665_v53 = vmul.f32 %v1654_v49, %v6805_v39  ;;  %v1545_v46 = vsub.f32 1.5, %v1544_v13  ;;  %v1571_v51 = vmul.f32 %v4452_v22, %v1570_v27  ;;  %v6989_v29 = vsub.f32 %v6931_v60, %v5241_v42 }
 0x1cb   : > { %v6983_v21 = vpop.eup %4455  ;;  %v429_v33 = vadd.f32 %v424_v9, %v339_v5  ;;  %4459 = vrcp.f32 %v2124_v43  ;;  %vm1576_vm13 = vweird.f32 %v4452_v22  ;;  %vm2255_vm14 = vweird.f32 %v6961_v52 }
 0x1cc   : > { %v1667_v18 = vsub.f32 %v1637_v24, %v1665_v53  ;;  %v1546_v23 = vmul.f32 %v4448_v57, %v1545_v46  ;;  %v1572_v4 = vmul.f32 0.5, %v1571_v51  ;;  %v2222_v39 = vmul.f32 %v6983_v21, %v6929_v31  ;;  %vm1577_vm0 = vmor %vm1575_vm10, %vm1576_vm13 }
 0x1cd   : > { %v6996_v9 = vadd.f32 %v512_v50, %v429_v33  ;;  %4461 = vrsqrt.f32 %v6981_v2  ;;  %v4458_v28 = vpop.eup %4457  ;;  %vm2228_vm15 = vweird.f32 %v6983_v21  ;;  %v7004_v49 = vadd.f32 0.81, %v1718_v0 }
 0x1ce   : > { %v1669_v13 = vmul.f32 %v1667_v18, %v1667_v18  ;;  %v1550_v27 = vsel %vm1549_vm12, %v4448_v57, %v1546_v23  ;;  %v1573_v24 = vsub.f32 1.5, %v1572_v4  ;;  %v2223_v5 = vmul.f32 %v6983_v21, %v2222_v39 }
 0x1cf   : > { %v1561_v43 = vmul.f32 %v1550_v27, %v6845_v3  ;;  %v2250_v55 = vmul.f32 %v4458_v28, %v6961_v52  ;;  %v1614_v50 = vmul.f32 %v6989_v29, %v6989_v29  ;;  %vm2256_vm1 = vweird.f32 %v4458_v28 }
 0x1d0   : > { %v1671_v53 = vadd.f32 0.1, %v1669_v13  ;;  %v1574_v46 = vmul.f32 %v4452_v22, %v1573_v24  ;;  %v2224_v51 = vmul.f32 0.5, %v2223_v5  ;;  %4463 = vrsqrt.f32 %v7004_v49  ;;  %vm7036_vm4 = vmor %vm2255_vm14, %vm2256_vm1 }
 0x1d1   : > { %v4460_v33 = vpop.eup %4459  ;;  %v2251_v57 = vmul.f32 %v4458_v28, %v2250_v55  ;;  %v7014_v3 = vsub.f32 %v6966_v14, %v5230_v38  ;;  %v7017_v24 = vadd.f32 0.81, %v1614_v50  ;;  %vm2227_vm2 = vweird.f32 %v6929_v31 }
 0x1d2   : > { %v2128_v0 = vmul.f32 %v4460_v33, %v2122_v44  ;;  %4465 = vrcp.f32 %v1671_v53  ;;  %v1578_v18 = vsel %vm1577_vm0, %v4452_v22, %v1574_v46  ;;  %v2225_v23 = vsub.f32 1.5, %v2224_v51  ;;  %vm2229_vm3 = vmor %vm2227_vm2, %vm2228_vm15 }
 0x1d3   : > { %v4462_v4 = vpop.eup %4461  ;;  %v1589_v39 = vmul.f32 %v1578_v18, %v6862_v17  ;;  %v2252_v27 = vmul.f32 0.5, %v2251_v57  ;;  %v1642_v45 = vmul.f32 %v7014_v3, %v7014_v3  ;;  %v7027_v22 = vsub.f32 %v6675_v6, %v5786_v32 }
 0x1d4   : > { %2133 = vrot.lane.b32.xlu0 %v2128_v0, %s5040_s3  ;;  %v2226_v5 = vmul.f32 %v6983_v21, %v2225_v23  ;;  %v1704_v44 = vmul.f32 %v4462_v4, %v6981_v2  ;;  %4467 = vrsqrt.f32 %v7017_v24  ;;  %vm1709_vm5 = vweird.f32 %v6981_v2 }
 0x1d5   : > { %v1591_v55 = vsub.f32 %v1561_v43, %v1589_v39  ;;  %v2253_v17 = vsub.f32 1.5, %v2252_v27  ;;  %v7040_v51 = vadd.f32 0.81, %v1642_v45  ;;  %v2294_v43 = vmul.f32 %v7027_v22, %v7027_v22 }
 0x1d6   : > { %v2230_v53 = vsel %vm2229_vm3, %v6983_v21, %v2226_v5  ;;  %v1705_v46 = vmul.f32 %v4462_v4, %v1704_v44  ;;  %v4464_v50 = vpop.eup %4463  ;;  %vm1710_vm6 = vweird.f32 %v4462_v4  ;;  %v7052_v45 = vsub.f32 %v6801_v48, %v5867_v47 }
 0x1d7   : > { %v1593_v33 = vmul.f32 %v1591_v55, %v1591_v55  ;;  %v2254_v57 = vmul.f32 %v4458_v28, %v2253_v17  ;;  %v2241_v0 = vmul.f32 %v2230_v53, %v6897_v20  ;;  %v1732_v18 = vmul.f32 %v4464_v50, %v7004_v49  ;;  %vm1711_vm9 = vmor %vm1709_vm5, %vm1710_vm6 }
 0x1d8   : > { %v4466_v21 = vpop.eup %4465  ;;  %v1706_v52 = vmul.f32 0.5, %v1705_v46  ;;  %4469 = vrsqrt.f32 %v7040_v51  ;;  %v7055_v17 = vadd.f32 0.81, %v2294_v43  ;;  %vm1737_vm7 = vweird.f32 %v7004_v49 }
 0x1d9   : > { %v1675_v23 = vmul.f32 %v4466_v21, %v1669_v13  ;;  %v1595_v39 = vadd.f32 0.1, %v1593_v33  ;;  %v2258_v27 = vsel %vm7036_vm4, %v4458_v28, %v2254_v57  ;;  %v1733_v55 = vmul.f32 %v4464_v50, %v1732_v18 }
 0x1da   : > { %v2269_v5 = vmul.f32 %v2258_v27, %v6926_v10  ;;  %v1707_v44 = vsub.f32 1.5, %v1706_v52  ;;  %v4468_v20 = vpop.eup %4467  ;;  %vm1738_vm8 = vweird.f32 %v4464_v50  ;;  %v7061_v28 = vsub.f32 %v6736_v58, %v5803_v26 }
 0x1db   : > { %1679 = vrot.lane.b32.xlu1 %v1675_v23, %s5038_s17  ;;  %4471 = vrcp.f32 %v1595_v39  ;;  %v1734_v31 = vmul.f32 0.5, %v1733_v55  ;;  %v1628_v10 = vmul.f32 %v4468_v20, %v7017_v24  ;;  %vm1661_vm10 = vweird.f32 %v7040_v51  ;;  %vm1739_vm13 = vmor %vm1737_vm7, %vm1738_vm8 }
 0x1dc   : > { %v2271_v13 = vsub.f32 %v2241_v0, %v2269_v5  ;;  %v1708_v53 = vmul.f32 %v4462_v4, %v1707_v44  ;;  %4473 = vrsqrt.f32 %v7055_v17  ;;  %v1869_v46 = vmul.f32 %v7052_v45, %v7052_v45 }
 0x1dd   : > { %v7073_v43 = vsub.f32 %v6801_v48, %v5672_v41  ;;  %v1735_v52 = vsub.f32 1.5, %v1734_v31  ;;  %v1629_v18 = vmul.f32 %v4468_v20, %v1628_v10  ;;  %vm1634_vm11 = vweird.f32 %v4468_v20 }
 0x1de   : > { %v4470_v57 = vpop.eup %4469  ;;  %v2273_v21 = vmul.f32 %v2271_v13, %v2271_v13  ;;  %v1712_v0 = vsel %vm1711_vm9, %v4462_v4, %v1708_v53  ;;  %v2322_v39 = vmul.f32 %v7061_v28, %v7061_v28  ;;  %v7084_v13 = vadd.f32 0.81, %v1869_v46 }
 0x1df   : > { %v1714_v23 = vmul.f32 %v1712_v0, %v6935_v63  ;;  %v1656_v2 = vmul.f32 %v4470_v57, %v7040_v51  ;;  %v1736_v5 = vmul.f32 %v4464_v50, %v1735_v52  ;;  %v1630_v44 = vmul.f32 0.5, %v1629_v18 }
 0x1e0   : > { %v2275_v27 = vadd.f32 0.1, %v2273_v21  ;;  %vm1662_vm12 = vweird.f32 %v4470_v57  ;;  %v7082_v4 = vadd.f32 0.81, %v2322_v39  ;;  %v7088_v63 = vsub.f32 %v6757_v61, %v5631_v15 }
 0x1e1   : > { %v4472_v55 = vpop.eup %4471  ;;  %v1657_v48 = vmul.f32 %v4470_v57, %v1656_v2  ;;  %v1740_v31 = vsel %vm1739_vm13, %v4464_v50, %v1736_v5  ;;  %v1631_v10 = vsub.f32 1.5, %v1630_v44  ;;  %v1793_v49 = vmul.f32 %v7073_v43, %v7073_v43  ;;  %vm7109_vm0 = vmor %vm1661_vm10, %vm1662_vm12 }
 0x1e2   : > { %v1599_v53 = vmul.f32 %v4472_v55, %v1593_v33  ;;  %4475 = vrcp.f32 %v2275_v27  ;;  %v7090_v0 = vpop.eup %4473  ;;  %v1742_v52 = vmul.f32 %v1740_v31, %v6970_v11  ;;  %vm1633_vm14 = vweird.f32 %v7017_v24 }
 0x1e3   : > { %v1658_v18 = vmul.f32 0.5, %v1657_v48  ;;  %4477 = vrsqrt.f32 %v7082_v4  ;;  %v1632_v46 = vmul.f32 %v4468_v20, %v1631_v10  ;;  %v2308_v33 = vmul.f32 %v7090_v0, %v7055_v17  ;;  %vm1635_vm15 = vmor %vm1633_vm14, %vm1634_vm11  ;;  %v4857_v10 = vld [vmem:[#allocation2 + $0x8] sm:$0xff] }
 0x1e4   : > { %1603 = vrot.lane.b32.xlu2 %v1599_v53, %s5040_s3  ;;  %v7102_v50 = vsub.f32 %v6757_v61, %v10351_v12  ;;  %v1744_v2 = vsub.f32 %v1714_v23, %v1742_v52  ;;  %4479 = vrsqrt.f32 %v7084_v13  ;;  %v1765_v23 = vmul.f32 %v7088_v63, %v7088_v63  ;;  %v10391_v52 = vld [vmem:[#allocation16_spill] sm:$0xff] }
 0x1e5   : > { %v1659_v11 = vsub.f32 1.5, %v1658_v18  ;;  %v1636_v39 = vsel %vm1635_vm15, %v4468_v20, %v1632_v46  ;;  %v2309_v24 = vmul.f32 %v7090_v0, %v2308_v33  ;;  %v7119_v20 = vadd.f32 0.81, %v1793_v49 }
 0x1e6   : > { %v1841_v61 = vmul.f32 %v7102_v50, %v7102_v50  ;;  %v1746_v5 = vmul.f32 %v1744_v2, %v1744_v2  ;;  %v1638_v44 = vmul.f32 %v1636_v39, %v6989_v29  ;;  %v7123_v31 = vadd.f32 0.81, %v1765_v23  ;;  %v4858_v23 = vld [vmem:[#allocation3 + $0x8] sm:$0xff] }
 0x1e7   : > { %v1660_v55 = vmul.f32 %v4470_v57, %v1659_v11  ;;  %v2310_v51 = vmul.f32 0.5, %v2309_v24  ;;  %v7126_v18 = vsub.f32 %v4857_v10, %v10391_v52  ;;  %4481 = vrsqrt.f32 %v7119_v20 }
 0x1e8   : > { %v4476_v48 = vpop.eup %4475  ;;  %v7121_v53 = vadd.f32 0.81, %v1841_v61  ;;  %v1748_v12 = vadd.f32 0.1, %v1746_v5  ;;  %vm2313_vm1 = vweird.f32 %v7055_v17  ;;  %vm2314_vm2 = vweird.f32 %v7090_v0 }
 0x1e9   : > { %v7128_v46 = vpop.eup %4477  ;;  %v2279_v33 = vmul.f32 %v4476_v48, %v2273_v21  ;;  %v1664_v29 = vsel %vm7109_vm0, %v4470_v57, %v1660_v55  ;;  %v2311_v2 = vsub.f32 1.5, %v2310_v51  ;;  %vm2341_vm3 = vweird.f32 %v7082_v4  ;;  %v7155_v48 = vld [vmem:[#allocation2 + $0x4] sm:$0xff]  ;;  %vm7163_vm6 = vmor %vm2313_vm1, %vm2314_vm2 }
 0x1ea   : > { %v1666_v49 = vmul.f32 %v1664_v29, %v7014_v3  ;;  %v2336_v11 = vmul.f32 %v7128_v46, %v7082_v4  ;;  %v7136_v39 = vpop.eup %4479  ;;  %4483 = vrcp.f32 %v1748_v12  ;;  %vm1879_vm4 = vweird.f32 %v7084_v13 }
 0x1eb   : > { %2283 = vrot.lane.b32.xlu0 %v2279_v33, %s5041_s4  ;;  %v2312_v21 = vmul.f32 %v7090_v0, %v2311_v2  ;;  %4485 = vrsqrt.f32 %v7121_v53  ;;  %v1874_v27 = vmul.f32 %v7136_v39, %v7084_v13  ;;  %v276_v12 = vmul.f32 %v7126_v18, %v7126_v18 }
 0x1ec   : > { %v1668_v57 = vsub.f32 %v1638_v44, %v1666_v49  ;;  %v2337_v3 = vmul.f32 %v7128_v46, %v2336_v11  ;;  %4487 = vrsqrt.f32 %v7123_v31  ;;  %vm2342_vm5 = vweird.f32 %v7128_v46  ;;  %v10392_v44 = vld [vmem:[#allocation15_spill] sm:$0xff] }
 0x1ed   : > { %v7153_v55 = vsub.f32 %v4858_v23, %v10392_v44  ;;  %v7157_v51 = vpop.eup %4481  ;;  %v1875_v33 = vmul.f32 %v7136_v39, %v1874_v27  ;;  %vm1880_vm7 = vweird.f32 %v7136_v39  ;;  %vm1803_vm8 = vweird.f32 %v7119_v20  ;;  %vm2343_vm9 = vmor %vm2341_vm3, %vm2342_vm5 }
 0x1ee   : > { %v1670_v24 = vmul.f32 %v1668_v57, %v1668_v57  ;;  %v2338_v61 = vmul.f32 0.5, %v2337_v3  ;;  %v7170_v29 = vadd.f32 0.81, %v276_v12  ;;  %v2316_v2 = vsel %vm7163_vm6, %v7090_v0, %v2312_v21  ;;  %vm7206_vm11 = vmor %vm1879_vm4, %vm1880_vm7 }
 0x1ef   : > { %v1798_v17 = vmul.f32 %v7157_v51, %v7119_v20  ;;  %v1876_v3 = vmul.f32 0.5, %v1875_v33  ;;  %v306_v27 = vmul.f32 %v7153_v55, %v7153_v55  ;;  %v7182_v12 = vsub.f32 %v7155_v48, %v10356_v8 }
 0x1f0   : > { %v1672_v49 = vadd.f32 0.1, %v1670_v24  ;;  %v2339_v11 = vsub.f32 1.5, %v2338_v61  ;;  %v4484_v57 = vpop.eup %4483  ;;  %4489 = vrsqrt.f32 %v7170_v29  ;;  %v2318_v10 = vmul.f32 %v2316_v2, %v7027_v22 }
 0x1f1   : > { %v7184_v23 = vpop.eup %4485  ;;  %v1752_v44 = vmul.f32 %v4484_v57, %v1746_v5  ;;  %v1799_v21 = vmul.f32 %v7157_v51, %v1798_v17  ;;  %vm1851_vm10 = vweird.f32 %v7121_v53  ;;  %v1877_v5 = vsub.f32 1.5, %v1876_v3  ;;  %v7214_v17 = vld [vmem:[#allocation3 + $0x4] sm:$0xff] }
 0x1f2   : > { %4491 = vrcp.f32 %v1672_v49  ;;  %v2340_v0 = vmul.f32 %v7128_v46, %v2339_v11  ;;  %v7188_v61 = vpop.eup %4487  ;;  %v1846_v33 = vmul.f32 %v7184_v23, %v7121_v53  ;;  %v7198_v49 = vadd.f32 0.81, %v306_v27 }
 0x1f3   : > { %1757 = vrot.lane.b32.xlu1 %v1752_v44, %s5041_s4  ;;  %v1770_v4 = vmul.f32 %v7188_v61, %v7123_v31  ;;  %vm1775_vm12 = vweird.f32 %v7123_v31  ;;  %v1800_v2 = vmul.f32 0.5, %v1799_v21  ;;  %vm1804_vm13 = vweird.f32 %v7157_v51 }
 0x1f4   : > { %v2344_v11 = vsel %vm2343_vm9, %v7128_v46, %v2340_v0  ;;  %v1847_v44 = vmul.f32 %v7184_v23, %v1846_v33  ;;  %v1878_v13 = vmul.f32 %v7136_v39, %v1877_v5  ;;  %4493 = vrsqrt.f32 %v7198_v49  ;;  %vm7231_vm15 = vmor %vm1803_vm8, %vm1804_vm13 }
 0x1f5   : > { %v2346_v46 = vmul.f32 %v2344_v11, %v7061_v28  ;;  %vm1852_vm14 = vweird.f32 %v7184_v23  ;;  %v1771_v57 = vmul.f32 %v7188_v61, %v1770_v4  ;;  %v1801_v3 = vsub.f32 1.5, %v1800_v2 }
 0x1f6   : > { %v2517_v27 = vmul.f32 %v7182_v12, %v7182_v12  ;;  %v7224_v0 = vpop.eup %4489  ;;  %v1848_v52 = vmul.f32 0.5, %v1847_v44  ;;  %v1882_v28 = vsel %vm7206_vm11, %v7136_v39, %v1878_v13  ;;  %v7237_v5 = vsub.f32 %v7214_v17, %v10357_v62  ;;  %vm1853_vm3 = vmor %vm1851_vm10, %vm1852_vm14 }
 0x1f7   : > { %v2348_v21 = vsub.f32 %v2318_v10, %v2346_v46  ;;  %v1772_v4 = vmul.f32 0.5, %v1771_v57  ;;  %vm1776_vm0 = vweird.f32 %v7188_v61  ;;  %v1802_v10 = vmul.f32 %v7157_v51, %v1801_v3 }
 0x1f8   : > { %v4492_v11 = vpop.eup %4491  ;;  %v290_v22 = vmul.f32 %v7224_v0, %v7170_v29  ;;  %vm295_vm1 = vweird.f32 %v7170_v29  ;;  %v1849_v2 = vsub.f32 1.5, %v1848_v52  ;;  %vm325_vm2 = vweird.f32 %v7198_v49  ;;  %vm1777_vm5 = vmor %vm1775_vm12, %vm1776_vm0 }
 0x1f9   : > { %v1676_v20 = vmul.f32 %v4492_v11, %v1670_v24  ;;  %v2350_v39 = vmul.f32 %v2348_v21, %v2348_v21  ;;  %v1893_v46 = vmul.f32 %v1882_v28, %v7052_v45  ;;  %v1773_v44 = vsub.f32 1.5, %v1772_v4 }
 0x1fa   : > { %v1806_v13 = vsel %vm7231_vm15, %v7157_v51, %v1802_v10  ;;  %v291_v57 = vmul.f32 %v7224_v0, %v290_v22  ;;  %v4494_v3 = vpop.eup %4493  ;;  %v1850_v8 = vmul.f32 %v7184_v23, %v1849_v2  ;;  %v7252_v24 = vadd.f32 0.81, %v2517_v27  ;;  %v7273_v22 = vld [vmem:[#allocation2 + $0xc] sm:$0xff] }
 0x1fb   : > { %1681 = vrot.lane.b32.xlu2 %v1676_v20, %s5038_s17  ;;  %v2352_v62 = vadd.f32 0.1, %v2350_v39  ;;  %v2545_v52 = vmul.f32 %v7237_v5, %v7237_v5  ;;  %v1774_v45 = vmul.f32 %v7188_v61, %v1773_v44  ;;  %vm296_vm4 = vweird.f32 %v7224_v0 }
 0x1fc   : > { %v292_v51 = vmul.f32 0.5, %v291_v57  ;;  %v320_v21 = vmul.f32 %v4494_v3, %v7198_v49  ;;  %v1854_v28 = vsel %vm1853_vm3, %v7184_v23, %v1850_v8  ;;  %v1817_v27 = vmul.f32 %v1806_v13, %v7073_v43  ;;  %vm7287_vm7 = vmor %vm295_vm1, %vm296_vm4 }
 0x1fd   : > { %4495 = vrcp.f32 %v2352_v62  ;;  %v7269_v33 = vadd.f32 0.81, %v2545_v52  ;;  %v1865_v53 = vmul.f32 %v1854_v28, %v7102_v50  ;;  %v1778_v11 = vsel %vm1777_vm5, %v7188_v61, %v1774_v45 }
 0x1fe   : > { %v293_v4 = vsub.f32 1.5, %v292_v51  ;;  %v321_v10 = vmul.f32 %v4494_v3, %v320_v21  ;;  %v1789_v62 = vmul.f32 %v1778_v11, %v7088_v63  ;;  %vm326_vm6 = vweird.f32 %v4494_v3 }
 0x1ff   : > { %4497 = vrsqrt.f32 %v7252_v24  ;;  %v7279_v8 = vsub.f32 %v6675_v6, %v5220_v34  ;;  %v1895_v43 = vsub.f32 %v1865_v53, %v1893_v46  ;;  %v7295_v6 = vsub.f32 %v6736_v58, %v5276_v56  ;;  %vm7307_vm8 = vmor %vm325_vm2, %vm326_vm6 }
 0x200   : > { %v294_v31 = vmul.f32 %v7224_v0, %v293_v4  ;;  %v322_v23 = vmul.f32 0.5, %v321_v10  ;;  %4499 = vrsqrt.f32 %v7269_v33  ;;  %v1819_v50 = vsub.f32 %v1789_v62, %v1817_v27  ;;  %v588_v27 = vpop.permute.xlu1 %587  ;;  %v7330_v62 = vld [vmem:[#allocation3 + $0xc] sm:$0xff] }
 0x201   : > { %v1990_v61 = vmul.f32 %v7279_v8, %v7279_v8  ;;  %v7299_v20 = vsub.f32 %v7273_v22, %v5222_v35  ;;  %v1897_v2 = vmul.f32 %v1895_v43, %v1895_v43  ;;  %v2018_v52 = vmul.f32 %v7295_v6, %v7295_v6 }
 0x202   : > { %v298_v29 = vsel %vm7287_vm7, %v7224_v0, %v294_v31  ;;  %v323_v46 = vsub.f32 1.5, %v322_v23  ;;  %v1821_v13 = vmul.f32 %v1819_v50, %v1819_v50  ;;  %v7337_v31 = vsub.f32 %v7330_v62, %v5418_v54 }
 0x203   : > { %v4496_v44 = vpop.eup %4495  ;;  %v7311_v58 = vadd.f32 0.81, %v1990_v61  ;;  %v1899_v51 = vadd.f32 0.1, %v1897_v2  ;;  %v2594_v0 = vmul.f32 %v7299_v20, %v7299_v20  ;;  %v300_v49 = vmul.f32 %v298_v29, %v7126_v18 }
 0x204   : > { %v2356_v45 = vmul.f32 %v4496_v44, %v2350_v39  ;;  %v324_v21 = vmul.f32 %v4494_v3, %v323_v46  ;;  %v1823_v53 = vadd.f32 0.1, %v1821_v13  ;;  %v7321_v11 = vadd.f32 0.81, %v2018_v52 }
 0x205   : > { %v7317_v28 = vpop.eup %4497  ;;  %4501 = vrsqrt.f32 %v7311_v58  ;;  %v7340_v23 = vadd.f32 %v588_v27, %v6996_v9  ;;  %v7344_v50 = vadd.f32 0.81, %v2594_v0  ;;  %vm2527_vm9 = vweird.f32 %v7252_v24 }
 0x206   : > { %v7323_v4 = vpop.eup %4499  ;;  %2361 = vrot.lane.b32.xlu0 %v2356_v45, %s5042_s30  ;;  %4503 = vrcp.f32 %v1899_v51  ;;  %v328_v39 = vsel %vm7307_vm8, %v4494_v3, %v324_v21  ;;  %v2522_v10 = vmul.f32 %v7317_v28, %v7252_v24  ;;  %vm2555_vm10 = vweird.f32 %v7269_v33 }
 0x207   : > { %4505 = vrcp.f32 %v1823_v53  ;;  %v330_v18 = vmul.f32 %v328_v39, %v7153_v55  ;;  %v2550_v43 = vmul.f32 %v7323_v4, %v7269_v33  ;;  %vm2528_vm11 = vweird.f32 %v7317_v28 }
 0x208   : > { %v2523_v3 = vmul.f32 %v7317_v28, %v2522_v10  ;;  %4507 = vrsqrt.f32 %v7321_v11  ;;  %v7352_v9 = vsub.f32 %v6931_v60, %v6083_v30  ;;  %v7361_v57 = vsub.f32 %v6966_v14, %v6088_v19  ;;  %vm2529_vm14 = vmor %vm2527_vm9, %vm2528_vm11 }
 0x209   : > { %v332_v63 = vsub.f32 %v300_v49, %v330_v18  ;;  %v2551_v55 = vmul.f32 %v7323_v4, %v2550_v43  ;;  %4509 = vrsqrt.f32 %v7344_v50  ;;  %v2622_v52 = vmul.f32 %v7337_v31, %v7337_v31 }
 0x20a   : > { %v2524_v61 = vmul.f32 0.5, %v2523_v3  ;;  %vm2556_vm12 = vweird.f32 %v7323_v4  ;;  %vm2009_vm13 = vweird.f32 %v7311_v58  ;;  %v1842_v21 = vmul.f32 %v7352_v9, %v7352_v9 }
 0x20b   : > { %v7355_v29 = vpop.eup %4501  ;;  %v7357_v46 = vmul.f32 %v332_v63, %v332_v63  ;;  %v2552_v44 = vmul.f32 0.5, %v2551_v55  ;;  %v1870_v49 = vmul.f32 %v7361_v57, %v7361_v57  ;;  %v7388_v55 = vadd.f32 0.81, %v2622_v52  ;;  %vm2557_vm15 = vmor %vm2555_vm10, %vm2556_vm12 }
 0x20c   : > { %v4504_v45 = vpop.eup %4503  ;;  %v2525_v51 = vsub.f32 1.5, %v2524_v61  ;;  %v2004_v60 = vmul.f32 %v7355_v29, %v7311_v58  ;;  %v7378_v3 = vadd.f32 0.81, %v1842_v21  ;;  %vm2010_vm0 = vweird.f32 %v7355_v29 }
 0x20d   : > { %v4506_v0 = vpop.eup %4505  ;;  %v1903_v27 = vmul.f32 %v4504_v45, %v1897_v2  ;;  %v336_v14 = vadd.f32 0.1, %v7357_v46  ;;  %v2553_v53 = vsub.f32 1.5, %v2552_v44  ;;  %v7409_v21 = vadd.f32 0.81, %v1870_v49  ;;  %vm7424_vm3 = vmor %vm2009_vm13, %vm2010_vm0 }
 0x20e   : > { %v7374_v39 = vpop.eup %4507  ;;  %v1827_v10 = vmul.f32 %v4506_v0, %v1821_v13  ;;  %v2526_v18 = vmul.f32 %v7317_v28, %v2525_v51  ;;  %v2005_v43 = vmul.f32 %v7355_v29, %v2004_v60  ;;  %v7390_v13 = vld [vmem:[#allocation2 + $0x3] sm:$0xff]  ;;  %4511 = vrsqrt.f32 %v7378_v3 }
 0x20f   : > { %1907 = vrot.lane.b32.xlu1 %v1903_v27, %s5043_s23  ;;  %v2554_v2 = vmul.f32 %v7323_v4, %v2553_v53  ;;  %v2032_v63 = vmul.f32 %v7374_v39, %v7321_v11  ;;  %v7394_v61 = vsub.f32 %v7390_v13, %v5227_v37  ;;  %v7396_v44 = vpop.eup %4509  ;;  %4513 = vrcp.f32 %v336_v14 }
 0x210   : > { %1831 = vrot.lane.b32.xlu2 %v1827_v10, %s5042_s30  ;;  %v2530_v24 = vsel %vm2529_vm14, %v7317_v28, %v2526_v18  ;;  %v2006_v45 = vmul.f32 0.5, %v2005_v43  ;;  %v2608_v33 = vmul.f32 %v7396_v44, %v7344_v50  ;;  %vm2037_vm1 = vweird.f32 %v7321_v11  ;;  %v7431_v10 = vld [vmem:[#allocation3 + $0x3] sm:$0xff] }
 0x211   : > { %v2541_v52 = vmul.f32 %v2530_v24, %v7182_v12  ;;  %v2558_v51 = vsel %vm2557_vm15, %v7323_v4, %v2554_v2  ;;  %v2033_v60 = vmul.f32 %v7374_v39, %v2032_v63  ;;  %vm2038_vm2 = vweird.f32 %v7374_v39 }
 0x212   : > { %v2569_v28 = vmul.f32 %v2558_v51, %v7237_v5  ;;  %v2007_v0 = vsub.f32 1.5, %v2006_v45  ;;  %4515 = vrsqrt.f32 %v7409_v21  ;;  %v2609_v53 = vmul.f32 %v7396_v44, %v2608_v33  ;;  %vm7446_vm5 = vmor %vm2037_vm1, %vm2038_vm2  ;;  %v426_v5 = vpop.permute.xlu0 %425 }
 0x213   : > { %v2034_v27 = vmul.f32 0.5, %v2033_v60  ;;  %4517 = vrsqrt.f32 %v7388_v55  ;;  %vm2613_vm4 = vweird.f32 %v7344_v50  ;;  %v2141_v49 = vmul.f32 %v7394_v61, %v7394_v61 }
 0x214   : > { %v2571_v12 = vsub.f32 %v2541_v52, %v2569_v28  ;;  %v2008_v4 = vmul.f32 %v7355_v29, %v2007_v0  ;;  %v7435_v18 = vsub.f32 %v7431_v10, %v5224_v36  ;;  %v7437_v43 = vpop.eup %4511  ;;  %v2610_v24 = vmul.f32 0.5, %v2609_v53 }
 0x215   : > { %v2035_v14 = vsub.f32 1.5, %v2034_v27  ;;  %v7452_v45 = vsub.f32 %v7390_v13, %v10378_v7  ;;  %v1856_v51 = vmul.f32 %v7437_v43, %v7378_v3  ;;  %vm1861_vm6 = vweird.f32 %v7378_v3 }
 0x216   : > { %v2573_v2 = vmul.f32 %v2571_v12, %v2571_v12  ;;  %v2012_v58 = vsel %vm7424_vm3, %v7355_v29, %v2008_v4  ;;  %vm2614_vm7 = vweird.f32 %v7396_v44  ;;  %v4514_v29 = vpop.eup %4513  ;;  %v2611_v28 = vsub.f32 1.5, %v2610_v24 }
 0x217   : > { %v2036_v52 = vmul.f32 %v7374_v39, %v2035_v14  ;;  %v2014_v60 = vmul.f32 %v2012_v58, %v7279_v8  ;;  %v7460_v0 = vadd.f32 0.81, %v2141_v49  ;;  %v1857_v12 = vmul.f32 %v7437_v43, %v1856_v51  ;;  %vm7487_vm11 = vmor %vm2613_vm4, %vm2614_vm7 }
 0x218   : > { %v2575_v11 = vadd.f32 0.1, %v2573_v2  ;;  %v4516_v33 = vpop.eup %4515  ;;  %vm2641_vm8 = vweird.f32 %v7388_v55  ;;  %v2169_v4 = vmul.f32 %v7435_v18, %v7435_v18  ;;  %vm1889_vm9 = vweird.f32 %v7409_v21 }
 0x219   : > { %v2040_v27 = vsel %vm7446_vm5, %v7374_v39, %v2036_v52  ;;  %v4518_v53 = vpop.eup %4517  ;;  %v1884_v14 = vmul.f32 %v4516_v33, %v7409_v21  ;;  %v2065_v49 = vmul.f32 %v7452_v45, %v7452_v45  ;;  %v340_v39 = vmul.f32 %v4514_v29, %v7357_v46 }
 0x21a   : > { %4519 = vrcp.f32 %v2575_v11  ;;  %v2042_v8 = vmul.f32 %v2040_v27, %v7295_v6  ;;  %v1858_v58 = vmul.f32 0.5, %v1857_v12  ;;  %v2612_v63 = vmul.f32 %v7396_v44, %v2611_v28 }
 0x21b   : > { %v2636_v24 = vmul.f32 %v4518_v53, %v7388_v55  ;;  %vm1862_vm10 = vweird.f32 %v7437_v43  ;;  %v1885_v51 = vmul.f32 %v4516_v33, %v1884_v14  ;;  %4521 = vrsqrt.f32 %v7460_v0 }
 0x21c   : > { %v2044_v52 = vsub.f32 %v2014_v60, %v2042_v8  ;;  %v7479_v6 = vadd.f32 %v426_v5, %v340_v39  ;;  %v1859_v11 = vsub.f32 1.5, %v1858_v58  ;;  %v7481_v7 = vadd.f32 0.81, %v2169_v4  ;;  %vm7502_vm13 = vmor %vm1861_vm6, %vm1862_vm10 }
 0x21d   : > { %v2637_v27 = vmul.f32 %v4518_v53, %v2636_v24  ;;  %v1886_v37 = vmul.f32 0.5, %v1885_v51  ;;  %vm2642_vm12 = vweird.f32 %v4518_v53  ;;  %v7491_v29 = vadd.f32 0.81, %v2065_v49 }
 0x21e   : > { %v2046_v36 = vmul.f32 %v2044_v52, %v2044_v52  ;;  %v1860_v60 = vmul.f32 %v7437_v43, %v1859_v11  ;;  %v2616_v28 = vsel %vm7487_vm11, %v7396_v44, %v2612_v63  ;;  %4523 = vrsqrt.f32 %v7481_v7  ;;  %vm7520_vm15 = vmor %vm2641_vm8, %vm2642_vm12 }
 0x21f   : > { %v2638_v12 = vmul.f32 0.5, %v2637_v27  ;;  %v1887_v8 = vsub.f32 1.5, %v1886_v37  ;;  %vm1890_vm14 = vweird.f32 %v4516_v33  ;;  %4525 = vrsqrt.f32 %v7491_v29 }
 0x220   : > { %v4520_v4 = vpop.eup %4519  ;;  %v2048_v5 = vadd.f32 0.1, %v2046_v36  ;;  %v1864_v44 = vsel %vm7502_vm13, %v7437_v43, %v1860_v60  ;;  %v7512_v39 = vsub.f32 %v7431_v10, %v5351_v25  ;;  %v2618_v63 = vmul.f32 %v2616_v28, %v7299_v20  ;;  %vm1891_vm0 = vmor %vm1889_vm9, %vm1890_vm14 }
 0x221   : > { %v2579_v14 = vmul.f32 %v4520_v4, %v2573_v2  ;;  %v2639_v49 = vsub.f32 1.5, %v2638_v12  ;;  %v7514_v58 = vpop.eup %4521  ;;  %v1888_v3 = vmul.f32 %v4516_v33, %v1887_v8  ;;  %v7526_v43 = vsub.f32 %v7155_v48, %v5492_v16 }
 0x222   : > { %4527 = vrcp.f32 %v2048_v5  ;;  %v2146_v20 = vmul.f32 %v7514_v58, %v7460_v0  ;;  %vm2151_vm1 = vweird.f32 %v7460_v0  ;;  %vm2179_vm2 = vweird.f32 %v7481_v7  ;;  %v7559_v5 = vld [vmem:[#allocation2 + $0xb] sm:$0xff] }
 0x223   : > { %2583 = vrot.lane.b32.xlu0 %v2579_v14, %s5039_s29  ;;  %v2640_v2 = vmul.f32 %v4518_v53, %v2639_v49  ;;  %v2093_v55 = vmul.f32 %v7512_v39, %v7512_v39  ;;  %v1866_v24 = vmul.f32 %v1864_v44, %v7352_v9  ;;  %v1892_v48 = vsel %vm1891_vm0, %v4516_v33, %v1888_v3 }
 0x224   : > { %vm2152_vm3 = vweird.f32 %v7514_v58  ;;  %v2745_v21 = vmul.f32 %v7526_v43, %v7526_v43  ;;  %v4524_v52 = vpop.eup %4523  ;;  %v1894_v51 = vmul.f32 %v1892_v48, %v7361_v57  ;;  %v2147_v27 = vmul.f32 %v7514_v58, %v2146_v20 }
 0x225   : > { %v2644_v11 = vsel %vm7520_vm15, %v4518_v53, %v2640_v2  ;;  %v7545_v46 = vadd.f32 0.81, %v2093_v55  ;;  %v7547_v60 = vpop.eup %4525  ;;  %v2174_v33 = vmul.f32 %v4524_v52, %v7481_v7  ;;  %v7555_v12 = vsub.f32 %v7214_v17, %v5234_v40  ;;  %vm7577_vm6 = vmor %vm2151_vm1, %vm2152_vm3 }
 0x226   : > { %v2646_v9 = vmul.f32 %v2644_v11, %v7337_v31  ;;  %v7551_v28 = vadd.f32 0.81, %v2745_v21  ;;  %v1896_v57 = vsub.f32 %v1866_v24, %v1894_v51  ;;  %v2148_v4 = vmul.f32 0.5, %v2147_v27  ;;  %v676_v24 = vpop.permute.xlu1 %675  ;;  %v514_v27 = vpop.permute.xlu0 %513 }
 0x227   : > { %v2070_v53 = vmul.f32 %v7547_v60, %v7491_v29  ;;  %v7563_v50 = vsub.f32 %v7559_v5, %v5563_v1  ;;  %v2175_v14 = vmul.f32 %v4524_v52, %v2174_v33  ;;  %vm2180_vm4 = vweird.f32 %v4524_v52 }
 0x228   : > { %v4528_v31 = vpop.eup %4527  ;;  %v2648_v8 = vsub.f32 %v2618_v63, %v2646_v9  ;;  %4529 = vrsqrt.f32 %v7545_v46  ;;  %v1898_v17 = vmul.f32 %v1896_v57, %v1896_v57  ;;  %v2149_v49 = vsub.f32 1.5, %v2148_v4  ;;  %vm7592_vm7 = vmor %vm2179_vm2, %vm2180_vm4 }
 0x229   : > { %v2052_v44 = vmul.f32 %v4528_v31, %v2046_v36  ;;  %v2071_v3 = vmul.f32 %v7547_v60, %v2070_v53  ;;  %v2176_v2 = vmul.f32 0.5, %v2175_v14  ;;  %vm2076_vm5 = vweird.f32 %v7547_v60  ;;  %v590_v53 = vpop.permute.xlu2 %589 }
 0x22a   : > { %v2650_v37 = vmul.f32 %v2648_v8, %v2648_v8  ;;  %4531 = vrsqrt.f32 %v7551_v28  ;;  %v1900_v20 = vadd.f32 0.1, %v1898_v17  ;;  %v2150_v63 = vmul.f32 %v7514_v58, %v2149_v49 }
 0x22b   : > { %2057 = vrot.lane.b32.xlu1 %v2052_v44, %s5039_s29  ;;  %v2072_v55 = vmul.f32 0.5, %v2071_v3  ;;  %v2773_v36 = vmul.f32 %v7555_v12, %v7555_v12  ;;  %v2177_v51 = vsub.f32 1.5, %v2176_v2  ;;  %v7582_v11 = vadd.f32 %v676_v24, %v7340_v23 }
 0x22c   : > { %v2652_v48 = vadd.f32 0.1, %v2650_v37  ;;  %v2218_v9 = vmul.f32 %v7563_v50, %v7563_v50  ;;  %4533 = vrcp.f32 %v1900_v20  ;;  %v2154_v33 = vsel %vm7577_vm6, %v7514_v58, %v2150_v63 }
 0x22d   : > { %v2073_v57 = vsub.f32 1.5, %v2072_v55  ;;  %v518_v23 = vadd.f32 %v514_v27, %v7479_v6  ;;  %v2178_v31 = vmul.f32 %v4524_v52, %v2177_v51  ;;  %vm2075_vm8 = vweird.f32 %v7491_v29 }
 0x22e   : > { %v4530_v4 = vpop.eup %4529  ;;  %4535 = vrcp.f32 %v2652_v48  ;;  %v7598_v8 = vadd.f32 0.81, %v2773_v36  ;;  %v2165_v58 = vmul.f32 %v2154_v33, %v7394_v61  ;;  %vm7611_vm9 = vmor %vm2075_vm8, %vm2076_vm5  ;;  %v7616_v61 = vadd.f32 0.81, %v2218_v9  ;;  %v7628_v36 = vld [vmem:[#allocation3 + $0xb] sm:$0xff] }
 0x22f   : > { %v2074_v14 = vmul.f32 %v7547_v60, %v2073_v57  ;;  %v2098_v7 = vmul.f32 %v4530_v4, %v7545_v46  ;;  %v7603_v44 = vadd.f32 %v590_v53, %v518_v23  ;;  %v2182_v6 = vsel %vm7592_vm7, %v4524_v52, %v2178_v31 }
 0x230   : > { %v7605_v49 = vpop.eup %4531  ;;  %4537 = vrsqrt.f32 %v7598_v8  ;;  %v2193_v29 = vmul.f32 %v2182_v6, %v7435_v18  ;;  %vm2103_vm10 = vweird.f32 %v7545_v46  ;;  %vm2104_vm11 = vweird.f32 %v4530_v4 }
 0x231   : > { %v2078_v2 = vsel %vm7611_vm9, %v7547_v60, %v2074_v14  ;;  %v2099_v20 = vmul.f32 %v4530_v4, %v2098_v7  ;;  %v2750_v52 = vmul.f32 %v7605_v49, %v7551_v28  ;;  %vm2755_vm12 = vweird.f32 %v7551_v28  ;;  %vm2105_vm13 = vmor %vm2103_vm10, %vm2104_vm11 }
 0x232   : > { %4539 = vrsqrt.f32 %v7616_v61  ;;  %v4534_v63 = vpop.eup %4533  ;;  %v2195_v55 = vsub.f32 %v2165_v58, %v2193_v29  ;;  %v7632_v60 = vsub.f32 %v7628_v36, %v5566_v59  ;;  %v2089_v51 = vmul.f32 %v2078_v2, %v7452_v45 }
 0x233   : > { %v2100_v24 = vmul.f32 0.5, %v2099_v20  ;;  %v2751_v18 = vmul.f32 %v7605_v49, %v2750_v52  ;;  %v1904_v21 = vmul.f32 %v4534_v63, %v1898_v17  ;;  %v7637_v27 = vsub.f32 %v7559_v5, %v5241_v42 }
 0x234   : > { %v4536_v48 = vpop.eup %4535  ;;  %v7641_v9 = vsub.f32 %v7628_v36, %v5230_v38  ;;  %v2197_v0 = vmul.f32 %v2195_v55, %v2195_v55  ;;  %v2246_v17 = vmul.f32 %v7632_v60, %v7632_v60  ;;  %v7652_v58 = vsub.f32 %v7431_v10, %v5867_v47 }
 0x235   : > { %v2656_v33 = vmul.f32 %v4536_v48, %v2650_v37  ;;  %v2101_v57 = vsub.f32 1.5, %v2100_v24  ;;  %v2752_v23 = vmul.f32 0.5, %v2751_v18  ;;  %1909 = vrot.lane.b32.xlu2 %v1904_v21, %s5043_s23  ;;  %v2142_v45 = vmul.f32 %v7637_v27, %v7637_v27 }
 0x236   : > { %v4538_v53 = vpop.eup %4537  ;;  %v2170_v31 = vmul.f32 %v7641_v9, %v7641_v9  ;;  %v2199_v37 = vadd.f32 0.1, %v2197_v0  ;;  %vm2756_vm14 = vweird.f32 %v7605_v49  ;;  %v7662_v29 = vadd.f32 0.81, %v2246_v17 }
 0x237   : > { %2661 = vrot.lane.b32.xlu0 %v2656_v33, %s5040_s3  ;;  %v2102_v14 = vmul.f32 %v4530_v4, %v2101_v57  ;;  %v2753_v7 = vsub.f32 1.5, %v2752_v23  ;;  %v2778_v6 = vmul.f32 %v4538_v53, %v7598_v8  ;;  %v7664_v2 = vadd.f32 0.81, %v2142_v45  ;;  %vm7677_vm15 = vmor %vm2755_vm12, %vm2756_vm14 }
 0x238   : > { %v7656_v3 = vpop.eup %4539  ;;  %v7666_v20 = vadd.f32 0.81, %v2170_v31  ;;  %4541 = vrcp.f32 %v2199_v37  ;;  %v2397_v46 = vmul.f32 %v7652_v58, %v7652_v58  ;;  %vm2783_vm0 = vweird.f32 %v7598_v8 }
 0x239   : > { %v2106_v52 = vsel %vm2105_vm13, %v4530_v4, %v2102_v14  ;;  %v2754_v63 = vmul.f32 %v7605_v49, %v2753_v7  ;;  %v2779_v55 = vmul.f32 %v4538_v53, %v2778_v6  ;;  %v2232_v18 = vmul.f32 %v7656_v3, %v7616_v61 }
 0x23a   : > { %v2117_v24 = vmul.f32 %v2106_v52, %v7512_v39  ;;  %4543 = vrsqrt.f32 %v7662_v29  ;;  %vm2784_vm1 = vweird.f32 %v4538_v53  ;;  %v7690_v28 = vsub.f32 %v7273_v22, %v5786_v32 }
 0x23b   : > { %v2780_v4 = vmul.f32 0.5, %v2779_v55  ;;  %4545 = vrsqrt.f32 %v7664_v2  ;;  %v2758_v21 = vsel %vm7677_vm15, %v7605_v49, %v2754_v63  ;;  %v2233_v33 = vmul.f32 %v7656_v3, %v2232_v18  ;;  %vm7692_vm2 = vmor %vm2783_vm0, %vm2784_vm1 }
 0x23c   : > { %v2119_v39 = vsub.f32 %v2089_v51, %v2117_v24  ;;  %4547 = vrsqrt.f32 %v7666_v20  ;;  %vm2237_vm3 = vweird.f32 %v7616_v61  ;;  %v7697_v51 = vadd.f32 0.81, %v2397_v46 }
 0x23d   : > { %v2781_v57 = vsub.f32 1.5, %v2780_v4  ;;  %v2234_v17 = vmul.f32 0.5, %v2233_v33  ;;  %v2769_v45 = vmul.f32 %v2758_v21, %v7526_v43  ;;  %vm2238_vm4 = vweird.f32 %v7656_v3 }
 0x23e   : > { %v2121_v23 = vmul.f32 %v2119_v39, %v2119_v39  ;;  %v4542_v49 = vpop.eup %4541  ;;  %v2822_v37 = vmul.f32 %v7690_v28, %v7690_v28  ;;  %vm2265_vm5 = vweird.f32 %v7662_v29  ;;  %vm2189_vm6 = vweird.f32 %v7666_v20  ;;  %vm2239_vm8 = vmor %vm2237_vm3, %vm2238_vm4 }
 0x23f   : > { %v2782_v31 = vmul.f32 %v4538_v53, %v2781_v57  ;;  %v2203_v7 = vmul.f32 %v4542_v49, %v2197_v0  ;;  %v2235_v52 = vsub.f32 1.5, %v2234_v17  ;;  %4549 = vrsqrt.f32 %v7697_v51 }
 0x240   : > { %v7703_v14 = vpop.eup %4543  ;;  %v2123_v6 = vadd.f32 0.1, %v2121_v23  ;;  %vm2161_vm7 = vweird.f32 %v7664_v2  ;;  %v7713_v24 = vadd.f32 0.81, %v2822_v37  ;;  %v7717_v0 = vsub.f32 %v7330_v62, %v5803_v26 }
 0x241   : > { %v4546_v63 = vpop.eup %4545  ;;  %v2786_v43 = vsel %vm7692_vm2, %v4538_v53, %v2782_v31  ;;  %v2260_v55 = vmul.f32 %v7703_v14, %v7662_v29  ;;  %2207 = vrot.lane.b32.xlu1 %v2203_v7, %s5038_s17  ;;  %v2236_v46 = vmul.f32 %v7656_v3, %v2235_v52  ;;  %v7731_v39 = vsub.f32 %v7390_v13, %v5631_v15 }
 0x242   : > { %4551 = vrcp.f32 %v2123_v6  ;;  %v2797_v18 = vmul.f32 %v2786_v43, %v7555_v12  ;;  %v2156_v53 = vmul.f32 %v4546_v63, %v7664_v2  ;;  %v4548_v48 = vpop.eup %4547  ;;  %v7735_v12 = vsub.f32 %v7431_v10, %v5672_v41 }
 0x243   : > { %v2261_v4 = vmul.f32 %v7703_v14, %v2260_v55  ;;  %4553 = vrsqrt.f32 %v7713_v24  ;;  %v2240_v33 = vsel %vm2239_vm8, %v7656_v3, %v2236_v46  ;;  %v2184_v8 = vmul.f32 %v4548_v48, %v7666_v20  ;;  %v10423_v3 = vld [vmem:[#allocation31_spill] sm:$0xff] }
 0x244   : > { %v2799_v21 = vsub.f32 %v2769_v45, %v2797_v18  ;;  %v2157_v57 = vmul.f32 %v4546_v63, %v2156_v53  ;;  %vm2266_vm9 = vweird.f32 %v7703_v14  ;;  %vm2162_vm10 = vweird.f32 %v4546_v63 }
 0x245   : > { %v2262_v61 = vmul.f32 0.5, %v2261_v4  ;;  %v2850_v17 = vmul.f32 %v7717_v0, %v7717_v0  ;;  %v7742_v49 = vpop.eup %4549  ;;  %v2242_v37 = vmul.f32 %v2240_v33, %v7563_v50  ;;  %v2185_v7 = vmul.f32 %v4548_v48, %v2184_v8  ;;  %vm2267_vm12 = vmor %vm2265_vm5, %vm2266_vm9 }
 0x246   : > { %v2801_v31 = vmul.f32 %v2799_v21, %v2799_v21  ;;  %v2158_v10 = vmul.f32 0.5, %v2157_v57  ;;  %v7749_v52 = vsub.f32 %v7390_v13, %v10423_v3  ;;  %v2402_v43 = vmul.f32 %v7742_v49, %v7697_v51  ;;  %v7762_v13 = vpop.permute.xlu2 %677  ;;  %vm2163_vm14 = vmor %vm2161_vm7, %vm2162_vm10 }
 0x247   : > { %v2263_v45 = vsub.f32 1.5, %v2262_v61  ;;  %v7745_v6 = vadd.f32 0.81, %v2850_v17  ;;  %v2186_v53 = vmul.f32 0.5, %v2185_v7  ;;  %vm2190_vm11 = vweird.f32 %v4548_v48 }
 0x248   : > { %v4552_v55 = vpop.eup %4551  ;;  %v2803_v18 = vadd.f32 0.1, %v2801_v31  ;;  %v2159_v46 = vsub.f32 1.5, %v2158_v10  ;;  %vm2407_vm13 = vweird.f32 %v7697_v51  ;;  %vm7774_vm15 = vmor %vm2189_vm6, %vm2190_vm11  ;;  %v2369_v61 = vmul.f32 %v7749_v52, %v7749_v52 }
 0x249   : > { %v7753_v4 = vpop.eup %4553  ;;  %v2127_v50 = vmul.f32 %v4552_v55, %v2121_v23  ;;  %v2264_v21 = vmul.f32 %v7703_v14, %v2263_v45  ;;  %4555 = vrsqrt.f32 %v7745_v6  ;;  %v2187_v23 = vsub.f32 1.5, %v2186_v53 }
 0x24a   : > { %4557 = vrcp.f32 %v2803_v18  ;;  %v2160_v33 = vmul.f32 %v4546_v63, %v2159_v46  ;;  %v2836_v57 = vmul.f32 %v7753_v4, %v7713_v24  ;;  %v2403_v2 = vmul.f32 %v7742_v49, %v2402_v43 }
 0x24b   : > { %2131 = vrot.lane.b32.xlu2 %v2127_v50, %s5040_s3  ;;  %v2268_v29 = vsel %vm2267_vm12, %v7703_v14, %v2264_v21  ;;  %vm2408_vm0 = vweird.f32 %v7742_v49  ;;  %v2188_v7 = vmul.f32 %v4548_v48, %v2187_v23  ;;  %v7785_v20 = vadd.f32 0.81, %v2369_v61 }
 0x24c   : > { %v2270_v17 = vmul.f32 %v2268_v29, %v7632_v60  ;;  %v2164_v10 = vsel %vm2163_vm14, %v4546_v63, %v2160_v33  ;;  %v2837_v14 = vmul.f32 %v7753_v4, %v2836_v57  ;;  %v2404_v55 = vmul.f32 0.5, %v2403_v2  ;;  %vm7805_vm3 = vmor %vm2407_vm13, %vm2408_vm0 }
 0x24d   : > { %v2166_v45 = vmul.f32 %v2164_v10, %v7637_v27  ;;  %v2293_v18 = vmul.f32 %v7731_v39, %v7731_v39  ;;  %v2192_v43 = vsel %vm7774_vm15, %v4548_v48, %v2188_v7  ;;  %v2321_v60 = vmul.f32 %v7735_v12, %v7735_v12 }
 0x24e   : > { %v2272_v46 = vsub.f32 %v2242_v37, %v2270_v17  ;;  %v2838_v53 = vmul.f32 0.5, %v2837_v14  ;;  %v2194_v50 = vmul.f32 %v2192_v43, %v7641_v9  ;;  %vm2841_vm1 = vweird.f32 %v7713_v24  ;;  %v766_v61 = vpop.permute.xlu2 %765  ;;  %v7823_v14 = vld [vmem:[#allocation2 + $0x5] sm:$0xff]  ;;  %v764_v37 = vpop.permute.xlu1 %763 }
 0x24f   : > { %v7793_v63 = vpop.eup %4555  ;;  %4559 = vrsqrt.f32 %v7785_v20  ;;  %v2405_v27 = vsub.f32 1.5, %v2404_v55  ;;  %vm2842_vm2 = vweird.f32 %v7753_v4  ;;  %v7810_v8 = vadd.f32 0.81, %v2293_v18  ;;  %v7827_v18 = vld [vmem:[#allocation3 + $0x5] sm:$0xff] }
 0x250   : > { %v4558_v21 = vpop.eup %4557  ;;  %v2274_v33 = vmul.f32 %v2272_v46, %v2272_v46  ;;  %v2839_v23 = vsub.f32 1.5, %v2838_v53  ;;  %v2864_v48 = vmul.f32 %v7793_v63, %v7745_v6  ;;  %v2196_v57 = vsub.f32 %v2166_v45, %v2194_v50  ;;  %vm2843_vm4 = vmor %vm2841_vm1, %vm2842_vm2 }
 0x251   : > { %v2807_v9 = vmul.f32 %v4558_v21, %v2801_v31  ;;  %v2406_v29 = vmul.f32 %v7742_v49, %v2405_v27  ;;  %v7814_v7 = vadd.f32 0.81, %v2321_v60  ;;  %4561 = vrsqrt.f32 %v7810_v8  ;;  %v10428_v60 = vld [vmem:[#allocation17_spill] sm:$0xff]  ;;  %v10429_v27 = vld [vmem:[#allocation24_spill] sm:$0xff] }
 0x252   : > { %v2276_v2 = vadd.f32 0.1, %v2274_v33  ;;  %v2840_v17 = vmul.f32 %v7753_v4, %v2839_v23  ;;  %v2865_v10 = vmul.f32 %v7793_v63, %v2864_v48  ;;  %v2198_v51 = vmul.f32 %v2196_v57, %v2196_v57 }
 0x253   : > { %2811 = vrot.lane.b32.xlu0 %v2807_v9, %s5041_s4  ;;  %v2410_v31 = vsel %vm7805_vm3, %v7742_v49, %v2406_v29  ;;  %vm2869_vm5 = vweird.f32 %v7745_v6  ;;  %vm2870_vm6 = vweird.f32 %v7793_v63  ;;  %vm2379_vm7 = vweird.f32 %v7785_v20 }
 0x254   : > { %4563 = vrcp.f32 %v2276_v2  ;;  %v2844_v45 = vsel %vm2843_vm4, %v7753_v4, %v2840_v17  ;;  %v2866_v55 = vmul.f32 0.5, %v2865_v10  ;;  %v2200_v24 = vadd.f32 0.1, %v2198_v51  ;;  %vm2871_vm8 = vmor %vm2869_vm5, %vm2870_vm6 }
 0x255   : > { %v7829_v46 = vpop.eup %4559  ;;  %v7833_v43 = vmul.f32 %v2410_v31, %v7652_v58  ;;  %4565 = vrsqrt.f32 %v7814_v7  ;;  %v2846_v49 = vmul.f32 %v2844_v45, %v7690_v28  ;;  %v7842_v50 = vsub.f32 %v7823_v14, %v10428_v60 }
 0x256   : > { %v2867_v53 = vsub.f32 1.5, %v2866_v55  ;;  %v2374_v4 = vmul.f32 %v7829_v46, %v7785_v20  ;;  %4567 = vrcp.f32 %v2200_v24  ;;  %v7846_v21 = vsub.f32 %v7827_v18, %v10429_v27  ;;  %v854_v6 = vpop.permute.xlu2 %853 }
 0x257   : > { %v7850_v58 = vsub.f32 %v7273_v22, %v5220_v34  ;;  %v7854_v28 = vsub.f32 %v7330_v62, %v5276_v56  ;;  %v682_v9 = vadd.f32 %v7762_v13, %v7603_v44  ;;  %v3045_v57 = vmul.f32 %v7842_v50, %v7842_v50  ;;  %v4562_v29 = vpop.eup %4561 }
 0x258   : > { %v2868_v23 = vmul.f32 %v7793_v63, %v2867_v53  ;;  %v2375_v48 = vmul.f32 %v7829_v46, %v2374_v4  ;;  %vm2380_vm9 = vweird.f32 %v7829_v46  ;;  %vm2303_vm10 = vweird.f32 %v7810_v8 }
 0x259   : > { %vm2331_vm11 = vweird.f32 %v7814_v7  ;;  %v7870_v22 = vadd.f32 %v764_v37, %v7582_v11  ;;  %v3073_v62 = vmul.f32 %v7846_v21, %v7846_v21  ;;  %v2298_v17 = vmul.f32 %v4562_v29, %v7810_v8  ;;  %vm2381_vm13 = vmor %vm2379_vm7, %vm2380_vm9 }
 0x25a   : > { %v4564_v44 = vpop.eup %4563  ;;  %v2872_v13 = vsel %vm2871_vm8, %v7793_v63, %v2868_v23  ;;  %v2376_v2 = vmul.f32 0.5, %v2375_v48  ;;  %v2518_v10 = vmul.f32 %v7850_v58, %v7850_v58  ;;  %v770_v24 = vadd.f32 %v766_v61, %v682_v9 }
 0x25b   : > { %v4566_v31 = vpop.eup %4565  ;;  %v2280_v45 = vmul.f32 %v4564_v44, %v2274_v33  ;;  %v2874_v55 = vmul.f32 %v2872_v13, %v7717_v0  ;;  %v7879_v11 = vadd.f32 0.81, %v3045_v57  ;;  %v2299_v4 = vmul.f32 %v4562_v29, %v2298_v17  ;;  %v7888_v0 = vld [vmem:[#allocation2 + $0xd] sm:$0xff] }
 0x25c   : > { %v2377_v53 = vsub.f32 1.5, %v2376_v2  ;;  %v2326_v37 = vmul.f32 %v4566_v31, %v7814_v7  ;;  %v2546_v63 = vmul.f32 %v7854_v28, %v7854_v28  ;;  %v4568_v23 = vpop.eup %4567  ;;  %vm2304_vm12 = vweird.f32 %v4562_v29 }
 0x25d   : > { %2285 = vrot.lane.b32.xlu1 %v2280_v45, %s5041_s4  ;;  %v2876_v48 = vsub.f32 %v2846_v49, %v2874_v55  ;;  %v7885_v56 = vadd.f32 %v854_v6, %v770_v24  ;;  %4569 = vrsqrt.f32 %v7879_v11  ;;  %v2204_v33 = vmul.f32 %v4568_v23, %v2198_v51  ;;  %vm2305_vm15 = vmor %vm2303_vm10, %vm2304_vm12 }
 0x25e   : > { %v2378_v61 = vmul.f32 %v7829_v46, %v2377_v53  ;;  %v2300_v9 = vmul.f32 0.5, %v2299_v4  ;;  %v2327_v57 = vmul.f32 %v4566_v31, %v2326_v37  ;;  %vm2332_vm14 = vweird.f32 %v4566_v31 }
 0x25f   : > { %v2878_v44 = vmul.f32 %v2876_v48, %v2876_v48  ;;  %v7895_v49 = vadd.f32 0.81, %v3073_v62  ;;  %v7897_v13 = vadd.f32 0.81, %v2518_v10  ;;  %2209 = vrot.lane.b32.xlu2 %v2204_v33, %s5038_s17  ;;  %v7903_v6 = vsub.f32 %v7888_v0, %v5222_v35  ;;  %vm2333_vm0 = vmor %vm2331_vm11, %vm2332_vm14 }
 0x260   : > { %v2382_v2 = vsel %vm2381_vm13, %v7829_v46, %v2378_v61  ;;  %v2301_v51 = vsub.f32 1.5, %v2300_v9  ;;  %v2328_v17 = vmul.f32 0.5, %v2327_v57  ;;  %v7907_v20 = vadd.f32 0.81, %v2546_v63 }
 0x261   : > { %v2880_v45 = vadd.f32 0.1, %v2878_v44  ;;  %v2393_v55 = vmul.f32 %v2382_v2, %v7749_v52  ;;  %4571 = vrsqrt.f32 %v7895_v49  ;;  %v3122_v52 = vmul.f32 %v7903_v6, %v7903_v6 }
 0x262   : > { %v2302_v62 = vmul.f32 %v4562_v29, %v2301_v51  ;;  %v2329_v10 = vsub.f32 1.5, %v2328_v17  ;;  %4573 = vrsqrt.f32 %v7897_v13  ;;  %vm3055_vm1 = vweird.f32 %v7879_v11 }
 0x263   : > { %v7913_v46 = vpop.eup %4569  ;;  %4575 = vrcp.f32 %v2880_v45  ;;  %v2423_v24 = vsub.f32 %v2393_v55, %v7833_v43  ;;  %v7925_v23 = vadd.f32 0.81, %v3122_v52  ;;  %v7935_v61 = vsub.f32 %v7559_v5, %v6083_v30 }
 0x264   : > { %v2306_v53 = vsel %vm2305_vm15, %v4562_v29, %v2302_v62  ;;  %v2330_v4 = vmul.f32 %v4566_v31, %v2329_v10  ;;  %v3050_v8 = vmul.f32 %v7913_v46, %v7879_v11  ;;  %4577 = vrsqrt.f32 %v7907_v20 }
 0x265   : > { %v2425_v37 = vmul.f32 %v2423_v24, %v2423_v24  ;;  %v2317_v63 = vmul.f32 %v2306_v53, %v7731_v39  ;;  %vm3056_vm2 = vweird.f32 %v7913_v46  ;;  %vm3083_vm3 = vweird.f32 %v7895_v49 }
 0x266   : > { %v2334_v43 = vsel %vm2333_vm0, %v4566_v31, %v2330_v4  ;;  %v3051_v48 = vmul.f32 %v7913_v46, %v3050_v8  ;;  %vm2565_vm4 = vweird.f32 %v7907_v20  ;;  %v7945_v57 = vsub.f32 %v7628_v36, %v6088_v19  ;;  %v7963_v4 = vld [vmem:[#allocation2 + $0x4] sm:$0xff]  ;;  %vm7977_vm7 = vmor %vm3055_vm1, %vm3056_vm2 }
 0x267   : > { %v7929_v7 = vpop.eup %4571  ;;  %v2427_v33 = vadd.f32 0.1, %v2425_v37  ;;  %v2345_v29 = vmul.f32 %v2334_v43, %v7735_v12  ;;  %v7947_v12 = vld [vmem:[#allocation3 + $0xd] sm:$0xff]  ;;  %4579 = vrsqrt.f32 %v7925_v23  ;;  %vm2537_vm5 = vweird.f32 %v7897_v13 }
 0x268   : > { %v7937_v39 = vpop.eup %4573  ;;  %v3052_v9 = vmul.f32 0.5, %v3051_v48  ;;  %v3078_v31 = vmul.f32 %v7929_v7, %v7895_v49  ;;  %v7955_v17 = vsub.f32 %v7947_v12, %v5418_v54  ;;  %v2370_v62 = vmul.f32 %v7935_v61, %v7935_v61  ;;  %v10430_v8 = vld [vmem:[#allocation19_spill] sm:$0xff] }
 0x269   : > { %v4576_v5 = vpop.eup %4575  ;;  %4581 = vrcp.f32 %v2427_v33  ;;  %v2347_v2 = vsub.f32 %v2317_v63, %v2345_v29  ;;  %v2532_v51 = vmul.f32 %v7937_v39, %v7897_v13  ;;  %v2398_v53 = vmul.f32 %v7945_v57, %v7945_v57 }
 0x26a   : > { %v2884_v45 = vmul.f32 %v4576_v5, %v2878_v44  ;;  %v3053_v55 = vsub.f32 1.5, %v3052_v9  ;;  %v3079_v36 = vmul.f32 %v7929_v7, %v3078_v31  ;;  %v4578_v10 = vpop.eup %4577  ;;  %v7967_v63 = vsub.f32 %v7963_v4, %v10430_v8 }
 0x26b   : > { %v2349_v24 = vmul.f32 %v2347_v2, %v2347_v2  ;;  %v2533_v52 = vmul.f32 %v7937_v39, %v2532_v51  ;;  %vm3084_vm6 = vweird.f32 %v7929_v7  ;;  %v2560_v48 = vmul.f32 %v4578_v10, %v7907_v20 }
 0x26c   : > { %2889 = vrot.lane.b32.xlu0 %v2884_v45, %s5042_s30  ;;  %v3054_v44 = vmul.f32 %v7913_v46, %v3053_v55  ;;  %v3080_v43 = vmul.f32 0.5, %v3079_v36  ;;  %v7981_v31 = vadd.f32 0.81, %v2370_v62  ;;  %v3150_v5 = vmul.f32 %v7955_v17, %v7955_v17  ;;  %vm3085_vm10 = vmor %vm3083_vm3, %vm3084_vm6 }
 0x26d   : > { %v2351_v33 = vadd.f32 0.1, %v2349_v24  ;;  %v2534_v9 = vmul.f32 0.5, %v2533_v52  ;;  %v7985_v2 = vpop.eup %4579  ;;  %v2561_v55 = vmul.f32 %v4578_v10, %v2560_v48  ;;  %v7990_v36 = vadd.f32 0.81, %v2398_v53 }
 0x26e   : > { %v3058_v51 = vsel %vm7977_vm7, %v7913_v46, %v3054_v44  ;;  %v3081_v45 = vsub.f32 1.5, %v3080_v43  ;;  %vm2538_vm8 = vweird.f32 %v7937_v39  ;;  %vm2566_vm9 = vweird.f32 %v4578_v10 }
 0x26f   : > { %v4582_v11 = vpop.eup %4581  ;;  %4583 = vrcp.f32 %v2351_v33  ;;  %v2535_v19 = vsub.f32 1.5, %v2534_v9  ;;  %v2562_v8 = vmul.f32 0.5, %v2561_v55  ;;  %v3069_v54 = vmul.f32 %v3058_v51, %v7842_v50  ;;  %vm2539_vm11 = vmor %vm2537_vm5, %vm2538_vm8  ;;  %v8029_v51 = vld [vmem:[#allocation3 + $0x4] sm:$0xff] }
 0x270   : > { %v2431_v62 = vmul.f32 %v4582_v11, %v2425_v37  ;;  %v3082_v52 = vmul.f32 %v7929_v7, %v3081_v45  ;;  %4585 = vrsqrt.f32 %v7981_v31  ;;  %v3136_v53 = vmul.f32 %v7985_v2, %v7925_v23  ;;  %vm8015_vm12 = vmor %vm2565_vm4, %vm2566_vm9  ;;  %v10435_v45 = vld [vmem:[#allocation18_spill] sm:$0xff]  ;;  %v10436_v11 = vld [vmem:[#allocation25_spill] sm:$0xff] }
 0x271   : > { %v2536_v46 = vmul.f32 %v7937_v39, %v2535_v19  ;;  %4587 = vrsqrt.f32 %v7990_v36  ;;  %v2563_v50 = vsub.f32 1.5, %v2562_v8  ;;  %v8008_v44 = vadd.f32 0.81, %v3150_v5 }
 0x272   : > { %2435 = vrot.lane.b32.xlu1 %v2431_v62, %s5043_s23  ;;  %v3086_v37 = vsel %vm3085_vm10, %v7929_v7, %v3082_v52  ;;  %v3137_v48 = vmul.f32 %v7985_v2, %v3136_v53  ;;  %v2669_v13 = vmul.f32 %v7967_v63, %v7967_v63  ;;  %vm3141_vm13 = vweird.f32 %v7925_v23 }
 0x273   : > { %v3097_v49 = vmul.f32 %v3086_v37, %v7846_v21  ;;  %v2540_v43 = vsel %vm2539_vm11, %v7937_v39, %v2536_v46  ;;  %v2564_v7 = vmul.f32 %v4578_v10, %v2563_v50  ;;  %4589 = vrsqrt.f32 %v8008_v44 }
 0x274   : > { %v2542_v21 = vmul.f32 %v2540_v43, %v7850_v58  ;;  %v3138_v39 = vmul.f32 0.5, %v3137_v48  ;;  %v8024_v29 = vadd.f32 0.81, %v2669_v13  ;;  %v8033_v55 = vsub.f32 %v8029_v51, %v10435_v45 }
 0x275   : > { %v4584_v8 = vpop.eup %4583  ;;  %v3099_v33 = vsub.f32 %v3069_v54, %v3097_v49  ;;  %v2568_v5 = vsel %vm8015_vm12, %v4578_v10, %v2564_v7  ;;  %v8037_v54 = vsub.f32 %v7963_v4, %v10436_v11  ;;  %vm2389_vm14 = vweird.f32 %v7981_v31 }
 0x276   : > { %v4586_v20 = vpop.eup %4585  ;;  %v2355_v9 = vmul.f32 %v4584_v8, %v2349_v24  ;;  %v2570_v52 = vmul.f32 %v2568_v5, %v7854_v28  ;;  %vm2417_vm15 = vweird.f32 %v7990_v36  ;;  %v3139_v46 = vsub.f32 1.5, %v3138_v39 }
 0x277   : > { %v4588_v58 = vpop.eup %4587  ;;  %v3101_v62 = vmul.f32 %v3099_v33, %v3099_v33  ;;  %v2384_v24 = vmul.f32 %v4586_v20, %v7981_v31  ;;  %vm3142_vm0 = vweird.f32 %v7985_v2  ;;  %4591 = vrsqrt.f32 %v8024_v29 }
 0x278   : > { %2359 = vrot.lane.b32.xlu2 %v2355_v9, %s5042_s30  ;;  %v2412_v10 = vmul.f32 %v4588_v58, %v7990_v36  ;;  %v2572_v37 = vsub.f32 %v2542_v21, %v2570_v52  ;;  %vm3169_vm1 = vweird.f32 %v8008_v44  ;;  %v2697_v43 = vmul.f32 %v8033_v55, %v8033_v55  ;;  %vm8069_vm5 = vmor %vm3141_vm13, %vm3142_vm0  ;;  %v10441_v36 = vld [vmem:[#allocation14_spill] sm:$0xff] }
 0x279   : > { %v3103_v53 = vadd.f32 0.1, %v3101_v62  ;;  %v2385_v50 = vmul.f32 %v4586_v20, %v2384_v24  ;;  %v4590_v28 = vpop.eup %4589  ;;  %v2593_v19 = vmul.f32 %v8037_v54, %v8037_v54  ;;  %v8054_v48 = vsub.f32 %v8029_v51, %v5351_v25 }
 0x27a   : > { %v2413_v49 = vmul.f32 %v4588_v58, %v2412_v10  ;;  %v2574_v13 = vmul.f32 %v2572_v37, %v2572_v37  ;;  %v3164_v8 = vmul.f32 %v4590_v28, %v8008_v44  ;;  %vm2390_vm2 = vweird.f32 %v4586_v20 }
 0x27b   : > { %4593 = vrcp.f32 %v3103_v53  ;;  %v2386_v7 = vmul.f32 0.5, %v2385_v50  ;;  %v3140_v21 = vmul.f32 %v7985_v2, %v3139_v46  ;;  %v8058_v39 = vadd.f32 0.81, %v2697_v43  ;;  %vm2391_vm6 = vmor %vm2389_vm14, %vm2390_vm2 }
 0x27c   : > { %v2414_v33 = vmul.f32 0.5, %v2413_v49  ;;  %v2576_v9 = vadd.f32 0.1, %v2574_v13  ;;  %vm2418_vm3 = vweird.f32 %v4588_v58  ;;  %v3165_v52 = vmul.f32 %v4590_v28, %v3164_v8 }
 0x27d   : > { %v2387_v5 = vsub.f32 1.5, %v2386_v7  ;;  %v8060_v24 = vpop.eup %4591  ;;  %vm3170_vm4 = vweird.f32 %v4590_v28  ;;  %4595 = vrsqrt.f32 %v8058_v39  ;;  %v8063_v53 = vadd.f32 0.81, %v2593_v19  ;;  %vm2419_vm8 = vmor %vm2417_vm15, %vm2418_vm3 }
 0x27e   : > { %v2415_v10 = vsub.f32 1.5, %v2414_v33  ;;  %4597 = vrcp.f32 %v2576_v9  ;;  %v3166_v50 = vmul.f32 0.5, %v3165_v52  ;;  %v2674_v49 = vmul.f32 %v8060_v24, %v8024_v29  ;;  %vm8093_vm9 = vmor %vm3169_vm1, %vm3170_vm4 }
 0x27f   : > { %v2388_v37 = vmul.f32 %v4586_v20, %v2387_v5  ;;  %v3144_v19 = vsel %vm8069_vm5, %v7985_v2, %v3140_v21  ;;  %vm2679_vm7 = vweird.f32 %v8024_v29  ;;  %4599 = vrsqrt.f32 %v8063_v53 }
 0x280   : > { %v2416_v43 = vmul.f32 %v4588_v58, %v2415_v10  ;;  %v3167_v8 = vsub.f32 1.5, %v3166_v50  ;;  %v2675_v33 = vmul.f32 %v8060_v24, %v2674_v49  ;;  %v2621_v31 = vmul.f32 %v8054_v48, %v8054_v48 }
 0x281   : > { %v4594_v23 = vpop.eup %4593  ;;  %v2392_v7 = vsel %vm2391_vm6, %v4586_v20, %v2388_v37  ;;  %v4865_v20 = vld [vmem:[#allocation2 + $0x1] sm:$0xff]  ;;  %vm2680_vm10 = vweird.f32 %v8060_v24  ;;  %vm2707_vm11 = vweird.f32 %v8058_v39  ;;  %vm2603_vm0 = vweird.f32 %v8063_v53 }
 0x282   : > { %v3107_v9 = vmul.f32 %v4594_v23, %v3101_v62  ;;  %v2394_v5 = vmul.f32 %v2392_v7, %v7935_v61  ;;  %v2420_v2 = vsel %vm2419_vm8, %v4588_v58, %v2416_v43  ;;  %v8098_v52 = vsub.f32 %v4865_v20, %v10441_v36  ;;  %vm8137_vm12 = vmor %vm2679_vm7, %vm2680_vm10 }
 0x283   : > { %v2422_v10 = vmul.f32 %v2420_v2, %v7945_v57  ;;  %v3168_v37 = vmul.f32 %v4590_v28, %v3167_v8  ;;  %v2676_v46 = vmul.f32 0.5, %v2675_v33  ;;  %v8101_v50 = vadd.f32 0.81, %v2621_v31  ;;  %v4596_v62 = vpop.eup %4595  ;;  %v10442_v33 = vld [vmem:[#allocation13_spill] sm:$0xff] }
 0x284   : > { %3111 = vrot.lane.b32.xlu0 %v3107_v9, %s5039_s29  ;;  %v3146_v61 = vmul.f32 %v3144_v19, %v7903_v6  ;;  %v863_v44 = vmul.f32 %v8098_v52, %v8098_v52  ;;  %v4598_v58 = vpop.eup %4597  ;;  %v2702_v23 = vmul.f32 %v4596_v62, %v8058_v39  ;;  %v4866_v19 = vld [vmem:[#allocation3 + $0x1] sm:$0xff]  ;;  %vm2708_vm13 = vweird.f32 %v4596_v62 }
 0x285   : > { %v2424_v49 = vsub.f32 %v2394_v5, %v2422_v10  ;;  %v3172_v57 = vsel %vm8093_vm9, %v4590_v28, %v3168_v37  ;;  %v2677_v43 = vsub.f32 1.5, %v2676_v46  ;;  %v8112_v7 = vpop.eup %4599  ;;  %v2580_v8 = vmul.f32 %v4598_v58, %v2574_v13  ;;  %vm8152_vm14 = vmor %vm2707_vm11, %vm2708_vm13 }
 0x286   : > { %v3174_v6 = vmul.f32 %v3172_v57, %v7955_v17  ;;  %4601 = vrsqrt.f32 %v8101_v50  ;;  %v8117_v31 = vsub.f32 %v4866_v19, %v10442_v33  ;;  %v2703_v2 = vmul.f32 %v4596_v62, %v2702_v23 }
 0x287   : > { %v2426_v9 = vmul.f32 %v2424_v49, %v2424_v49  ;;  %v2678_v5 = vmul.f32 %v8060_v24, %v2677_v43  ;;  %v2598_v28 = vmul.f32 %v8112_v7, %v8063_v53  ;;  %2585 = vrot.lane.b32.xlu1 %v2580_v8, %s5039_s29  ;;  %v8123_v20 = vadd.f32 0.81, %v863_v44  ;;  %v8160_v8 = vld [vmem:[#allocation2 + $0xc] sm:$0xff] }
 0x288   : > { %v3176_v21 = vsub.f32 %v3146_v61, %v3174_v6  ;;  %v8127_v17 = vsub.f32 %v7823_v14, %v5492_v16  ;;  %v8131_v13 = vsub.f32 %v7827_v18, %v5234_v40  ;;  %v2704_v46 = vmul.f32 0.5, %v2703_v2 }
 0x289   : > { %v2428_v10 = vadd.f32 0.1, %v2426_v9  ;;  %v2599_v61 = vmul.f32 %v8112_v7, %v2598_v28  ;;  %v2682_v14 = vsel %vm8137_vm12, %v8060_v24, %v2678_v5  ;;  %4603 = vrsqrt.f32 %v8123_v20 }
 0x28a   : > { %v3178_v44 = vmul.f32 %v3176_v21, %v3176_v21  ;;  %v2705_v18 = vsub.f32 1.5, %v2704_v46  ;;  %v893_v29 = vmul.f32 %v8117_v31, %v8117_v31  ;;  %v3273_v24 = vmul.f32 %v8127_v17, %v8127_v17 }
 0x28b   : > { %4605 = vrcp.f32 %v2428_v10  ;;  %v2600_v58 = vmul.f32 0.5, %v2599_v61  ;;  %v3301_v23 = vmul.f32 %v8131_v13, %v8131_v13  ;;  %v8164_v6 = vsub.f32 %v8160_v8, %v5563_v1 }
 0x28c   : > { %v8148_v49 = vpop.eup %4601  ;;  %v3180_v57 = vadd.f32 0.1, %v3178_v44  ;;  %v2706_v19 = vmul.f32 %v4596_v62, %v2705_v18  ;;  %v2693_v2 = vmul.f32 %v2682_v14, %v7967_v63  ;;  %vm2604_vm15 = vweird.f32 %v8112_v7 }
 0x28d   : > { %v2601_v5 = vsub.f32 1.5, %v2600_v58  ;;  %v2626_v39 = vmul.f32 %v8148_v49, %v8101_v50  ;;  %v8170_v28 = vadd.f32 0.81, %v893_v29  ;;  %v8176_v46 = vadd.f32 0.81, %v3273_v24  ;;  %vm8192_vm2 = vmor %vm2603_vm0, %vm2604_vm15 }
 0x28e   : > { %4607 = vrcp.f32 %v3180_v57  ;;  %v2710_v21 = vsel %vm8152_vm14, %v4596_v62, %v2706_v19  ;;  %v8182_v63 = vadd.f32 0.81, %v3301_v23  ;;  %v2746_v14 = vmul.f32 %v8164_v6, %v8164_v6  ;;  %v852_v57 = vpop.permute.xlu1 %851 }
 0x28f   : > { %v2602_v10 = vmul.f32 %v8112_v7, %v2601_v5  ;;  %v2627_v37 = vmul.f32 %v8148_v49, %v2626_v39  ;;  %v8178_v61 = vpop.eup %4603  ;;  %v2721_v18 = vmul.f32 %v2710_v21, %v8033_v55  ;;  %4609 = vrsqrt.f32 %v8170_v28  ;;  %v8210_v21 = vld [vmem:[#allocation3 + $0xc] sm:$0xff] }
 0x290   : > { %vm2631_vm1 = vweird.f32 %v8101_v50  ;;  %v868_v29 = vmul.f32 %v8178_v61, %v8123_v20  ;;  %vm2632_vm3 = vweird.f32 %v8148_v49  ;;  %vm873_vm4 = vweird.f32 %v8123_v20 }
 0x291   : > { %v4606_v58 = vpop.eup %4605  ;;  %v2628_v62 = vmul.f32 0.5, %v2627_v37  ;;  %v2723_v24 = vsub.f32 %v2693_v2, %v2721_v18  ;;  %v8199_v53 = vadd.f32 %v852_v57, %v7870_v22  ;;  %v2606_v23 = vsel %vm8192_vm2, %v8112_v7, %v2602_v10  ;;  %vm2633_vm5 = vmor %vm2631_vm1, %vm2632_vm3 }
 0x292   : > { %v2432_v43 = vmul.f32 %v4606_v58, %v2426_v9  ;;  %v869_v9 = vmul.f32 %v8178_v61, %v868_v29  ;;  %4611 = vrsqrt.f32 %v8176_v46  ;;  %v8208_v2 = vadd.f32 0.81, %v2746_v14 }
 0x293   : > { %v2629_v19 = vsub.f32 1.5, %v2628_v62  ;;  %v2725_v39 = vmul.f32 %v2723_v24, %v2723_v24  ;;  %4613 = vrsqrt.f32 %v8182_v63  ;;  %v8214_v22 = vsub.f32 %v8210_v21, %v5566_v59 }
 0x294   : > { %v4608_v5 = vpop.eup %4607  ;;  %2437 = vrot.lane.b32.xlu2 %v2432_v43, %s5043_s23  ;;  %v870_v37 = vmul.f32 0.5, %v869_v9  ;;  %v8219_v18 = vsub.f32 %v8160_v8, %v5241_v42  ;;  %v2617_v29 = vmul.f32 %v2606_v23, %v8037_v54  ;;  %4615 = vrsqrt.f32 %v8208_v2 }
 0x295   : > { %v3184_v7 = vmul.f32 %v4608_v5, %v3178_v44  ;;  %v2630_v10 = vmul.f32 %v8148_v49, %v2629_v19  ;;  %v4610_v58 = vpop.eup %4609  ;;  %v2727_v62 = vadd.f32 0.1, %v2725_v39  ;;  %v2774_v44 = vmul.f32 %v8214_v22, %v8214_v22 }
 0x296   : > { %v871_v57 = vsub.f32 1.5, %v870_v37  ;;  %v898_v43 = vmul.f32 %v4610_v58, %v8170_v28  ;;  %vm903_vm6 = vweird.f32 %v8170_v28  ;;  %vm874_vm7 = vweird.f32 %v8178_v61 }
 0x297   : > { %3189 = vrot.lane.b32.xlu0 %v3184_v7, %s5040_s3  ;;  %v2634_v14 = vsel %vm2633_vm5, %v8148_v49, %v2630_v10  ;;  %4617 = vrcp.f32 %v2727_v62  ;;  %v8235_v50 = vadd.f32 0.81, %v2774_v44  ;;  %vm3311_vm8 = vweird.f32 %v8182_v63  ;;  %vm8250_vm10 = vmor %vm873_vm4, %vm874_vm7  ;;  %v4869_v62 = vld [vmem:[#allocation2 + $0x9] sm:$0xff] }
 0x298   : > { %v2645_v54 = vmul.f32 %v2634_v14, %v8054_v48  ;;  %v4612_v24 = vpop.eup %4611  ;;  %v872_v55 = vmul.f32 %v8178_v61, %v871_v57  ;;  %v899_v23 = vmul.f32 %v4610_v58, %v898_v43  ;;  %v2670_v49 = vmul.f32 %v8219_v18, %v8219_v18 }
 0x299   : > { %v4614_v19 = vpop.eup %4613  ;;  %v3278_v5 = vmul.f32 %v4612_v24, %v8176_v46  ;;  %vm3283_vm9 = vweird.f32 %v8176_v46  ;;  %4619 = vrsqrt.f32 %v8235_v50  ;;  %v8246_v48 = vsub.f32 %v8210_v21, %v5230_v38 }
 0x29a   : > { %v2647_v9 = vsub.f32 %v2617_v29, %v2645_v54  ;;  %v900_v10 = vmul.f32 0.5, %v899_v23  ;;  %vm904_vm11 = vweird.f32 %v4610_v58  ;;  %v3306_v37 = vmul.f32 %v4614_v19, %v8182_v63  ;;  %v10451_v29 = vld [vmem:[#allocation16_spill] sm:$0xff]  ;;  %v8258_v14 = vpop.eup %4615 }
 0x29b   : > { %v8256_v44 = vsub.f32 %v4869_v62, %v10451_v29  ;;  %v876_v43 = vsel %vm8250_vm10, %v8178_v61, %v872_v55  ;;  %v3279_v20 = vmul.f32 %v4612_v24, %v3278_v5  ;;  %vm3284_vm12 = vweird.f32 %v4612_v24  ;;  %vm8268_vm14 = vmor %vm903_vm6, %vm904_vm11 }
 0x29c   : > { %v2649_v57 = vmul.f32 %v2647_v9, %v2647_v9  ;;  %v901_v54 = vsub.f32 1.5, %v900_v10  ;;  %v3307_v38 = vmul.f32 %v4614_v19, %v3306_v37  ;;  %vm3312_vm13 = vweird.f32 %v4614_v19  ;;  %vm3285_vm1 = vmor %vm3283_vm9, %vm3284_vm12 }
 0x29d   : > { %v2760_v23 = vmul.f32 %v8258_v14, %v8208_v2  ;;  %v4618_v42 = vpop.eup %4617  ;;  %v3280_v9 = vmul.f32 0.5, %v3279_v20  ;;  %v8272_v7 = vadd.f32 0.81, %v2670_v49  ;;  %v2698_v61 = vmul.f32 %v8246_v48, %v8246_v48  ;;  %vm8288_vm15 = vmor %vm3311_vm8, %vm3312_vm13 }
 0x29e   : > { %v2651_v59 = vadd.f32 0.1, %v2649_v57  ;;  %v2731_v55 = vmul.f32 %v4618_v42, %v2725_v39  ;;  %v902_v5 = vmul.f32 %v4610_v58, %v901_v54  ;;  %v3308_v10 = vmul.f32 0.5, %v3307_v38 }
 0x29f   : > { %v2761_v37 = vmul.f32 %v8258_v14, %v2760_v23  ;;  %v4620_v29 = vpop.eup %4619  ;;  %v887_v1 = vmul.f32 %v876_v43, %v8098_v52  ;;  %v3281_v28 = vsub.f32 1.5, %v3280_v9  ;;  %v8278_v40 = vadd.f32 0.81, %v2698_v61 }
 0x2a0   : > { %4621 = vrcp.f32 %v2651_v59  ;;  %2735 = vrot.lane.b32.xlu1 %v2731_v55, %s5038_s17  ;;  %v906_v49 = vsel %vm8268_vm14, %v4610_v58, %v902_v5  ;;  %v3309_v20 = vsub.f32 1.5, %v3308_v10  ;;  %v2788_v42 = vmul.f32 %v4620_v29, %v8235_v50  ;;  %v4870_v5 = vld [vmem:[#allocation3 + $0x9] sm:$0xff] }
 0x2a1   : > { %v2762_v16 = vmul.f32 0.5, %v2761_v37  ;;  %v917_v38 = vmul.f32 %v906_v49, %v8117_v31  ;;  %v3282_v39 = vmul.f32 %v4612_v24, %v3281_v28  ;;  %vm2766_vm0 = vweird.f32 %v8258_v14  ;;  %v10458_v10 = vld [vmem:[#allocation15_spill] sm:$0xff] }
 0x2a2   : > { %4623 = vrsqrt.f32 %v8272_v7  ;;  %v3310_v52 = vmul.f32 %v4614_v19, %v3309_v20  ;;  %v2789_v43 = vmul.f32 %v4620_v29, %v2788_v42  ;;  %vm2765_vm2 = vweird.f32 %v8208_v2 }
 0x2a3   : > { %v2763_v58 = vsub.f32 1.5, %v2762_v16  ;;  %4625 = vrsqrt.f32 %v8278_v40  ;;  %v919_v31 = vsub.f32 %v887_v1, %v917_v38  ;;  %v3286_v54 = vsel %vm3285_vm1, %v4612_v24, %v3282_v39  ;;  %vm8310_vm3 = vmor %vm2765_vm2, %vm2766_vm0 }
 0x2a4   : > { %v864_v63 = vmul.f32 %v8256_v44, %v8256_v44  ;;  %v3297_v23 = vmul.f32 %v3286_v54, %v8127_v17  ;;  %v3314_v62 = vsel %vm8288_vm15, %v4614_v19, %v3310_v52  ;;  %v2790_v9 = vmul.f32 0.5, %v2789_v43 }
 0x2a5   : > { %v2764_v46 = vmul.f32 %v8258_v14, %v2763_v58  ;;  %v8305_v16 = vmul.f32 %v919_v31, %v919_v31  ;;  %v3325_v55 = vmul.f32 %v3314_v62, %v8131_v13  ;;  %vm2794_vm4 = vweird.f32 %v4620_v29 }
 0x2a6   : > { %v4622_v61 = vpop.eup %4621  ;;  %v8314_v2 = vadd.f32 0.81, %v864_v63  ;;  %v2791_v19 = vsub.f32 1.5, %v2790_v9  ;;  %v8320_v37 = vsub.f32 %v4870_v5, %v10458_v10  ;;  %vm2793_vm5 = vweird.f32 %v8235_v50 }
 0x2a7   : > { %v2655_v17 = vmul.f32 %v4622_v61, %v2649_v57  ;;  %v2768_v24 = vsel %vm8310_vm3, %v8258_v14, %v2764_v46  ;;  %v923_v28 = vadd.f32 0.1, %v8305_v16  ;;  %v3327_v49 = vsub.f32 %v3297_v23, %v3325_v55  ;;  %vm2795_vm7 = vmor %vm2793_vm5, %vm2794_vm4 }
 0x2a8   : > { %v4624_v13 = vpop.eup %4623  ;;  %4627 = vrsqrt.f32 %v8314_v2  ;;  %v2792_v42 = vmul.f32 %v4620_v29, %v2791_v19  ;;  %vm2717_vm6 = vweird.f32 %v8278_v40  ;;  %v2770_v38 = vmul.f32 %v2768_v24, %v8164_v6 }
 0x2a9   : > { %v4626_v20 = vpop.eup %4625  ;;  %2659 = vrot.lane.b32.xlu2 %v2655_v17, %s5040_s3  ;;  %v2684_v57 = vmul.f32 %v4624_v13, %v8272_v7  ;;  %v3329_v14 = vmul.f32 %v3327_v49, %v3327_v49  ;;  %v8333_v59 = vsub.f32 %v8029_v51, %v5867_v47  ;;  %v894_v50 = vmul.f32 %v8320_v37, %v8320_v37 }
 0x2aa   : > { %v2712_v39 = vmul.f32 %v4626_v20, %v8278_v40  ;;  %v2796_v52 = vsel %vm2795_vm7, %v4620_v29, %v2792_v42  ;;  %v8339_v43 = vsub.f32 %v7888_v0, %v5786_v32  ;;  %4629 = vrcp.f32 %v923_v28 }
 0x2ab   : > { %v2685_v58 = vmul.f32 %v4624_v13, %v2684_v57  ;;  %v3331_v31 = vadd.f32 0.1, %v3329_v14  ;;  %v2798_v6 = vmul.f32 %v2796_v52, %v8214_v22  ;;  %vm2718_vm8 = vweird.f32 %v4626_v20 }
 0x2ac   : > { %v2713_v54 = vmul.f32 %v4626_v20, %v2712_v39  ;;  %v8342_v23 = vadd.f32 0.81, %v894_v50  ;;  %v3350_v29 = vmul.f32 %v8339_v43, %v8339_v43  ;;  %v2925_v61 = vmul.f32 %v8333_v59, %v8333_v59  ;;  %vm8359_vm11 = vmor %vm2717_vm6, %vm2718_vm8 }
 0x2ad   : > { %v2686_v63 = vmul.f32 0.5, %v2685_v58  ;;  %4631 = vrcp.f32 %v3331_v31  ;;  %v2800_v46 = vsub.f32 %v2770_v38, %v2798_v6  ;;  %vm2690_vm9 = vweird.f32 %v4624_v13 }
 0x2ae   : > { %v8346_v62 = vpop.eup %4627  ;;  %v2714_v9 = vmul.f32 0.5, %v2713_v54  ;;  %4633 = vrsqrt.f32 %v8342_v23  ;;  %v8353_v24 = vadd.f32 0.81, %v3350_v29  ;;  %vm2689_vm10 = vweird.f32 %v8272_v7 }
 0x2af   : > { %v2687_v55 = vsub.f32 1.5, %v2686_v63  ;;  %v878_v22 = vmul.f32 %v8346_v62, %v8314_v2  ;;  %v2802_v1 = vmul.f32 %v2800_v46, %v2800_v46  ;;  %v8366_v49 = vsub.f32 %v7947_v12, %v5803_v26  ;;  %vm2691_vm12 = vmor %vm2689_vm10, %vm2690_vm9 }
 0x2b0   : > { %v2715_v17 = vsub.f32 1.5, %v2714_v9  ;;  %v4630_v42 = vpop.eup %4629  ;;  %4635 = vrsqrt.f32 %v8353_v24  ;;  %v8369_v7 = vadd.f32 0.81, %v2925_v61  ;;  %vm883_vm13 = vweird.f32 %v8314_v2  ;;  %v8400_v9 = vpop.permute.xlu0 %999 }
 0x2b1   : > { %v2688_v19 = vmul.f32 %v4624_v13, %v2687_v55  ;;  %v879_v28 = vmul.f32 %v8346_v62, %v878_v22  ;;  %v2804_v57 = vadd.f32 0.1, %v2802_v1  ;;  %v3378_v52 = vmul.f32 %v8366_v49, %v8366_v49 }
 0x2b2   : > { %v2716_v38 = vmul.f32 %v4626_v20, %v2715_v17  ;;  %v8379_v6 = vsub.f32 %v8029_v51, %v5672_v41  ;;  %vm884_vm14 = vweird.f32 %v8346_v62  ;;  %v927_v51 = vmul.f32 %v4630_v42, %v8305_v16 }
 0x2b3   : > { %v2692_v39 = vsel %vm2691_vm12, %v4624_v13, %v2688_v19  ;;  %v880_v40 = vmul.f32 0.5, %v879_v28  ;;  %v4632_v58 = vpop.eup %4631  ;;  %4637 = vrcp.f32 %v2804_v57  ;;  %v8384_v46 = vadd.f32 0.81, %v3378_v52  ;;  %vm8427_vm2 = vmor %vm883_vm13, %vm884_vm14 }
 0x2b4   : > { %v2694_v50 = vmul.f32 %v2692_v39, %v8219_v18  ;;  %v2720_v31 = vsel %vm8359_vm11, %v4626_v20, %v2716_v38  ;;  %v8381_v54 = vpop.eup %4633  ;;  %v3335_v13 = vmul.f32 %v4632_v58, %v3329_v14  ;;  %4639 = vrsqrt.f32 %v8369_v7  ;;  %v8421_v39 = vld [vmem:[#allocation2 + $0x6] sm:$0xff] }
 0x2b5   : > { %v2722_v63 = vmul.f32 %v2720_v31, %v8246_v48  ;;  %v881_v29 = vsub.f32 1.5, %v880_v40  ;;  %v908_v18 = vmul.f32 %v8381_v54, %v8342_v23  ;;  %v8392_v20 = vsub.f32 %v7963_v4, %v5631_v15 }
 0x2b6   : > { %3339 = vrot.lane.b32.xlu0 %v3335_v13, %s5041_s4  ;;  %vm913_vm15 = vweird.f32 %v8342_v23  ;;  %4641 = vrsqrt.f32 %v8384_v46  ;;  %v8398_v48 = vpop.eup %4635  ;;  %v2849_v16 = vmul.f32 %v8379_v6, %v8379_v6  ;;  %v8409_v17 = vadd.f32 %v927_v51, %v8199_v53 }
 0x2b7   : > { %v2724_v14 = vsub.f32 %v2694_v50, %v2722_v63  ;;  %v882_v61 = vmul.f32 %v8346_v62, %v881_v29  ;;  %v909_v55 = vmul.f32 %v8381_v54, %v908_v18  ;;  %v2821_v22 = vmul.f32 %v8392_v20, %v8392_v20 }
 0x2b8   : > { %v3364_v5 = vmul.f32 %v8398_v48, %v8353_v24  ;;  %vm3369_vm0 = vweird.f32 %v8353_v24  ;;  %vm914_vm1 = vweird.f32 %v8381_v54  ;;  %v8417_v57 = vsub.f32 %v7963_v4, %v10423_v3  ;;  %v8485_v52 = vpop.permute.xlu0 %1077 }
 0x2b9   : > { %v2726_v19 = vmul.f32 %v2724_v14, %v2724_v14  ;;  %v4638_v28 = vpop.eup %4637  ;;  %v910_v42 = vmul.f32 0.5, %v909_v55  ;;  %v8419_v38 = vadd.f32 0.81, %v2821_v22  ;;  %vm2935_vm3 = vweird.f32 %v8369_v7  ;;  %vm8450_vm4 = vmor %vm913_vm15, %vm914_vm1  ;;  %v8461_v14 = vpop.permute.xlu1 %1001 }
 0x2ba   : > { %v2808_v53 = vmul.f32 %v4638_v28, %v2802_v1  ;;  %v3365_v58 = vmul.f32 %v8398_v48, %v3364_v5  ;;  %v8433_v4 = vadd.f32 0.81, %v2849_v16  ;;  %v8435_v50 = vpop.eup %4639  ;;  %v886_v1 = vsel %vm8427_vm2, %v8346_v62, %v882_v61 }
 0x2bb   : > { %v2728_v40 = vadd.f32 0.1, %v2726_v19  ;;  %v911_v31 = vsub.f32 1.5, %v910_v42  ;;  %v2897_v2 = vmul.f32 %v8417_v57, %v8417_v57  ;;  %4643 = vrsqrt.f32 %v8419_v38 }
 0x2bc   : > { %v8443_v13 = vpop.eup %4641  ;;  %2813 = vrot.lane.b32.xlu1 %v2808_v53, %s5041_s4  ;;  %v3366_v62 = vmul.f32 0.5, %v3365_v58  ;;  %v2930_v29 = vmul.f32 %v8435_v50, %v8369_v7  ;;  %v8458_v18 = vsub.f32 %v8421_v39, %v10428_v60  ;;  %vm3370_vm5 = vweird.f32 %v8398_v48  ;;  %v8472_v60 = vld [vmem:[#allocation3 + $0x6] sm:$0xff]  ;;  %v1076_v7 = vpop.permute.xlu2 %1075 }
 0x2bd   : > { %4645 = vrcp.f32 %v2728_v40  ;;  %v912_v51 = vmul.f32 %v8381_v54, %v911_v31  ;;  %v3392_v23 = vmul.f32 %v8443_v13, %v8384_v46  ;;  %vm3397_vm6 = vweird.f32 %v8384_v46  ;;  %vm8491_vm9 = vmor %vm3369_vm0, %vm3370_vm5 }
 0x2be   : > { %v8467_v61 = vadd.f32 0.81, %v2897_v2  ;;  %v888_v55 = vmul.f32 %v886_v1, %v8256_v44  ;;  %v3367_v22 = vsub.f32 1.5, %v3366_v62  ;;  %v2931_v16 = vmul.f32 %v8435_v50, %v2930_v29 }
 0x2bf   : > { %4647 = vrsqrt.f32 %v8433_v4  ;;  %v916_v5 = vsel %vm8450_vm4, %v8381_v54, %v912_v51  ;;  %v3393_v28 = vmul.f32 %v8443_v13, %v3392_v23  ;;  %vm2936_vm7 = vweird.f32 %v8435_v50 }
 0x2c0   : > { %4649 = vrsqrt.f32 %v8467_v61  ;;  %v918_v42 = vmul.f32 %v916_v5, %v8320_v37  ;;  %v3368_v44 = vmul.f32 %v8398_v48, %v3367_v22  ;;  %vm3398_vm8 = vweird.f32 %v8443_v13  ;;  %vm8529_vm12 = vmor %vm2935_vm3, %vm2936_vm7 }
 0x2c1   : > { %v2932_v53 = vmul.f32 0.5, %v2931_v16  ;;  %v8483_v40 = vpop.eup %4643  ;;  %v3394_v58 = vmul.f32 0.5, %v3393_v28  ;;  %vm2859_vm10 = vweird.f32 %v8433_v4  ;;  %v3573_v37 = vmul.f32 %v8458_v18, %v8458_v18  ;;  %vm3399_vm13 = vmor %vm3397_vm6, %vm3398_vm8 }
 0x2c2   : > { %v8500_v1 = vsub.f32 %v8472_v60, %v10429_v27  ;;  %v920_v2 = vsub.f32 %v888_v55, %v918_v42  ;;  %v3372_v24 = vsel %vm8491_vm9, %v8398_v48, %v3368_v44  ;;  %v2826_v62 = vmul.f32 %v8483_v40, %v8419_v38  ;;  %v10467_v27 = vld [vmem:[#allocation23_spill] sm:$0xff] }
 0x2c3   : > { %v4646_v31 = vpop.eup %4645  ;;  %v2933_v63 = vsub.f32 1.5, %v2932_v53  ;;  %vm2831_vm11 = vweird.f32 %v8419_v38  ;;  %v3395_v51 = vsub.f32 1.5, %v3394_v58  ;;  %v8510_v23 = vsub.f32 %v7888_v0, %v5220_v34 }
 0x2c4   : > { %v2732_v29 = vmul.f32 %v4646_v31, %v2726_v19  ;;  %v8514_v22 = vsub.f32 %v7947_v12, %v10467_v27  ;;  %v922_v16 = vmul.f32 %v920_v2, %v920_v2  ;;  %v3374_v48 = vmul.f32 %v3372_v24, %v8339_v43 }
 0x2c5   : > { %v8516_v55 = vpop.eup %4647  ;;  %v2827_v5 = vmul.f32 %v8483_v40, %v2826_v62  ;;  %v1005_v28 = vadd.f32 %v8400_v9, %v8409_v17  ;;  %v3396_v0 = vmul.f32 %v8443_v13, %v3395_v51  ;;  %v2934_v42 = vmul.f32 %v8435_v50, %v2933_v63 }
 0x2c6   : > { %v4650_v19 = vpop.eup %4649  ;;  %2737 = vrot.lane.b32.xlu2 %v2732_v29, %s5038_s17  ;;  %v2854_v43 = vmul.f32 %v8516_v55, %v8433_v4  ;;  %v8535_v44 = vadd.f32 0.81, %v3573_v37  ;;  %v924_v9 = vadd.f32 0.1, %v922_v16  ;;  %vm2907_vm14 = vweird.f32 %v8467_v61  ;;  %v1152_v37 = vpop.permute.xlu1 %1151 }
 0x2c7   : > { %v2902_v17 = vmul.f32 %v4650_v19, %v8467_v61  ;;  %vm2832_vm15 = vweird.f32 %v8483_v40  ;;  %vm2860_vm0 = vweird.f32 %v8516_v55  ;;  %v3400_v53 = vsel %vm3399_vm13, %v8443_v13, %v3396_v0  ;;  %v1228_v0 = vpop.permute.xlu0 %1227 }
 0x2c8   : > { %vm2908_vm1 = vweird.f32 %v4650_v19  ;;  %v2828_v54 = vmul.f32 0.5, %v2827_v5  ;;  %v2855_v58 = vmul.f32 %v8516_v55, %v2854_v43  ;;  %4651 = vrcp.f32 %v924_v9  ;;  %vm8559_vm2 = vmor %vm2831_vm11, %vm2832_vm15 }
 0x2c9   : > { %v3402_v46 = vmul.f32 %v3400_v53, %v8366_v49  ;;  %v2903_v31 = vmul.f32 %v4650_v19, %v2902_v17  ;;  %v1081_v2 = vadd.f32 %v1076_v7, %v1005_v28  ;;  %v2938_v24 = vsel %vm8529_vm12, %v8435_v50, %v2934_v42  ;;  %vm8571_vm3 = vmor %vm2859_vm10, %vm2860_vm0 }
 0x2ca   : > { %v2829_v63 = vsub.f32 1.5, %v2828_v54  ;;  %v2856_v62 = vmul.f32 0.5, %v2855_v58  ;;  %4653 = vrsqrt.f32 %v8535_v44  ;;  %v3601_v5 = vmul.f32 %v8500_v1, %v8500_v1  ;;  %vm2909_vm4 = vmor %vm2907_vm14, %vm2908_vm1 }
 0x2cb   : > { %v3404_v29 = vsub.f32 %v3374_v48, %v3402_v46  ;;  %v2904_v13 = vmul.f32 0.5, %v2903_v31  ;;  %v1157_v51 = vadd.f32 %v1152_v37, %v1081_v2  ;;  %v3046_v48 = vmul.f32 %v8510_v23, %v8510_v23 }
 0x2cc   : > { %v2830_v43 = vmul.f32 %v8483_v40, %v2829_v63  ;;  %v2857_v50 = vsub.f32 1.5, %v2856_v62  ;;  %v3074_v28 = vmul.f32 %v8514_v22, %v8514_v22  ;;  %v8577_v17 = vadd.f32 0.81, %v3601_v5 }
 0x2cd   : > { %v3406_v42 = vmul.f32 %v3404_v29, %v3404_v29  ;;  %v2905_v12 = vsub.f32 1.5, %v2904_v13  ;;  %v8575_v38 = vadd.f32 %v1228_v0, %v1157_v51  ;;  %v8583_v54 = vadd.f32 0.81, %v3046_v48  ;;  %v8604_v51 = vld [vmem:[#allocation2 + $0xe] sm:$0xff]  ;;  %v10474_v48 = vld [vmem:[#allocation26_spill] sm:$0xff] }
 0x2ce   : > { %v2834_v7 = vsel %vm8559_vm2, %v8483_v40, %v2830_v43  ;;  %v2858_v53 = vmul.f32 %v8516_v55, %v2857_v50  ;;  %v8585_v58 = vadd.f32 0.81, %v3074_v28  ;;  %v4652_v37 = vpop.eup %4651  ;;  %4655 = vrsqrt.f32 %v8577_v17  ;;  %v8633_v28 = vld [vmem:[#allocation2 + $0x5] sm:$0xff] }
 0x2cf   : > { %v3408_v4 = vadd.f32 0.1, %v3406_v42  ;;  %v2906_v46 = vmul.f32 %v4650_v19, %v2905_v12  ;;  %v2845_v31 = vmul.f32 %v2834_v7, %v8392_v20  ;;  %v928_v63 = vmul.f32 %v4652_v37, %v922_v16  ;;  %v10475_v12 = vld [vmem:[#allocation19_spill] sm:$0xff] }
 0x2d0   : > { %v8589_v2 = vpop.eup %4653  ;;  %v2862_v40 = vsel %vm8571_vm3, %v8516_v55, %v2858_v53  ;;  %4657 = vrsqrt.f32 %v8583_v54  ;;  %v2949_v61 = vmul.f32 %v2938_v24, %v8333_v59  ;;  %vm3583_vm5 = vweird.f32 %v8535_v44  ;;  %v8617_v24 = vld [vmem:[#allocation3 + $0xe] sm:$0xff] }
 0x2d1   : > { %4659 = vrcp.f32 %v3408_v4  ;;  %v2910_v62 = vsel %vm2909_vm4, %v4650_v19, %v2906_v46  ;;  %v2873_v29 = vmul.f32 %v2862_v40, %v8379_v6  ;;  %v3578_v20 = vmul.f32 %v8589_v2, %v8535_v44 }
 0x2d2   : > { %v930_v13 = vadd.f32 %v928_v63, %v7885_v56  ;;  %v2921_v16 = vmul.f32 %v2910_v62, %v8417_v57  ;;  %4661 = vrsqrt.f32 %v8585_v58  ;;  %vm3584_vm6 = vweird.f32 %v8589_v2 }
 0x2d3   : > { %v2875_v5 = vsub.f32 %v2845_v31, %v2873_v29  ;;  %v3579_v55 = vmul.f32 %v8589_v2, %v3578_v20  ;;  %v8615_v59 = vsub.f32 %v8160_v8, %v6083_v30  ;;  %v8621_v43 = vsub.f32 %v8604_v51, %v5222_v35  ;;  %v10476_v20 = vld [vmem:[#allocation32_spill] sm:$0xff]  ;;  %vm8659_vm11 = vmor %vm3583_vm5, %vm3584_vm6 }
 0x2d4   : > { %v1006_v19 = vadd.f32 %v8461_v14, %v930_v13  ;;  %v2951_v0 = vsub.f32 %v2921_v16, %v2949_v61  ;;  %v8611_v6 = vpop.eup %4655  ;;  %vm3611_vm7 = vweird.f32 %v8577_v17  ;;  %vm3093_vm8 = vweird.f32 %v8585_v58 }
 0x2d5   : > { %v2877_v56 = vmul.f32 %v2875_v5, %v2875_v5  ;;  %v3580_v57 = vmul.f32 0.5, %v3579_v55  ;;  %v3606_v50 = vmul.f32 %v8611_v6, %v8577_v17  ;;  %v8631_v8 = vsub.f32 %v8617_v24, %v10474_v48 }
 0x2d6   : > { %v8623_v14 = vpop.eup %4657  ;;  %v2953_v49 = vmul.f32 %v2951_v0, %v2951_v0  ;;  %v8637_v35 = vsub.f32 %v8633_v28, %v10475_v12  ;;  %v1082_v7 = vadd.f32 %v8485_v52, %v1006_v19  ;;  %vm3065_vm9 = vweird.f32 %v8583_v54 }
 0x2d7   : > { %v4660_v9 = vpop.eup %4659  ;;  %v2879_v53 = vadd.f32 0.1, %v2877_v56  ;;  %v3581_v37 = vsub.f32 1.5, %v3580_v57  ;;  %v3060_v4 = vmul.f32 %v8623_v14, %v8583_v54  ;;  %v3607_v63 = vmul.f32 %v8611_v6, %v3606_v50 }
 0x2d8   : > { %v3412_v46 = vmul.f32 %v4660_v9, %v3406_v42  ;;  %v2955_v31 = vadd.f32 0.1, %v2953_v49  ;;  %v2898_v40 = vmul.f32 %v8615_v59, %v8615_v59  ;;  %v4662_v62 = vpop.eup %4661  ;;  %v8650_v13 = vsub.f32 %v8210_v21, %v10476_v20 }
 0x2d9   : > { %4663 = vrcp.f32 %v2879_v53  ;;  %v3582_v29 = vmul.f32 %v8589_v2, %v3581_v37  ;;  %v3061_v52 = vmul.f32 %v8623_v14, %v3060_v4  ;;  %v3608_v42 = vmul.f32 0.5, %v3607_v63 }
 0x2da   : > { %3417 = vrot.lane.b32.xlu0 %v3412_v46, %s5042_s30  ;;  %4665 = vrcp.f32 %v2955_v31  ;;  %vm3612_vm10 = vweird.f32 %v8611_v6  ;;  %v3088_v16 = vmul.f32 %v4662_v62, %v8585_v58  ;;  %vm3066_vm12 = vweird.f32 %v8623_v14 }
 0x2db   : > { %v3062_v5 = vmul.f32 0.5, %v3061_v52  ;;  %v8664_v21 = vadd.f32 0.81, %v2898_v40  ;;  %v2926_v55 = vmul.f32 %v8650_v13, %v8650_v13  ;;  %v3586_v19 = vsel %vm8659_vm11, %v8589_v2, %v3582_v29  ;;  %vm3613_vm14 = vmor %vm3611_vm7, %vm3612_vm10 }
 0x2dc   : > { %v3609_v0 = vsub.f32 1.5, %v3608_v42  ;;  %v3089_v57 = vmul.f32 %v4662_v62, %v3088_v16  ;;  %v3650_v44 = vmul.f32 %v8621_v43, %v8621_v43  ;;  %vm3094_vm13 = vweird.f32 %v4662_v62  ;;  %vm8695_vm15 = vmor %vm3065_vm9, %vm3066_vm12  ;;  %v1154_v42 = vpop.permute.xlu2 %1153 }
 0x2dd   : > { %v3063_v50 = vsub.f32 1.5, %v3062_v5  ;;  %4667 = vrsqrt.f32 %v8664_v21  ;;  %v8674_v48 = vadd.f32 0.81, %v2926_v55  ;;  %v3678_v4 = vmul.f32 %v8631_v8, %v8631_v8  ;;  %vm8707_vm0 = vmor %vm3093_vm8, %vm3094_vm13  ;;  %v1230_v5 = vpop.permute.xlu1 %1229 }
 0x2de   : > { %v3610_v9 = vmul.f32 %v8611_v6, %v3609_v0  ;;  %v3090_v53 = vmul.f32 0.5, %v3089_v57  ;;  %v8677_v37 = vadd.f32 0.81, %v3650_v44  ;;  %v3597_v46 = vmul.f32 %v3586_v19, %v8458_v18 }
 0x2df   : > { %v4664_v2 = vpop.eup %4663  ;;  %v3064_v31 = vmul.f32 %v8623_v14, %v3063_v50  ;;  %4669 = vrsqrt.f32 %v8674_v48  ;;  %v3197_v63 = vmul.f32 %v8637_v35, %v8637_v35  ;;  %v1158_v55 = vadd.f32 %v1154_v42, %v1082_v7  ;;  %v1306_v50 = vpop.permute.xlu0 %1305 }
 0x2e0   : > { %v4666_v40 = vpop.eup %4665  ;;  %v2883_v29 = vmul.f32 %v4664_v2, %v2877_v56  ;;  %v3614_v52 = vsel %vm3613_vm14, %v8611_v6, %v3610_v9  ;;  %v3091_v17 = vsub.f32 1.5, %v3090_v53  ;;  %4671 = vrsqrt.f32 %v8677_v37 }
 0x2e1   : > { %v2959_v16 = vmul.f32 %v4666_v40, %v2953_v49  ;;  %v3625_v61 = vmul.f32 %v3614_v52, %v8500_v1  ;;  %v3068_v56 = vsel %vm8695_vm15, %v8623_v14, %v3064_v31  ;;  %v8712_v19 = vadd.f32 0.81, %v3678_v4  ;;  %v8727_v4 = vld [vmem:[#allocation3 + $0x5] sm:$0xff] }
 0x2e2   : > { %2887 = vrot.lane.b32.xlu2 %v2883_v29, %s5042_s30  ;;  %v3092_v6 = vmul.f32 %v4662_v62, %v3091_v17  ;;  %v3070_v14 = vmul.f32 %v3068_v56, %v8510_v23  ;;  %vm2917_vm1 = vweird.f32 %v8664_v21  ;;  %v1234_v57 = vadd.f32 %v1230_v5, %v1158_v55 }
 0x2e3   : > { %v8714_v49 = vpop.eup %4667  ;;  %2963 = vrot.lane.b32.xlu1 %v2959_v16, %s5043_s23  ;;  %v3627_v1 = vsub.f32 %v3597_v46, %v3625_v61  ;;  %v8723_v44 = vadd.f32 0.81, %v3197_v63  ;;  %4673 = vrsqrt.f32 %v8712_v19  ;;  %v8731_v23 = vsub.f32 %v8727_v4, %v10435_v45 }
 0x2e4   : > { %v3096_v58 = vsel %vm8707_vm0, %v4662_v62, %v3092_v6  ;;  %v2912_v0 = vmul.f32 %v8714_v49, %v8664_v21  ;;  %v8737_v31 = vadd.f32 %v1306_v50, %v1234_v57  ;;  %v8741_v63 = vsub.f32 %v8633_v28, %v10436_v11  ;;  %v4874_v50 = vld [vmem:[#allocation3 + $0x2] sm:$0xff] }
 0x2e5   : > { %v4670_v7 = vpop.eup %4669  ;;  %v3629_v9 = vmul.f32 %v3627_v1, %v3627_v1  ;;  %v3098_v53 = vmul.f32 %v3096_v58, %v8514_v22  ;;  %vm2945_vm2 = vweird.f32 %v8674_v48  ;;  %vm2918_vm3 = vweird.f32 %v8714_v49 }
 0x2e6   : > { %v8733_v62 = vpop.eup %4671  ;;  %v2913_v2 = vmul.f32 %v8714_v49, %v2912_v0  ;;  %v2940_v46 = vmul.f32 %v4670_v7, %v8674_v48  ;;  %4675 = vrsqrt.f32 %v8723_v44  ;;  %vm3669_vm4 = vweird.f32 %v8677_v37  ;;  %vm8770_vm7 = vmor %vm2917_vm1, %vm2918_vm3 }
 0x2e7   : > { %v3631_v22 = vadd.f32 0.1, %v3629_v9  ;;  %v3100_v40 = vsub.f32 %v3070_v14, %v3098_v53  ;;  %v3664_v29 = vmul.f32 %v8733_v62, %v8677_v37  ;;  %v3225_v16 = vmul.f32 %v8731_v23, %v8731_v23 }
 0x2e8   : > { %v2914_v52 = vmul.f32 0.5, %v2913_v2  ;;  %v2941_v18 = vmul.f32 %v4670_v7, %v2940_v46  ;;  %vm3697_vm5 = vweird.f32 %v8712_v19  ;;  %v3121_v54 = vmul.f32 %v8741_v63, %v8741_v63  ;;  %v4873_v46 = vld [vmem:[#allocation2 + $0x2] sm:$0xff] }
 0x2e9   : > { %4677 = vrcp.f32 %v3631_v22  ;;  %v3102_v17 = vmul.f32 %v3100_v40, %v3100_v40  ;;  %v3665_v42 = vmul.f32 %v8733_v62, %v3664_v29  ;;  %v8755_v6 = vpop.eup %4673  ;;  %vm2946_vm6 = vweird.f32 %v4670_v7 }
 0x2ea   : > { %v2915_v61 = vsub.f32 1.5, %v2914_v52  ;;  %v2942_v56 = vmul.f32 0.5, %v2941_v18  ;;  %v8757_v1 = vadd.f32 0.81, %v3225_v16  ;;  %v3692_v0 = vmul.f32 %v8755_v6, %v8712_v19  ;;  %vm2947_vm8 = vmor %vm2945_vm2, %vm2946_vm6 }
 0x2eb   : > { %v3104_v5 = vadd.f32 0.1, %v3102_v17  ;;  %v3666_v55 = vmul.f32 0.5, %v3665_v42  ;;  %v8764_v57 = vsub.f32 %v8727_v4, %v5351_v25  ;;  %v8774_v2 = vadd.f32 0.81, %v3121_v54 }
 0x2ec   : > { %v2916_v14 = vmul.f32 %v8714_v49, %v2915_v61  ;;  %v2943_v58 = vsub.f32 1.5, %v2942_v56  ;;  %v8777_v22 = vsub.f32 %v4873_v46, %v10441_v36  ;;  %v8779_v40 = vpop.eup %4675  ;;  %v3693_v21 = vmul.f32 %v8755_v6, %v3692_v0 }
 0x2ed   : > { %4679 = vrcp.f32 %v3104_v5  ;;  %v3667_v53 = vsub.f32 1.5, %v3666_v55  ;;  %vm3670_vm9 = vweird.f32 %v8733_v62  ;;  %vm3698_vm10 = vweird.f32 %v8755_v6 }
 0x2ee   : > { %v2920_v29 = vsel %vm8770_vm7, %v8714_v49, %v2916_v14  ;;  %v2944_v52 = vmul.f32 %v4670_v7, %v2943_v58  ;;  %4681 = vrsqrt.f32 %v8757_v1  ;;  %v3202_v16 = vmul.f32 %v8779_v40, %v8723_v44  ;;  %vm8802_vm12 = vmor %vm3669_vm4, %vm3670_vm9 }
 0x2ef   : > { %v4678_v18 = vpop.eup %4677  ;;  %v3668_v42 = vmul.f32 %v8733_v62, %v3667_v53  ;;  %v3694_v56 = vmul.f32 0.5, %v3693_v21  ;;  %4683 = vrsqrt.f32 %v8774_v2  ;;  %v2922_v54 = vmul.f32 %v2920_v29, %v8615_v59  ;;  %vm8818_vm14 = vmor %vm3697_vm5, %vm3698_vm10 }
 0x2f0   : > { %v3635_v49 = vmul.f32 %v4678_v18, %v3629_v9  ;;  %v2948_v61 = vsel %vm2947_vm8, %v4670_v7, %v2944_v52  ;;  %v3203_v48 = vmul.f32 %v8779_v40, %v3202_v16  ;;  %vm3207_vm11 = vweird.f32 %v8723_v44 }
 0x2f1   : > { %v2950_v5 = vmul.f32 %v2948_v61, %v8650_v13  ;;  %v3695_v7 = vsub.f32 1.5, %v3694_v56  ;;  %vm3235_vm13 = vweird.f32 %v8757_v1  ;;  %v3149_v59 = vmul.f32 %v8764_v57, %v8764_v57  ;;  %v10489_v61 = vld [vmem:[#allocation27_spill] sm:$0xff] }
 0x2f2   : > { %3639 = vrot.lane.b32.xlu0 %v3635_v49, %s5039_s29  ;;  %v1391_v13 = vmul.f32 %v8777_v22, %v8777_v22  ;;  %v3672_v58 = vsel %vm8802_vm12, %v8733_v62, %v3668_v42  ;;  %v3204_v0 = vmul.f32 0.5, %v3203_v48  ;;  %v8823_v53 = vsub.f32 %v4874_v50, %v10442_v33 }
 0x2f3   : > { %v4680_v9 = vpop.eup %4679  ;;  %v2952_v14 = vsub.f32 %v2922_v54, %v2950_v5  ;;  %v3696_v52 = vmul.f32 %v8755_v6, %v3695_v7  ;;  %v8828_v21 = vadd.f32 0.81, %v3149_v59  ;;  %vm3208_vm15 = vweird.f32 %v8779_v40 }
 0x2f4   : > { %v8825_v46 = vpop.eup %4681  ;;  %v3108_v29 = vmul.f32 %v4680_v9, %v3102_v17  ;;  %v8830_v62 = vadd.f32 0.81, %v1391_v13  ;;  %v3205_v19 = vsub.f32 1.5, %v3204_v0  ;;  %v3674_v49 = vmul.f32 %v3672_v58, %v8621_v43  ;;  %vm8852_vm0 = vmor %vm3207_vm11, %vm3208_vm15 }
 0x2f5   : > { %v2954_v18 = vmul.f32 %v2952_v14, %v2952_v14  ;;  %v3230_v42 = vmul.f32 %v8825_v46, %v8757_v1  ;;  %v8835_v16 = vpop.eup %4683  ;;  %v3700_v17 = vsel %vm8818_vm14, %v8755_v6, %v3696_v52  ;;  %4685 = vrsqrt.f32 %v8828_v21  ;;  %v1304_v52 = vpop.permute.xlu2 %1303 }
 0x2f6   : > { %3113 = vrot.lane.b32.xlu1 %v3108_v29, %s5039_s29  ;;  %v8845_v56 = vsub.f32 %v8421_v39, %v10489_v61  ;;  %v3702_v5 = vmul.f32 %v3700_v17, %v8631_v8  ;;  %v3206_v48 = vmul.f32 %v8779_v40, %v3205_v19  ;;  %vm3236_vm1 = vweird.f32 %v8825_v46 }
 0x2f7   : > { %v2956_v54 = vadd.f32 0.1, %v2954_v18  ;;  %v3231_v55 = vmul.f32 %v8825_v46, %v3230_v42  ;;  %v3126_v6 = vmul.f32 %v8835_v16, %v8774_v2  ;;  %4687 = vrsqrt.f32 %v8830_v62  ;;  %vm8879_vm4 = vmor %vm3235_vm13, %vm3236_vm1 }
 0x2f8   : > { %v1421_v39 = vmul.f32 %v8823_v53, %v8823_v53  ;;  %v3704_v8 = vsub.f32 %v3674_v49, %v3702_v5  ;;  %v3210_v44 = vsel %vm8852_vm0, %v8779_v40, %v3206_v48  ;;  %v3801_v9 = vmul.f32 %v8845_v56, %v8845_v56  ;;  %v10494_v49 = vld [vmem:[#allocation21_spill] sm:$0xff] }
 0x2f9   : > { %4689 = vrcp.f32 %v2956_v54  ;;  %v3232_v7 = vmul.f32 0.5, %v3231_v55  ;;  %v3127_v59 = vmul.f32 %v8835_v16, %v3126_v6  ;;  %vm3131_vm2 = vweird.f32 %v8774_v2  ;;  %v1380_v54 = vpop.permute.xlu1 %1379  ;;  %v8898_v48 = vld [vmem:[#allocation2 + $0xd] sm:$0xff] }
 0x2fa   : > { %v8866_v13 = vadd.f32 0.81, %v1421_v39  ;;  %v3706_v14 = vmul.f32 %v3704_v8, %v3704_v8  ;;  %vm3132_vm3 = vweird.f32 %v8835_v16  ;;  %v3221_v0 = vmul.f32 %v3210_v44, %v8637_v35  ;;  %v10495_v55 = vld [vmem:[#allocation28_spill] sm:$0xff] }
 0x2fb   : > { %v3233_v58 = vsub.f32 1.5, %v3232_v7  ;;  %v8872_v37 = vpop.eup %4685  ;;  %v3128_v50 = vmul.f32 0.5, %v3127_v59  ;;  %v8884_v29 = vadd.f32 0.81, %v3801_v9  ;;  %vm3159_vm5 = vweird.f32 %v8828_v21  ;;  %vm8919_vm9 = vmor %vm3131_vm2, %vm3132_vm3 }
 0x2fc   : > { %4691 = vrsqrt.f32 %v8866_v13  ;;  %v3708_v19 = vadd.f32 0.1, %v3706_v14  ;;  %v3154_v35 = vmul.f32 %v8872_v37, %v8828_v21  ;;  %v8892_v1 = vsub.f32 %v8472_v60, %v10494_v49  ;;  %v10498_v49 = vld [vmem:[#allocation29_spill] sm:$0xff] }
 0x2fd   : > { %v3234_v42 = vmul.f32 %v8825_v46, %v3233_v58  ;;  %v8894_v17 = vpop.eup %4687  ;;  %v3129_v61 = vsub.f32 1.5, %v3128_v50  ;;  %v1309_v5 = vadd.f32 %v1304_v52, %v8575_v38  ;;  %4693 = vrsqrt.f32 %v8884_v29 }
 0x2fe   : > { %v8902_v43 = vsub.f32 %v8898_v48, %v10495_v55  ;;  %4695 = vrcp.f32 %v3708_v19  ;;  %v3155_v39 = vmul.f32 %v8872_v37, %v3154_v35  ;;  %v1396_v8 = vmul.f32 %v8894_v17, %v8830_v62  ;;  %v8936_v35 = vld [vmem:[#allocation3 + $0xd] sm:$0xff] }
 0x2ff   : > { %v4690_v6 = vpop.eup %4689  ;;  %v3238_v60 = vsel %vm8879_vm4, %v8825_v46, %v3234_v42  ;;  %vm1401_vm6 = vweird.f32 %v8830_v62  ;;  %vm1431_vm7 = vweird.f32 %v8866_v13  ;;  %v3130_v7 = vmul.f32 %v8835_v16, %v3129_v61 }
 0x300   : > { %v2960_v38 = vmul.f32 %v4690_v6, %v2954_v18  ;;  %v3249_v44 = vmul.f32 %v3238_v60, %v8731_v23  ;;  %vm3160_vm8 = vweird.f32 %v8872_v37  ;;  %v3156_v59 = vmul.f32 0.5, %v3155_v39 }
 0x301   : > { %v1397_v9 = vmul.f32 %v8894_v17, %v1396_v8  ;;  %v8924_v58 = vadd.f32 %v1380_v54, %v1309_v5  ;;  %v3829_v23 = vmul.f32 %v8892_v1, %v8892_v1  ;;  %v3134_v2 = vsel %vm8919_vm9, %v8835_v16, %v3130_v7  ;;  %vm3161_vm11 = vmor %vm3159_vm5, %vm3160_vm8 }
 0x302   : > { %v4692_v18 = vpop.eup %4691  ;;  %2965 = vrot.lane.b32.xlu2 %v2960_v38, %s5043_s23  ;;  %v3251_v40 = vsub.f32 %v3221_v0, %v3249_v44  ;;  %vm1402_vm10 = vweird.f32 %v8894_v17  ;;  %v3274_v50 = vmul.f32 %v8902_v43, %v8902_v43  ;;  %v3157_v52 = vsub.f32 1.5, %v3156_v59 }
 0x303   : > { %v1398_v19 = vmul.f32 0.5, %v1397_v9  ;;  %v1426_v42 = vmul.f32 %v4692_v18, %v8866_v13  ;;  %v8940_v61 = vsub.f32 %v8936_v35, %v10498_v49  ;;  %v8942_v0 = vpop.eup %4693  ;;  %v3145_v16 = vmul.f32 %v3134_v2, %v8741_v63  ;;  %vm1403_vm13 = vmor %vm1401_vm6, %vm1402_vm10 }
 0x304   : > { %v3253_v54 = vmul.f32 %v3251_v40, %v3251_v40  ;;  %v8945_v5 = vadd.f32 0.81, %v3829_v23  ;;  %v8947_v6 = vadd.f32 0.81, %v3274_v50  ;;  %v4696_v60 = vpop.eup %4695  ;;  %v3158_v39 = vmul.f32 %v8872_v37, %v3157_v52  ;;  %v10501_v52 = vld [vmem:[#allocation22_spill] sm:$0xff] }
 0x305   : > { %v1399_v8 = vsub.f32 1.5, %v1398_v19  ;;  %v1427_v38 = vmul.f32 %v4692_v18, %v1426_v42  ;;  %v3806_v44 = vmul.f32 %v8942_v0, %v8884_v29  ;;  %v3712_v7 = vmul.f32 %v4696_v60, %v3706_v14 }
 0x306   : > { %v3255_v46 = vadd.f32 0.1, %v3253_v54  ;;  %vm1432_vm12 = vweird.f32 %v4692_v18  ;;  %4697 = vrsqrt.f32 %v8945_v5  ;;  %v3162_v63 = vsel %vm3161_vm11, %v8872_v37, %v3158_v39 }
 0x307   : > { %v1400_v59 = vmul.f32 %v8894_v17, %v1399_v8  ;;  %v1428_v9 = vmul.f32 0.5, %v1427_v38  ;;  %v3807_v23 = vmul.f32 %v8942_v0, %v3806_v44  ;;  %3717 = vrot.lane.b32.xlu0 %v3712_v7, %s5040_s3  ;;  %v3173_v14 = vmul.f32 %v3162_v63, %v8764_v57  ;;  %vm8971_vm14 = vmor %vm1431_vm7, %vm1432_vm12  ;;  %v10502_v44 = vld [vmem:[#allocation20_spill] sm:$0xff] }
 0x308   : > { %4699 = vrcp.f32 %v3255_v46  ;;  %v3302_v57 = vmul.f32 %v8940_v61, %v8940_v61  ;;  %v8979_v62 = vsub.f32 %v8898_v48, %v10501_v52  ;;  %vm3812_vm15 = vweird.f32 %v8942_v0  ;;  %v4877_v46 = vld [vmem:[#allocation2 + $0xa] sm:$0xff] }
 0x309   : > { %v1404_v21 = vsel %vm1403_vm13, %v8894_v17, %v1400_v59  ;;  %v1429_v40 = vsub.f32 1.5, %v1428_v9  ;;  %v3808_v2 = vmul.f32 0.5, %v3807_v23  ;;  %4701 = vrsqrt.f32 %v8947_v6  ;;  %v10503_v63 = vld [vmem:[#allocation16_spill] sm:$0xff] }
 0x30a   : > { %v3175_v37 = vsub.f32 %v3145_v16, %v3173_v14  ;;  %v1415_v60 = vmul.f32 %v1404_v21, %v8777_v22  ;;  %v8983_v13 = vadd.f32 0.81, %v3302_v57  ;;  %v3198_v39 = vmul.f32 %v8979_v62, %v8979_v62 }
 0x30b   : > { %v1430_v17 = vmul.f32 %v4692_v18, %v1429_v40  ;;  %v3809_v19 = vsub.f32 1.5, %v3808_v2  ;;  %v8992_v7 = vsub.f32 %v8936_v35, %v10502_v44  ;;  %v8995_v59 = vsub.f32 %v4877_v46, %v10503_v63 }
 0x30c   : > { %v4698_v42 = vpop.eup %4697  ;;  %v3177_v16 = vmul.f32 %v3175_v37, %v3175_v37  ;;  %4703 = vrsqrt.f32 %v8983_v13  ;;  %v9002_v2 = vadd.f32 0.81, %v3198_v39  ;;  %v4878_v37 = vld [vmem:[#allocation3 + $0xa] sm:$0xff]  ;;  %vm3811_vm0 = vweird.f32 %v8884_v29 }
 0x30d   : > { %v1434_v8 = vsel %vm8971_vm14, %v4692_v18, %v1430_v17  ;;  %v3834_v38 = vmul.f32 %v4698_v42, %v8945_v5  ;;  %v3810_v14 = vmul.f32 %v8942_v0, %v3809_v19  ;;  %v9005_v50 = vsub.f32 %v4878_v37, %v10458_v10  ;;  %vm9013_vm1 = vmor %vm3811_vm0, %vm3812_vm15 }
 0x30e   : > { %v4700_v9 = vpop.eup %4699  ;;  %v3179_v22 = vadd.f32 0.1, %v3177_v16  ;;  %v1445_v23 = vmul.f32 %v1434_v8, %v8823_v53  ;;  %vm3839_vm2 = vweird.f32 %v8945_v5  ;;  %vm3840_vm3 = vweird.f32 %v4698_v42 }
 0x30f   : > { %v9000_v21 = vpop.eup %4701  ;;  %v3259_v18 = vmul.f32 %v4700_v9, %v3253_v54  ;;  %v3835_v40 = vmul.f32 %v4698_v42, %v3834_v38  ;;  %v3814_v29 = vsel %vm9013_vm1, %v8942_v0, %v3810_v14  ;;  %v1392_v39 = vmul.f32 %v8995_v59, %v8995_v59  ;;  %vm9033_vm4 = vmor %vm3839_vm2, %vm3840_vm3  ;;  %v1382_v9 = vpop.permute.xlu2 %1381 }
 0x310   : > { %4705 = vrcp.f32 %v3179_v22  ;;  %v1447_v57 = vsub.f32 %v1415_v60, %v1445_v23  ;;  %v3288_v53 = vmul.f32 %v9000_v21, %v8947_v6  ;;  %v3226_v60 = vmul.f32 %v8992_v7, %v8992_v7 }
 0x311   : > { %3263 = vrot.lane.b32.xlu1 %v3259_v18, %s5038_s17  ;;  %v3836_v17 = vmul.f32 0.5, %v3835_v40  ;;  %4707 = vrsqrt.f32 %v9002_v2  ;;  %v1422_v38 = vmul.f32 %v9005_v50, %v9005_v50  ;;  %vm3293_vm5 = vweird.f32 %v8947_v6 }
 0x312   : > { %v3289_v19 = vmul.f32 %v9000_v21, %v3288_v53  ;;  %v9029_v5 = vpop.eup %4703  ;;  %v9031_v46 = vmul.f32 %v1447_v57, %v1447_v57  ;;  %v9038_v22 = vadd.f32 0.81, %v3226_v60  ;;  %v3825_v23 = vmul.f32 %v3814_v29, %v8845_v56 }
 0x313   : > { %v3837_v8 = vsub.f32 1.5, %v3836_v17  ;;  %v3316_v18 = vmul.f32 %v9029_v5, %v8983_v13  ;;  %vm3321_vm6 = vweird.f32 %v8983_v13  ;;  %v9044_v40 = vadd.f32 0.81, %v1392_v39 }
 0x314   : > { %v3290_v0 = vmul.f32 0.5, %v3289_v19  ;;  %vm3294_vm7 = vweird.f32 %v9000_v21  ;;  %v9047_v53 = vadd.f32 0.81, %v1422_v38  ;;  %v9051_v54 = vsub.f32 %v8604_v51, %v5786_v32 }
 0x315   : > { %v3838_v14 = vmul.f32 %v4698_v42, %v3837_v8  ;;  %v3317_v19 = vmul.f32 %v9029_v5, %v3316_v18  ;;  %4709 = vrsqrt.f32 %v9038_v22  ;;  %v1451_v60 = vadd.f32 0.1, %v9031_v46  ;;  %vm9067_vm8 = vmor %vm3293_vm5, %vm3294_vm7 }
 0x316   : > { %v4706_v37 = vpop.eup %4705  ;;  %v3291_v57 = vsub.f32 1.5, %v3290_v0  ;;  %vm3217_vm9 = vweird.f32 %v9002_v2  ;;  %4711 = vrsqrt.f32 %v9044_v40  ;;  %v9079_v38 = vsub.f32 %v8727_v4, %v5672_v41 }
 0x317   : > { %v9053_v17 = vpop.eup %4707  ;;  %v3183_v56 = vmul.f32 %v4706_v37, %v3177_v16  ;;  %v3842_v29 = vsel %vm9033_vm4, %v4698_v42, %v3838_v14  ;;  %v3318_v42 = vmul.f32 0.5, %v3317_v19  ;;  %4713 = vrsqrt.f32 %v9047_v53 }
 0x318   : > { %v3853_v39 = vmul.f32 %v3842_v29, %v8892_v1  ;;  %v3292_v8 = vmul.f32 %v9000_v21, %v3291_v57  ;;  %v3212_v32 = vmul.f32 %v9053_v17, %v9002_v2  ;;  %v9075_v1 = vsub.f32 %v8727_v4, %v5867_v47 }
 0x319   : > { %3187 = vrot.lane.b32.xlu2 %v3183_v56, %s5040_s3  ;;  %v3319_v18 = vsub.f32 1.5, %v3318_v42  ;;  %vm3322_vm10 = vweird.f32 %v9029_v5  ;;  %v9088_v37 = vadd.f32 %v1382_v9, %v8737_v31  ;;  %v3878_v4 = vmul.f32 %v9051_v54, %v9051_v54 }
 0x31a   : > { %v3855_v0 = vsub.f32 %v3825_v23, %v3853_v39  ;;  %v3296_v6 = vsel %vm9067_vm8, %v9000_v21, %v3292_v8  ;;  %v3213_v14 = vmul.f32 %v9053_v17, %v3212_v32  ;;  %4715 = vrcp.f32 %v1451_v60  ;;  %vm3323_vm13 = vmor %vm3321_vm6, %vm3322_vm10 }
 0x31b   : > { %vm3245_vm11 = vweird.f32 %v9038_v22  ;;  %v4710_v56 = vpop.eup %4709  ;;  %v3298_v21 = vmul.f32 %v3296_v6, %v8902_v43  ;;  %v3320_v29 = vmul.f32 %v9029_v5, %v3319_v18  ;;  %vm3218_vm12 = vweird.f32 %v9053_v17 }
 0x31c   : > { %v3857_v57 = vmul.f32 %v3855_v0, %v3855_v0  ;;  %v3214_v23 = vmul.f32 0.5, %v3213_v14  ;;  %v9096_v19 = vadd.f32 0.81, %v3878_v4  ;;  %v3240_v60 = vmul.f32 %v4710_v56, %v9038_v22  ;;  %v9105_v32 = vpop.eup %4711  ;;  %vm9124_vm1 = vmor %vm3217_vm9, %vm3218_vm12 }
 0x31d   : > { %v9103_v8 = vsub.f32 %v8617_v24, %v5803_v26  ;;  %v3324_v43 = vsel %vm3323_vm13, %v9029_v5, %v3320_v29  ;;  %vm1441_vm14 = vweird.f32 %v9047_v53  ;;  %v3453_v16 = vmul.f32 %v9075_v1, %v9075_v1  ;;  %v4714_v13 = vpop.eup %4713 }
 0x31e   : > { %v3859_v39 = vadd.f32 0.1, %v3857_v57  ;;  %v3215_v31 = vsub.f32 1.5, %v3214_v23  ;;  %4717 = vrsqrt.f32 %v9096_v19  ;;  %v3326_v42 = vmul.f32 %v3324_v43, %v8940_v61 }
 0x31f   : > { %v3241_v0 = vmul.f32 %v4710_v56, %v3240_v60  ;;  %vm3246_vm15 = vweird.f32 %v4710_v56  ;;  %v1406_v26 = vmul.f32 %v9105_v32, %v9044_v40  ;;  %vm1411_vm0 = vweird.f32 %v9044_v40 }
 0x320   : > { %4719 = vrcp.f32 %v3859_v39  ;;  %v3216_v9 = vmul.f32 %v9053_v17, %v3215_v31  ;;  %v1436_v5 = vmul.f32 %v4714_v13, %v9047_v53  ;;  %v3377_v6 = vmul.f32 %v9079_v38, %v9079_v38  ;;  %v4716_v14 = vpop.eup %4715  ;;  %vm9144_vm4 = vmor %vm3245_vm11, %vm3246_vm15 }
 0x321   : > { %v3328_v18 = vsub.f32 %v3298_v21, %v3326_v42  ;;  %v3242_v4 = vmul.f32 0.5, %v3241_v0  ;;  %vm1412_vm2 = vweird.f32 %v9105_v32  ;;  %v3906_v23 = vmul.f32 %v9103_v8, %v9103_v8 }
 0x322   : > { %v3220_v29 = vsel %vm9124_vm1, %v9053_v17, %v3216_v9  ;;  %v1407_v21 = vmul.f32 %v9105_v32, %v1406_v26  ;;  %v1437_v39 = vmul.f32 %v4714_v13, %v1436_v5  ;;  %v9135_v31 = vadd.f32 0.81, %v3453_v16  ;;  %vm1413_vm6 = vmor %vm1411_vm0, %vm1412_vm2 }
 0x323   : > { %v3330_v2 = vmul.f32 %v3328_v18, %v3328_v18  ;;  %v3243_v60 = vsub.f32 1.5, %v3242_v4  ;;  %vm1442_vm3 = vweird.f32 %v4714_v13  ;;  %v9137_v43 = vadd.f32 0.81, %v3906_v23 }
 0x324   : > { %v9139_v42 = vpop.eup %4717  ;;  %v1408_v17 = vmul.f32 0.5, %v1407_v21  ;;  %v1438_v9 = vmul.f32 0.5, %v1437_v39  ;;  %v9150_v16 = vsub.f32 %v8633_v28, %v10423_v3  ;;  %4721 = vrsqrt.f32 %v9135_v31  ;;  %v9157_v21 = vpop.permute.xlu0 %1527  ;;  %vm9165_vm5 = vmor %vm1441_vm14, %vm1442_vm3 }
 0x325   : > { %v3332_v5 = vadd.f32 0.1, %v3330_v2  ;;  %v3222_v18 = vmul.f32 %v3220_v29, %v8979_v62  ;;  %v3244_v61 = vmul.f32 %v4710_v56, %v3243_v60  ;;  %v3892_v22 = vmul.f32 %v9139_v42, %v9096_v19 }
 0x326   : > { %v4720_v26 = vpop.eup %4719  ;;  %v1409_v23 = vsub.f32 1.5, %v1408_v17  ;;  %v1439_v41 = vsub.f32 1.5, %v1438_v9  ;;  %4723 = vrsqrt.f32 %v9137_v43  ;;  %v1455_v39 = vmul.f32 %v4716_v14, %v9031_v46 }
 0x327   : > { %v3863_v4 = vmul.f32 %v4720_v26, %v3857_v57  ;;  %4725 = vrcp.f32 %v3332_v5  ;;  %v3248_v3 = vsel %vm9144_vm4, %v4710_v56, %v3244_v61  ;;  %v3893_v57 = vmul.f32 %v9139_v42, %v3892_v22 }
 0x328   : > { %v3250_v29 = vmul.f32 %v3248_v3, %v8992_v7  ;;  %v1410_v60 = vmul.f32 %v9105_v32, %v1409_v23  ;;  %v1440_v46 = vmul.f32 %v4714_v13, %v1439_v41  ;;  %v3425_v14 = vmul.f32 %v9150_v16, %v9150_v16 }
 0x329   : > { %3867 = vrot.lane.b32.xlu0 %v3863_v4, %s5041_s4  ;;  %v1457_v56 = vadd.f32 %v1455_v39, %v8924_v58  ;;  %v3894_v53 = vmul.f32 0.5, %v3893_v57  ;;  %v9182_v0 = vsub.f32 %v8633_v28, %v5631_v15  ;;  %v9184_v17 = vadd.f32 0.81, %v3377_v6 }
 0x32a   : > { %v9186_v3 = vpop.eup %4721  ;;  %v3252_v41 = vsub.f32 %v3222_v18, %v3250_v29  ;;  %v1414_v7 = vsel %vm1413_vm6, %v9105_v32, %v1410_v60  ;;  %v1444_v58 = vsel %vm9165_vm5, %v4714_v13, %v1440_v46  ;;  %v9191_v9 = vadd.f32 0.81, %v3425_v14  ;;  %v9202_v18 = vpop.permute.xlu1 %1529 }
 0x32b   : > { %v1416_v40 = vmul.f32 %v1414_v7, %v8995_v59  ;;  %v1446_v26 = vmul.f32 %v1444_v58, %v9005_v50  ;;  %v3895_v5 = vsub.f32 1.5, %v3894_v53  ;;  %v3458_v28 = vmul.f32 %v9186_v3, %v9135_v31 }
 0x32c   : > { %v9197_v6 = vpop.eup %4723  ;;  %v3254_v61 = vmul.f32 %v3252_v41, %v3252_v41  ;;  %vm3897_vm7 = vweird.f32 %v9096_v19  ;;  %vm3898_vm8 = vweird.f32 %v9139_v42  ;;  %4727 = vrsqrt.f32 %v9191_v9  ;;  %v9229_v60 = vpop.permute.xlu0 %1605 }
 0x32d   : > { %v4726_v32 = vpop.eup %4725  ;;  %v1448_v13 = vsub.f32 %v1416_v40, %v1446_v26  ;;  %v3896_v59 = vmul.f32 %v9139_v42, %v3895_v5  ;;  %v3920_v50 = vmul.f32 %v9197_v6, %v9137_v43  ;;  %v9209_v22 = vsub.f32 %v8604_v51, %v5220_v34  ;;  %vm9222_vm10 = vmor %vm3897_vm7, %vm3898_vm8 }
 0x32e   : > { %v3336_v4 = vmul.f32 %v4726_v32, %v3330_v2  ;;  %v3256_v23 = vadd.f32 0.1, %v3254_v61  ;;  %v3459_v39 = vmul.f32 %v9186_v3, %v3458_v28  ;;  %v3349_v62 = vmul.f32 %v9182_v0, %v9182_v0 }
 0x32f   : > { %v1450_v57 = vmul.f32 %v1448_v13, %v1448_v13  ;;  %v3921_v29 = vmul.f32 %v9197_v6, %v3920_v50  ;;  %vm3463_vm9 = vweird.f32 %v9135_v31  ;;  %4729 = vrsqrt.f32 %v9184_v17  ;;  %v9274_v31 = vld [vmem:[#allocation2 + $0x6] sm:$0xff] }
 0x330   : > { %3341 = vrot.lane.b32.xlu1 %v3336_v4, %s5041_s4  ;;  %4731 = vrcp.f32 %v3256_v23  ;;  %vm3925_vm11 = vweird.f32 %v9137_v43  ;;  %v3460_v51 = vmul.f32 0.5, %v3459_v39  ;;  %v9227_v2 = vadd.f32 0.81, %v3349_v62 }
 0x331   : > { %v1452_v46 = vadd.f32 0.1, %v1450_v57  ;;  %v3900_v14 = vsel %vm9222_vm10, %v9139_v42, %v3896_v59  ;;  %v3922_v53 = vmul.f32 0.5, %v3921_v29  ;;  %v3574_v19 = vmul.f32 %v9209_v22, %v9209_v22  ;;  %v9281_v29 = vld [vmem:[#allocation3 + $0x6] sm:$0xff] }
 0x332   : > { %v9236_v41 = vpop.eup %4727  ;;  %v3461_v7 = vsub.f32 1.5, %v3460_v51  ;;  %vm3464_vm12 = vweird.f32 %v9186_v3  ;;  %4733 = vrsqrt.f32 %v9227_v2  ;;  %v9242_v58 = vsub.f32 %v8617_v24, %v10467_v27  ;;  %v1680_v43 = vpop.permute.xlu1 %1679 }
 0x333   : > { %4735 = vrcp.f32 %v1452_v46  ;;  %v3923_v40 = vsub.f32 1.5, %v3922_v53  ;;  %vm3926_vm13 = vweird.f32 %v9197_v6  ;;  %v3430_v42 = vmul.f32 %v9236_v41, %v9191_v9  ;;  %vm9261_vm0 = vmor %vm3463_vm9, %vm3464_vm12 }
 0x334   : > { %vm3435_vm14 = vweird.f32 %v9191_v9  ;;  %v3902_v26 = vmul.f32 %v3900_v14, %v9051_v54  ;;  %v3462_v5 = vmul.f32 %v9186_v3, %v3461_v7  ;;  %vm3387_vm15 = vweird.f32 %v9184_v17  ;;  %vm3927_vm1 = vmor %vm3925_vm11, %vm3926_vm13 }
 0x335   : > { %v9251_v28 = vadd.f32 0.81, %v3574_v19  ;;  %v9253_v32 = vpop.eup %4729  ;;  %v3924_v27 = vmul.f32 %v9197_v6, %v3923_v40  ;;  %v3431_v24 = vmul.f32 %v9236_v41, %v3430_v42  ;;  %v1533_v54 = vadd.f32 %v9157_v21, %v1457_v56  ;;  %v1604_v21 = vpop.permute.xlu2 %1603 }
 0x336   : > { %v3602_v59 = vmul.f32 %v9242_v58, %v9242_v58  ;;  %v4732_v50 = vpop.eup %4731  ;;  %vm3436_vm2 = vweird.f32 %v9236_v41  ;;  %v3382_v4 = vmul.f32 %v9253_v32, %v9184_v17  ;;  %v9278_v23 = vsub.f32 %v9274_v31, %v10475_v12 }
 0x337   : > { %4737 = vrsqrt.f32 %v9251_v28  ;;  %v3260_v56 = vmul.f32 %v4732_v50, %v3254_v61  ;;  %v3928_v39 = vsel %vm3927_vm1, %v9197_v6, %v3924_v27  ;;  %v3432_v62 = vmul.f32 0.5, %v3431_v24  ;;  %vm3437_vm5 = vmor %vm3435_vm14, %vm3436_vm2 }
 0x338   : > { %v9285_v34 = vsub.f32 %v9281_v29, %v10435_v45  ;;  %v4734_v51 = vpop.eup %4733  ;;  %v3930_v46 = vmul.f32 %v3928_v39, %v9103_v8  ;;  %v3466_v12 = vsel %vm9261_vm0, %v9186_v3, %v3462_v5  ;;  %v3383_v14 = vmul.f32 %v9253_v32, %v3382_v4  ;;  %v1756_v3 = vpop.permute.xlu0 %1755 }
 0x339   : > { %v1609_v61 = vadd.f32 %v1604_v21, %v1533_v54  ;;  %v4736_v53 = vpop.eup %4735  ;;  %3265 = vrot.lane.b32.xlu2 %v3260_v56, %s5038_s17  ;;  %v3433_v6 = vsub.f32 1.5, %v3432_v62  ;;  %v3354_v19 = vmul.f32 %v4734_v51, %v9227_v2  ;;  %vm3359_vm3 = vweird.f32 %v9227_v2 }
 0x33a   : > { %vm3388_vm4 = vweird.f32 %v9253_v32  ;;  %v9296_v45 = vadd.f32 0.81, %v3602_v59  ;;  %v1456_v8 = vmul.f32 %v4736_v53, %v1450_v57  ;;  %v3932_v7 = vsub.f32 %v3902_v26, %v3930_v46 }
 0x33b   : > { %v3384_v40 = vmul.f32 0.5, %v3383_v14  ;;  %v1685_v42 = vadd.f32 %v1680_v43, %v1609_v61  ;;  %v3434_v5 = vmul.f32 %v9236_v41, %v3433_v6  ;;  %v3477_v27 = vmul.f32 %v3466_v12, %v9075_v1  ;;  %vm9315_vm7 = vmor %vm3387_vm15, %vm3388_vm4 }
 0x33c   : > { %v3355_v24 = vmul.f32 %v4734_v51, %v3354_v19  ;;  %4739 = vrsqrt.f32 %v9296_v45  ;;  %v1458_v54 = vadd.f32 %v1456_v8, %v9088_v37  ;;  %v3934_v50 = vmul.f32 %v3932_v7, %v3932_v7 }
 0x33d   : > { %v9301_v13 = vpop.eup %4737  ;;  %v3385_v57 = vsub.f32 1.5, %v3384_v40  ;;  %v9308_v26 = vadd.f32 %v1756_v3, %v1685_v42  ;;  %v3438_v59 = vsel %vm3437_vm5, %v9236_v41, %v3434_v5  ;;  %vm3360_vm6 = vweird.f32 %v4734_v51  ;;  %v1682_v1 = vpop.permute.xlu2 %1681 }
 0x33e   : > { %v3356_v4 = vmul.f32 0.5, %v3355_v24  ;;  %v3588_v37 = vmul.f32 %v9301_v13, %v9251_v28  ;;  %v1534_v9 = vadd.f32 %v9202_v18, %v1458_v54  ;;  %v3936_v21 = vadd.f32 0.1, %v3934_v50  ;;  %vm3361_vm11 = vmor %vm3359_vm3, %vm3360_vm6 }
 0x33f   : > { %v3449_v56 = vmul.f32 %v3438_v59, %v9150_v16  ;;  %v3386_v41 = vmul.f32 %v9253_v32, %v3385_v57  ;;  %vm3593_vm8 = vweird.f32 %v9251_v28  ;;  %v9328_v17 = vsub.f32 %v8898_v48, %v6083_v30 }
 0x340   : > { %v3357_v39 = vsub.f32 1.5, %v3356_v4  ;;  %v3589_v62 = vmul.f32 %v9301_v13, %v3588_v37  ;;  %v9332_v43 = vsub.f32 %v8936_v35, %v10476_v20  ;;  %4741 = vrcp.f32 %v3936_v21 }
 0x341   : > { %v3479_v18 = vsub.f32 %v3449_v56, %v3477_v27  ;;  %v3390_v16 = vsel %vm9315_vm7, %v9253_v32, %v3386_v41  ;;  %vm3621_vm9 = vweird.f32 %v9296_v45  ;;  %vm3594_vm10 = vweird.f32 %v9301_v13  ;;  %v1758_v41 = vpop.permute.xlu1 %1757 }
 0x342   : > { %v4740_v46 = vpop.eup %4739  ;;  %v3358_v12 = vmul.f32 %v4734_v51, %v3357_v39  ;;  %v3590_v14 = vmul.f32 0.5, %v3589_v62  ;;  %v3426_v48 = vmul.f32 %v9328_v17, %v9328_v17  ;;  %v3401_v35 = vmul.f32 %v3390_v16, %v9079_v38  ;;  %vm9364_vm13 = vmor %vm3593_vm8, %vm3594_vm10 }
 0x343   : > { %v3481_v61 = vmul.f32 %v3479_v18, %v3479_v18  ;;  %v3616_v53 = vmul.f32 %v4740_v46, %v9296_v45  ;;  %v3454_v32 = vmul.f32 %v9332_v43, %v9332_v43  ;;  %v3725_v7 = vmul.f32 %v9278_v23, %v9278_v23 }
 0x344   : > { %v3362_v6 = vsel %vm3361_vm11, %v4734_v51, %v3358_v12  ;;  %v3591_v19 = vsub.f32 1.5, %v3590_v14  ;;  %v9348_v8 = vadd.f32 0.81, %v3426_v48  ;;  %v1610_v38 = vadd.f32 %v9229_v60, %v1534_v9  ;;  %v4881_v9 = vld [vmem:[#allocation2 + $0x3] sm:$0xff] }
 0x345   : > { %v3483_v40 = vadd.f32 0.1, %v3481_v61  ;;  %v3373_v42 = vmul.f32 %v3362_v6, %v9182_v0  ;;  %v3617_v3 = vmul.f32 %v4740_v46, %v3616_v53  ;;  %v9353_v2 = vadd.f32 0.81, %v3454_v32 }
 0x346   : > { %v3592_v5 = vmul.f32 %v9301_v13, %v3591_v19  ;;  %4743 = vrsqrt.f32 %v9348_v8  ;;  %v9358_v27 = vadd.f32 0.81, %v3725_v7  ;;  %v4742_v51 = vpop.eup %4741  ;;  %vm3622_vm12 = vweird.f32 %v4740_v46  ;;  %v1834_v7 = vpop.permute.xlu0 %1833 }
 0x347   : > { %4745 = vrcp.f32 %v3483_v40  ;;  %v3403_v24 = vsub.f32 %v3373_v42, %v3401_v35  ;;  %v3618_v54 = vmul.f32 0.5, %v3617_v3  ;;  %v3940_v57 = vmul.f32 %v4742_v51, %v3934_v50  ;;  %vm9376_vm14 = vmor %vm3621_vm9, %vm3622_vm12  ;;  %v4882_v42 = vld [vmem:[#allocation3 + $0x3] sm:$0xff] }
 0x348   : > { %4747 = vrsqrt.f32 %v9353_v2  ;;  %v3596_v59 = vsel %vm9364_vm13, %v9301_v13, %v3592_v5  ;;  %v3753_v50 = vmul.f32 %v9285_v34, %v9285_v34  ;;  %v9384_v37 = vsub.f32 %v9274_v31, %v10436_v11 }
 0x349   : > { %v3405_v60 = vmul.f32 %v3403_v24, %v3403_v24  ;;  %v3619_v4 = vsub.f32 1.5, %v3618_v54  ;;  %4749 = vrsqrt.f32 %v9358_v27  ;;  %3945 = vrot.lane.b32.xlu0 %v3940_v57, %s5042_s30  ;;  %v9388_v13 = vsub.f32 %v9281_v29, %v5351_v25 }
 0x34a   : > { %v9391_v21 = vsub.f32 %v4881_v9, %v10441_v36  ;;  %v1686_v39 = vadd.f32 %v1682_v1, %v1610_v38  ;;  %v3598_v18 = vmul.f32 %v3596_v59, %v9209_v22  ;;  %v9396_v16 = vadd.f32 0.81, %v3753_v50 }
 0x34b   : > { %v3407_v45 = vadd.f32 0.1, %v3405_v60  ;;  %v3620_v56 = vmul.f32 %v4740_v46, %v3619_v4  ;;  %v3649_v11 = vmul.f32 %v9384_v37, %v9384_v37  ;;  %v3677_v25 = vmul.f32 %v9388_v13, %v9388_v13 }
 0x34c   : > { %v9393_v62 = vpop.eup %4743  ;;  %v1919_v35 = vmul.f32 %v9391_v21, %v9391_v21  ;;  %v1762_v6 = vadd.f32 %v1758_v41, %v1686_v39  ;;  %vm3445_vm15 = vweird.f32 %v9348_v8  ;;  %v9419_v3 = vsub.f32 %v4882_v42, %v10442_v33 }
 0x34d   : > { %v4746_v12 = vpop.eup %4745  ;;  %4751 = vrcp.f32 %v3407_v45  ;;  %v3624_v14 = vsel %vm9376_vm14, %v4740_v46, %v3620_v56  ;;  %v3440_v48 = vmul.f32 %v9393_v62, %v9348_v8  ;;  %vm3473_vm0 = vweird.f32 %v9353_v2 }
 0x34e   : > { %v9408_v22 = vpop.eup %4747  ;;  %v3487_v53 = vmul.f32 %v4746_v12, %v3481_v61  ;;  %v3626_v32 = vmul.f32 %v3624_v14, %v9242_v58  ;;  %4753 = vrsqrt.f32 %v9396_v16  ;;  %v9423_v61 = vadd.f32 %v1834_v7, %v1762_v6 }
 0x34f   : > { %v9412_v19 = vpop.eup %4749  ;;  %v3441_v40 = vmul.f32 %v9393_v62, %v3440_v48  ;;  %v3468_v46 = vmul.f32 %v9408_v22, %v9353_v2  ;;  %v9428_v24 = vadd.f32 0.81, %v3649_v11  ;;  %v9430_v54 = vadd.f32 0.81, %v3677_v25 }
 0x350   : > { %3491 = vrot.lane.b32.xlu1 %v3487_v53, %s5043_s23  ;;  %v3628_v58 = vsub.f32 %v3598_v18, %v3626_v32  ;;  %v3730_v38 = vmul.f32 %v9412_v19, %v9358_v27  ;;  %vm3446_vm1 = vweird.f32 %v9393_v62  ;;  %v9434_v59 = vadd.f32 0.81, %v1919_v35  ;;  %v9472_v32 = vld [vmem:[#allocation2 + $0xe] sm:$0xff] }
 0x351   : > { %v3442_v5 = vmul.f32 0.5, %v3441_v40  ;;  %v3469_v51 = vmul.f32 %v9408_v22, %v3468_v46  ;;  %4755 = vrsqrt.f32 %v9428_v24  ;;  %v1949_v50 = vmul.f32 %v9419_v3, %v9419_v3  ;;  %vm3447_vm3 = vmor %vm3445_vm15, %vm3446_vm1  ;;  %v9487_v46 = vld [vmem:[#allocation3 + $0xe] sm:$0xff] }
 0x352   : > { %v3630_v57 = vmul.f32 %v3628_v58, %v3628_v58  ;;  %v3731_v0 = vmul.f32 %v9412_v19, %v3730_v38  ;;  %4757 = vrsqrt.f32 %v9430_v54  ;;  %vm3474_vm2 = vweird.f32 %v9408_v22  ;;  %v1832_v38 = vpop.permute.xlu2 %1831 }
 0x353   : > { %v4752_v4 = vpop.eup %4751  ;;  %v3443_v1 = vsub.f32 1.5, %v3442_v5  ;;  %v3470_v28 = vmul.f32 0.5, %v3469_v51  ;;  %vm3735_vm4 = vweird.f32 %v9358_v27  ;;  %vm3736_vm5 = vweird.f32 %v9412_v19  ;;  %vm3475_vm6 = vmor %vm3473_vm0, %vm3474_vm2 }
 0x354   : > { %v9439_v9 = vpop.eup %4753  ;;  %v3411_v45 = vmul.f32 %v4752_v4, %v3405_v60  ;;  %v3632_v56 = vadd.f32 0.1, %v3630_v57  ;;  %v3732_v41 = vmul.f32 0.5, %v3731_v0  ;;  %vm3763_vm7 = vweird.f32 %v9396_v16  ;;  %vm9468_vm9 = vmor %vm3735_vm4, %vm3736_vm5 }
 0x355   : > { %v3444_v39 = vmul.f32 %v9393_v62, %v3443_v1  ;;  %v3471_v18 = vsub.f32 1.5, %v3470_v28  ;;  %v3758_v11 = vmul.f32 %v9439_v9, %v9396_v16  ;;  %vm3764_vm8 = vweird.f32 %v9439_v9 }
 0x356   : > { %3415 = vrot.lane.b32.xlu2 %v3411_v45, %s5042_s30  ;;  %4759 = vrcp.f32 %v3632_v56  ;;  %v3733_v60 = vsub.f32 1.5, %v3732_v41  ;;  %v9462_v8 = vadd.f32 0.81, %v1949_v50  ;;  %v9476_v6 = vsub.f32 %v9472_v32, %v10495_v55  ;;  %vm9506_vm13 = vmor %vm3763_vm7, %vm3764_vm8 }
 0x357   : > { %v3448_v25 = vsel %vm3447_vm3, %v9393_v62, %v3444_v39  ;;  %v3472_v12 = vmul.f32 %v9408_v22, %v3471_v18  ;;  %v3759_v14 = vmul.f32 %v9439_v9, %v3758_v11  ;;  %4761 = vrsqrt.f32 %v9434_v59  ;;  %v9464_v27 = vpop.eup %4755 }
 0x358   : > { %v3734_v48 = vmul.f32 %v9412_v19, %v3733_v60  ;;  %v3450_v62 = vmul.f32 %v3448_v25, %v9328_v17  ;;  %v9478_v7 = vpop.eup %4757  ;;  %vm3659_vm10 = vweird.f32 %v9428_v24  ;;  %v9491_v42 = vsub.f32 %v9487_v46, %v10498_v49 }
 0x359   : > { %v3476_v35 = vsel %vm3475_vm6, %v9408_v22, %v3472_v12  ;;  %v3760_v2 = vmul.f32 0.5, %v3759_v14  ;;  %v3654_v22 = vmul.f32 %v9464_v27, %v9428_v24  ;;  %vm3660_vm11 = vweird.f32 %v9464_v27 }
 0x35a   : > { %v3478_v40 = vmul.f32 %v3476_v35, %v9332_v43  ;;  %v3738_v17 = vsel %vm9468_vm9, %v9412_v19, %v3734_v48  ;;  %v3682_v43 = vmul.f32 %v9478_v7, %v9430_v54  ;;  %vm3687_vm12 = vweird.f32 %v9430_v54  ;;  %vm3661_vm0 = vmor %vm3659_vm10, %vm3660_vm11 }
 0x35b   : > { %v3761_v55 = vsub.f32 1.5, %v3760_v2  ;;  %v9499_v19 = vsub.f32 %v9472_v32, %v10501_v52  ;;  %v3749_v51 = vmul.f32 %v3738_v17, %v9278_v23  ;;  %v3655_v0 = vmul.f32 %v9464_v27, %v3654_v22  ;;  %v1908_v23 = vpop.permute.xlu1 %1907 }
 0x35c   : > { %v4760_v58 = vpop.eup %4759  ;;  %v3480_v5 = vsub.f32 %v3450_v62, %v3478_v40  ;;  %4763 = vrsqrt.f32 %v9462_v8  ;;  %v3683_v28 = vmul.f32 %v9478_v7, %v3682_v43  ;;  %v1837_v50 = vadd.f32 %v1832_v38, %v9308_v26 }
 0x35d   : > { %v9512_v4 = vpop.eup %4761  ;;  %v3636_v52 = vmul.f32 %v4760_v58, %v3630_v57  ;;  %v3762_v1 = vmul.f32 %v9439_v9, %v3761_v55  ;;  %v3656_v16 = vmul.f32 0.5, %v3655_v0  ;;  %vm3688_vm14 = vweird.f32 %v9478_v7 }
 0x35e   : > { %v3482_v45 = vmul.f32 %v3480_v5, %v3480_v5  ;;  %v1924_v56 = vmul.f32 %v9512_v4, %v9434_v59  ;;  %v3684_v41 = vmul.f32 0.5, %v3683_v28  ;;  %vm1929_vm15 = vweird.f32 %v9434_v59  ;;  %vm3689_vm2 = vmor %vm3687_vm12, %vm3688_vm14 }
 0x35f   : > { %3641 = vrot.lane.b32.xlu1 %v3636_v52, %s5039_s29  ;;  %v3766_v57 = vsel %vm9506_vm13, %v9439_v9, %v3762_v1  ;;  %v9525_v39 = vadd.f32 %v1908_v23, %v1837_v50  ;;  %v3802_v26 = vmul.f32 %v9476_v6, %v9476_v6  ;;  %v3657_v60 = vsub.f32 1.5, %v3656_v16  ;;  %v9647_v50 = vpop.permute.xlu0 %2055 }
 0x360   : > { %v3484_v18 = vadd.f32 0.1, %v3482_v45  ;;  %v3777_v11 = vmul.f32 %v3766_v57, %v9285_v34  ;;  %v1925_v25 = vmul.f32 %v9512_v4, %v1924_v56  ;;  %v3685_v12 = vsub.f32 1.5, %v3684_v41  ;;  %v4886_v57 = vld [vmem:[#allocation3 + $0xb] sm:$0xff] }
 0x361   : > { %v9531_v14 = vadd.f32 0.81, %v3802_v26  ;;  %v3830_v9 = vmul.f32 %v9491_v42, %v9491_v42  ;;  %v3726_v48 = vmul.f32 %v9499_v19, %v9499_v19  ;;  %v3658_v53 = vmul.f32 %v9464_v27, %v3657_v60 }
 0x362   : > { %v4764_v62 = vpop.eup %4763  ;;  %4765 = vrcp.f32 %v3484_v18  ;;  %v3779_v35 = vsub.f32 %v3749_v51, %v3777_v11  ;;  %v1926_v2 = vmul.f32 0.5, %v1925_v25  ;;  %v3686_v34 = vmul.f32 %v9478_v7, %v3685_v12 }
 0x363   : > { %v1954_v40 = vmul.f32 %v4764_v62, %v9462_v8  ;;  %vm1959_vm1 = vweird.f32 %v9462_v8  ;;  %4767 = vrsqrt.f32 %v9531_v14  ;;  %v3662_v22 = vsel %vm3661_vm0, %v9464_v27, %v3658_v53 }
 0x364   : > { %v3781_v17 = vmul.f32 %v3779_v35, %v3779_v35  ;;  %v1927_v55 = vsub.f32 1.5, %v1926_v2  ;;  %vm1930_vm3 = vweird.f32 %v9512_v4  ;;  %v3673_v24 = vmul.f32 %v3662_v22, %v9384_v37 }
 0x365   : > { %v3690_v43 = vsel %vm3689_vm2, %v9478_v7, %v3686_v34  ;;  %v1955_v58 = vmul.f32 %v4764_v62, %v1954_v40  ;;  %v9554_v38 = vadd.f32 0.81, %v3830_v9  ;;  %v9558_v49 = vadd.f32 0.81, %v3726_v48  ;;  %vm9569_vm5 = vmor %vm1929_vm15, %vm1930_vm3  ;;  %v1910_v34 = vpop.permute.xlu2 %1909 }
 0x366   : > { %v3783_v5 = vadd.f32 0.1, %v3781_v17  ;;  %v3701_v51 = vmul.f32 %v3690_v43, %v9388_v13  ;;  %v1928_v27 = vmul.f32 %v9512_v4, %v1927_v55  ;;  %vm1960_vm4 = vweird.f32 %v4764_v62 }
 0x367   : > { %v1956_v0 = vmul.f32 0.5, %v1955_v58  ;;  %4769 = vrsqrt.f32 %v9554_v38  ;;  %v9563_v54 = vsub.f32 %v9487_v46, %v10502_v44  ;;  %vm9581_vm6 = vmor %vm1959_vm1, %vm1960_vm4  ;;  %v9594_v8 = vsub.f32 %v4886_v57, %v10458_v10 }
 0x368   : > { %v4766_v37 = vpop.eup %4765  ;;  %4771 = vrcp.f32 %v3783_v5  ;;  %v3703_v7 = vsub.f32 %v3673_v24, %v3701_v51  ;;  %v1932_v28 = vsel %vm9569_vm5, %v9512_v4, %v1928_v27  ;;  %v4885_v4 = vld [vmem:[#allocation2 + $0xb] sm:$0xff]  ;;  %v9598_v41 = vsub.f32 %v9281_v29, %v5867_v47 }
 0x369   : > { %v9573_v52 = vpop.eup %4767  ;;  %v3488_v1 = vmul.f32 %v4766_v37, %v3482_v45  ;;  %v1957_v44 = vsub.f32 1.5, %v1956_v0  ;;  %4773 = vrsqrt.f32 %v9558_v49  ;;  %v3754_v45 = vmul.f32 %v9563_v54, %v9563_v54 }
 0x36a   : > { %v3705_v23 = vmul.f32 %v3703_v7, %v3703_v7  ;;  %v3816_v59 = vmul.f32 %v9573_v52, %v9531_v14  ;;  %v9591_v56 = vsub.f32 %v4885_v4, %v10503_v63  ;;  %v1943_v18 = vmul.f32 %v1932_v28, %v9391_v21 }
 0x36b   : > { %3493 = vrot.lane.b32.xlu2 %v3488_v1, %s5043_s23  ;;  %v1958_v16 = vmul.f32 %v4764_v62, %v1957_v44  ;;  %v9602_v60 = vadd.f32 0.81, %v3754_v45  ;;  %v1950_v48 = vmul.f32 %v9594_v8, %v9594_v8  ;;  %vm3822_vm7 = vweird.f32 %v9573_v52 }
 0x36c   : > { %v3707_v26 = vadd.f32 0.1, %v3705_v23  ;;  %v3817_v11 = vmul.f32 %v9573_v52, %v3816_v59  ;;  %v1920_v9 = vmul.f32 %v9591_v56, %v9591_v56  ;;  %vm3821_vm8 = vweird.f32 %v9531_v14 }
 0x36d   : > { %v4770_v25 = vpop.eup %4769  ;;  %v1962_v12 = vsel %vm9581_vm6, %v4764_v62, %v1958_v16  ;;  %v3981_v62 = vmul.f32 %v9598_v41, %v9598_v41  ;;  %vm3849_vm9 = vweird.f32 %v9554_v38  ;;  %v9625_v43 = vadd.f32 0.81, %v1950_v48  ;;  %vm9633_vm10 = vmor %vm3821_vm8, %vm3822_vm7 }
 0x36e   : > { %v4772_v35 = vpop.eup %4771  ;;  %4775 = vrcp.f32 %v3707_v26  ;;  %v1973_v47 = vmul.f32 %v1962_v12, %v9419_v3  ;;  %v3818_v53 = vmul.f32 0.5, %v3817_v11  ;;  %v3844_v21 = vmul.f32 %v4770_v25, %v9554_v38  ;;  %v10536_v12 = vld [vmem:[#allocation30_spill] sm:$0xff]  ;;  %v9674_v38 = vpop.permute.xlu2 %2131 }
 0x36f   : > { %v9612_v2 = vpop.eup %4773  ;;  %v3787_v40 = vmul.f32 %v4772_v35, %v3781_v17  ;;  %4777 = vrsqrt.f32 %v9602_v60  ;;  %v9623_v17 = vadd.f32 0.81, %v1920_v9  ;;  %vm3850_vm11 = vweird.f32 %v4770_v25 }
 0x370   : > { %v1975_v22 = vsub.f32 %v1943_v18, %v1973_v47  ;;  %v3819_v55 = vsub.f32 1.5, %v3818_v53  ;;  %v3845_v24 = vmul.f32 %v4770_v25, %v3844_v21  ;;  %v3740_v3 = vmul.f32 %v9612_v2, %v9558_v49  ;;  %vm3851_vm14 = vmor %vm3849_vm9, %vm3850_vm11 }
 0x371   : > { %3791 = vrot.lane.b32.xlu1 %v3787_v40, %s5038_s17  ;;  %vm3745_vm12 = vweird.f32 %v9558_v49  ;;  %4779 = vrsqrt.f32 %v9623_v17  ;;  %v9639_v14 = vadd.f32 0.81, %v3981_v62  ;;  %vm3746_vm13 = vweird.f32 %v9612_v2 }
 0x372   : > { %v9627_v58 = vmul.f32 %v1975_v22, %v1975_v22  ;;  %v3820_v5 = vmul.f32 %v9573_v52, %v3819_v55  ;;  %v3846_v51 = vmul.f32 0.5, %v3845_v24  ;;  %v3741_v27 = vmul.f32 %v9612_v2, %v3740_v3  ;;  %vm9681_vm15 = vmor %vm3745_vm12, %vm3746_vm13  ;;  %v10541_v3 = vld [vmem:[#allocation31_spill] sm:$0xff] }
 0x373   : > { %4781 = vrsqrt.f32 %v9625_v43  ;;  %v9653_v45 = vsub.f32 %v9274_v31, %v5631_v15  ;;  %vm3773_vm0 = vweird.f32 %v9602_v60  ;;  %vm1939_vm2 = vweird.f32 %v9623_v17 }
 0x374   : > { %v4776_v37 = vpop.eup %4775  ;;  %v1979_v7 = vadd.f32 0.1, %v9627_v58  ;;  %v3824_v13 = vsel %vm9633_vm10, %v9573_v52, %v3820_v5  ;;  %v3847_v1 = vsub.f32 1.5, %v3846_v51  ;;  %v3742_v28 = vmul.f32 0.5, %v3741_v27 }
 0x375   : > { %v9645_v44 = vpop.eup %4777  ;;  %v3711_v59 = vmul.f32 %v4776_v37, %v3705_v23  ;;  %v3826_v57 = vmul.f32 %v3824_v13, %v9476_v6  ;;  %v9663_v23 = vadd.f32 %v1910_v34, %v9423_v61  ;;  %v3877_v15 = vmul.f32 %v9653_v45, %v9653_v45  ;;  %v9717_v37 = vpop.permute.xlu0 %2133 }
 0x376   : > { %4783 = vrcp.f32 %v1979_v7  ;;  %v3848_v16 = vmul.f32 %v4770_v25, %v3847_v1  ;;  %v3743_v4 = vsub.f32 1.5, %v3742_v28  ;;  %v3768_v52 = vmul.f32 %v9645_v44, %v9602_v60 }
 0x377   : > { %3715 = vrot.lane.b32.xlu2 %v3711_v59, %s5040_s3  ;;  %4785 = vrsqrt.f32 %v9639_v14  ;;  %v9672_v6 = vsub.f32 %v9281_v29, %v10536_v12  ;;  %v4780_v9 = vpop.eup %4779  ;;  %vm3774_vm1 = vweird.f32 %v9645_v44  ;;  %vm1969_vm3 = vweird.f32 %v9625_v43  ;;  %v9725_v59 = vpop.permute.xlu1 %2057 }
 0x378   : > { %v3852_v26 = vsel %vm3851_vm14, %v4770_v25, %v3848_v16  ;;  %v3744_v18 = vmul.f32 %v9612_v2, %v3743_v4  ;;  %v3769_v11 = vmul.f32 %v9645_v44, %v3768_v52  ;;  %v9686_v25 = vadd.f32 0.81, %v3877_v15  ;;  %vm9706_vm4 = vmor %vm3773_vm0, %vm3774_vm1 }
 0x379   : > { %v3854_v61 = vmul.f32 %v3852_v26, %v9491_v42  ;;  %v1934_v42 = vmul.f32 %v4780_v9, %v9623_v17  ;;  %v4782_v47 = vpop.eup %4781  ;;  %vm1940_vm5 = vweird.f32 %v4780_v9  ;;  %v9712_v5 = vsub.f32 %v9274_v31, %v10541_v3 }
 0x37a   : > { %v3748_v29 = vsel %vm9681_vm15, %v9612_v2, %v3744_v18  ;;  %v3770_v35 = vmul.f32 0.5, %v3769_v11  ;;  %4787 = vrsqrt.f32 %v9686_v25  ;;  %v1964_v40 = vmul.f32 %v4782_v47, %v9625_v43  ;;  %vm1941_vm7 = vmor %vm1939_vm2, %vm1940_vm5  ;;  %v9740_v11 = vpop.permute.xlu2 %2209 }
 0x37b   : > { %v3856_v53 = vsub.f32 %v3826_v57, %v3854_v61  ;;  %v1935_v34 = vmul.f32 %v4780_v9, %v1934_v42  ;;  %v3905_v2 = vmul.f32 %v9672_v6, %v9672_v6  ;;  %v3750_v55 = vmul.f32 %v3748_v29, %v9499_v19  ;;  %v4887_v61 = vld [vmem:[#allocation2 + $0x4] sm:$0xff] }
 0x37c   : > { %v4784_v49 = vpop.eup %4783  ;;  %v3771_v21 = vsub.f32 1.5, %v3770_v35  ;;  %v1965_v0 = vmul.f32 %v4782_v47, %v1964_v40  ;;  %vm1970_vm6 = vweird.f32 %v4782_v47  ;;  %v3953_v13 = vmul.f32 %v9712_v5, %v9712_v5  ;;  %v4888_v40 = vld [vmem:[#allocation3 + $0x4] sm:$0xff] }
 0x37d   : > { %v9699_v62 = vpop.eup %4785  ;;  %v3858_v22 = vmul.f32 %v3856_v53, %v3856_v53  ;;  %v1936_v27 = vmul.f32 0.5, %v1935_v34  ;;  %v1983_v60 = vmul.f32 %v4784_v49, %v9627_v58  ;;  %v9733_v57 = vadd.f32 0.81, %v3905_v2  ;;  %vm9745_vm8 = vmor %vm1969_vm3, %vm1970_vm6 }
 0x37e   : > { %v3772_v51 = vmul.f32 %v9645_v44, %v3771_v21  ;;  %v3986_v19 = vmul.f32 %v9699_v62, %v9639_v14  ;;  %v1966_v28 = vmul.f32 0.5, %v1965_v0  ;;  %v9731_v52 = vadd.f32 0.81, %v3953_v13 }
 0x37f   : > { %v3860_v7 = vadd.f32 0.1, %v3858_v22  ;;  %v1937_v1 = vsub.f32 1.5, %v1936_v27  ;;  %v9751_v17 = vsub.f32 %v4887_v61, %v10441_v36  ;;  %v1985_v48 = vadd.f32 %v1983_v60, %v9525_v39  ;;  %v2284_v27 = vpop.permute.xlu0 %2283 }
 0x380   : > { %v3776_v31 = vsel %vm9706_vm4, %v9645_v44, %v3772_v51  ;;  %v3987_v16 = vmul.f32 %v9699_v62, %v3986_v19  ;;  %v9728_v4 = vpop.eup %4787  ;;  %v1967_v44 = vsub.f32 1.5, %v1966_v28  ;;  %vm3991_vm9 = vweird.f32 %v9639_v14 }
 0x381   : > { %4789 = vrcp.f32 %v3860_v7  ;;  %v3778_v58 = vmul.f32 %v3776_v31, %v9563_v54  ;;  %v1938_v15 = vmul.f32 %v4780_v9, %v1937_v1  ;;  %v3882_v18 = vmul.f32 %v9728_v4, %v9686_v25 }
 0x382   : > { %v3988_v26 = vmul.f32 0.5, %v3987_v16  ;;  %4791 = vrsqrt.f32 %v9731_v52  ;;  %v1968_v35 = vmul.f32 %v4782_v47, %v1967_v44  ;;  %v9761_v2 = vsub.f32 %v4888_v40, %v10442_v33  ;;  %v2360_v44 = vpop.permute.xlu2 %2359 }
 0x383   : > { %v3780_v12 = vsub.f32 %v3750_v55, %v3778_v58  ;;  %v1942_v29 = vsel %vm1941_vm7, %v4780_v9, %v1938_v15  ;;  %v3883_v42 = vmul.f32 %v9728_v4, %v3882_v18  ;;  %4793 = vrsqrt.f32 %v9733_v57 }
 0x384   : > { %v1944_v49 = vmul.f32 %v1942_v29, %v9591_v56  ;;  %v1972_v43 = vsel %vm9745_vm8, %v4782_v47, %v1968_v35  ;;  %v3989_v21 = vsub.f32 1.5, %v3988_v26  ;;  %vm3887_vm10 = vweird.f32 %v9686_v25 }
 0x385   : > { %v3782_v53 = vmul.f32 %v3780_v12, %v3780_v12  ;;  %v3884_v34 = vmul.f32 0.5, %v3883_v42  ;;  %v1974_v55 = vmul.f32 %v1972_v43, %v9594_v8  ;;  %v9767_v56 = vsub.f32 %v9472_v32, %v6083_v30 }
 0x386   : > { %vm3992_vm11 = vweird.f32 %v9699_v62  ;;  %v2061_v47 = vadd.f32 %v9647_v50, %v1985_v48  ;;  %v2447_v3 = vmul.f32 %v9751_v17, %v9751_v17  ;;  %vm3915_vm12 = vweird.f32 %v9733_v57  ;;  %v2208_v50 = vpop.permute.xlu1 %2207 }
 0x387   : > { %v4790_v39 = vpop.eup %4789  ;;  %v3784_v9 = vadd.f32 0.1, %v3782_v53  ;;  %v1976_v0 = vsub.f32 %v1944_v49, %v1974_v55  ;;  %v3885_v8 = vsub.f32 1.5, %v3884_v34  ;;  %v3954_v19 = vmul.f32 %v9767_v56, %v9767_v56  ;;  %vm9787_vm13 = vmor %vm3991_vm9, %vm3992_vm11  ;;  %v4889_v34 = vld [vmem:[#allocation2 + $0xc] sm:$0xff] }
 0x388   : > { %v3864_v24 = vmul.f32 %v4790_v39, %v3858_v22  ;;  %v9773_v51 = vpop.eup %4791  ;;  %v3990_v22 = vmul.f32 %v9699_v62, %v3989_v21  ;;  %v2137_v60 = vadd.f32 %v9674_v38, %v2061_v47  ;;  %vm3888_vm14 = vweird.f32 %v9728_v4 }
 0x389   : > { %4795 = vrcp.f32 %v3784_v9  ;;  %v3958_v30 = vmul.f32 %v9773_v51, %v9731_v52  ;;  %v4794_v7 = vpop.eup %4793  ;;  %v1978_v13 = vmul.f32 %v1976_v0, %v1976_v0  ;;  %v9792_v1 = vadd.f32 0.81, %v3954_v19  ;;  %vm9816_vm1 = vmor %vm3887_vm10, %vm3888_vm14  ;;  %v4890_v0 = vld [vmem:[#allocation3 + $0xc] sm:$0xff] }
 0x38a   : > { %3869 = vrot.lane.b32.xlu1 %v3864_v24, %s5041_s4  ;;  %v9796_v28 = vsub.f32 %v9487_v46, %v10476_v20  ;;  %v3910_v16 = vmul.f32 %v4794_v7, %v9733_v57  ;;  %v9800_v58 = vadd.f32 0.81, %v2447_v3  ;;  %v2477_v14 = vmul.f32 %v9761_v2, %v9761_v2 }
 0x38b   : > { %v3959_v38 = vmul.f32 %v9773_v51, %v3958_v30  ;;  %v1980_v15 = vadd.f32 0.1, %v1978_v13  ;;  %v3886_v26 = vmul.f32 %v9728_v4, %v3885_v8  ;;  %v2213_v18 = vadd.f32 %v2208_v50, %v2137_v60 }
 0x38c   : > { %4797 = vrsqrt.f32 %v9792_v1  ;;  %v3994_v20 = vsel %vm9787_vm13, %v9699_v62, %v3990_v22  ;;  %v3911_v54 = vmul.f32 %v4794_v7, %v3910_v16  ;;  %v3982_v61 = vmul.f32 %v9796_v28, %v9796_v28 }
 0x38d   : > { %v3960_v12 = vmul.f32 0.5, %v3959_v38  ;;  %4799 = vrcp.f32 %v1980_v15  ;;  %vm3964_vm15 = vweird.f32 %v9773_v51  ;;  %vm3916_vm0 = vweird.f32 %v4794_v7 }
 0x38e   : > { %v2289_v29 = vadd.f32 %v2284_v27, %v2213_v18  ;;  %v3912_v62 = vmul.f32 0.5, %v3911_v54  ;;  %v9820_v43 = vadd.f32 0.81, %v3982_v61  ;;  %vm3963_vm2 = vweird.f32 %v9731_v52  ;;  %vm9846_vm4 = vmor %vm3915_vm12, %vm3916_vm0  ;;  %v9863_v22 = vpop.permute.xlu1 %2285 }
 0x38f   : > { %v4796_v48 = vpop.eup %4795  ;;  %v3961_v42 = vsub.f32 1.5, %v3960_v12  ;;  %v3890_v21 = vsel %vm9816_vm1, %v9728_v4, %v3886_v26  ;;  %vm9831_vm3 = vmor %vm3963_vm2, %vm3964_vm15  ;;  %v9836_v52 = vadd.f32 0.81, %v2477_v14  ;;  %v9840_v4 = vpop.permute.xlu0 %2361  ;;  %v4005_v55 = vmul.f32 %v3994_v20, %v9598_v41 }
 0x390   : > { %v3788_v35 = vmul.f32 %v4796_v48, %v3782_v53  ;;  %v9827_v53 = vsub.f32 %v4889_v34, %v10503_v63  ;;  %v3913_v39 = vsub.f32 1.5, %v3912_v62  ;;  %4801 = vrsqrt.f32 %v9820_v43 }
 0x391   : > { %v3962_v25 = vmul.f32 %v9773_v51, %v3961_v42  ;;  %4803 = vrsqrt.f32 %v9800_v58  ;;  %v9859_v57 = vsub.f32 %v4890_v0, %v10458_v10  ;;  %v3901_v30 = vmul.f32 %v3890_v21, %v9653_v45 }
 0x392   : > { %3793 = vrot.lane.b32.xlu2 %v3788_v35, %s5038_s17  ;;  %v9838_v9 = vpop.eup %4797  ;;  %v2448_v47 = vmul.f32 %v9827_v53, %v9827_v53  ;;  %v3914_v27 = vmul.f32 %v4794_v7, %v3913_v39  ;;  %v9865_v50 = vadd.f32 %v2360_v44, %v2289_v29  ;;  %4805 = vrsqrt.f32 %v9836_v52  ;;  %s4977_s17 = scalar_lea.hbm %s10246_s2, 32 }
 0x393   : > { %v3966_v3 = vsel %vm9831_vm3, %v9773_v51, %v3962_v25  ;;  %v3968_v41 = vmul.f32 %v9838_v9, %v9792_v1  ;;  %v4800_v8 = vpop.eup %4799  ;;  %vm3974_vm5 = vweird.f32 %v9838_v9  ;;  %vm3973_vm6 = vweird.f32 %v9792_v1  ;;  %p4979_p3 = scmp.lt.s32.totalorder %s4977_s17, %s4973_s7 }
 0x394   : > { %v3977_v19 = vmul.f32 %v3966_v3, %v9712_v5  ;;  %v9867_v60 = vadd.f32 0.81, %v2448_v47  ;;  %v1984_v51 = vmul.f32 %v4800_v8, %v1978_v13  ;;  %v3918_v31 = vsel %vm9846_vm4, %v4794_v7, %v3914_v27  ;;  %v9874_v5 = vpop.permute.xlu2 %2437  ;;  %vm9907_vm8 = vmor %vm3973_vm6, %vm3974_vm5 }
 0x395   : > { %v3969_v38 = vmul.f32 %v9838_v9, %v3968_v41  ;;  %v3929_v14 = vmul.f32 %v3918_v31, %v9672_v6  ;;  %v2478_v13 = vmul.f32 %v9859_v57, %v9859_v57  ;;  %vm4001_vm9 = vweird.f32 %v9820_v43  ;;  %p4980_p4 = por %p4979_p3, %p4978_p2 }
 0x396   : > { %v4007_v16 = vsub.f32 %v3977_v19, %v4005_v55  ;;  %4807 = vrsqrt.f32 %v9867_v60  ;;  %v4802_v45 = vpop.eup %4801  ;;  %v1986_v15 = vadd.f32 %v1984_v51, %v9663_v23  ;;  %v9895_v34 = vpop.permute.xlu1 %2435  ;;  %v4891_v19 = vld [vmem:[#allocation2 + $0xd] sm:$0xff]  ;;  %vm2467_vm12 = vweird.f32 %v9867_v60 }
 0x397   : > { %v3970_v44 = vmul.f32 0.5, %v3969_v38  ;;  %v9880_v26 = vpop.eup %4803  ;;  %v3931_v18 = vsub.f32 %v3901_v30, %v3929_v14  ;;  %v3996_v12 = vmul.f32 %v4802_v45, %v9820_v43  ;;  %v9888_v35 = vadd.f32 0.81, %v2478_v13  ;;  %v9892_v49 = vpop.permute.xlu0 %2583  ;;  %v4892_v14 = vld [vmem:[#allocation2 + $0x5] sm:$0xff]  ;;  %p4981_p5 = pnand %p4980_p4, %p4976_p1 }
 0x398   : > { %v4009_v7 = vmul.f32 %v4007_v16, %v4007_v16  ;;  %v2062_v20 = vadd.f32 %v9725_v59, %v1986_v15  ;;  %v9884_v29 = vpop.eup %4805  ;;  %vm4002_vm7 = vweird.f32 %v4802_v45  ;;  %v9924_v30 = vsub.f32 %v4891_v19, %v10503_v63  ;;  %v4893_v15 = vld [vmem:[#allocation3 + $0x5] sm:$0xff] }
 0x399   : > { %v3971_v6 = vsub.f32 1.5, %v3970_v44  ;;  %v3933_v61 = vmul.f32 %v3931_v18, %v3931_v18  ;;  %v3997_v48 = vmul.f32 %v4802_v45, %v3996_v12  ;;  %v2482_v39 = vmul.f32 %v9884_v29, %v9836_v52  ;;  %vm4003_vm10 = vmor %vm4001_vm9, %vm4002_vm7  ;;  %v4894_v18 = vld [vmem:[#allocation3 + $0xd] sm:$0xff] }
 0x39a   : > { %v4011_v54 = vadd.f32 0.1, %v4009_v7  ;;  %v2138_v23 = vadd.f32 %v9717_v37, %v2062_v20  ;;  %v2452_v37 = vmul.f32 %v9880_v26, %v9800_v58  ;;  %v9934_v44 = vsub.f32 %v4893_v15, %v10442_v33 }
 0x39b   : > { %v3935_v62 = vadd.f32 0.1, %v3933_v61  ;;  %v3972_v59 = vmul.f32 %v9838_v9, %v3971_v6  ;;  %v3998_v21 = vmul.f32 0.5, %v3997_v48  ;;  %v2483_v8 = vmul.f32 %v9884_v29, %v2482_v39 }
 0x39c   : > { %v9890_v42 = vpop.eup %4807  ;;  %4809 = vrcp.f32 %v4011_v54  ;;  %v9899_v25 = vadd.f32 %v9740_v11, %v2138_v23  ;;  %v9917_v47 = vpop.permute.xlu2 %2659  ;;  %v2453_v0 = vmul.f32 %v9880_v26, %v2452_v37  ;;  %v2976_v13 = vmul.f32 %v9924_v30, %v9924_v30 }
 0x39d   : > { %4811 = vrcp.f32 %v3935_v62  ;;  %v3999_v40 = vsub.f32 1.5, %v3998_v21  ;;  %v2462_v1 = vmul.f32 %v9890_v42, %v9867_v60  ;;  %v3976_v11 = vsel %vm9907_vm8, %v9838_v9, %v3972_v59 }
 0x39e   : > { %4813 = vrsqrt.f32 %v9888_v35  ;;  %v3978_v43 = vmul.f32 %v3976_v11, %v9767_v56  ;;  %v9928_v16 = vpop.permute.xlu1 %2585  ;;  %v9940_v12 = vsub.f32 %v4894_v18, %v10458_v10  ;;  %v2454_v48 = vmul.f32 0.5, %v2453_v0 }
 0x39f   : > { %v4000_v24 = vmul.f32 %v4802_v45, %v3999_v40  ;;  %v2463_v3 = vmul.f32 %v9890_v42, %v2462_v1  ;;  %v9942_v6 = vpop.permute.xlu0 %2661  ;;  %v2484_v23 = vmul.f32 0.5, %v2483_v8  ;;  %vm2468_vm11 = vweird.f32 %v9890_v42 }
 0x3a0   : > { %v3005_v59 = vmul.f32 %v9934_v44, %v9934_v44  ;;  %v9951_v21 = vadd.f32 0.81, %v2976_v13  ;;  %v3006_v55 = vmul.f32 %v9940_v12, %v9940_v12  ;;  %vm2497_vm13 = vweird.f32 %v9888_v35  ;;  %vm9964_vm15 = vmor %vm2467_vm12, %vm2468_vm11 }
 0x3a1   : > { %v4004_v41 = vsel %vm4003_vm10, %v4802_v45, %v4000_v24  ;;  %v2464_v31 = vmul.f32 0.5, %v2463_v3  ;;  %v9931_v45 = vsub.f32 %v4892_v14, %v10441_v36  ;;  %v2455_v3 = vsub.f32 1.5, %v2454_v48 }
 0x3a2   : > { %v4810_v27 = vpop.eup %4809  ;;  %v4006_v51 = vmul.f32 %v4004_v41, %v9796_v28  ;;  %v9960_v24 = vadd.f32 0.81, %v3006_v55  ;;  %vm2487_vm0 = vweird.f32 %v9836_v52  ;;  %vm2488_vm1 = vweird.f32 %v9884_v29  ;;  %v4895_v41 = vld [vmem:[#allocation2 + $0x6] sm:$0xff] }
 0x3a3   : > { %v4015_v9 = vmul.f32 %v4810_v27, %v4009_v7  ;;  %v4812_v38 = vpop.eup %4811  ;;  %v2465_v28 = vsub.f32 1.5, %v2464_v31  ;;  %v2485_v27 = vsub.f32 1.5, %v2484_v23  ;;  %vm2458_vm3 = vweird.f32 %v9880_v26  ;;  %vm9990_vm4 = vmor %vm2487_vm0, %vm2488_vm1 }
 0x3a4   : > { %v3939_v56 = vmul.f32 %v4812_v38, %v3933_v61  ;;  %v4008_v7 = vsub.f32 %v3978_v43, %v4006_v51  ;;  %v4814_v20 = vpop.eup %4813  ;;  %v2975_v61 = vmul.f32 %v9931_v45, %v9931_v45  ;;  %v9956_v1 = vpop.permute.xlu2 %2737  ;;  %v2456_v31 = vmul.f32 %v9880_v26, %v2455_v3 }
 0x3a5   : > { %4019 = vrot.lane.b32.xlu1 %v4015_v9, %s5043_s23  ;;  %v2492_v62 = vmul.f32 %v4814_v20, %v9888_v35  ;;  %v2466_v40 = vmul.f32 %v9890_v42, %v2465_v28  ;;  %vm2498_vm14 = vweird.f32 %v4814_v20  ;;  %v9976_v9 = vadd.f32 0.81, %v3005_v59 }
 0x3a6   : > { %3943 = vrot.lane.b32.xlu2 %v3939_v56, %s5042_s30  ;;  %v4010_v54 = vmul.f32 %v4008_v7, %v4008_v7  ;;  %v9968_v0 = vpop.permute.xlu1 %2735  ;;  %v9970_v8 = vadd.f32 0.81, %v2975_v61  ;;  %vm2499_vm2 = vmor %vm2497_vm13, %vm2498_vm14  ;;  %vm2457_vm5 = vweird.f32 %v9800_v58  ;;  %v10007_v28 = vsub.f32 %v9472_v32, %v10503_v63 }
 0x3a7   : > { %v2493_v39 = vmul.f32 %v4814_v20, %v2492_v62  ;;  %v2470_v60 = vsel %vm9964_vm15, %v9890_v42, %v2466_v40  ;;  %v9984_v51 = vpop.permute.xlu0 %2811  ;;  %v2486_v42 = vmul.f32 %v9884_v29, %v2485_v27  ;;  %vm2459_vm6 = vmor %vm2457_vm5, %vm2458_vm3  ;;  %vm3025_vm7 = vweird.f32 %v9960_v24 }
 0x3a8   : > { %v4012_v37 = vadd.f32 0.1, %v4010_v54  ;;  %v2472_v38 = vmul.f32 %v2470_v60, %v9827_v53  ;;  %v2460_v18 = vsel %vm2459_vm6, %v9880_v26, %v2456_v31  ;;  %v3504_v61 = vmul.f32 %v10007_v28, %v10007_v28 }
 0x3a9   : > { %v2494_v11 = vmul.f32 0.5, %v2493_v39  ;;  %v2490_v58 = vsel %vm9990_vm4, %v9884_v29, %v2486_v42  ;;  %v2471_v26 = vmul.f32 %v2460_v18, %v9751_v17  ;;  %v10043_v60 = vsub.f32 %v4895_v41, %v10441_v36 }
 0x3aa   : > { %4815 = vrcp.f32 %v4012_v37  ;;  %v2501_v29 = vmul.f32 %v2490_v58, %v9761_v2  ;;  %v10032_v37 = vsub.f32 %v9487_v46, %v10458_v10  ;;  %v10040_v2 = vadd.f32 0.81, %v3504_v61  ;;  %v4896_v10 = vld [vmem:[#allocation3 + $0x6] sm:$0xff] }
 0x3ab   : > { %4817 = vrsqrt.f32 %v9951_v21  ;;  %v2495_v19 = vsub.f32 1.5, %v2494_v11  ;;  %v10046_v46 = vsub.f32 %v4896_v10, %v10442_v33  ;;  %v3503_v33 = vmul.f32 %v10043_v60, %v10043_v60 }
 0x3ac   : > { %4819 = vrsqrt.f32 %v9960_v24  ;;  %v2503_v3 = vsub.f32 %v2471_v26, %v2501_v29  ;;  %vm2995_vm11 = vweird.f32 %v9951_v21  ;;  %vm3015_vm14 = vweird.f32 %v9976_v9 }
 0x3ad   : > { %v2496_v43 = vmul.f32 %v4814_v20, %v2495_v19  ;;  %4821 = vrsqrt.f32 %v9970_v8  ;;  %v3534_v19 = vmul.f32 %v10032_v37, %v10032_v37  ;;  %vm2985_vm0 = vweird.f32 %v9970_v8 }
 0x3ae   : > { %4823 = vrsqrt.f32 %v9976_v9 }
 0x3af   : > { %v2500_v35 = vsel %vm2499_vm2, %v4814_v20, %v2496_v43  ;;  %v10014_v20 = vpop.permute.xlu2 %2887  ;;  %v10036_v11 = vpop.permute.xlu0 %2889  ;;  %4825 = vrsqrt.f32 %v10040_v2 }
 0x3b0   : > { %v4816_v14 = vpop.eup %4815  ;;  %v2502_v56 = vmul.f32 %v2500_v35, %v9859_v57  ;;  %v10058_v35 = vmul.f32 %v2503_v3, %v2503_v3 }
 0x3b1   : > { %v9995_v15 = vpop.eup %4817  ;;  %v4016_v13 = vmul.f32 %v4816_v14, %v4010_v54  ;;  %v10016_v54 = vpop.permute.xlu1 %2813 }
 0x3b2   : > { %v9999_v7 = vpop.eup %4819  ;;  %v2990_v53 = vmul.f32 %v9995_v15, %v9951_v21  ;;  %v2504_v57 = vsub.f32 %v2472_v38, %v2502_v56  ;;  %v2290_v38 = vadd.f32 %v9863_v22, %v9899_v25  ;;  %v3533_v22 = vmul.f32 %v10046_v46, %v10046_v46 }
 0x3b3   : > { %4021 = vrot.lane.b32.xlu2 %v4016_v13, %s5043_s23  ;;  %v3020_v48 = vmul.f32 %v9999_v7, %v9960_v24  ;;  %v10021_v63 = vpop.eup %4821  ;;  %vm3026_vm8 = vweird.f32 %v9999_v7  ;;  %v10067_v25 = vadd.f32 0.81, %v3534_v19  ;;  %vm2996_vm9 = vweird.f32 %v9995_v15 }
 0x3b4   : > { %v2991_v23 = vmul.f32 %v9995_v15, %v2990_v53  ;;  %v10024_v62 = vpop.eup %4823  ;;  %v2506_v59 = vmul.f32 %v2504_v57, %v2504_v57  ;;  %v2980_v40 = vmul.f32 %v10021_v63, %v9970_v8  ;;  %vm10072_vm10 = vmor %vm3025_vm7, %vm3026_vm8  ;;  %v2366_v58 = vadd.f32 %v9840_v4, %v2290_v38 }
 0x3b5   : > { %v3021_v32 = vmul.f32 %v9999_v7, %v3020_v48  ;;  %v3010_v17 = vmul.f32 %v10024_v62, %v9976_v9  ;;  %v2507_v57 = vadd.f32 0.1, %v10058_v35  ;;  %vm10081_vm12 = vmor %vm2995_vm11, %vm2996_vm9  ;;  %v10088_v26 = vpop.eup %4825  ;;  %v10096_v61 = vadd.f32 0.81, %v3533_v22 }
 0x3b6   : > { %v2992_v39 = vmul.f32 0.5, %v2991_v23  ;;  %v2508_v27 = vadd.f32 0.1, %v2506_v59  ;;  %v2981_v43 = vmul.f32 %v10021_v63, %v2980_v40  ;;  %vm2986_vm13 = vweird.f32 %v10021_v63 }
 0x3b7   : > { %v3022_v55 = vmul.f32 0.5, %v3021_v32  ;;  %v10053_v14 = vpop.permute.xlu2 %2965  ;;  %v3011_v52 = vmul.f32 %v10024_v62, %v3010_v17  ;;  %v10079_v48 = vpop.permute.xlu0 %3111  ;;  %v10085_v32 = vadd.f32 0.81, %v3503_v33  ;;  %vm3016_vm15 = vweird.f32 %v10024_v62  ;;  %vm2987_vm2 = vmor %vm2985_vm0, %vm2986_vm13 }
 0x3b8   : > { %v2993_v31 = vsub.f32 1.5, %v2992_v39  ;;  %4827 = vrcp.f32 %v2508_v27  ;;  %v2982_v13 = vmul.f32 0.5, %v2981_v43  ;;  %vm10119_vm1 = vmor %vm3015_vm14, %vm3016_vm15  ;;  %vm3553_vm3 = vweird.f32 %v10067_v25 }
 0x3b9   : > { %v3023_v42 = vsub.f32 1.5, %v3022_v55  ;;  %v10056_v36 = vpop.permute.xlu1 %2963  ;;  %v3012_v53 = vmul.f32 0.5, %v3011_v52  ;;  %4829 = vrsqrt.f32 %v10067_v25  ;;  %v2442_v55 = vadd.f32 %v9874_v5, %v2366_v58 }
 0x3ba   : > { %v2994_v56 = vmul.f32 %v9995_v15, %v2993_v31  ;;  %v2983_v29 = vsub.f32 1.5, %v2982_v13  ;;  %4831 = vrcp.f32 %v2507_v57  ;;  %v3518_v5 = vmul.f32 %v10088_v26, %v10040_v2 }
 0x3bb   : > { %v3024_v24 = vmul.f32 %v9999_v7, %v3023_v42  ;;  %v3013_v39 = vsub.f32 1.5, %v3012_v53  ;;  %4833 = vrsqrt.f32 %v10085_v32  ;;  %vm3524_vm5 = vweird.f32 %v10088_v26 }
 0x3bc   : > { %v2998_v4 = vsel %vm10081_vm12, %v9995_v15, %v2994_v56  ;;  %v2984_v41 = vmul.f32 %v10021_v63, %v2983_v29  ;;  %4835 = vrsqrt.f32 %v10096_v61  ;;  %v3519_v8 = vmul.f32 %v10088_v26, %v3518_v5 }
 0x3bd   : > { %v3028_v21 = vsel %vm10072_vm10, %v9999_v7, %v3024_v24  ;;  %v3000_v15 = vmul.f32 %v2998_v4, %v9924_v30  ;;  %v3014_v19 = vmul.f32 %v10024_v62, %v3013_v39  ;;  %v2441_v56 = vadd.f32 %v9895_v34, %v9865_v50 }
 0x3be   : > { %v4828_v40 = vpop.eup %4827  ;;  %v3030_v3 = vmul.f32 %v3028_v21, %v9940_v12  ;;  %v2988_v38 = vsel %vm2987_vm2, %v10021_v63, %v2984_v41  ;;  %v3520_v18 = vmul.f32 0.5, %v3519_v8  ;;  %vm3523_vm7 = vweird.f32 %v10040_v2 }
 0x3bf   : > { %v10101_v17 = vpop.permute.xlu2 %3187  ;;  %v2512_v27 = vmul.f32 %v4828_v40, %v2506_v59  ;;  %v10113_v10 = vpop.eup %4829  ;;  %v3018_v22 = vsel %vm10119_vm1, %v10024_v62, %v3014_v19  ;;  %vm3525_vm8 = vmor %vm3523_vm7, %vm3524_vm5  ;;  %vm3543_vm9 = vweird.f32 %v10096_v61  ;;  %vm3513_vm13 = vweird.f32 %v10085_v32 }
 0x3c0   : > { %v3548_v12 = vmul.f32 %v10113_v10, %v10067_v25  ;;  %v3032_v59 = vsub.f32 %v3000_v15, %v3030_v3  ;;  %v4832_v31 = vpop.eup %4831  ;;  %v10133_v33 = vpop.permute.xlu0 %3189  ;;  %v3029_v53 = vmul.f32 %v3018_v22, %v9934_v44  ;;  %v3521_v44 = vsub.f32 1.5, %v3520_v18 }
 0x3c1   : > { %v10106_v7 = vpop.permute.xlu1 %3113  ;;  %v2514_v43 = vadd.f32 %v2512_v27, %v2442_v55  ;;  %v10131_v52 = vpop.eup %4833  ;;  %v2511_v57 = vmul.f32 %v4832_v31, %v10058_v35  ;;  %vm3554_vm4 = vweird.f32 %v10113_v10 }
 0x3c2   : > { %v3549_v9 = vmul.f32 %v10113_v10, %v3548_v12  ;;  %v10138_v13 = vpop.eup %4835  ;;  %v3034_v63 = vmul.f32 %v3032_v59, %v3032_v59  ;;  %v3508_v62 = vmul.f32 %v10131_v52, %v10085_v32  ;;  %vm10166_vm6 = vmor %vm3553_vm3, %vm3554_vm4  ;;  %vm3514_vm11 = vweird.f32 %v10131_v52 }
 0x3c3   : > { %v2590_v42 = vadd.f32 %v9928_v16, %v2514_v43  ;;  %v2999_v16 = vmul.f32 %v2988_v38, %v9931_v45  ;;  %v3538_v50 = vmul.f32 %v10138_v13, %v10096_v61  ;;  %v2513_v34 = vadd.f32 %v2511_v57, %v2441_v56  ;;  %vm3515_vm14 = vmor %vm3513_vm13, %vm3514_vm11 }
 0x3c4   : > { %v3550_v58 = vmul.f32 0.5, %v3549_v9  ;;  %v3036_v45 = vadd.f32 0.1, %v3034_v63  ;;  %v3509_v40 = vmul.f32 %v10131_v52, %v3508_v62  ;;  %vm3544_vm10 = vweird.f32 %v10138_v13 }
 0x3c5   : > { %v2666_v24 = vadd.f32 %v9942_v6, %v2590_v42  ;;  %v3031_v4 = vsub.f32 %v2999_v16, %v3029_v53  ;;  %v3539_v35 = vmul.f32 %v10138_v13, %v3538_v50  ;;  %v2589_v55 = vadd.f32 %v9892_v49, %v2513_v34  ;;  %vm3545_vm12 = vmor %vm3543_vm9, %vm3544_vm10 }
 0x3c6   : > { %v3551_v21 = vsub.f32 1.5, %v3550_v58  ;;  %4837 = vrcp.f32 %v3036_v45  ;;  %v3510_v41 = vmul.f32 0.5, %v3509_v40  ;;  %vm4048_vm4 = vcmask 130048  }
 0x3c7   : > { %v10146_v23 = vpop.permute.xlu2 %3265  ;;  %v2742_v6 = vadd.f32 %v9956_v1, %v2666_v24  ;;  %v3033_v3 = vmul.f32 %v3031_v4, %v3031_v4  ;;  %v3522_v1 = vmul.f32 %v10088_v26, %v3521_v44  ;;  %v3540_v5 = vmul.f32 0.5, %v3539_v35 }
 0x3c8   : > { %v10161_v15 = vpop.permute.xlu0 %3339  ;;  %v3552_v27 = vmul.f32 %v10113_v10, %v3551_v21  ;;  %v2665_v49 = vadd.f32 %v9917_v47, %v2589_v55  ;;  %v3511_v38 = vsub.f32 1.5, %v3510_v41  ;;  %v4029_v41 = vlaneseq }
 0x3c9   : > { %v10148_v29 = vpop.permute.xlu1 %3263  ;;  %v2818_v39 = vadd.f32 %v10016_v54, %v2742_v6  ;;  %v3035_v30 = vadd.f32 0.1, %v3033_v3  ;;  %v3526_v12 = vsel %vm3525_vm8, %v10088_v26, %v3522_v1 }
 0x3ca   : > { %v3556_v59 = vsel %vm10166_vm6, %v10113_v10, %v3552_v27  ;;  %v2741_v42 = vadd.f32 %v9968_v0, %v2665_v49  ;;  %v3528_v47 = vmul.f32 %v3526_v12, %v10007_v28  ;;  %v3512_v22 = vmul.f32 %v10131_v52, %v3511_v38 }
 0x3cb   : > { %v2894_v25 = vadd.f32 %v10036_v11, %v2818_v39  ;;  %v3541_v11 = vsub.f32 1.5, %v3540_v5  ;;  %v3558_v8 = vmul.f32 %v3556_v59, %v10032_v37  ;;  %4839 = vrcp.f32 %v3035_v30 }
 0x3cc   : > { %v4838_v31 = vpop.eup %4837  ;;  %v2817_v9 = vadd.f32 %v9984_v51, %v2741_v42  ;;  %v3516_v51 = vsel %vm3515_vm14, %v10131_v52, %v3512_v22 }
 0x3cd   : > { %v2970_v2 = vadd.f32 %v10053_v14, %v2894_v25  ;;  %v3040_v26 = vmul.f32 %v4838_v31, %v3034_v63  ;;  %v3542_v0 = vmul.f32 %v10138_v13, %v3541_v11  ;;  %v3560_v61 = vsub.f32 %v3528_v47, %v3558_v8 }
 0x3ce   : > { %v2893_v37 = vadd.f32 %v10014_v20, %v2817_v9  ;;  %v3527_v32 = vmul.f32 %v3516_v51, %v10043_v60 }
 0x3cf   : > { %v10173_v19 = vpop.permute.xlu2 %3415  ;;  %v3042_v14 = vadd.f32 %v3040_v26, %v2970_v2  ;;  %v3546_v16 = vsel %vm3545_vm12, %v10138_v13, %v3542_v0  ;;  %v3562_v18 = vmul.f32 %v3560_v61, %v3560_v61 }
 0x3d0   : > { %v3418_v10 = vpop.permute.xlu0 %3417  ;;  %v2969_v53 = vadd.f32 %v10056_v36, %v2893_v37  ;;  %v3557_v57 = vmul.f32 %v3546_v16, %v10046_v46 }
 0x3d1   : > { %v3342_v43 = vpop.permute.xlu1 %3341  ;;  %v3118_v28 = vadd.f32 %v10106_v7, %v3042_v14  ;;  %v4840_v24 = vpop.eup %4839  ;;  %v3564_v20 = vadd.f32 0.1, %v3562_v18 }
 0x3d2   : > { %v3039_v7 = vmul.f32 %v4840_v24, %v3033_v3  ;;  %v3559_v52 = vsub.f32 %v3527_v32, %v3557_v57 }
 0x3d3   : > { %v3194_v58 = vadd.f32 %v10133_v33, %v3118_v28  ;;  %4841 = vrcp.f32 %v3564_v20 }
 0x3d4   : > { %v3041_v62 = vadd.f32 %v3039_v7, %v2969_v53  ;;  %v3561_v4 = vmul.f32 %v3559_v52, %v3559_v52 }
 0x3d5   : > { %v3270_v34 = vadd.f32 %v10146_v23, %v3194_v58 }
 0x3d6   : > { %v3117_v13 = vadd.f32 %v10079_v48, %v3041_v62  ;;  %v3563_v60 = vadd.f32 0.1, %v3561_v4 }
 0x3d7   : > { %v3494_v56 = vpop.permute.xlu2 %3493  ;;  %v3346_v45 = vadd.f32 %v3342_v43, %v3270_v34  ;;  %v4030_v43 = vshrl.u32 %v4029_v41, 7 }
 0x3d8   : > { %v3640_v50 = vpop.permute.xlu0 %3639  ;;  %v3193_v33 = vadd.f32 %v10101_v17, %v3117_v13  ;;  %4843 = vrcp.f32 %v3563_v60 }
 0x3d9   : > { %v3492_v63 = vpop.permute.xlu1 %3491  ;;  %v3422_v44 = vadd.f32 %v3418_v10, %v3346_v45  ;;  %v4842_v21 = vpop.eup %4841  ;;  %v4031_v31 = vadd.s32 8, %v4030_v43  ;;  %vm4034_vm5 = vcmp.ge.s32.totalorder %v4030_v43, 1 }
 0x3da   : > { %v3269_v46 = vadd.f32 %v10148_v29, %v3193_v33  ;;  %v3568_v39 = vmul.f32 %v4842_v21, %v3562_v18 }
 0x3db   : > { %v3498_v35 = vadd.f32 %v3494_v56, %v3422_v44  ;;  %vm4037_vm15 = vcmp.le.s32.totalorder %v4031_v31, 14 }
 0x3dc   : > { %v3345_v23 = vadd.f32 %v10161_v15, %v3269_v46  ;;  %v4033_v15 = vand.u32 127, %v4029_v41 }
 0x3dd   : > { %v3570_v48 = vadd.f32 %v3568_v39, %v3498_v35 }
 0x3de   : > { %v3421_v27 = vadd.f32 %v10173_v19, %v3345_v23  ;;  %v4844_v5 = vpop.eup %4843  ;;  %vm4040_vm0 = vcmp.ge.s32.totalorder %v4033_v15, 1  ;;  %vm4043_vm2 = vcmp.le.s32.totalorder %v4033_v15, 14 }
 0x3df   : > { %v3716_v6 = vpop.permute.xlu2 %3715  ;;  %v3567_v49 = vmul.f32 %v4844_v5, %v3561_v4  ;;  %vm4042_vm1 = vmand %vm4037_vm15, %vm4040_vm0 }
 0x3e0   : > { %v3718_v40 = vpop.permute.xlu0 %3717  ;;  %v3497_v17 = vadd.f32 %v3492_v63, %v3421_v27  ;;  %vm4045_vm3 = vmand %vm4042_vm1, %vm4043_vm2 }
 0x3e1   : > { %v3642_v36 = vpop.permute.xlu1 %3641  ;;  %vm4041_vm6 = vmand %vm4034_vm5, %vm4040_vm0 }
 0x3e2   : > { %v3646_v1 = vadd.f32 %v3642_v36, %v3570_v48  ;;  %v3569_v29 = vadd.f32 %v3567_v49, %v3497_v17  ;;  %vm4044_vm7 = vmand %vm4041_vm6, %vm4043_vm2 }
 0x3e4   : > { %v3722_v25 = vadd.f32 %v3718_v40, %v3646_v1  ;;  %v3645_v38 = vadd.f32 %v3640_v50, %v3569_v29 }
 0x3e6   : > { %v3721_v2 = vadd.f32 %v3716_v6, %v3645_v38 }
 0x3e8   : > { %v3868_v54 = vpop.permute.xlu0 %3867 }
 0x3e9   : > { %v3792_v3 = vpop.permute.xlu1 %3791 }
 0x3ea   : > { %v3797_v47 = vadd.f32 %v3792_v3, %v3721_v2 }
 0x3ec   : > { %v3794_v55 = vpop.permute.xlu2 %3793  ;;  %v3873_v10 = vadd.f32 %v3868_v54, %v3797_v47 }
 0x3ed   : > { %v3798_v59 = vadd.f32 %v3794_v55, %v3722_v25 }
 0x3f0   : > { %v3946_v11 = vpop.permute.xlu0 %3945 }
 0x3fc   : > { %v3870_v12 = vpop.permute.xlu1 %3869 }
 0x3fd   : > { %v3874_v42 = vadd.f32 %v3870_v12, %v3798_v59 }
 0x3ff   : > { %v3950_v19 = vadd.f32 %v3946_v11, %v3874_v42 }
 0x400   : > { %v3944_v30 = vpop.permute.xlu2 %3943 }
 0x401   : > { %v3949_v0 = vadd.f32 %v3944_v30, %v3873_v10 }
 0x40d   : > { %v4022_v8 = vpop.permute.xlu2 %4021 }
 0x40e   : > { %v4026_v26 = vadd.f32 %v4022_v8, %v3950_v19 }
 0x410   : > { %v4028_v9 = vmul.f32 0.020408163, %v4026_v26 }
 0x412   : > { %v4047_v22 = vsel %vm4045_vm3, %v4028_v9, 0.0 }
 0x413   : > { %4050 = vst.msk [vmem:[%s205_s6 + $0x8] sm:$0xff] %vm4048_vm4, %v4047_v22 }
 0x417   : > { %v4020_v14 = vpop.permute.xlu1 %4019 }
 0x418   : > { %v4025_v61 = vadd.f32 %v4020_v14, %v3949_v0 }
 0x41a   : > { %v4027_v28 = vmul.f32 0.020408163, %v4025_v61 }
 0x41c   : > { %v4046_v37 = vsel %vm4044_vm7, %v4027_v28, 0.0 }
 0x41d   : > { %4049 = vst.msk [vmem:[%s205_s6] sm:$0xff] %vm4048_vm4, %v4046_v37 }
 0x41e   : > { %4984 = shalt.err (!%p4981_p5)
}
 0x41f   : > { %s5044_s22 = smov 128   ;;  %s5045_s4 = smov 8  }
 0x420   : > { %4193 = dma.vmem_to_hbm [thread:$0]  (%p5107_p11), %s4065_s19, 256, %s4067_s26, %s4052_s13, %s5044_s22, %s5044_s22, %s5045_s4  }
 0x421 PF: > { %s4081_s30 = sand.u32 1, %s5015_s9   ;;  %p4203_p7 = pnand %p4165_p9, %p5111_p12 }
 0x422   : > { %s4082_s23 = scalar_lea.sflag [#allocation6], %s4081_s30 }
 0x423   : > { %p4204_p8 = pneg %p4203_p7 }
 0x425   : > { %5010 = dma.done.wait (%p4204_p8), %s4082_s23, 256  }
 0x426   : > { %5012 = vsyncadd (%p4204_p8), %s4082_s23, 4294967040  ;;  %p18_p10 = scmp.ge.s32.totalorder %s5086_s15, 4   ;;  %s10566_s9 = smov %s5019_s10 }
 0x427   : > { %s10567_s10 = smov %s5023_s11  ;;  %s10568_s11 = smov %s5098_s18 }
 0x428   : > { %s10569_s12 = smov %s5086_s15  ;;  %20 = sbr.rel (!%p18_p10) target bundleno = 7 (0x7), region = 90 }
 0x42d   :  { %4088 = vsyncpa [#allocation5], 1 }
 0x42e   :  { %4090 = vsyncpa [#allocation5 + $0x1], 1 }
 0x42f   :  { %4091 = vsyncpa [#allocation8], 1 }
 0x430   :  { %4093 = vsyncpa [#allocation8 + $0x1], 1 }
 0x431   :  { %4094 = vsyncpa [#allocation6], 1 }
 0x432   :  { %4096 = vsyncpa [#allocation6 + $0x1], 1 }

</bundles_post_ra>
